<compile_context>
chip_gen: v7x
topology: tpu7x:2x2x1
jax: 0.10.0
libtpu: 0.0.40
codegen_flags: <defaults>
</compile_context>

<pallas_src>
from functools import partial

import jax
import jax.numpy as jnp
from jax.experimental import pallas as pl
from jax.experimental.pallas import tpu as pltpu


def _round_up(x, m):
    return ((x + m - 1) // m) * m


# --------------------------------------------------------------------------- #
# Kernel: one batch-row tile per grid step, all three layers fused in VMEM.
# --------------------------------------------------------------------------- #
def qnet_kernel(x_ref, w1_ref, b1_ref, w2_ref, b2_ref, w3_ref, b3_ref, out_ref):
    cd = w1_ref.dtype  # compute (MXU operand) dtype, bf16 by default

    x = x_ref[...].astype(cd)

    h1 = jnp.dot(x, w1_ref[...], preferred_element_type=jnp.float32) + b1_ref[...]
    h1 = jnp.maximum(h1, 0.0).astype(cd)          # bias-add/ReLU in f32, cast for MXU

    h2 = jnp.dot(h1, w2_ref[...], preferred_element_type=jnp.float32) + b2_ref[...]
    h2 = jnp.maximum(h2, 0.0).astype(cd)

    out = jnp.dot(h2, w3_ref[...], preferred_element_type=jnp.float32) + b3_ref[...]
    out_ref[...] = out.astype(out_ref.dtype)


# --------------------------------------------------------------------------- #
# Batch-tile chooser: big tiles to amortize per-step overhead, but keep
# n_tiles >= 2 for large batches so both v7x TensorCores get work.
# --------------------------------------------------------------------------- #
def _choose_tb(batch, tb_min=512, tb_max=4096):
    b8 = _round_up(batch, 8)
    if b8 <= 2 * tb_min:
        return b8                                   # small batch: one tile, minimal padding
    tb = _round_up(-(-b8 // 2), 8)                  # ceil(b8/2), sublane-aligned -> >= 2 tiles
    return max(tb_min, min(tb, tb_max))


# --------------------------------------------------------------------------- #
# Forward wrapper (jitted so pad / final slice fuse with neighboring ops).
# --------------------------------------------------------------------------- #
@partial(jax.jit, static_argnames=("action_dim", "tb"))
def qnet_forward(x, padded_params, action_dim, tb=None):
    """x: (B, state_dim) f32. padded_params: output of prepare_qnet_params."""
    B, state_dim = x.shape
    p = padded_params
    hidden_p = p["w1"].shape[1]
    action_p = p["w3"].shape[1]

    if tb is None:
        tb = _choose_tb(B)
    B_p = _round_up(B, tb)
    n_tiles = B_p // tb

    x_p = x if B_p == B else jnp.pad(x, ((0, B_p - B), (0, 0)))

    resident = lambda shape: pl.BlockSpec(shape, lambda i: (0, 0))

    out_p = pl.pallas_call(
        qnet_kernel,
        out_shape=jax.ShapeDtypeStruct((B_p, action_p), jnp.float32),
        grid=(n_tiles,),
        in_specs=[
            pl.BlockSpec((tb, state_dim), lambda i: (i, 0)),   # x: batch-tiled (f32)
            resident((state_dim, hidden_p)),                   # w1 (bf16, resident)
            resident((1, hidden_p)),                           # b1 (f32)
            resident((hidden_p, hidden_p)),                    # w2 (bf16)
            resident((1, hidden_p)),                           # b2 (f32)
            resident((hidden_p, action_p)),                    # w3 (bf16)
            resident((1, action_p)),                           # b3 (f32)
        ],
        out_specs=pl.BlockSpec((tb, action_p), lambda i: (i, 0)),
        compiler_params=pltpu.CompilerParams(
            dimension_semantics=("parallel",),  # shard batch tiles across TCs (v7x megacore)
        ),
    )(x_p, p["w1"], p["b1"], p["w2"], p["b2"], p["w3"], p["b3"])

    return out_p[:B, :action_dim]


# --------------------------------------------------------------------------- #
# One-time parameter preparation: pad to lane-dense widths, cast weights.
# Zero-padded weight rows/columns and zero bias entries are exact for a
# Linear+ReLU stack; padded Q columns are sliced away in qnet_forward.
# --------------------------------------------------------------------------- #
def prepare_qnet_params(params, compute_dtype=jnp.bfloat16):
    state_dim, hidden_dim = params["w1"].shape
    action_dim = params["w3"].shape[1]
    hidden_p = _round_up(hidden_dim, 128)
    action_p = _round_up(action_dim, 128)
    # TODO(synk): pad hidden/action to 256 multiples on v6e/v7x once hidden_dim is non-toy.

    def pad2(a, rows, cols, dtype):
        a = jnp.pad(a, ((0, rows - a.shape[0]), (0, cols - a.shape[1])))
        return a.astype(dtype)

    padded = {
        "w1": pad2(params["w1"], state_dim, hidden_p, compute_dtype),
        "b1": pad2(params["b1"], 1, hidden_p, jnp.float32),
        "w2": pad2(params["w2"], hidden_p, hidden_p, compute_dtype),
        "b2": pad2(params["b2"], 1, hidden_p, jnp.float32),
        "w3": pad2(params["w3"], hidden_p, action_p, compute_dtype),
        "b3": pad2(params["b3"], 1, action_p, jnp.float32),
    }
    return padded, action_dim


def init_qnet_params(key, state_dim, hidden_dim, action_dim):
    """PyTorch-Linear-style init U[-1/sqrt(fan_in), 1/sqrt(fan_in)]; weights stored (in, out)."""
    keys = jax.random.split(key, 6)

    def linear(kw, kb, fan_in, fan_out):
        bound = 1.0 / jnp.sqrt(fan_in)
        w = jax.random.uniform(kw, (fan_in, fan_out), jnp.float32, -bound, bound)
        b = jax.random.uniform(kb, (1, fan_out), jnp.float32, -bound, bound)
        return w, b

    w1, b1 = linear(keys[0], keys[1], state_dim, hidden_dim)
    w2, b2 = linear(keys[2], keys[3], hidden_dim, hidden_dim)
    w3, b3 = linear(keys[4], keys[5], hidden_dim, action_dim)
    return {"w1": w1, "b1": b1, "w2": w2, "b2": b2, "w3": w3, "b3": b3}


# --------------------------------------------------------------------------- #
# References (f32 exact semantics, and a bf16-operand mirror of the kernel).
# --------------------------------------------------------------------------- #
def qnet_reference_f32(x, params):
    h1 = jnp.maximum(x @ params["w1"] + params["b1"], 0.0)
    h2 = jnp.maximum(h1 @ params["w2"] + params["b2"], 0.0)
    return h2 @ params["w3"] + params["b3"]


def qnet_reference_bf16(x, params):
    cd = jnp.bfloat16
    h1 = jnp.dot(x.astype(cd), params["w1"].astype(cd),
                 preferred_element_type=jnp.float32) + params["b1"]
    h1 = jnp.maximum(h1, 0.0).astype(cd)
    h2 = jnp.dot(h1, params["w2"].astype(cd),
                 preferred_element_type=jnp.float32) + params["b2"]
    h2 = jnp.maximum(h2, 0.0).astype(cd)
    return jnp.dot(h2, params["w3"].astype(cd),
                   preferred_element_type=jnp.float32) + params["b3"]


if __name__ == "__main__":
    state_dim, hidden_dim, action_dim = 16, 32, 8

    key = jax.random.PRNGKey(0)
    k_params, k_x1, k_x2 = jax.random.split(key, 3)
    params = init_qnet_params(k_params, state_dim, hidden_dim, action_dim)
    padded_params, act_dim = prepare_qnet_params(params)

    # Case 1: larger batch -> adaptive chooser gives 2 tiles of 2000 rows
    # (n_tiles >= 2 feeds both TensorCores on v7x; B_p == B so no x padding).
    x_big = jax.random.normal(k_x1, (4000, state_dim), jnp.float32)
    out_big = jax.block_until_ready(qnet_forward(x_big, padded_params, act_dim))
    assert out_big.shape == (4000, action_dim)
    assert jnp.allclose(out_big, qnet_reference_bf16(x_big, params), atol=5e-3, rtol=5e-3)
    assert jnp.allclose(out_big, qnet_reference_f32(x_big, params), atol=5e-2, rtol=5e-2)

    # Case 2: tiny batch (the module's typical DQN action-selection usage) -> one small tile.
    x_small = jax.random.normal(k_x2, (8, state_dim), jnp.float32)
    out_small = jax.block_until_ready(qnet_forward(x_small, padded_params, act_dim))
    assert out_small.shape == (8, action_dim)
    assert jnp.allclose(out_small, qnet_reference_bf16(x_small, params), atol=5e-3, rtol=5e-3)
    assert jnp.allclose(out_small, qnet_reference_f32(x_small, params), atol=5e-2, rtol=5e-2)

    print("KERNEL_OK")
</pallas_src>

<mosaic_0001>
module attributes {stable_mosaic.version = 11 : i64} {
  func.func @qnet_kernel(%arg0: i32, %arg1: memref<2000x16xf32, #tpu.memory_space<vmem>>, %arg2: memref<16x128xbf16, #tpu.memory_space<vmem>>, %arg3: memref<1x128xf32, #tpu.memory_space<vmem>>, %arg4: memref<128x128xbf16, #tpu.memory_space<vmem>>, %arg5: memref<1x128xf32, #tpu.memory_space<vmem>>, %arg6: memref<128x128xbf16, #tpu.memory_space<vmem>>, %arg7: memref<1x128xf32, #tpu.memory_space<vmem>>, %arg8: memref<2000x128xf32, #tpu.memory_space<vmem>>) attributes {dimension_semantics = [#tpu.dimension_semantics<parallel>], iteration_bounds = array<i64: 2>, scalar_prefetch = 0 : i64, scratch_operands = 0 : i64, tpu.core_type = #tpu.core_type<tc>, window_params = [{transform_indices = @transform_0, window_bounds = array<i64: 2000, 16>}, {pipeline_mode = #tpu.pipeline_mode<synchronous>, transform_indices = @transform_1, window_bounds = array<i64: 16, 128>}, {pipeline_mode = #tpu.pipeline_mode<synchronous>, transform_indices = @transform_2, window_bounds = array<i64: 1, 128>}, {pipeline_mode = #tpu.pipeline_mode<synchronous>, transform_indices = @transform_3, window_bounds = array<i64: 128, 128>}, {pipeline_mode = #tpu.pipeline_mode<synchronous>, transform_indices = @transform_4, window_bounds = array<i64: 1, 128>}, {pipeline_mode = #tpu.pipeline_mode<synchronous>, transform_indices = @transform_5, window_bounds = array<i64: 128, 128>}, {pipeline_mode = #tpu.pipeline_mode<synchronous>, transform_indices = @transform_6, window_bounds = array<i64: 1, 128>}, {transform_indices = @transform_7, window_bounds = array<i64: 2000, 128>}]} {
    %c0 = arith.constant 0 : index
    %c0_0 = arith.constant 0 : index
    %0 = vector.load %arg1[%c0, %c0_0] : memref<2000x16xf32, #tpu.memory_space<vmem>>, vector<2000x16xf32>
    %1 = arith.truncf %0 : vector<2000x16xf32> to vector<2000x16xbf16>
    %c0_1 = arith.constant 0 : index
    %c0_2 = arith.constant 0 : index
    %2 = vector.load %arg2[%c0_1, %c0_2] : memref<16x128xbf16, #tpu.memory_space<vmem>>, vector<16x128xbf16>
    %cst = arith.constant dense<0.000000e+00> : vector<2000x128xf32>
    %3 = tpu.matmul %1, %2, %cst {dimension_numbers = #tpu.dot_dimension_numbers<[1], [0], [0], [1], [0, 0, 1, 1], [], []>} : vector<2000x16xbf16>, vector<16x128xbf16>, vector<2000x128xf32> -> vector<2000x128xf32>
    %c0_3 = arith.constant 0 : index
    %c0_4 = arith.constant 0 : index
    %4 = vector.load %arg3[%c0_3, %c0_4] : memref<1x128xf32, #tpu.memory_space<vmem>>, vector<1x128xf32>
    %5 = vector.broadcast %4 : vector<1x128xf32> to vector<2000x128xf32>
    %6 = arith.addf %3, %5 : vector<2000x128xf32>
    %cst_5 = arith.constant 0.000000e+00 : f32
    %7 = vector.broadcast %cst_5 : f32 to vector<2000x128xf32>
    %8 = arith.maximumf %6, %7 : vector<2000x128xf32>
    %9 = arith.truncf %8 : vector<2000x128xf32> to vector<2000x128xbf16>
    %c0_6 = arith.constant 0 : index
    %c0_7 = arith.constant 0 : index
    %10 = vector.load %arg4[%c0_6, %c0_7] : memref<128x128xbf16, #tpu.memory_space<vmem>>, vector<128x128xbf16>
    %cst_8 = arith.constant dense<0.000000e+00> : vector<2000x128xf32>
    %11 = tpu.matmul %9, %10, %cst_8 {dimension_numbers = #tpu.dot_dimension_numbers<[1], [0], [0], [1], [0, 0, 1, 1], [], []>} : vector<2000x128xbf16>, vector<128x128xbf16>, vector<2000x128xf32> -> vector<2000x128xf32>
    %c0_9 = arith.constant 0 : index
    %c0_10 = arith.constant 0 : index
    %12 = vector.load %arg5[%c0_9, %c0_10] : memref<1x128xf32, #tpu.memory_space<vmem>>, vector<1x128xf32>
    %13 = vector.broadcast %12 : vector<1x128xf32> to vector<2000x128xf32>
    %14 = arith.addf %11, %13 : vector<2000x128xf32>
    %cst_11 = arith.constant 0.000000e+00 : f32
    %15 = vector.broadcast %cst_11 : f32 to vector<2000x128xf32>
    %16 = arith.maximumf %14, %15 : vector<2000x128xf32>
    %17 = arith.truncf %16 : vector<2000x128xf32> to vector<2000x128xbf16>
    %c0_12 = arith.constant 0 : index
    %c0_13 = arith.constant 0 : index
    %18 = vector.load %arg6[%c0_12, %c0_13] : memref<128x128xbf16, #tpu.memory_space<vmem>>, vector<128x128xbf16>
    %cst_14 = arith.constant dense<0.000000e+00> : vector<2000x128xf32>
    %19 = tpu.matmul %17, %18, %cst_14 {dimension_numbers = #tpu.dot_dimension_numbers<[1], [0], [0], [1], [0, 0, 1, 1], [], []>} : vector<2000x128xbf16>, vector<128x128xbf16>, vector<2000x128xf32> -> vector<2000x128xf32>
    %c0_15 = arith.constant 0 : index
    %c0_16 = arith.constant 0 : index
    %20 = vector.load %arg7[%c0_15, %c0_16] : memref<1x128xf32, #tpu.memory_space<vmem>>, vector<1x128xf32>
    %21 = vector.broadcast %20 : vector<1x128xf32> to vector<2000x128xf32>
    %22 = arith.addf %19, %21 : vector<2000x128xf32>
    %c0_17 = arith.constant 0 : index
    %c0_18 = arith.constant 0 : index
    %23 = vector.load %arg8[%c0_17, %c0_18] : memref<2000x128xf32, #tpu.memory_space<vmem>>, vector<2000x128xf32>
    tpu.vector_store %arg8[%c0_17, %c0_18], %22 {strides = array<i32>} : memref<2000x128xf32, #tpu.memory_space<vmem>>, vector<2000x128xf32>,
    return
  }
  func.func @transform_0(%arg0: i32) -> (i32, i32) {
    %c0_i32 = arith.constant 0 : i32
    %c0_i32_0 = arith.constant 0 : i32
    return %arg0, %c0_i32 : i32, i32
  }
  func.func @transform_1(%arg0: i32) -> (i32, i32) {
    %c0_i32 = arith.constant 0 : i32
    %c0_i32_0 = arith.constant 0 : i32
    %c0_i32_1 = arith.constant 0 : i32
    return %c0_i32, %c0_i32_0 : i32, i32
  }
  func.func @transform_2(%arg0: i32) -> (i32, i32) {
    %c0_i32 = arith.constant 0 : i32
    %c0_i32_0 = arith.constant 0 : i32
    %c0_i32_1 = arith.constant 0 : i32
    return %c0_i32, %c0_i32_0 : i32, i32
  }
  func.func @transform_3(%arg0: i32) -> (i32, i32) {
    %c0_i32 = arith.constant 0 : i32
    %c0_i32_0 = arith.constant 0 : i32
    %c0_i32_1 = arith.constant 0 : i32
    return %c0_i32, %c0_i32_0 : i32, i32
  }
  func.func @transform_4(%arg0: i32) -> (i32, i32) {
    %c0_i32 = arith.constant 0 : i32
    %c0_i32_0 = arith.constant 0 : i32
    %c0_i32_1 = arith.constant 0 : i32
    return %c0_i32, %c0_i32_0 : i32, i32
  }
  func.func @transform_5(%arg0: i32) -> (i32, i32) {
    %c0_i32 = arith.constant 0 : i32
    %c0_i32_0 = arith.constant 0 : i32
    %c0_i32_1 = arith.constant 0 : i32
    return %c0_i32, %c0_i32_0 : i32, i32
  }
  func.func @transform_6(%arg0: i32) -> (i32, i32) {
    %c0_i32 = arith.constant 0 : i32
    %c0_i32_0 = arith.constant 0 : i32
    %c0_i32_1 = arith.constant 0 : i32
    return %c0_i32, %c0_i32_0 : i32, i32
  }
  func.func @transform_7(%arg0: i32) -> (i32, i32) {
    %c0_i32 = arith.constant 0 : i32
    %c0_i32_0 = arith.constant 0 : i32
    return %arg0, %c0_i32 : i32, i32
  }
}

</mosaic_0001>

<bundles_post_ra>
// kernel: qnet_forward.1
= control target key start
LH: loop header
LB: loop body
LE: loop exit
PB: predicated region body
PF: predicated region fallthrough
CT: control target
= control target key end

     0   :  { %s7516_s24 = smov 0   ;;  %s10183_s0 = inlined_call_operand.vmem [shape: f32[4000,16], index: 0, kind: input, shape index: {}]   ;;  %s10184_s1 = inlined_call_operand.vmem [shape: bf16[16,128], index: 1, kind: input, shape index: {}]   ;;  %s10185_s2 = inlined_call_operand.vmem [shape: f32[1,128], index: 2, kind: input, shape index: {}]   ;;  %s10186_s3 = inlined_call_operand.vmem [shape: bf16[128,128], index: 3, kind: input, shape index: {}]   ;;  %s10187_s4 = inlined_call_operand.vmem [shape: f32[1,128], index: 4, kind: input, shape index: {}]   ;;  %s10188_s5 = inlined_call_operand.vmem [shape: bf16[128,128], index: 5, kind: input, shape index: {}]   ;;  %s10189_s6 = inlined_call_operand.vmem [shape: f32[1,128], index: 6, kind: input, shape index: {}]   ;;  %s10190_s7 = inlined_call_operand.vmem [shape: f32[4000,128], index: 7, kind: output, shape index: {}]  }
   0x1 LB: > { %s5346_s25 = sadd.s32 4294967295, %s7472_s24   ;;  %p5350_p0 = scmp.ge.s32.totalorder %s7472_s24, 1  ;;  %s7472_s24 = sphi %s7516_s24, %s17_s24  }
   0x2   : > { %p238_p1 = scmp.lt.s32.totalorder %s7472_s24, 3 }
   0x4   : > { %p239_p2 = pnand %p5350_p0, %p238_p1 }
   0x6   : > { %242 = sbr.rel (%p239_p2) target bundleno = 1948 (0x79c), region = 48 }
   0xd   : > { %v7438_v0 = vld [vmem:[%s10184_s1] sm:$0xff]   ;;  %v10191_v1 = vmov 0.0   ;;  %s270_s28 = smul.u32 250, %s5346_s25  ;;  %vm7475_vm0 = vmmov 0   ;;  %vm673_vm1 = vcmask 130048   ;;  %v7440_v8 = vld [vmem:[%s10186_s3 + $0x8] sm:$0xff]  }
   0xe   : > { %7426 = vmatprep.subr.bf16.mxu1 %v10191_v1  ;;  %5892 = vmatprep.subr.bf16.mxu0 %v10191_v1  ;;  %v7439_v4 = vld [vmem:[%s10186_s3] sm:$0xff]   ;;  %v7441_v10 = vld [vmem:[%s10186_s3 + $0x10] sm:$0xff]   ;;  %v7442_v29 = vld [vmem:[%s10186_s3 + $0x18] sm:$0xff]  }
   0xf   : > { %7427 = vmatpush3.bf16.msra.mxu1 %v7438_v0  ;;  %6146 = vmatprep.mubr.msk.bf16.mxu1 %vm7475_vm0, %v10191_v1  ;;  %p271_p3 = scmp.lt.s32.totalorder %s270_s28, 499  ;;  %v7443_v45 = vld [vmem:[%s10188_s5] sm:$0xff]  }
  0x10   : > { %6394 = vmatprep.subr.bf16.mxu1 %v10191_v1  ;;  %5893 = vmatpush3.bf16.msra.mxu0 %v7438_v0 }
  0x11   : > { %5894 = vmatprep.mubr.msk.bf16.mxu0 %vm7475_vm0, %v10191_v1  ;;  %6910 = vmatprep.subr.bf16.mxu0 %v10191_v1  ;;  %s10281_s28 = smov (!%p271_p3, %s270_s28), 499 }
  0x12   : > { %s5351_s29 = sshll.u32 %s10281_s28, 3 }
  0x13   : > { %s7543_s9 = scalar_lea.vmem %s10183_s0, %s5351_s29  ;;  %s9039_s17 = scalar_lea.vmem %s10190_s7, %s5351_s29 }
  0x14   : > { %v409_v2 = vld [vmem:[%s7543_s9 + $0x3f0] sm:$0xff]  ;;  %v410_v3 = vld [vmem:[%s7543_s9 + $0x3f8] sm:$0xff]  ;;  %v411_v6 = vld [vmem:[%s7543_s9 + $0x400] sm:$0xff] }
  0x15   : > { %v596_v5 = vpack.c.bf16 %v410_v3, %v409_v2  ;;  %v412_v7 = vld [vmem:[%s7543_s9 + $0x408] sm:$0xff]  ;;  %v413_v11 = vld [vmem:[%s7543_s9 + $0x410] sm:$0xff]  ;;  %v414_v12 = vld [vmem:[%s7543_s9 + $0x418] sm:$0xff] }
  0x16   : > { %v597_v9 = vpack.c.bf16 %v412_v7, %v411_v6  ;;  %v598_v13 = vpack.c.bf16 %v414_v12, %v413_v11  ;;  %v415_v14 = vld [vmem:[%s7543_s9 + $0x420] sm:$0xff]  ;;  %v416_v15 = vld [vmem:[%s7543_s9 + $0x428] sm:$0xff]  ;;  %v417_v17 = vld [vmem:[%s7543_s9 + $0x430] sm:$0xff] }
  0x17   : > { %6147 = vmatmul.mubr.msk.bf16.vlgmr.msra.gmra.mrb[0].mxu1 %vm673_vm1, %v596_v5  ;;  %v599_v16 = vpack.c.bf16 %v416_v15, %v415_v14  ;;  %v418_v18 = vld [vmem:[%s7543_s9 + $0x438] sm:$0xff]  ;;  %v419_v20 = vld [vmem:[%s7543_s9 + $0x440] sm:$0xff]  ;;  %v420_v21 = vld [vmem:[%s7543_s9 + $0x448] sm:$0xff] }
  0x18   : > { %6395 = vmatpush3.bf16.msra.mxu1 %v7439_v4  ;;  %6150 = vmatprep.mubr.msk.bf16.mxu1 %vm7475_vm0, %v10191_v1  ;;  %v600_v19 = vpack.c.bf16 %v418_v18, %v417_v17  ;;  %v601_v22 = vpack.c.bf16 %v420_v21, %v419_v20  ;;  %v421_v23 = vld [vmem:[%s7543_s9 + $0x450] sm:$0xff]  ;;  %v422_v24 = vld [vmem:[%s7543_s9 + $0x458] sm:$0xff]  ;;  %v423_v26 = vld [vmem:[%s7543_s9 + $0x460] sm:$0xff] }
  0x19   : > { %6396 = vmatprep.subr.bf16.mxu1 %v10191_v1  ;;  %v602_v25 = vpack.c.bf16 %v422_v24, %v421_v23  ;;  %v424_v27 = vld [vmem:[%s7543_s9 + $0x468] sm:$0xff]  ;;  %v425_v30 = vld [vmem:[%s7543_s9 + $0x470] sm:$0xff]  ;;  %v426_v31 = vld [vmem:[%s7543_s9 + $0x478] sm:$0xff] }
  0x1a   : > { %v603_v28 = vpack.c.bf16 %v424_v27, %v423_v26  ;;  %v604_v32 = vpack.c.bf16 %v426_v31, %v425_v30  ;;  %v427_v33 = vld [vmem:[%s7543_s9 + $0x480] sm:$0xff]  ;;  %v428_v34 = vld [vmem:[%s7543_s9 + $0x488] sm:$0xff]  ;;  %v429_v36 = vld [vmem:[%s7543_s9 + $0x490] sm:$0xff] }
  0x1b   : > { %v605_v35 = vpack.c.bf16 %v428_v34, %v427_v33  ;;  %v430_v37 = vld [vmem:[%s7543_s9 + $0x498] sm:$0xff]  ;;  %v283_v39 = vld [vmem:[%s7543_s9] sm:$0xff]  ;;  %v284_v40 = vld [vmem:[%s7543_s9 + $0x8] sm:$0xff] }
  0x1c   : > { %6397 = vmatpush3.bf16.msra.mxu1 %v7440_v8  ;;  %v606_v38 = vpack.c.bf16 %v430_v37, %v429_v36  ;;  %v533_v41 = vpack.c.bf16 %v284_v40, %v283_v39  ;;  %v431_v42 = vld [vmem:[%s7543_s9 + $0x4a0] sm:$0xff]  ;;  %v432_v43 = vld [vmem:[%s7543_s9 + $0x4a8] sm:$0xff]  ;;  %v285_v46 = vld [vmem:[%s7543_s9 + $0x10] sm:$0xff] }
  0x1d   : > { %6398 = vmatprep.subr.bf16.mxu1 %v10191_v1  ;;  %v607_v44 = vpack.c.bf16 %v432_v43, %v431_v42  ;;  %v286_v47 = vld [vmem:[%s7543_s9 + $0x18] sm:$0xff]  ;;  %v433_v49 = vld [vmem:[%s7543_s9 + $0x4b0] sm:$0xff]  ;;  %v287_v52 = vld [vmem:[%s7543_s9 + $0x20] sm:$0xff] }
  0x1e   : > { %5895 = vmatmul.mubr.msk.bf16.vlgmr.msra.gmra.mrb[0].mxu0 %vm673_vm1, %v533_v41  ;;  %v534_v48 = vpack.c.bf16 %v286_v47, %v285_v46  ;;  %v434_v50 = vld [vmem:[%s7543_s9 + $0x4b8] sm:$0xff]  ;;  %v288_v53 = vld [vmem:[%s7543_s9 + $0x28] sm:$0xff]  ;;  %v435_v55 = vld [vmem:[%s7543_s9 + $0x4c0] sm:$0xff] }
  0x1f   : > { %6151 = vmatmul.mubr.msk.bf16.gmra.mrb[4].mxu1 %vm673_vm1, %v597_v9  ;;  %5898 = vmatprep.mubr.msk.bf16.mxu0 %vm7475_vm0, %v10191_v1  ;;  %v608_v51 = vpack.c.bf16 %v434_v50, %v433_v49  ;;  %v535_v54 = vpack.c.bf16 %v288_v53, %v287_v52  ;;  %v436_v56 = vld [vmem:[%s7543_s9 + $0x4c8] sm:$0xff]  ;;  %v289_v58 = vld [vmem:[%s7543_s9 + $0x30] sm:$0xff]  ;;  %v290_v59 = vld [vmem:[%s7543_s9 + $0x38] sm:$0xff] }
  0x20   : > { %6154 = vmatprep.mubr.msk.bf16.mxu1 %vm7475_vm0, %v10191_v1  ;;  %6399 = vmatpush3.bf16.msra.mxu1 %v7441_v10  ;;  %v609_v57 = vpack.c.bf16 %v436_v56, %v435_v55  ;;  %v536_v60 = vpack.c.bf16 %v290_v59, %v289_v58  ;;  %v437_v61 = vld [vmem:[%s7543_s9 + $0x4d0] sm:$0xff]  ;;  %v438_v62 = vld [vmem:[%s7543_s9 + $0x4d8] sm:$0xff]  ;;  %v291_v0 = vld [vmem:[%s7543_s9 + $0x40] sm:$0xff] }
  0x21   : > { %6400 = vmatprep.subr.bf16.mxu1 %v10191_v1  ;;  %6911 = vmatpush3.bf16.msra.mxu0 %v7443_v45  ;;  %v610_v63 = vpack.c.bf16 %v438_v62, %v437_v61  ;;  %v292_v2 = vld [vmem:[%s7543_s9 + $0x48] sm:$0xff]  ;;  %v439_v4 = vld [vmem:[%s7543_s9 + $0x4e0] sm:$0xff]  ;;  %v293_v7 = vld [vmem:[%s7543_s9 + $0x50] sm:$0xff] }
  0x22   : > { %6912 = vmatprep.subr.bf16.mxu0 %v10191_v1  ;;  %v537_v3 = vpack.c.bf16 %v292_v2, %v291_v0  ;;  %v440_v5 = vld [vmem:[%s7543_s9 + $0x4e8] sm:$0xff]  ;;  %v294_v8 = vld [vmem:[%s7543_s9 + $0x58] sm:$0xff]  ;;  %v441_v10 = vld [vmem:[%s7543_s9 + $0x4f0] sm:$0xff] }
  0x23   : > { %v611_v6 = vpack.c.bf16 %v440_v5, %v439_v4  ;;  %v538_v9 = vpack.c.bf16 %v294_v8, %v293_v7  ;;  %v442_v11 = vld [vmem:[%s7543_s9 + $0x4f8] sm:$0xff]  ;;  %v7444_v12 = vld [vmem:[%s10186_s3 + $0x20] sm:$0xff]   ;;  %v296_v15 = vld [vmem:[%s7543_s9 + $0x68] sm:$0xff] }
  0x24   : > { %6401 = vmatpush3.bf16.msra.mxu1 %v7442_v29  ;;  %v295_v14 = vld [vmem:[%s7543_s9 + $0x60] sm:$0xff]  ;;  %v444_v18 = vld [vmem:[%s7543_s9 + $0x508] sm:$0xff]  ;;  %v297_v20 = vld [vmem:[%s7543_s9 + $0x70] sm:$0xff] }
  0x25   : > { %6402 = vmatprep.subr.bf16.mxu1 %v10191_v1  ;;  %v443_v17 = vld [vmem:[%s7543_s9 + $0x500] sm:$0xff]  ;;  %v298_v21 = vld [vmem:[%s7543_s9 + $0x78] sm:$0xff]  ;;  %v445_v23 = vld [vmem:[%s7543_s9 + $0x510] sm:$0xff] }
  0x26   : > { %5899 = vmatmul.mubr.msk.bf16.gmra.mrb[4].mxu0 %vm673_vm1, %v534_v48  ;;  %v446_v24 = vld [vmem:[%s7543_s9 + $0x518] sm:$0xff]  ;;  %v299_v26 = vld [vmem:[%s7543_s9 + $0x80] sm:$0xff]  ;;  %v300_v27 = vld [vmem:[%s7543_s9 + $0x88] sm:$0xff] }
  0x27   : > { %6155 = vmatmul.mubr.msk.bf16.gmra.mrb[8].mxu1 %vm673_vm1, %v598_v13  ;;  %5902 = vmatprep.mubr.msk.bf16.mxu0 %vm7475_vm0, %v10191_v1  ;;  %v612_v13 = vpack.c.bf16 %v442_v11, %v441_v10  ;;  %v447_v29 = vld [vmem:[%s7543_s9 + $0x520] sm:$0xff]  ;;  %v448_v30 = vld [vmem:[%s7543_s9 + $0x528] sm:$0xff]  ;;  %v301_v33 = vld [vmem:[%s7543_s9 + $0x90] sm:$0xff] }
  0x28   : > { %6158 = vmatprep.mubr.msk.bf16.mxu1 %vm7475_vm0, %v10191_v1  ;;  %6403 = vmatpush3.bf16.msra.mxu1 %v7444_v12  ;;  %v615_v31 = vpack.c.bf16 %v448_v30, %v447_v29  ;;  %v302_v34 = vld [vmem:[%s7543_s9 + $0x98] sm:$0xff]  ;;  %v449_v36 = vld [vmem:[%s7543_s9 + $0x530] sm:$0xff]  ;;  %v303_v39 = vld [vmem:[%s7543_s9 + $0xa0] sm:$0xff] }
  0x29   : > { %6404 = vmatprep.subr.bf16.mxu1 %v10191_v1  ;;  %v450_v37 = vld [vmem:[%s7543_s9 + $0x538] sm:$0xff]  ;;  %v304_v40 = vld [vmem:[%s7543_s9 + $0xa8] sm:$0xff]  ;;  %v451_v42 = vld [vmem:[%s7543_s9 + $0x540] sm:$0xff] }
  0x2a   : > { %v543_v41 = vpack.c.bf16 %v304_v40, %v303_v39  ;;  %v452_v43 = vld [vmem:[%s7543_s9 + $0x548] sm:$0xff]  ;;  %v305_v45 = vld [vmem:[%s7543_s9 + $0xb0] sm:$0xff]  ;;  %v306_v46 = vld [vmem:[%s7543_s9 + $0xb8] sm:$0xff] }
  0x2b   : > { %v544_v47 = vpack.c.bf16 %v306_v46, %v305_v45  ;;  %v453_v48 = vld [vmem:[%s7543_s9 + $0x550] sm:$0xff]  ;;  %v454_v49 = vld [vmem:[%s7543_s9 + $0x558] sm:$0xff]  ;;  %v308_v52 = vld [vmem:[%s7543_s9 + $0xc8] sm:$0xff] }
  0x2c   : > { %v618_v50 = vpack.c.bf16 %v454_v49, %v453_v48  ;;  %v456_v55 = vld [vmem:[%s7543_s9 + $0x568] sm:$0xff]  ;;  %v310_v58 = vld [vmem:[%s7543_s9 + $0xd8] sm:$0xff]  ;;  %v311_v0 = vld [vmem:[%s7543_s9 + $0xe0] sm:$0xff] }
  0x2d   : > { %v458_v61 = vld [vmem:[%s7543_s9 + $0x578] sm:$0xff]  ;;  %v7446_v62 = vld [vmem:[%s10186_s3 + $0x28] sm:$0xff]   ;;  %v459_v4 = vld [vmem:[%s7543_s9 + $0x580] sm:$0xff] }
  0x2e   : > { %5903 = vmatmul.mubr.msk.bf16.gmra.mrb[8].mxu0 %vm673_vm1, %v535_v54  ;;  %v455_v54 = vld [vmem:[%s7543_s9 + $0x560] sm:$0xff]  ;;  %6405 = vmatpush3.bf16.msra.mxu1 %v7446_v62  ;;  %v312_v2 = vld [vmem:[%s7543_s9 + $0xe8] sm:$0xff]  ;;  %v313_v7 = vld [vmem:[%s7543_s9 + $0xf0] sm:$0xff] }
  0x2f   : > { %6159 = vmatmul.mubr.msk.bf16.gmra.mrb[12].mxu1 %vm673_vm1, %v599_v16  ;;  %5906 = vmatprep.mubr.msk.bf16.mxu0 %vm7475_vm0, %v10191_v1  ;;  %v539_v16 = vpack.c.bf16 %v296_v15, %v295_v14  ;;  %v619_v56 = vpack.c.bf16 %v456_v55, %v455_v54  ;;  %v460_v5 = vld [vmem:[%s7543_s9 + $0x588] sm:$0xff]  ;;  %v314_v8 = vld [vmem:[%s7543_s9 + $0xf8] sm:$0xff]  ;;  %v461_v10 = vld [vmem:[%s7543_s9 + $0x590] sm:$0xff] }
  0x30   : > { %6162 = vmatprep.mubr.msk.bf16.mxu1 %vm7475_vm0, %v10191_v1  ;;  %6406 = vmatprep.subr.bf16.mxu1 %v10191_v1  ;;  %v462_v11 = vld [vmem:[%s7543_s9 + $0x598] sm:$0xff]  ;;  %v316_v14 = vld [vmem:[%s7543_s9 + $0x108] sm:$0xff]  ;;  %v469_v62 = vld [vmem:[%s7543_s9 + $0x5d0] sm:$0xff] }
  0x31   : > { %v622_v12 = vpack.c.bf16 %v462_v11, %v461_v10  ;;  %v468_v48 = vld [vmem:[%s7543_s9 + $0x5c8] sm:$0xff] }
  0x32   : > { %v324_v10 = vld [vmem:[%s7543_s9 + $0x148] sm:$0xff] }
  0x36   : > { %5907 = vmatmul.mubr.msk.bf16.gmra.mrb[12].mxu0 %vm673_vm1, %v536_v60  ;;  %v457_v60 = vld [vmem:[%s7543_s9 + $0x570] sm:$0xff] }
  0x37   : > { %6163 = vmatmul.mubr.msk.bf16.gmra.mrb[16].mxu1 %vm673_vm1, %v600_v19  ;;  %5910 = vmatprep.mubr.msk.bf16.mxu0 %vm7475_vm0, %v10191_v1  ;;  %v613_v19 = vpack.c.bf16 %v444_v18, %v443_v17  ;;  %v463_v17 = vld [vmem:[%s7543_s9 + $0x5a0] sm:$0xff]  ;;  %v464_v18 = vld [vmem:[%s7543_s9 + $0x5a8] sm:$0xff] }
  0x38   : > { %6166 = vmatprep.mubr.msk.bf16.mxu1 %vm7475_vm0, %v10191_v1 }
  0x3e   : > { %5911 = vmatmul.mubr.msk.bf16.gmra.mrb[16].mxu0 %vm673_vm1, %v537_v3  ;;  %v547_v3 = vpack.c.bf16 %v312_v2, %v311_v0 }
  0x3f   : > { %6167 = vmatmul.mubr.msk.bf16.gmra.mrb[20].mxu1 %vm673_vm1, %v601_v22  ;;  %5914 = vmatprep.mubr.msk.bf16.mxu0 %vm7475_vm0, %v10191_v1  ;;  %v540_v22 = vpack.c.bf16 %v298_v21, %v297_v20 }
  0x40   : > { %6170 = vmatprep.mubr.msk.bf16.mxu1 %vm7475_vm0, %v10191_v1 }
  0x46   : > { %5915 = vmatmul.mubr.msk.bf16.gmra.mrb[20].mxu0 %vm673_vm1, %v538_v9  ;;  %v548_v9 = vpack.c.bf16 %v314_v8, %v313_v7 }
  0x47   : > { %6171 = vmatmul.mubr.msk.bf16.gmra.mrb[24].mxu1 %vm673_vm1, %v602_v25  ;;  %5918 = vmatprep.mubr.msk.bf16.mxu0 %vm7475_vm0, %v10191_v1  ;;  %v614_v25 = vpack.c.bf16 %v446_v24, %v445_v23  ;;  %v623_v23 = vpack.c.bf16 %v464_v18, %v463_v17 }
  0x48   : > { %6174 = vmatprep.mubr.msk.bf16.mxu1 %vm7475_vm0, %v10191_v1 }
  0x4e   : > { %5919 = vmatmul.mubr.msk.bf16.gmra.mrb[24].mxu0 %vm673_vm1, %v539_v16  ;;  %v7795_v16 = vld [vmem:[%s10185_s2] ss:$0 sm:$0xff] }
  0x4f   : > { %6175 = vmatmul.mubr.msk.bf16.gmra.mrb[28].mxu1 %vm673_vm1, %v603_v28  ;;  %5922 = vmatprep.mubr.msk.bf16.mxu0 %vm7475_vm0, %v10191_v1  ;;  %v541_v28 = vpack.c.bf16 %v300_v27, %v299_v26  ;;  %v317_v27 = vld [vmem:[%s7543_s9 + $0x110] sm:$0xff] }
  0x50   : > { %6178 = vmatprep.mubr.msk.bf16.mxu1 %vm7475_vm0, %v10191_v1 }
  0x56   : > { %5923 = vmatmul.mubr.msk.bf16.gmra.mrb[28].mxu0 %vm673_vm1, %v540_v22 }
  0x57   : > { %6179 = vmatmul.mubr.msk.bf16.gmra.mrb[32].mxu1 %vm673_vm1, %v604_v32  ;;  %5926 = vmatprep.mubr.msk.bf16.mxu0 %vm7475_vm0, %v10191_v1  ;;  %v7445_v32 = vld [vmem:[%s10188_s5 + $0x8] sm:$0xff]  }
  0x58   : > { %6182 = vmatprep.mubr.msk.bf16.mxu1 %vm7475_vm0, %v10191_v1  ;;  %6913 = vmatpush3.bf16.msra.mxu0 %v7445_v32  ;;  %v465_v32 = vld [vmem:[%s7543_s9 + $0x5b0] sm:$0xff] }
  0x59   : > { %6914 = vmatprep.subr.bf16.mxu0 %v10191_v1 }
  0x5e   : > { %5927 = vmatmul.mubr.msk.bf16.gmra.mrb[32].mxu0 %vm673_vm1, %v541_v28  ;;  %v318_v28 = vld [vmem:[%s7543_s9 + $0x118] sm:$0xff] }
  0x5f   : > { %6183 = vmatmul.mubr.msk.bf16.gmra.mrb[36].mxu1 %vm673_vm1, %v605_v35  ;;  %5930 = vmatprep.mubr.msk.bf16.mxu0 %vm7475_vm0, %v10191_v1  ;;  %v542_v35 = vpack.c.bf16 %v302_v34, %v301_v33  ;;  %v550_v29 = vpack.c.bf16 %v318_v28, %v317_v27  ;;  %v466_v33 = vld [vmem:[%s7543_s9 + $0x5b8] sm:$0xff] }
  0x60   : > { %6186 = vmatprep.mubr.msk.bf16.mxu1 %vm7475_vm0, %v10191_v1  ;;  %v326_v27 = vld [vmem:[%s7543_s9 + $0x158] sm:$0xff] }
  0x66   : > { %5931 = vmatmul.mubr.msk.bf16.gmra.mrb[36].mxu0 %vm673_vm1, %v542_v35 }
  0x67   : > { %6187 = vmatmul.mubr.msk.bf16.gmra.mrb[40].mxu1 %vm673_vm1, %v606_v38  ;;  %5934 = vmatprep.mubr.msk.bf16.mxu0 %vm7475_vm0, %v10191_v1  ;;  %v616_v38 = vpack.c.bf16 %v450_v37, %v449_v36 }
  0x68   : > { %6190 = vmatprep.mubr.msk.bf16.mxu1 %vm7475_vm0, %v10191_v1 }
  0x6e   : > { %5935 = vmatmul.mubr.msk.bf16.gmra.mrb[40].mxu0 %vm673_vm1, %v543_v41 }
  0x6f   : > { %6191 = vmatmul.mubr.msk.bf16.gmra.mrb[44].mxu1 %vm673_vm1, %v607_v44  ;;  %5938 = vmatprep.mubr.msk.bf16.mxu0 %vm7475_vm0, %v10191_v1  ;;  %v617_v44 = vpack.c.bf16 %v452_v43, %v451_v42  ;;  %v319_v42 = vld [vmem:[%s7543_s9 + $0x120] sm:$0xff]  ;;  %v320_v43 = vld [vmem:[%s7543_s9 + $0x128] sm:$0xff] }
  0x70   : > { %6194 = vmatprep.mubr.msk.bf16.mxu1 %vm7475_vm0, %v10191_v1 }
  0x76   : > { %5939 = vmatmul.mubr.msk.bf16.gmra.mrb[44].mxu0 %vm673_vm1, %v544_v47  ;;  %v467_v47 = vld [vmem:[%s7543_s9 + $0x5c0] sm:$0xff] }
  0x77   : > { %6195 = vmatmul.mubr.msk.bf16.gmra.mrb[48].mxu1 %vm673_vm1, %v608_v51  ;;  %5942 = vmatprep.mubr.msk.bf16.mxu0 %vm7475_vm0, %v10191_v1  ;;  %v307_v51 = vld [vmem:[%s7543_s9 + $0xc0] sm:$0xff] }
  0x78   : > { %6198 = vmatprep.mubr.msk.bf16.mxu1 %vm7475_vm0, %v10191_v1  ;;  %v545_v53 = vpack.c.bf16 %v308_v52, %v307_v51 }
  0x7e   : > { %5943 = vmatmul.mubr.msk.bf16.gmra.mrb[48].mxu0 %vm673_vm1, %v545_v53  ;;  %v625_v53 = vpack.c.bf16 %v468_v48, %v467_v47  ;;  %v475_v47 = vld [vmem:[%s7543_s9 + $0x600] sm:$0xff]  ;;  %v476_v48 = vld [vmem:[%s7543_s9 + $0x608] sm:$0xff] }
  0x7f   : > { %6199 = vmatmul.mubr.msk.bf16.gmra.mrb[52].mxu1 %vm673_vm1, %v609_v57  ;;  %5946 = vmatprep.mubr.msk.bf16.mxu0 %vm7475_vm0, %v10191_v1  ;;  %v309_v57 = vld [vmem:[%s7543_s9 + $0xd0] sm:$0xff] }
  0x80   : > { %6202 = vmatprep.mubr.msk.bf16.mxu1 %vm7475_vm0, %v10191_v1  ;;  %v546_v59 = vpack.c.bf16 %v310_v58, %v309_v57  ;;  %v321_v57 = vld [vmem:[%s7543_s9 + $0x130] sm:$0xff]  ;;  %v322_v58 = vld [vmem:[%s7543_s9 + $0x138] sm:$0xff] }
  0x86   : > { %5947 = vmatmul.mubr.msk.bf16.gmra.mrb[52].mxu0 %vm673_vm1, %v546_v59  ;;  %v552_v59 = vpack.c.bf16 %v322_v58, %v321_v57  ;;  %v329_v58 = vld [vmem:[%s7543_s9 + $0x170] sm:$0xff] }
  0x87   : > { %6203 = vmatmul.mubr.msk.bf16.gmra.mrb[56].mxu1 %vm673_vm1, %v610_v63  ;;  %5950 = vmatprep.mubr.msk.bf16.mxu0 %vm7475_vm0, %v10191_v1  ;;  %v620_v63 = vpack.c.bf16 %v458_v61, %v457_v60 }
  0x88   : > { %6206 = vmatprep.mubr.msk.bf16.mxu1 %vm7475_vm0, %v10191_v1 }
  0x8e   : > { %5951 = vmatmul.mubr.msk.bf16.gmra.mrb[56].mxu0 %vm673_vm1, %v547_v3 }
  0x8f   : > { %6207 = vmatmul.mubr.msk.bf16.gmra.mrb[60].mxu1 %vm673_vm1, %v611_v6  ;;  %5954 = vmatprep.mubr.msk.bf16.mxu0 %vm7475_vm0, %v10191_v1  ;;  %v621_v6 = vpack.c.bf16 %v460_v5, %v459_v4 }
  0x90   : > { %6210 = vmatprep.mubr.msk.bf16.mxu1 %vm7475_vm0, %v10191_v1 }
  0x96   : > { %5955 = vmatmul.mubr.msk.bf16.gmra.mrb[60].mxu0 %vm673_vm1, %v548_v9  ;;  %v323_v9 = vld [vmem:[%s7543_s9 + $0x140] sm:$0xff] }
  0x97   : > { %6211 = vmatmul.mubr.msk.bf16.gmra.mrb[64].mxu1 %vm673_vm1, %v612_v13  ;;  %5958 = vmatprep.mubr.msk.bf16.mxu0 %vm7475_vm0, %v10191_v1  ;;  %v315_v13 = vld [vmem:[%s7543_s9 + $0x100] sm:$0xff]  ;;  %v553_v11 = vpack.c.bf16 %v324_v10, %v323_v9 }
  0x98   : > { %6214 = vmatprep.mubr.msk.bf16.mxu1 %vm7475_vm0, %v10191_v1  ;;  %v549_v15 = vpack.c.bf16 %v316_v14, %v315_v13  ;;  %v471_v14 = vld [vmem:[%s7543_s9 + $0x5e0] sm:$0xff] }
  0x9e   : > { %5959 = vmatmul.mubr.msk.bf16.gmra.mrb[64].mxu0 %vm673_vm1, %v549_v15  ;;  %v472_v15 = vld [vmem:[%s7543_s9 + $0x5e8] sm:$0xff] }
  0x9f   : > { %6215 = vmatmul.mubr.msk.bf16.gmra.mrb[68].mxu1 %vm673_vm1, %v613_v19  ;;  %v7447_v19 = vld [vmem:[%s10188_s5 + $0x10] sm:$0xff]   ;;  %5962 = vmatprep.mubr.msk.bf16.mxu0 %vm7475_vm0, %v10191_v1 }
  0xa0   : > { %6218 = vmatprep.mubr.msk.bf16.mxu1 %vm7475_vm0, %v10191_v1  ;;  %6915 = vmatpush3.bf16.msra.mxu0 %v7447_v19 }
  0xa1   : > { %6916 = vmatprep.subr.bf16.mxu0 %v10191_v1 }
  0xa6   : > { %5963 = vmatmul.mubr.msk.bf16.gmra.mrb[68].mxu0 %vm673_vm1, %v550_v29 }
  0xa7   : > { %6219 = vmatmul.mubr.msk.bf16.gmra.mrb[72].mxu1 %vm673_vm1, %v614_v25  ;;  %5966 = vmatprep.mubr.msk.bf16.mxu0 %vm7475_vm0, %v10191_v1 }
  0xa8   : > { %6222 = vmatprep.mubr.msk.bf16.mxu1 %vm7475_vm0, %v10191_v1 }
  0xaf   : > { %6223 = vmatmul.mubr.msk.bf16.gmra.mrb[76].mxu1 %vm673_vm1, %v615_v31 }
  0xb0   : > { %6226 = vmatprep.mubr.msk.bf16.mxu1 %vm7475_vm0, %v10191_v1 }
  0xb7   : > { %6227 = vmatmul.mubr.msk.bf16.gmra.mrb[80].mxu1 %vm673_vm1, %v616_v38  ;;  %v624_v38 = vpack.c.bf16 %v466_v33, %v465_v32  ;;  %v474_v32 = vld [vmem:[%s7543_s9 + $0x5f8] sm:$0xff] }
  0xb8   : > { %6230 = vmatprep.mubr.msk.bf16.mxu1 %vm7475_vm0, %v10191_v1 }
  0xbf   : > { %6231 = vmatmul.mubr.msk.bf16.gmra.mrb[84].mxu1 %vm673_vm1, %v617_v44  ;;  %v551_v44 = vpack.c.bf16 %v320_v43, %v319_v42  ;;  %v327_v42 = vld [vmem:[%s7543_s9 + $0x160] sm:$0xff]  ;;  %v328_v43 = vld [vmem:[%s7543_s9 + $0x168] sm:$0xff] }
  0xc0   : > { %6234 = vmatprep.mubr.msk.bf16.mxu1 %vm7475_vm0, %v10191_v1 }
  0xc1   : > { %5967 = vmatmul.mubr.msk.bf16.gmra.mrb[72].mxu0 %vm673_vm1, %v551_v44  ;;  %v555_v44 = vpack.c.bf16 %v328_v43, %v327_v42 }
  0xc2   : > { %5970 = vmatprep.mubr.msk.bf16.mxu0 %vm7475_vm0, %v10191_v1 }
  0xc7   : > { %6235 = vmatmul.mubr.msk.bf16.gmra.mrb[88].mxu1 %vm673_vm1, %v618_v50 }
  0xc8   : > { %6238 = vmatprep.mubr.msk.bf16.mxu1 %vm7475_vm0, %v10191_v1 }
  0xc9   : > { %5971 = vmatmul.mubr.msk.bf16.gmra.mrb[76].mxu0 %vm673_vm1, %v552_v59  ;;  %v330_v59 = vld [vmem:[%s7543_s9 + $0x178] sm:$0xff] }
  0xca   : > { %5974 = vmatprep.mubr.msk.bf16.mxu0 %vm7475_vm0, %v10191_v1 }
  0xcf   : > { %6239 = vmatmul.mubr.msk.bf16.gmra.mrb[92].mxu1 %vm673_vm1, %v619_v56 }
  0xd0   : > { %6242 = vmatprep.mubr.msk.bf16.mxu1 %vm7475_vm0, %v10191_v1 }
  0xd1   : > { %5975 = vmatmul.mubr.msk.bf16.gmra.mrb[80].mxu0 %vm673_vm1, %v553_v11  ;;  %v331_v11 = vld [vmem:[%s7543_s9 + $0x180] sm:$0xff] }
  0xd2   : > { %5978 = vmatprep.mubr.msk.bf16.mxu0 %vm7475_vm0, %v10191_v1 }
  0xd7   : > { %6243 = vmatmul.mubr.msk.bf16.gmra.mrb[96].mxu1 %vm673_vm1, %v620_v63  ;;  %v470_v63 = vld [vmem:[%s7543_s9 + $0x5d8] sm:$0xff] }
  0xd8   : > { %6246 = vmatprep.mubr.msk.bf16.mxu1 %vm7475_vm0, %v10191_v1  ;;  %v626_v5 = vpack.c.bf16 %v470_v63, %v469_v62  ;;  %v477_v63 = vld [vmem:[%s7543_s9 + $0x610] sm:$0xff] }
  0xdf   : > { %6247 = vmatmul.mubr.msk.bf16.gmra.mrb[100].mxu1 %vm673_vm1, %v621_v6 }
  0xe0   : > { %6250 = vmatprep.mubr.msk.bf16.mxu1 %vm7475_vm0, %v10191_v1 }
  0xe7   : > { %6251 = vmatmul.mubr.msk.bf16.gmra.mrb[104].mxu1 %vm673_vm1, %v622_v12 }
  0xe8   : > { %6254 = vmatprep.mubr.msk.bf16.mxu1 %vm7475_vm0, %v10191_v1 }
  0xea   : > { %v1587_v20 = vpop.f32.mrb[0].mxu1 }
  0xeb   : > { %v1588_v21 = vadd.f32 %v7795_v16, %v1587_v20  ;;  %v6148_v22 = vpop.f32.mrb[1].mxu1 }
  0xec   : > { %v1590_v24 = vpop.f32.mrb[2].mxu1 }
  0xed   : > { %v1591_v25 = vadd.f32 %v7795_v16, %v1590_v24  ;;  %v6149_v26 = vpop.f32.mrb[3].mxu1  ;;  %v2208_v30 = vmax.f32 %v1588_v21, 0.0  ;;  %v627_v21 = vpack.c.bf16 %v472_v15, %v471_v14 }
  0xee   : > { %v325_v26 = vld [vmem:[%s7543_s9 + $0x150] sm:$0xff] }
  0xef   : > { %v2209_v31 = vmax.f32 %v1591_v25, 0.0  ;;  %6255 = vmatmul.mubr.msk.bf16.gmra.mrb[108].mxu1 %vm673_vm1, %v623_v23  ;;  %v7448_v25 = vld [vmem:[%s10186_s3 + $0x30] sm:$0xff]   ;;  %v554_v28 = vpack.c.bf16 %v326_v27, %v325_v26 }
  0xf0   : > { %6258 = vmatprep.mubr.msk.bf16.mxu1 %vm7475_vm0, %v10191_v1  ;;  %6407 = vmatpush3.bf16.msra.mxu1 %v7448_v25 }
  0xf1   : > { %v7818_v34 = vpack.c.bf16 %v2209_v31, %v2208_v30  ;;  %v473_v31 = vld [vmem:[%s7543_s9 + $0x5f0] sm:$0xff]  ;;  %5979 = vmatmul.mubr.msk.bf16.gmra.mrb[84].mxu0 %vm673_vm1, %v554_v28  ;;  %6408 = vmatprep.subr.bf16.mxu1 %v10191_v1 }
  0xf2   : > { %v1595_v35 = vpop.f32.mrb[4].mxu1  ;;  %5982 = vmatprep.mubr.msk.bf16.mxu0 %vm7475_vm0, %v10191_v1 }
  0xf3   : > { %v1596_v36 = vadd.f32 %v7795_v16, %v1595_v35  ;;  %v6152_v37 = vpop.f32.mrb[5].mxu1 }
  0xf4   : > { %v1598_v39 = vpop.f32.mrb[6].mxu1 }
  0xf5   : > { %v1599_v40 = vadd.f32 %v7795_v16, %v1598_v39  ;;  %v6153_v41 = vpop.f32.mrb[7].mxu1  ;;  %v2210_v45 = vmax.f32 %v1596_v36, 0.0 }
  0xf7   : > { %v2211_v46 = vmax.f32 %v1599_v40, 0.0  ;;  %6259 = vmatmul.mubr.msk.bf16.gmra.mrb[112].mxu1 %vm673_vm1, %v624_v38  ;;  %v628_v38 = vpack.c.bf16 %v474_v32, %v473_v31 }
  0xf8   : > { %6262 = vmatprep.mubr.msk.bf16.mxu1 %vm7475_vm0, %v10191_v1 }
  0xf9   : > { %v7832_v49 = vpack.c.bf16 %v2211_v46, %v2210_v45  ;;  %5983 = vmatmul.mubr.msk.bf16.gmra.mrb[88].mxu0 %vm673_vm1, %v555_v44 }
  0xfa   : > { %v1603_v50 = vpop.f32.mrb[8].mxu1  ;;  %5986 = vmatprep.mubr.msk.bf16.mxu0 %vm7475_vm0, %v10191_v1 }
  0xfb   : > { %v1604_v51 = vadd.f32 %v7795_v16, %v1603_v50  ;;  %v6156_v52 = vpop.f32.mrb[9].mxu1 }
  0xfc   : > { %v1606_v54 = vpop.f32.mrb[10].mxu1 }
  0xfd   : > { %v1607_v55 = vadd.f32 %v7795_v16, %v1606_v54  ;;  %v6157_v56 = vpop.f32.mrb[11].mxu1  ;;  %v2212_v60 = vmax.f32 %v1604_v51, 0.0  ;;  %v629_v54 = vpack.c.bf16 %v476_v48, %v475_v47  ;;  %v336_v47 = vld [vmem:[%s7543_s9 + $0x1a8] sm:$0xff] }
  0xff   : > { %v2213_v61 = vmax.f32 %v1607_v55, 0.0  ;;  %6263 = vmatmul.mubr.msk.bf16.gmra.mrb[116].mxu1 %vm673_vm1, %v625_v53 }
 0x100   : > { %6266 = vmatprep.mubr.msk.bf16.mxu1 %vm7475_vm0, %v10191_v1 }
 0x101   : > { %v7846_v0 = vpack.c.bf16 %v2213_v61, %v2212_v60  ;;  %v556_v60 = vpack.c.bf16 %v330_v59, %v329_v58 }
 0x102   : > { %v1611_v2 = vpop.f32.mrb[12].mxu1 }
 0x103   : > { %v1612_v3 = vadd.f32 %v7795_v16, %v1611_v2  ;;  %v6160_v4 = vpop.f32.mrb[13].mxu1  ;;  %v478_v2 = vld [vmem:[%s7543_s9 + $0x618] sm:$0xff]  ;;  %5987 = vmatmul.mubr.msk.bf16.gmra.mrb[92].mxu0 %vm673_vm1, %v556_v60  ;;  %v1083_v60 = vpop.f32.mrb[0].mxu0 }
 0x104   : > { %v1614_v6 = vpop.f32.mrb[14].mxu1  ;;  %5990 = vmatprep.mubr.msk.bf16.mxu0 %vm7475_vm0, %v10191_v1 }
 0x105   : > { %v1615_v7 = vadd.f32 %v7795_v16, %v1614_v6  ;;  %v6161_v8 = vpop.f32.mrb[15].mxu1  ;;  %v2214_v12 = vmax.f32 %v1612_v3, 0.0 }
 0x107   : > { %v2215_v13 = vmax.f32 %v1615_v7, 0.0  ;;  %6267 = vmatmul.mubr.msk.bf16.gmra.mrb[120].mxu1 %vm673_vm1, %v626_v5  ;;  %v630_v7 = vpack.c.bf16 %v478_v2, %v477_v63 }
 0x108   : > { %6270 = vmatprep.mubr.msk.bf16.mxu1 %vm7475_vm0, %v10191_v1 }
 0x109   : > { %v7860_v17 = vpack.c.bf16 %v2215_v13, %v2214_v12  ;;  %v332_v12 = vld [vmem:[%s7543_s9 + $0x188] sm:$0xff] }
 0x10a   : > { %v1619_v18 = vpop.f32.mrb[16].mxu1  ;;  %v557_v13 = vpack.c.bf16 %v332_v12, %v331_v11 }
 0x10b   : > { %v1620_v19 = vadd.f32 %v7795_v16, %v1619_v18  ;;  %v6164_v20 = vpop.f32.mrb[17].mxu1  ;;  %v479_v18 = vld [vmem:[%s7543_s9 + $0x620] sm:$0xff] }
 0x10c   : > { %v1622_v22 = vpop.f32.mrb[18].mxu1  ;;  %5991 = vmatmul.mubr.msk.bf16.gmra.mrb[96].mxu0 %vm673_vm1, %v557_v13 }
 0x10d   : > { %v1623_v23 = vadd.f32 %v7795_v16, %v1622_v22  ;;  %v6165_v24 = vpop.f32.mrb[19].mxu1  ;;  %v2216_v29 = vmax.f32 %v1620_v19, 0.0  ;;  %v480_v19 = vld [vmem:[%s7543_s9 + $0x628] sm:$0xff]  ;;  %5994 = vmatprep.mubr.msk.bf16.mxu0 %vm7475_vm0, %v10191_v1 }
 0x10e   : > { %v631_v25 = vpack.c.bf16 %v480_v19, %v479_v18 }
 0x10f   : > { %v2217_v30 = vmax.f32 %v1623_v23, 0.0  ;;  %6271 = vmatmul.mubr.msk.bf16.gmra.mrb[124].mxu1 %vm673_vm1, %v627_v21  ;;  %v7449_v21 = vld [vmem:[%s10188_s5 + $0x18] sm:$0xff]  }
 0x110   : > { %6274 = vmatprep.mubr.msk.bf16.mxu1 %vm7475_vm0, %v10191_v1  ;;  %6917 = vmatpush3.bf16.msra.mxu0 %v7449_v21 }
 0x111   : > { %v7876_v33 = vpack.c.bf16 %v2217_v30, %v2216_v29  ;;  %6918 = vmatprep.subr.bf16.mxu0 %v10191_v1  ;;  %v333_v29 = vld [vmem:[%s7543_s9 + $0x190] sm:$0xff]  ;;  %v334_v30 = vld [vmem:[%s7543_s9 + $0x198] sm:$0xff] }
 0x112   : > { %v1627_v35 = vpop.f32.mrb[20].mxu1  ;;  %v558_v31 = vpack.c.bf16 %v334_v30, %v333_v29 }
 0x113   : > { %v1628_v36 = vadd.f32 %v7795_v16, %v1627_v35  ;;  %v6168_v37 = vpop.f32.mrb[21].mxu1 }
 0x114   : > { %v1630_v39 = vpop.f32.mrb[22].mxu1  ;;  %v482_v37 = vld [vmem:[%s7543_s9 + $0x638] sm:$0xff]  ;;  %5995 = vmatmul.mubr.msk.bf16.gmra.mrb[100].mxu0 %vm673_vm1, %v558_v31 }
 0x115   : > { %v1631_v40 = vadd.f32 %v7795_v16, %v1630_v39  ;;  %v6169_v41 = vpop.f32.mrb[23].mxu1  ;;  %v2218_v45 = vmax.f32 %v1628_v36, 0.0  ;;  %v481_v36 = vld [vmem:[%s7543_s9 + $0x630] sm:$0xff]  ;;  %5998 = vmatprep.mubr.msk.bf16.mxu0 %vm7475_vm0, %v10191_v1 }
 0x116   : > { %v632_v42 = vpack.c.bf16 %v482_v37, %v481_v36  ;;  %v340_v36 = vld [vmem:[%s7543_s9 + $0x1c8] sm:$0xff] }
 0x117   : > { %v2219_v46 = vmax.f32 %v1631_v40, 0.0  ;;  %6275 = vmatmul.mubr.msk.bf16.gmra.mrb[128].mxu1 %vm673_vm1, %v628_v38 }
 0x118   : > { %6278 = vmatprep.mubr.msk.bf16.mxu1 %vm7475_vm0, %v10191_v1 }
 0x119   : > { %v7891_v50 = vpack.c.bf16 %v2219_v46, %v2218_v45  ;;  %v335_v46 = vld [vmem:[%s7543_s9 + $0x1a0] sm:$0xff] }
 0x11a   : > { %v1635_v51 = vpop.f32.mrb[24].mxu1  ;;  %v559_v48 = vpack.c.bf16 %v336_v47, %v335_v46 }
 0x11b   : > { %v1636_v52 = vadd.f32 %v7795_v16, %v1635_v51  ;;  %v6172_v53 = vpop.f32.mrb[25].mxu1 }
 0x11c   : > { %v1638_v55 = vpop.f32.mrb[26].mxu1  ;;  %v483_v53 = vld [vmem:[%s7543_s9 + $0x640] sm:$0xff]  ;;  %5999 = vmatmul.mubr.msk.bf16.gmra.mrb[104].mxu0 %vm673_vm1, %v559_v48  ;;  %v7450_v48 = vld [vmem:[%s10186_s3 + $0x38] sm:$0xff]  }
 0x11d   : > { %v1639_v56 = vadd.f32 %v7795_v16, %v1638_v55  ;;  %v6173_v57 = vpop.f32.mrb[27].mxu1  ;;  %v2220_v61 = vmax.f32 %v1636_v52, 0.0  ;;  %6002 = vmatprep.mubr.msk.bf16.mxu0 %vm7475_vm0, %v10191_v1  ;;  %6409 = vmatpush3.bf16.msra.mxu1 %v7450_v48 }
 0x11f   : > { %v2221_v62 = vmax.f32 %v1639_v56, 0.0  ;;  %6279 = vmatmul.mubr.msk.bf16.gmra.mrb[132].mxu1 %vm673_vm1, %v629_v54  ;;  %v484_v54 = vld [vmem:[%s7543_s9 + $0x648] sm:$0xff] }
 0x120   : > { %6282 = vmatprep.mubr.msk.bf16.mxu1 %vm7475_vm0, %v10191_v1  ;;  %v633_v59 = vpack.c.bf16 %v484_v54, %v483_v53 }
 0x121   : > { %v7905_v3 = vpack.c.bf16 %v2221_v62, %v2220_v61  ;;  %v5896_v62 = vpop.f32.mrb[1].mxu0 }
 0x122   : > { %v1643_v4 = vpop.f32.mrb[28].mxu1 }
 0x123   : > { %v1644_v5 = vadd.f32 %v7795_v16, %v1643_v4  ;;  %v6176_v6 = vpop.f32.mrb[29].mxu1  ;;  %v1084_v4 = vadd.f32 %v7795_v16, %v1083_v60 }
 0x124   : > { %v1646_v8 = vpop.f32.mrb[30].mxu1  ;;  %v337_v6 = vld [vmem:[%s7543_s9 + $0x1b0] sm:$0xff] }
 0x125   : > { %v1647_v9 = vadd.f32 %v7795_v16, %v1646_v8  ;;  %v6177_v10 = vpop.f32.mrb[31].mxu1  ;;  %v2222_v14 = vmax.f32 %v1644_v5, 0.0  ;;  %v1086_v5 = vpop.f32.mrb[2].mxu0  ;;  %v2082_v12 = vmax.f32 %v1084_v4, 0.0  ;;  %v342_v4 = vld [vmem:[%s7543_s9 + $0x1d8] sm:$0xff] }
 0x126   : > { %v5897_v8 = vpop.f32.mrb[3].mxu0  ;;  %v1087_v13 = vadd.f32 %v7795_v16, %v1086_v5 }
 0x127   : > { %v2223_v15 = vmax.f32 %v1647_v9, 0.0  ;;  %6283 = vmatmul.mubr.msk.bf16.gmra.mrb[136].mxu1 %vm673_vm1, %v630_v7  ;;  %v338_v7 = vld [vmem:[%s7543_s9 + $0x1b8] sm:$0xff] }
 0x128   : > { %6286 = vmatprep.mubr.msk.bf16.mxu1 %vm7475_vm0, %v10191_v1  ;;  %v560_v9 = vpack.c.bf16 %v338_v7, %v337_v6  ;;  %v2083_v19 = vmax.f32 %v1087_v13, 0.0 }
 0x129   : > { %v7919_v20 = vpack.c.bf16 %v2223_v15, %v2222_v14  ;;  %v485_v14 = vld [vmem:[%s7543_s9 + $0x650] sm:$0xff]  ;;  %v486_v15 = vld [vmem:[%s7543_s9 + $0x658] sm:$0xff] }
 0x12a   : > { %v1651_v22 = vpop.f32.mrb[32].mxu1  ;;  %6003 = vmatmul.mubr.msk.bf16.gmra.mrb[108].mxu0 %vm673_vm1, %v560_v9 }
 0x12b   : > { %v1652_v23 = vadd.f32 %v7795_v16, %v1651_v22  ;;  %v6180_v24 = vpop.f32.mrb[33].mxu1  ;;  %6006 = vmatprep.mubr.msk.bf16.mxu0 %vm7475_vm0, %v10191_v1 }
 0x12c   : > { %v1654_v26 = vpop.f32.mrb[34].mxu1  ;;  %v634_v24 = vpack.c.bf16 %v486_v15, %v485_v14 }
 0x12d   : > { %v1655_v27 = vadd.f32 %v7795_v16, %v1654_v26  ;;  %v6181_v28 = vpop.f32.mrb[35].mxu1  ;;  %v2224_v32 = vmax.f32 %v1652_v23, 0.0  ;;  %v1091_v26 = vpop.f32.mrb[4].mxu0 }
 0x12e   : > { %v5900_v28 = vpop.f32.mrb[5].mxu0  ;;  %v1092_v31 = vadd.f32 %v7795_v16, %v1091_v26 }
 0x12f   : > { %v2225_v35 = vmax.f32 %v1655_v27, 0.0  ;;  %6287 = vmatmul.mubr.msk.bf16.gmra.mrb[140].mxu1 %vm673_vm1, %v631_v25  ;;  %v7973_v25 = vpack.c.bf16 %v2083_v19, %v2082_v12  ;;  %v490_v12 = vld [vmem:[%s7543_s9 + $0x678] sm:$0xff] }
 0x130   : > { %6290 = vmatprep.mubr.msk.bf16.mxu1 %vm7475_vm0, %v10191_v1 }
 0x131   : > { %v7937_v38 = vpack.c.bf16 %v2225_v35, %v2224_v32  ;;  %v1094_v32 = vpop.f32.mrb[6].mxu0  ;;  %v339_v35 = vld [vmem:[%s7543_s9 + $0x1c0] sm:$0xff] }
 0x132   : > { %v1659_v39 = vpop.f32.mrb[36].mxu1  ;;  %v5901_v37 = vpop.f32.mrb[7].mxu0 }
 0x133   : > { %v1660_v40 = vadd.f32 %v7795_v16, %v1659_v39  ;;  %v6184_v41 = vpop.f32.mrb[37].mxu1  ;;  %v561_v39 = vpack.c.bf16 %v340_v36, %v339_v35  ;;  %v344_v35 = vld [vmem:[%s7543_s9 + $0x1e8] sm:$0xff] }
 0x134   : > { %v1662_v43 = vpop.f32.mrb[38].mxu1 }
 0x135   : > { %v1663_v44 = vadd.f32 %v7795_v16, %v1662_v43  ;;  %v6185_v45 = vpop.f32.mrb[39].mxu1  ;;  %v2226_v51 = vmax.f32 %v1660_v40, 0.0  ;;  %v1095_v43 = vadd.f32 %v7795_v16, %v1094_v32  ;;  %6007 = vmatmul.mubr.msk.bf16.gmra.mrb[112].mxu0 %vm673_vm1, %v561_v39  ;;  %v343_v32 = vld [vmem:[%s7543_s9 + $0x1e0] sm:$0xff] }
 0x136   : > { %v488_v45 = vld [vmem:[%s7543_s9 + $0x668] sm:$0xff]  ;;  %6010 = vmatprep.mubr.msk.bf16.mxu0 %vm7475_vm0, %v10191_v1  ;;  %v563_v37 = vpack.c.bf16 %v344_v35, %v343_v32 }
 0x137   : > { %v2227_v52 = vmax.f32 %v1663_v44, 0.0  ;;  %6291 = vmatmul.mubr.msk.bf16.gmra.mrb[144].mxu1 %vm673_vm1, %v632_v42  ;;  %v2084_v42 = vmax.f32 %v1092_v31, 0.0  ;;  %v487_v44 = vld [vmem:[%s7543_s9 + $0x660] sm:$0xff]  ;;  %v2085_v47 = vmax.f32 %v1095_v43, 0.0 }
 0x138   : > { %6294 = vmatprep.mubr.msk.bf16.mxu1 %vm7475_vm0, %v10191_v1  ;;  %v635_v54 = vpack.c.bf16 %v488_v45, %v487_v44  ;;  %v491_v43 = vld [vmem:[%s7543_s9 + $0x680] sm:$0xff]  ;;  %v492_v44 = vld [vmem:[%s7543_s9 + $0x688] sm:$0xff] }
 0x139   : > { %v7951_v55 = vpack.c.bf16 %v2227_v52, %v2226_v51 }
 0x13a   : > { %v1667_v56 = vpop.f32.mrb[40].mxu1 }
 0x13b   : > { %v1668_v57 = vadd.f32 %v7795_v16, %v1667_v56  ;;  %v6188_v58 = vpop.f32.mrb[41].mxu1  ;;  %v1099_v56 = vpop.f32.mrb[8].mxu0 }
 0x13c   : > { %v1670_v61 = vpop.f32.mrb[42].mxu1  ;;  %v1100_v62 = vadd.f32 %v7795_v16, %v1099_v56 }
 0x13d   : > { %v1671_v63 = vadd.f32 %v7795_v16, %v1670_v61  ;;  %v6189_v2 = vpop.f32.mrb[43].mxu1  ;;  %v2228_v10 = vmax.f32 %v1668_v57, 0.0  ;;  %v7994_v57 = vpack.c.bf16 %v2085_v47, %v2084_v42 }
 0x13e   : > { %v341_v2 = vld [vmem:[%s7543_s9 + $0x1d0] sm:$0xff]  ;;  %v2086_v9 = vmax.f32 %v1100_v62, 0.0 }
 0x13f   : > { %v2229_v11 = vmax.f32 %v1671_v63, 0.0  ;;  %6295 = vmatmul.mubr.msk.bf16.gmra.mrb[148].mxu1 %vm673_vm1, %v633_v59  ;;  %v5904_v59 = vpop.f32.mrb[9].mxu0  ;;  %v562_v6 = vpack.c.bf16 %v342_v4, %v341_v2  ;;  %v345_v2 = vld [vmem:[%s7543_s9 + $0x1f0] sm:$0xff]  ;;  %v346_v4 = vld [vmem:[%s7543_s9 + $0x1f8] sm:$0xff] }
 0x140   : > { %6298 = vmatprep.mubr.msk.bf16.mxu1 %vm7475_vm0, %v10191_v1  ;;  %v1102_v63 = vpop.f32.mrb[10].mxu0 }
 0x141   : > { %v7967_v18 = vpack.c.bf16 %v2229_v11, %v2228_v10  ;;  %v5905_v5 = vpop.f32.mrb[11].mxu0  ;;  %v1103_v10 = vadd.f32 %v7795_v16, %v1102_v63  ;;  %v489_v11 = vld [vmem:[%s7543_s9 + $0x670] sm:$0xff]  ;;  %6011 = vmatmul.mubr.msk.bf16.gmra.mrb[116].mxu0 %vm673_vm1, %v562_v6  ;;  %v564_v6 = vpack.c.bf16 %v346_v4, %v345_v2 }
 0x142   : > { %v1675_v21 = vpop.f32.mrb[44].mxu1  ;;  %6014 = vmatprep.mubr.msk.bf16.mxu0 %vm7475_vm0, %v10191_v1 }
 0x143   : > { %v1676_v22 = vadd.f32 %v7795_v16, %v1675_v21  ;;  %v6192_v23 = vpop.f32.mrb[45].mxu1  ;;  %v2087_v14 = vmax.f32 %v1103_v10, 0.0 }
 0x144   : > { %v1678_v27 = vpop.f32.mrb[46].mxu1 }
 0x145   : > { %v1679_v29 = vadd.f32 %v7795_v16, %v1678_v27  ;;  %v6193_v30 = vpop.f32.mrb[47].mxu1  ;;  %v2230_v40 = vmax.f32 %v1676_v22, 0.0  ;;  %v636_v22 = vpack.c.bf16 %v490_v12, %v489_v11  ;;  %v8012_v23 = vpack.c.bf16 %v2087_v14, %v2086_v9  ;;  %v493_v11 = vld [vmem:[%s7543_s9 + $0x690] sm:$0xff]  ;;  %v494_v12 = vld [vmem:[%s7543_s9 + $0x698] sm:$0xff] }
 0x147   : > { %v2231_v41 = vmax.f32 %v1679_v29, 0.0  ;;  %6299 = vmatmul.mubr.msk.bf16.gmra.mrb[152].mxu1 %vm673_vm1, %v634_v24  ;;  %v1107_v24 = vpop.f32.mrb[12].mxu0 }
 0x148   : > { %6302 = vmatprep.mubr.msk.bf16.mxu1 %vm7475_vm0, %v10191_v1  ;;  %v5908_v27 = vpop.f32.mrb[13].mxu0  ;;  %v1108_v30 = vadd.f32 %v7795_v16, %v1107_v24  ;;  %v638_v24 = vpack.c.bf16 %v494_v12, %v493_v11 }
 0x149   : > { %v7985_v46 = vpack.c.bf16 %v2231_v41, %v2230_v40  ;;  %v1110_v31 = vpop.f32.mrb[14].mxu0  ;;  %6015 = vmatmul.mubr.msk.bf16.gmra.mrb[120].mxu0 %vm673_vm1, %v563_v37  ;;  %v348_v37 = vld [vmem:[%s7543_s9 + $0x208] sm:$0xff] }
 0x14a   : > { %v1683_v51 = vpop.f32.mrb[48].mxu1  ;;  %v5909_v36 = vpop.f32.mrb[15].mxu0  ;;  %v2088_v41 = vmax.f32 %v1108_v30, 0.0  ;;  %v1111_v42 = vadd.f32 %v7795_v16, %v1110_v31  ;;  %6018 = vmatprep.mubr.msk.bf16.mxu0 %vm7475_vm0, %v10191_v1 }
 0x14b   : > { %v1684_v52 = vadd.f32 %v7795_v16, %v1683_v51  ;;  %v6196_v53 = vpop.f32.mrb[49].mxu1  ;;  %v1115_v56 = vpop.f32.mrb[16].mxu0  ;;  %v347_v36 = vld [vmem:[%s7543_s9 + $0x200] sm:$0xff] }
 0x14c   : > { %v1686_v58 = vpop.f32.mrb[50].mxu1  ;;  %v2089_v47 = vmax.f32 %v1111_v42, 0.0  ;;  %v637_v53 = vpack.c.bf16 %v492_v44, %v491_v43  ;;  %v5912_v59 = vpop.f32.mrb[17].mxu0  ;;  %v1116_v62 = vadd.f32 %v7795_v16, %v1115_v56 }
 0x14d   : > { %v1687_v60 = vadd.f32 %v7795_v16, %v1686_v58  ;;  %v6197_v61 = vpop.f32.mrb[51].mxu1  ;;  %v2232_v7 = vmax.f32 %v1684_v52, 0.0  ;;  %v1118_v63 = vpop.f32.mrb[18].mxu0 }
 0x14e   : > { %v5913_v5 = vpop.f32.mrb[19].mxu0  ;;  %v2090_v9 = vmax.f32 %v1116_v62, 0.0  ;;  %v1119_v10 = vadd.f32 %v7795_v16, %v1118_v63 }
 0x14f   : > { %v2233_v8 = vmax.f32 %v1687_v60, 0.0  ;;  %6303 = vmatmul.mubr.msk.bf16.gmra.mrb[156].mxu1 %vm673_vm1, %v635_v54  ;;  %v8030_v54 = vpack.c.bf16 %v2089_v47, %v2088_v41  ;;  %v1123_v27 = vpop.f32.mrb[20].mxu0  ;;  %v495_v47 = vld [vmem:[%s7543_s9 + $0x6a0] sm:$0xff] }
 0x150   : > { %6306 = vmatprep.mubr.msk.bf16.mxu1 %vm7475_vm0, %v10191_v1  ;;  %v1124_v32 = vadd.f32 %v7795_v16, %v1123_v27 }
 0x151   : > { %v8006_v13 = vpack.c.bf16 %v2233_v8, %v2232_v7  ;;  %6019 = vmatmul.mubr.msk.bf16.gmra.mrb[124].mxu0 %vm673_vm1, %v564_v6 }
 0x152   : > { %v1691_v15 = vpop.f32.mrb[52].mxu1  ;;  %6022 = vmatprep.mubr.msk.bf16.mxu0 %vm7475_vm0, %v10191_v1  ;;  %v2092_v43 = vmax.f32 %v1124_v32, 0.0 }
 0x153   : > { %v1692_v19 = vadd.f32 %v7795_v16, %v1691_v15  ;;  %v6200_v21 = vpop.f32.mrb[53].mxu1  ;;  %v2091_v15 = vmax.f32 %v1119_v10, 0.0 }
 0x154   : > { %v1694_v26 = vpop.f32.mrb[54].mxu1 }
 0x155   : > { %v1695_v28 = vadd.f32 %v7795_v16, %v1694_v26  ;;  %v6201_v29 = vpop.f32.mrb[55].mxu1  ;;  %v2234_v39 = vmax.f32 %v1692_v19, 0.0  ;;  %v8048_v26 = vpack.c.bf16 %v2091_v15, %v2090_v9  ;;  %v350_v9 = vld [vmem:[%s7543_s9 + $0x218] sm:$0xff] }
 0x156   : > { %v5916_v29 = vpop.f32.mrb[21].mxu0 }
 0x157   : > { %v2235_v40 = vmax.f32 %v1695_v28, 0.0  ;;  %6307 = vmatmul.mubr.msk.bf16.gmra.mrb[160].mxu1 %vm673_vm1, %v636_v22  ;;  %v1126_v35 = vpop.f32.mrb[22].mxu0 }
 0x158   : > { %6310 = vmatprep.mubr.msk.bf16.mxu1 %vm7475_vm0, %v10191_v1  ;;  %v1127_v44 = vadd.f32 %v7795_v16, %v1126_v35 }
 0x159   : > { %v8024_v45 = vpack.c.bf16 %v2235_v40, %v2234_v39  ;;  %v5917_v39 = vpop.f32.mrb[23].mxu0  ;;  %v565_v40 = vpack.c.bf16 %v348_v37, %v347_v36 }
 0x15a   : > { %v1699_v48 = vpop.f32.mrb[56].mxu1  ;;  %v1131_v62 = vpop.f32.mrb[24].mxu0 }
 0x15b   : > { %v1700_v51 = vadd.f32 %v7795_v16, %v1699_v48  ;;  %v6204_v52 = vpop.f32.mrb[57].mxu1  ;;  %v496_v48 = vld [vmem:[%s7543_s9 + $0x6a8] sm:$0xff]  ;;  %6023 = vmatmul.mubr.msk.bf16.gmra.mrb[128].mxu0 %vm673_vm1, %v565_v40  ;;  %v5920_v2 = vpop.f32.mrb[25].mxu0  ;;  %v1132_v6 = vadd.f32 %v7795_v16, %v1131_v62 }
 0x15c   : > { %v1702_v58 = vpop.f32.mrb[58].mxu1  ;;  %v2093_v52 = vmax.f32 %v1127_v44, 0.0  ;;  %6026 = vmatprep.mubr.msk.bf16.mxu0 %vm7475_vm0, %v10191_v1  ;;  %v351_v44 = vld [vmem:[%s7543_s9 + $0x220] sm:$0xff]  ;;  %v500_v62 = vld [vmem:[%s7543_s9 + $0x6c8] sm:$0xff] }
 0x15d   : > { %v1703_v60 = vadd.f32 %v7795_v16, %v1702_v58  ;;  %v6205_v61 = vpop.f32.mrb[59].mxu1  ;;  %v2236_v7 = vmax.f32 %v1700_v51, 0.0 }
 0x15e   : > { %v8069_v61 = vpack.c.bf16 %v2093_v52, %v2092_v43 }
 0x15f   : > { %v2237_v8 = vmax.f32 %v1703_v60, 0.0  ;;  %6311 = vmatmul.mubr.msk.bf16.gmra.mrb[164].mxu1 %vm673_vm1, %v637_v53  ;;  %v7451_v53 = vld [vmem:[%s10188_s5 + $0x20] sm:$0xff]   ;;  %v639_v60 = vpack.c.bf16 %v496_v48, %v495_v47  ;;  %v352_v47 = vld [vmem:[%s7543_s9 + $0x228] sm:$0xff] }
 0x160   : > { %6314 = vmatprep.mubr.msk.bf16.mxu1 %vm7475_vm0, %v10191_v1  ;;  %6919 = vmatpush3.bf16.msra.mxu0 %v7451_v53  ;;  %v567_v52 = vpack.c.bf16 %v352_v47, %v351_v44 }
 0x161   : > { %v8042_v14 = vpack.c.bf16 %v2237_v8, %v2236_v7  ;;  %6920 = vmatprep.subr.bf16.mxu0 %v10191_v1  ;;  %v1134_v7 = vpop.f32.mrb[26].mxu0  ;;  %v349_v8 = vld [vmem:[%s7543_s9 + $0x210] sm:$0xff] }
 0x162   : > { %v1707_v19 = vpop.f32.mrb[60].mxu1  ;;  %v5921_v10 = vpop.f32.mrb[27].mxu0  ;;  %v566_v11 = vpack.c.bf16 %v350_v9, %v349_v8 }
 0x163   : > { %v1708_v21 = vadd.f32 %v7795_v16, %v1707_v19  ;;  %v6208_v22 = vpop.f32.mrb[61].mxu1  ;;  %v2094_v19 = vmax.f32 %v1132_v6, 0.0  ;;  %v1139_v36 = vpop.f32.mrb[28].mxu0 }
 0x164   : > { %v1710_v28 = vpop.f32.mrb[62].mxu1  ;;  %v497_v22 = vld [vmem:[%s7543_s9 + $0x6b0] sm:$0xff]  ;;  %6027 = vmatmul.mubr.msk.bf16.gmra.mrb[132].mxu0 %vm673_vm1, %v566_v11  ;;  %v5924_v39 = vpop.f32.mrb[29].mxu0 }
 0x165   : > { %v1711_v30 = vadd.f32 %v7795_v16, %v1710_v28  ;;  %v6209_v31 = vpop.f32.mrb[63].mxu1  ;;  %v2238_v41 = vmax.f32 %v1708_v21, 0.0  ;;  %v1135_v21 = vadd.f32 %v7795_v16, %v1134_v7  ;;  %6030 = vmatprep.mubr.msk.bf16.mxu0 %vm7475_vm0, %v10191_v1  ;;  %v1142_v43 = vpop.f32.mrb[30].mxu0  ;;  %v502_v39 = vld [vmem:[%s7543_s9 + $0x6d8] sm:$0xff] }
 0x166   : > { %v5925_v48 = vpop.f32.mrb[31].mxu0 }
 0x167   : > { %v2239_v42 = vmax.f32 %v1711_v30, 0.0  ;;  %6315 = vmatmul.mubr.msk.bf16.gmra.mrb[168].mxu1 %vm673_vm1, %v638_v24  ;;  %v498_v24 = vld [vmem:[%s7543_s9 + $0x6b8] sm:$0xff]  ;;  %v2095_v28 = vmax.f32 %v1135_v21, 0.0  ;;  %v1147_v9 = vpop.f32.mrb[32].mxu0 }
 0x168   : > { %6318 = vmatprep.mubr.msk.bf16.mxu1 %vm7475_vm0, %v10191_v1  ;;  %v640_v32 = vpack.c.bf16 %v498_v24, %v497_v22  ;;  %v5928_v11 = vpop.f32.mrb[33].mxu0  ;;  %v353_v22 = vld [vmem:[%s7543_s9 + $0x230] sm:$0xff]  ;;  %v354_v24 = vld [vmem:[%s7543_s9 + $0x238] sm:$0xff] }
 0x169   : > { %v8060_v51 = vpack.c.bf16 %v2239_v42, %v2238_v41  ;;  %v8088_v35 = vpack.c.bf16 %v2095_v28, %v2094_v19  ;;  %v1140_v42 = vadd.f32 %v7795_v16, %v1139_v36  ;;  %v1148_v19 = vadd.f32 %v7795_v16, %v1147_v9  ;;  %v1150_v21 = vpop.f32.mrb[34].mxu0 }
 0x16a   : > { %v1715_v56 = vpop.f32.mrb[64].mxu1  ;;  %v5929_v28 = vpop.f32.mrb[35].mxu0  ;;  %v1151_v36 = vadd.f32 %v7795_v16, %v1150_v21 }
 0x16b   : > { %v1716_v58 = vadd.f32 %v7795_v16, %v1715_v56  ;;  %v6212_v59 = vpop.f32.mrb[65].mxu1 }
 0x16c   : > { %v1718_v63 = vpop.f32.mrb[66].mxu1  ;;  %v1143_v59 = vadd.f32 %v7795_v16, %v1142_v43  ;;  %6031 = vmatmul.mubr.msk.bf16.gmra.mrb[136].mxu0 %vm673_vm1, %v567_v52  ;;  %v1155_v52 = vpop.f32.mrb[36].mxu0 }
 0x16d   : > { %v1719_v4 = vadd.f32 %v7795_v16, %v1718_v63  ;;  %v6213_v5 = vpop.f32.mrb[67].mxu1  ;;  %v2240_v12 = vmax.f32 %v1716_v58, 0.0  ;;  %v2096_v58 = vmax.f32 %v1140_v42, 0.0  ;;  %6034 = vmatprep.mubr.msk.bf16.mxu0 %vm7475_vm0, %v10191_v1 }
 0x16e   : > { %v2097_v2 = vmax.f32 %v1143_v59, 0.0 }
 0x16f   : > { %v2241_v15 = vmax.f32 %v1719_v4, 0.0  ;;  %6319 = vmatmul.mubr.msk.bf16.gmra.mrb[172].mxu1 %vm673_vm1, %v639_v60  ;;  %v499_v60 = vld [vmem:[%s7543_s9 + $0x6c0] sm:$0xff] }
 0x170   : > { %6322 = vmatprep.mubr.msk.bf16.mxu1 %vm7475_vm0, %v10191_v1  ;;  %v641_v7 = vpack.c.bf16 %v500_v62, %v499_v60  ;;  %v8106_v8 = vpack.c.bf16 %v2097_v2, %v2096_v58  ;;  %v1156_v60 = vadd.f32 %v7795_v16, %v1155_v52  ;;  %v355_v2 = vld [vmem:[%s7543_s9 + $0x240] sm:$0xff] }
 0x171   : > { %v8082_v27 = vpack.c.bf16 %v2241_v15, %v2240_v12 }
 0x172   : > { %v1723_v29 = vpop.f32.mrb[68].mxu1 }
 0x173   : > { %v1724_v30 = vadd.f32 %v7795_v16, %v1723_v29  ;;  %v6216_v31 = vpop.f32.mrb[69].mxu1  ;;  %v568_v29 = vpack.c.bf16 %v354_v24, %v353_v22 }
 0x174   : > { %v1726_v37 = vpop.f32.mrb[70].mxu1 }
 0x175   : > { %v1727_v40 = vadd.f32 %v7795_v16, %v1726_v37  ;;  %v6217_v41 = vpop.f32.mrb[71].mxu1  ;;  %v2242_v53 = vmax.f32 %v1724_v30, 0.0  ;;  %v501_v37 = vld [vmem:[%s7543_s9 + $0x6d0] sm:$0xff]  ;;  %6035 = vmatmul.mubr.msk.bf16.gmra.mrb[140].mxu0 %vm673_vm1, %v568_v29 }
 0x176   : > { %v2099_v41 = vmax.f32 %v1151_v36, 0.0  ;;  %6038 = vmatprep.mubr.msk.bf16.mxu0 %vm7475_vm0, %v10191_v1  ;;  %v642_v47 = vpack.c.bf16 %v502_v39, %v501_v37 }
 0x177   : > { %v2243_v56 = vmax.f32 %v1727_v40, 0.0  ;;  %6323 = vmatmul.mubr.msk.bf16.gmra.mrb[176].mxu1 %vm673_vm1, %v640_v32  ;;  %v2098_v32 = vmax.f32 %v1148_v19, 0.0 }
 0x178   : > { %6326 = vmatprep.mubr.msk.bf16.mxu1 %vm7475_vm0, %v10191_v1 }
 0x179   : > { %v8100_v63 = vpack.c.bf16 %v2243_v56, %v2242_v53  ;;  %v8124_v48 = vpack.c.bf16 %v2099_v41, %v2098_v32  ;;  %v5932_v56 = vpop.f32.mrb[37].mxu0 }
 0x17a   : > { %v1731_v4 = vpop.f32.mrb[72].mxu1  ;;  %v1158_v62 = vpop.f32.mrb[38].mxu0 }
 0x17b   : > { %v1732_v5 = vadd.f32 %v7795_v16, %v1731_v4  ;;  %v6220_v6 = vpop.f32.mrb[73].mxu1  ;;  %v356_v4 = vld [vmem:[%s7543_s9 + $0x248] sm:$0xff]  ;;  %v1159_v11 = vadd.f32 %v7795_v16, %v1158_v62  ;;  %v506_v62 = vld [vmem:[%s7543_s9 + $0x6f8] sm:$0xff] }
 0x17c   : > { %v1734_v10 = vpop.f32.mrb[74].mxu1  ;;  %v569_v6 = vpack.c.bf16 %v356_v4, %v355_v2 }
 0x17d   : > { %v1735_v12 = vadd.f32 %v7795_v16, %v1734_v10  ;;  %v6221_v15 = vpop.f32.mrb[75].mxu1  ;;  %v2244_v30 = vmax.f32 %v1732_v5, 0.0  ;;  %v5933_v5 = vpop.f32.mrb[39].mxu0  ;;  %v2100_v10 = vmax.f32 %v1156_v60, 0.0  ;;  %v2101_v21 = vmax.f32 %v1159_v11, 0.0  ;;  %v505_v60 = vld [vmem:[%s7543_s9 + $0x6f0] sm:$0xff] }
 0x17e   : > { %v504_v15 = vld [vmem:[%s7543_s9 + $0x6e8] sm:$0xff]  ;;  %6039 = vmatmul.mubr.msk.bf16.gmra.mrb[144].mxu0 %vm673_vm1, %v569_v6 }
 0x17f   : > { %v2245_v31 = vmax.f32 %v1735_v12, 0.0  ;;  %6327 = vmatmul.mubr.msk.bf16.gmra.mrb[180].mxu1 %vm673_vm1, %v641_v7  ;;  %v503_v12 = vld [vmem:[%s7543_s9 + $0x6e0] sm:$0xff]  ;;  %6042 = vmatprep.mubr.msk.bf16.mxu0 %vm7475_vm0, %v10191_v1 }
 0x180   : > { %6330 = vmatprep.mubr.msk.bf16.mxu1 %vm7475_vm0, %v10191_v1  ;;  %v643_v29 = vpack.c.bf16 %v504_v15, %v503_v12 }
 0x181   : > { %v8118_v40 = vpack.c.bf16 %v2245_v31, %v2244_v30  ;;  %v8142_v30 = vpack.c.bf16 %v2101_v21, %v2100_v10  ;;  %v1163_v31 = vpop.f32.mrb[40].mxu0 }
 0x182   : > { %v1739_v42 = vpop.f32.mrb[76].mxu1  ;;  %v5936_v36 = vpop.f32.mrb[41].mxu0  ;;  %v1164_v41 = vadd.f32 %v7795_v16, %v1163_v31  ;;  %v360_v31 = vld [vmem:[%s7543_s9 + $0x268] sm:$0xff] }
 0x183   : > { %10193 = vst [vmem:[#allocation2_spill] sm:$0xff] %v8118_v40  ;;  %v1740_v43 = vadd.f32 %v7795_v16, %v1739_v42  ;;  %v6224_v44 = vpop.f32.mrb[77].mxu1  ;;  %v1166_v42 = vpop.f32.mrb[42].mxu0 }
 0x184   : > { %v1742_v53 = vpop.f32.mrb[78].mxu1  ;;  %v358_v44 = vld [vmem:[%s7543_s9 + $0x258] sm:$0xff] }
 0x185   : > { %v1743_v58 = vadd.f32 %v7795_v16, %v1742_v53  ;;  %v6225_v59 = vpop.f32.mrb[79].mxu1  ;;  %v2246_v7 = vmax.f32 %v1740_v43, 0.0  ;;  %v357_v43 = vld [vmem:[%s7543_s9 + $0x250] sm:$0xff] }
 0x186   : > { %v570_v52 = vpack.c.bf16 %v358_v44, %v357_v43  ;;  %v1167_v59 = vadd.f32 %v7795_v16, %v1166_v42  ;;  %v507_v43 = vld [vmem:[%s7543_s9 + $0x700] sm:$0xff]  ;;  %v508_v44 = vld [vmem:[%s7543_s9 + $0x708] sm:$0xff] }
 0x187   : > { %v2247_v9 = vmax.f32 %v1743_v58, 0.0  ;;  %6331 = vmatmul.mubr.msk.bf16.gmra.mrb[184].mxu1 %vm673_vm1, %v642_v47  ;;  %v5937_v47 = vpop.f32.mrb[43].mxu0  ;;  %v2102_v58 = vmax.f32 %v1164_v41, 0.0 }
 0x188   : > { %6334 = vmatprep.mubr.msk.bf16.mxu1 %vm7475_vm0, %v10191_v1  ;;  %v2103_v4 = vmax.f32 %v1167_v59, 0.0  ;;  %6043 = vmatmul.mubr.msk.bf16.gmra.mrb[148].mxu0 %vm673_vm1, %v570_v52  ;;  %v1171_v11 = vpop.f32.mrb[44].mxu0  ;;  %v645_v59 = vpack.c.bf16 %v508_v44, %v507_v43 }
 0x189   : > { %v8136_v19 = vpack.c.bf16 %v2247_v9, %v2246_v7  ;;  %6046 = vmatprep.mubr.msk.bf16.mxu0 %vm7475_vm0, %v10191_v1  ;;  %v644_v9 = vpack.c.bf16 %v506_v62, %v505_v60  ;;  %v5940_v15 = vpop.f32.mrb[45].mxu0 }
 0x18a   : > { %v1747_v22 = vpop.f32.mrb[80].mxu1  ;;  %v8165_v10 = vpack.c.bf16 %v2103_v4, %v2102_v58  ;;  %v362_v15 = vld [vmem:[%s7543_s9 + $0x278] sm:$0xff] }
 0x18b   : > { %10194 = vst [vmem:[#allocation3_spill] sm:$0xff] %v8136_v19  ;;  %v1748_v24 = vadd.f32 %v7795_v16, %v1747_v22  ;;  %v6228_v28 = vpop.f32.mrb[81].mxu1 }
 0x18c   : > { %v1750_v32 = vpop.f32.mrb[82].mxu1  ;;  %v1174_v28 = vpop.f32.mrb[46].mxu0 }
 0x18d   : > { %v1751_v37 = vadd.f32 %v7795_v16, %v1750_v32  ;;  %v6229_v39 = vpop.f32.mrb[83].mxu1  ;;  %v2248_v53 = vmax.f32 %v1748_v24, 0.0  ;;  %v8162_v16 = vld [vmem:[%s10185_s2] ss:$0 sm:$0xff]  ;;  %v5941_v32 = vpop.f32.mrb[47].mxu0 }
 0x18e   : > { %v1172_v24 = vadd.f32 %v8162_v16, %v1171_v11  ;;  %v1175_v42 = vadd.f32 %v8162_v16, %v1174_v28  ;;  %v1179_v62 = vpop.f32.mrb[48].mxu0  ;;  %v509_v32 = vld [vmem:[%s7543_s9 + $0x710] sm:$0xff] }
 0x18f   : > { %v2249_v56 = vmax.f32 %v1751_v37, 0.0  ;;  %6335 = vmatmul.mubr.msk.bf16.gmra.mrb[188].mxu1 %vm673_vm1, %v643_v29  ;;  %v359_v29 = vld [vmem:[%s7543_s9 + $0x260] sm:$0xff] }
 0x190   : > { %6338 = vmatprep.mubr.msk.bf16.mxu1 %vm7475_vm0, %v10191_v1  ;;  %v571_v36 = vpack.c.bf16 %v360_v31, %v359_v29  ;;  %v2104_v41 = vmax.f32 %v1172_v24, 0.0  ;;  %v2105_v52 = vmax.f32 %v1175_v42, 0.0 }
 0x191   : > { %v8154_v2 = vpack.c.bf16 %v2249_v56, %v2248_v53 }
 0x192   : > { %v1755_v5 = vpop.f32.mrb[84].mxu1  ;;  %6047 = vmatmul.mubr.msk.bf16.gmra.mrb[152].mxu0 %vm673_vm1, %v571_v36  ;;  %v8183_v60 = vpack.c.bf16 %v2105_v52, %v2104_v41  ;;  %v510_v36 = vld [vmem:[%s7543_s9 + $0x718] sm:$0xff] }
 0x193   : > { %10195 = vst [vmem:[#allocation4_spill] sm:$0xff] %v8154_v2  ;;  %v1756_v6 = vadd.f32 %v8162_v16, %v1755_v5  ;;  %v6232_v7 = vpop.f32.mrb[85].mxu1  ;;  %6050 = vmatprep.mubr.msk.bf16.mxu0 %vm7475_vm0, %v10191_v1  ;;  %v5944_v5 = vpop.f32.mrb[49].mxu0  ;;  %v646_v44 = vpack.c.bf16 %v510_v36, %v509_v32  ;;  %v7452_v32 = vld [vmem:[%s10188_s5 + $0x28] sm:$0xff]  }
 0x194   : > { %v1758_v12 = vpop.f32.mrb[86].mxu1  ;;  %v1182_v11 = vpop.f32.mrb[50].mxu0  ;;  %6921 = vmatpush3.bf16.msra.mxu0 %v7452_v32 }
 0x195   : > { %v1759_v21 = vadd.f32 %v8162_v16, %v1758_v12  ;;  %v6233_v22 = vpop.f32.mrb[87].mxu1  ;;  %v2250_v37 = vmax.f32 %v1756_v6, 0.0  ;;  %v361_v12 = vld [vmem:[%s7543_s9 + $0x270] sm:$0xff]  ;;  %v1183_v31 = vadd.f32 %v8162_v16, %v1182_v11  ;;  %6922 = vmatprep.subr.bf16.mxu0 %v10191_v1 }
 0x196   : > { %v572_v22 = vpack.c.bf16 %v362_v15, %v361_v12 }
 0x197   : > { %v2251_v39 = vmax.f32 %v1759_v21, 0.0  ;;  %6339 = vmatmul.mubr.msk.bf16.gmra.mrb[192].mxu1 %vm673_vm1, %v644_v9  ;;  %v1180_v9 = vadd.f32 %v8162_v16, %v1179_v62  ;;  %v5945_v21 = vpop.f32.mrb[51].mxu0 }
 0x198   : > { %6342 = vmatprep.mubr.msk.bf16.mxu1 %vm7475_vm0, %v10191_v1 }
 0x199   : > { %v8177_v47 = vpack.c.bf16 %v2251_v39, %v2250_v37  ;;  %v2106_v29 = vmax.f32 %v1180_v9, 0.0  ;;  %v2107_v39 = vmax.f32 %v1183_v31, 0.0 }
 0x19a   : > { %v1763_v53 = vpop.f32.mrb[88].mxu1  ;;  %6051 = vmatmul.mubr.msk.bf16.gmra.mrb[156].mxu0 %vm673_vm1, %v572_v22 }
 0x19b   : > { %10196 = vst [vmem:[#allocation5_spill] sm:$0xff] %v8177_v47  ;;  %v1764_v56 = vadd.f32 %v8162_v16, %v1763_v53  ;;  %v6236_v58 = vpop.f32.mrb[89].mxu1  ;;  %6054 = vmatprep.mubr.msk.bf16.mxu0 %vm7475_vm0, %v10191_v1  ;;  %v8201_v52 = vpack.c.bf16 %v2107_v39, %v2106_v29  ;;  %v1187_v53 = vpop.f32.mrb[52].mxu0 }
 0x19c   : > { %v1766_v4 = vpop.f32.mrb[90].mxu1  ;;  %v5948_v58 = vpop.f32.mrb[53].mxu0 }
 0x19d   : > { %v1767_v6 = vadd.f32 %v8162_v16, %v1766_v4  ;;  %v6237_v7 = vpop.f32.mrb[91].mxu1  ;;  %v2252_v24 = vmax.f32 %v1764_v56, 0.0  ;;  %v1188_v4 = vadd.f32 %v8162_v16, %v1187_v53  ;;  %v1190_v5 = vpop.f32.mrb[54].mxu0 }
 0x19e   : > { %v364_v7 = vld [vmem:[%s7543_s9 + $0x288] sm:$0xff]  ;;  %v5949_v9 = vpop.f32.mrb[55].mxu0  ;;  %v1191_v22 = vadd.f32 %v8162_v16, %v1190_v5  ;;  %v365_v5 = vld [vmem:[%s7543_s9 + $0x290] sm:$0xff] }
 0x19f   : > { %v2253_v28 = vmax.f32 %v1767_v6, 0.0  ;;  %6343 = vmatmul.mubr.msk.bf16.gmra.mrb[196].mxu1 %vm673_vm1, %v645_v59  ;;  %v363_v6 = vld [vmem:[%s7543_s9 + $0x280] sm:$0xff]  ;;  %v2108_v21 = vmax.f32 %v1188_v4, 0.0 }
 0x1a0   : > { %6346 = vmatprep.mubr.msk.bf16.mxu1 %vm7475_vm0, %v10191_v1  ;;  %v573_v11 = vpack.c.bf16 %v364_v7, %v363_v6  ;;  %v2109_v31 = vmax.f32 %v1191_v22, 0.0  ;;  %v366_v6 = vld [vmem:[%s7543_s9 + $0x298] sm:$0xff]  ;;  %v513_v22 = vld [vmem:[%s7543_s9 + $0x730] sm:$0xff] }
 0x1a1   : > { %v8195_v37 = vpack.c.bf16 %v2253_v28, %v2252_v24  ;;  %v511_v24 = vld [vmem:[%s7543_s9 + $0x720] sm:$0xff]  ;;  %v512_v28 = vld [vmem:[%s7543_s9 + $0x728] sm:$0xff]  ;;  %v574_v9 = vpack.c.bf16 %v366_v6, %v365_v5 }
 0x1a2   : > { %v1771_v41 = vpop.f32.mrb[92].mxu1  ;;  %6055 = vmatmul.mubr.msk.bf16.gmra.mrb[160].mxu0 %vm673_vm1, %v573_v11  ;;  %v367_v5 = vld [vmem:[%s7543_s9 + $0x2a0] sm:$0xff]  ;;  %v368_v6 = vld [vmem:[%s7543_s9 + $0x2a8] sm:$0xff] }
 0x1a3   : > { %10197 = vst [vmem:[#allocation6_spill] sm:$0xff] %v8195_v37  ;;  %v1772_v42 = vadd.f32 %v8162_v16, %v1771_v41  ;;  %v6240_v43 = vpop.f32.mrb[93].mxu1  ;;  %6058 = vmatprep.mubr.msk.bf16.mxu0 %vm7475_vm0, %v10191_v1 }
 0x1a4   : > { %v1774_v56 = vpop.f32.mrb[94].mxu1  ;;  %v8222_v43 = vpack.c.bf16 %v2109_v31, %v2108_v21 }
 0x1a5   : > { %v1775_v59 = vadd.f32 %v8162_v16, %v1774_v56  ;;  %v6241_v62 = vpop.f32.mrb[95].mxu1  ;;  %v2254_v12 = vmax.f32 %v1772_v42, 0.0  ;;  %v647_v42 = vpack.c.bf16 %v512_v28, %v511_v24  ;;  %v514_v24 = vld [vmem:[%s7543_s9 + $0x738] sm:$0xff] }
 0x1a7   : > { %v2255_v15 = vmax.f32 %v1775_v59, 0.0  ;;  %6347 = vmatmul.mubr.msk.bf16.gmra.mrb[200].mxu1 %vm673_vm1, %v646_v44  ;;  %v1195_v44 = vpop.f32.mrb[56].mxu0 }
 0x1a8   : > { %6350 = vmatprep.mubr.msk.bf16.mxu1 %vm7475_vm0, %v10191_v1  ;;  %v5952_v56 = vpop.f32.mrb[57].mxu0  ;;  %v1196_v62 = vadd.f32 %v8162_v16, %v1195_v44 }
 0x1a9   : > { %v8213_v29 = vpack.c.bf16 %v2255_v15, %v2254_v12  ;;  %v1198_v4 = vpop.f32.mrb[58].mxu0 }
 0x1aa   : > { %v1779_v36 = vpop.f32.mrb[96].mxu1  ;;  %v5953_v7 = vpop.f32.mrb[59].mxu0  ;;  %v2110_v15 = vmax.f32 %v1196_v62, 0.0  ;;  %v1199_v21 = vadd.f32 %v8162_v16, %v1198_v4  ;;  %6059 = vmatmul.mubr.msk.bf16.gmra.mrb[164].mxu0 %vm673_vm1, %v574_v9  ;;  %v575_v9 = vpack.c.bf16 %v368_v6, %v367_v5 }
 0x1ab   : > { %10198 = vst [vmem:[#allocation7_spill] sm:$0xff] %v8213_v29  ;;  %v1780_v39 = vadd.f32 %v8162_v16, %v1779_v36  ;;  %v6244_v41 = vpop.f32.mrb[97].mxu1  ;;  %6062 = vmatprep.mubr.msk.bf16.mxu0 %vm7475_vm0, %v10191_v1  ;;  %v1203_v44 = vpop.f32.mrb[60].mxu0 }
 0x1ac   : > { %v1782_v53 = vpop.f32.mrb[98].mxu1  ;;  %v2111_v31 = vmax.f32 %v1199_v21, 0.0  ;;  %v648_v41 = vpack.c.bf16 %v514_v24, %v513_v22  ;;  %v5956_v56 = vpop.f32.mrb[61].mxu0  ;;  %v1204_v62 = vadd.f32 %v8162_v16, %v1203_v44  ;;  %v515_v22 = vld [vmem:[%s7543_s9 + $0x740] sm:$0xff]  ;;  %v516_v24 = vld [vmem:[%s7543_s9 + $0x748] sm:$0xff] }
 0x1ad   : > { %v1783_v58 = vadd.f32 %v8162_v16, %v1782_v53  ;;  %v6245_v59 = vpop.f32.mrb[99].mxu1  ;;  %v2256_v11 = vmax.f32 %v1780_v39, 0.0  ;;  %v1206_v4 = vpop.f32.mrb[62].mxu0  ;;  %v649_v44 = vpack.c.bf16 %v516_v24, %v515_v22  ;;  %v517_v24 = vld [vmem:[%s7543_s9 + $0x750] sm:$0xff] }
 0x1ae   : > { %v5957_v7 = vpop.f32.mrb[63].mxu0  ;;  %v1207_v21 = vadd.f32 %v8162_v16, %v1206_v4 }
 0x1af   : > { %v2257_v12 = vmax.f32 %v1783_v58, 0.0  ;;  %6351 = vmatmul.mubr.msk.bf16.gmra.mrb[204].mxu1 %vm673_vm1, %v647_v42  ;;  %v8241_v42 = vpack.c.bf16 %v2111_v31, %v2110_v15  ;;  %v2112_v15 = vmax.f32 %v1204_v62, 0.0  ;;  %v1211_v56 = vpop.f32.mrb[64].mxu0  ;;  %v369_v7 = vld [vmem:[%s7543_s9 + $0x2b0] sm:$0xff] }
 0x1b0   : > { %6354 = vmatprep.mubr.msk.bf16.mxu1 %vm7475_vm0, %v10191_v1  ;;  %v1212_v5 = vadd.f32 %v8162_v16, %v1211_v56 }
 0x1b1   : > { %v8235_v28 = vpack.c.bf16 %v2257_v12, %v2256_v11 }
 0x1b2   : > { %v1787_v32 = vpop.f32.mrb[100].mxu1  ;;  %6063 = vmatmul.mubr.msk.bf16.gmra.mrb[168].mxu0 %vm673_vm1, %v575_v9  ;;  %v370_v9 = vld [vmem:[%s7543_s9 + $0x2b8] sm:$0xff] }
 0x1b3   : > { %10199 = vst [vmem:[#allocation8_spill] sm:$0xff] %v8235_v28  ;;  %v1788_v36 = vadd.f32 %v8162_v16, %v1787_v32  ;;  %v6248_v39 = vpop.f32.mrb[101].mxu1  ;;  %v2113_v32 = vmax.f32 %v1207_v21, 0.0  ;;  %6066 = vmatprep.mubr.msk.bf16.mxu0 %vm7475_vm0, %v10191_v1 }
 0x1b4   : > { %v1790_v53 = vpop.f32.mrb[102].mxu1 }
 0x1b5   : > { %v1791_v58 = vadd.f32 %v8162_v16, %v1790_v53  ;;  %v6249_v59 = vpop.f32.mrb[103].mxu1  ;;  %v2258_v11 = vmax.f32 %v1788_v36, 0.0  ;;  %v8259_v53 = vpack.c.bf16 %v2113_v32, %v2112_v15  ;;  %v2114_v15 = vmax.f32 %v1212_v5, 0.0  ;;  %v518_v32 = vld [vmem:[%s7543_s9 + $0x758] sm:$0xff] }
 0x1b6   : > { %v5960_v59 = vpop.f32.mrb[65].mxu0 }
 0x1b7   : > { %v2259_v12 = vmax.f32 %v1791_v58, 0.0  ;;  %6355 = vmatmul.mubr.msk.bf16.gmra.mrb[208].mxu1 %vm673_vm1, %v648_v41  ;;  %v1214_v6 = vpop.f32.mrb[66].mxu0  ;;  %v650_v59 = vpack.c.bf16 %v518_v32, %v517_v24  ;;  %v10202_v32 = vmov 0.0  }
 0x1b8   : > { %6358 = vmatprep.mubr.msk.bf16.mxu1 %vm7475_vm0, %v10191_v1  ;;  %v1215_v22 = vadd.f32 %v8162_v16, %v1214_v6 }
 0x1b9   : > { %v8253_v31 = vpack.c.bf16 %v2259_v12, %v2258_v11  ;;  %v5961_v11 = vpop.f32.mrb[67].mxu0  ;;  %v576_v12 = vpack.c.bf16 %v370_v9, %v369_v7 }
 0x1ba   : > { %v1795_v39 = vpop.f32.mrb[104].mxu1  ;;  %v2115_v56 = vmax.f32 %v1215_v22, 0.0 }
 0x1bb   : > { %10200 = vst [vmem:[#allocation9_spill] sm:$0xff] %v8253_v31  ;;  %v1796_v36 = vadd.f32 %v8162_v16, %v1795_v39  ;;  %v6252_v41 = vpop.f32.mrb[105].mxu1  ;;  %6067 = vmatmul.mubr.msk.bf16.gmra.mrb[172].mxu0 %vm673_vm1, %v576_v12 }
 0x1bc   : > { %v1798_v58 = vpop.f32.mrb[106].mxu1  ;;  %6070 = vmatprep.mubr.msk.bf16.mxu0 %vm7475_vm0, %v10191_v1 }
 0x1bd   : > { %v1799_v62 = vadd.f32 %v8162_v16, %v1798_v58  ;;  %v6253_v4 = vpop.f32.mrb[107].mxu1  ;;  %v2260_v21 = vmax.f32 %v1796_v36, 0.0 }
 0x1be   : > { %v1219_v4 = vpop.f32.mrb[68].mxu0 }
 0x1bf   : > { %v2261_v39 = vmax.f32 %v1799_v62, 0.0  ;;  %6359 = vmatmul.mubr.msk.bf16.gmra.mrb[212].mxu1 %vm673_vm1, %v649_v44  ;;  %v8277_v62 = vpack.c.bf16 %v2115_v56, %v2114_v15  ;;  %v5964_v6 = vpop.f32.mrb[69].mxu0  ;;  %v1220_v11 = vadd.f32 %v8162_v16, %v1219_v4  ;;  %v519_v56 = vld [vmem:[%s7543_s9 + $0x760] sm:$0xff] }
 0x1c0   : > { %6362 = vmatprep.mubr.msk.bf16.mxu1 %vm7475_vm0, %v10191_v1  ;;  %v1222_v12 = vpop.f32.mrb[70].mxu0 }
 0x1c1   : > { %v8271_v41 = vpack.c.bf16 %v2261_v39, %v2260_v21  ;;  %v371_v21 = vld [vmem:[%s7543_s9 + $0x2c0] sm:$0xff]  ;;  %v372_v39 = vld [vmem:[%s7543_s9 + $0x2c8] sm:$0xff]  ;;  %v5965_v22 = vpop.f32.mrb[71].mxu0  ;;  %v2116_v15 = vmax.f32 %v1220_v11, 0.0  ;;  %v1223_v24 = vadd.f32 %v8162_v16, %v1222_v12 }
 0x1c2   : > { %v1803_v58 = vpop.f32.mrb[108].mxu1  ;;  %v577_v1 = vpack.c.bf16 %v372_v39, %v371_v21  ;;  %v1227_v12 = vpop.f32.mrb[72].mxu0 }
 0x1c3   : > { %10201 = vst [vmem:[#allocation10_spill] sm:$0xff] %v8271_v41  ;;  %v1804_v36 = vadd.f32 %v8162_v16, %v1803_v58  ;;  %v6256_v44 = vpop.f32.mrb[109].mxu1  ;;  %v2117_v4 = vmax.f32 %v1223_v24, 0.0  ;;  %v5968_v39 = vpop.f32.mrb[73].mxu0  ;;  %v373_v24 = vld [vmem:[%s7543_s9 + $0x2d0] sm:$0xff] }
 0x1c4   : > { %v1806_v5 = vpop.f32.mrb[110].mxu1  ;;  %6071 = vmatmul.mubr.msk.bf16.gmra.mrb[176].mxu0 %vm673_vm1, %v577_v1  ;;  %v1228_v1 = vadd.f32 %v8162_v16, %v1227_v12 }
 0x1c5   : > { %v1807_v7 = vadd.f32 %v8162_v16, %v1806_v5  ;;  %v6257_v9 = vpop.f32.mrb[111].mxu1  ;;  %v2262_v58 = vmax.f32 %v1804_v36, 0.0  ;;  %v520_v5 = vld [vmem:[%s7543_s9 + $0x768] sm:$0xff]  ;;  %6074 = vmatprep.mubr.msk.bf16.mxu0 %vm7475_vm0, %v10202_v32  ;;  %v8295_v11 = vpack.c.bf16 %v2117_v4, %v2116_v15  ;;  %v522_v4 = vld [vmem:[%s7543_s9 + $0x778] sm:$0xff] }
 0x1c6   : > { %v2118_v15 = vmax.f32 %v1228_v1, 0.0 }
 0x1c7   : > { %v2263_v44 = vmax.f32 %v1807_v7, 0.0  ;;  %6363 = vmatmul.mubr.msk.bf16.gmra.mrb[216].mxu1 %vm673_vm1, %v650_v59  ;;  %v651_v7 = vpack.c.bf16 %v520_v5, %v519_v56  ;;  %v521_v5 = vld [vmem:[%s7543_s9 + $0x770] sm:$0xff] }
 0x1c8   : > { %6366 = vmatprep.mubr.msk.bf16.mxu1 %vm7475_vm0, %v10202_v32 }
 0x1c9   : > { %v8289_v6 = vpack.c.bf16 %v2263_v44, %v2262_v58  ;;  %v1230_v44 = vpop.f32.mrb[74].mxu0 }
 0x1ca   : > { %v1811_v9 = vpop.f32.mrb[112].mxu1  ;;  %v5969_v41 = vpop.f32.mrb[75].mxu0  ;;  %v1231_v56 = vadd.f32 %v8162_v16, %v1230_v44 }
 0x1cb   : > { %10203 = vst [vmem:[#allocation11_spill] sm:$0xff] %v8289_v6  ;;  %v1812_v36 = vadd.f32 %v8162_v16, %v1811_v9  ;;  %v6260_v59 = vpop.f32.mrb[113].mxu1  ;;  %v374_v6 = vld [vmem:[%s7543_s9 + $0x2d8] sm:$0xff] }
 0x1cc   : > { %v1814_v21 = vpop.f32.mrb[114].mxu1  ;;  %v578_v31 = vpack.c.bf16 %v374_v6, %v373_v24  ;;  %v2119_v12 = vmax.f32 %v1231_v56, 0.0  ;;  %v376_v56 = vld [vmem:[%s7543_s9 + $0x2e8] sm:$0xff] }
 0x1cd   : > { %v1815_v22 = vadd.f32 %v8162_v16, %v1814_v21  ;;  %v6261_v58 = vpop.f32.mrb[115].mxu1  ;;  %v2264_v9 = vmax.f32 %v1812_v36, 0.0 }
 0x1ce   : > { %6075 = vmatmul.mubr.msk.bf16.gmra.mrb[180].mxu0 %vm673_vm1, %v578_v31  ;;  %v8313_v39 = vpack.c.bf16 %v2119_v12, %v2118_v15  ;;  %v524_v12 = vld [vmem:[%s7543_s9 + $0x788] sm:$0xff] }
 0x1cf   : > { %v2265_v59 = vmax.f32 %v1815_v22, 0.0  ;;  %6367 = vmatmul.mubr.msk.bf16.gmra.mrb[220].mxu1 %vm673_vm1, %v651_v7  ;;  %6078 = vmatprep.mubr.msk.bf16.mxu0 %vm7475_vm0, %v10202_v32  ;;  %v652_v7 = vpack.c.bf16 %v522_v4, %v521_v5  ;;  %v1235_v22 = vpop.f32.mrb[76].mxu0  ;;  %v523_v4 = vld [vmem:[%s7543_s9 + $0x780] sm:$0xff] }
 0x1d0   : > { %6370 = vmatprep.mubr.msk.bf16.mxu1 %vm7475_vm0, %v10202_v32  ;;  %v5972_v1 = vpop.f32.mrb[77].mxu0  ;;  %v1236_v31 = vadd.f32 %v8162_v16, %v1235_v22 }
 0x1d1   : > { %v8307_v21 = vpack.c.bf16 %v2265_v59, %v2264_v9  ;;  %v1238_v9 = vpop.f32.mrb[78].mxu0  ;;  %v375_v59 = vld [vmem:[%s7543_s9 + $0x2e0] sm:$0xff]  ;;  %v653_v1 = vpack.c.bf16 %v524_v12, %v523_v4  ;;  %v525_v12 = vld [vmem:[%s7543_s9 + $0x790] sm:$0xff] }
 0x1d2   : > { %v1819_v41 = vpop.f32.mrb[116].mxu1  ;;  %v579_v28 = vpack.c.bf16 %v376_v56, %v375_v59  ;;  %v2120_v15 = vmax.f32 %v1236_v31, 0.0  ;;  %v1239_v5 = vadd.f32 %v8162_v16, %v1238_v9 }
 0x1d3   : > { %10204 = vst [vmem:[#allocation12_spill] sm:$0xff] %v8307_v21  ;;  %v1820_v6 = vadd.f32 %v8162_v16, %v1819_v41  ;;  %v6264_v36 = vpop.f32.mrb[117].mxu1  ;;  %v5973_v21 = vpop.f32.mrb[79].mxu0 }
 0x1d4   : > { %v1822_v58 = vpop.f32.mrb[118].mxu1  ;;  %v2121_v22 = vmax.f32 %v1239_v5, 0.0  ;;  %v378_v5 = vld [vmem:[%s7543_s9 + $0x2f8] sm:$0xff] }
 0x1d5   : > { %v1823_v44 = vadd.f32 %v8162_v16, %v1822_v58  ;;  %v6265_v24 = vpop.f32.mrb[119].mxu1  ;;  %v2266_v41 = vmax.f32 %v1820_v6, 0.0 }
 0x1d6   : > { %6079 = vmatmul.mubr.msk.bf16.gmra.mrb[184].mxu0 %vm673_vm1, %v579_v28  ;;  %v1243_v24 = vpop.f32.mrb[80].mxu0 }
 0x1d7   : > { %v2267_v36 = vmax.f32 %v1823_v44, 0.0  ;;  %6371 = vmatmul.mubr.msk.bf16.gmra.mrb[224].mxu1 %vm673_vm1, %v652_v7  ;;  %6082 = vmatprep.mubr.msk.bf16.mxu0 %vm7475_vm0, %v10202_v32  ;;  %v8331_v44 = vpack.c.bf16 %v2121_v22, %v2120_v15  ;;  %v5976_v9 = vpop.f32.mrb[81].mxu0  ;;  %v1244_v28 = vadd.f32 %v8162_v16, %v1243_v24  ;;  %v526_v22 = vld [vmem:[%s7543_s9 + $0x798] sm:$0xff] }
 0x1d8   : > { %6374 = vmatprep.mubr.msk.bf16.mxu1 %vm7475_vm0, %v10202_v32  ;;  %v654_v9 = vpack.c.bf16 %v526_v22, %v525_v12 }
 0x1d9   : > { %v8325_v58 = vpack.c.bf16 %v2267_v36, %v2266_v41  ;;  %v1246_v41 = vpop.f32.mrb[82].mxu0  ;;  %v377_v36 = vld [vmem:[%s7543_s9 + $0x2f0] sm:$0xff]  ;;  %v2122_v15 = vmax.f32 %v1244_v28, 0.0 }
 0x1da   : > { %v1827_v21 = vpop.f32.mrb[120].mxu1  ;;  %v580_v29 = vpack.c.bf16 %v378_v5, %v377_v36  ;;  %v1247_v4 = vadd.f32 %v8162_v16, %v1246_v41 }
 0x1db   : > { %10205 = vst [vmem:[#allocation13_spill] sm:$0xff] %v8325_v58  ;;  %v1828_v6 = vadd.f32 %v8162_v16, %v1827_v21  ;;  %v6268_v7 = vpop.f32.mrb[121].mxu1  ;;  %v5977_v58 = vpop.f32.mrb[83].mxu0 }
 0x1dc   : > { %v1830_v31 = vpop.f32.mrb[122].mxu1  ;;  %v2123_v24 = vmax.f32 %v1247_v4, 0.0  ;;  %v1251_v28 = vpop.f32.mrb[84].mxu0 }
 0x1dd   : > { %v1831_v59 = vadd.f32 %v8162_v16, %v1830_v31  ;;  %v6269_v56 = vpop.f32.mrb[123].mxu1  ;;  %v2268_v21 = vmax.f32 %v1828_v6, 0.0  ;;  %v1252_v5 = vadd.f32 %v8162_v16, %v1251_v28 }
 0x1de   : > { %6083 = vmatmul.mubr.msk.bf16.gmra.mrb[188].mxu0 %vm673_vm1, %v580_v29  ;;  %v5980_v29 = vpop.f32.mrb[85].mxu0 }
 0x1df   : > { %v2269_v7 = vmax.f32 %v1831_v59, 0.0  ;;  %6375 = vmatmul.mubr.msk.bf16.gmra.mrb[228].mxu1 %vm673_vm1, %v653_v1  ;;  %6086 = vmatprep.mubr.msk.bf16.mxu0 %vm7475_vm0, %v10202_v32  ;;  %v8349_v59 = vpack.c.bf16 %v2123_v24, %v2122_v15  ;;  %v1254_v4 = vpop.f32.mrb[86].mxu0  ;;  %v2124_v15 = vmax.f32 %v1252_v5, 0.0  ;;  %v527_v24 = vld [vmem:[%s7543_s9 + $0x7a0] sm:$0xff] }
 0x1e0   : > { %6378 = vmatprep.mubr.msk.bf16.mxu1 %vm7475_vm0, %v10202_v32  ;;  %v1255_v12 = vadd.f32 %v8162_v16, %v1254_v4  ;;  %v5981_v22 = vpop.f32.mrb[87].mxu0 }
 0x1e1   : > { %v8343_v31 = vpack.c.bf16 %v2269_v7, %v2268_v21  ;;  %v379_v21 = vld [vmem:[%s7543_s9 + $0x300] sm:$0xff]  ;;  %v380_v7 = vld [vmem:[%s7543_s9 + $0x308] sm:$0xff]  ;;  %v382_v22 = vld [vmem:[%s7543_s9 + $0x318] sm:$0xff] }
 0x1e2   : > { %v1835_v58 = vpop.f32.mrb[124].mxu1  ;;  %v2125_v28 = vmax.f32 %v1255_v12, 0.0  ;;  %v381_v12 = vld [vmem:[%s7543_s9 + $0x310] sm:$0xff] }
 0x1e3   : > { %10206 = vst [vmem:[#allocation14_spill] sm:$0xff] %v8343_v31  ;;  %v1836_v6 = vadd.f32 %v8162_v16, %v1835_v58  ;;  %v6272_v1 = vpop.f32.mrb[125].mxu1  ;;  %v581_v31 = vpack.c.bf16 %v380_v7, %v379_v21  ;;  %v1259_v21 = vpop.f32.mrb[88].mxu0 }
 0x1e4   : > { %v1838_v56 = vpop.f32.mrb[126].mxu1  ;;  %v528_v1 = vld [vmem:[%s7543_s9 + $0x7a8] sm:$0xff]  ;;  %v8370_v29 = vpack.c.bf16 %v2125_v28, %v2124_v15  ;;  %v1260_v4 = vadd.f32 %v8162_v16, %v1259_v21 }
 0x1e5   : > { %v1839_v41 = vadd.f32 %v8162_v16, %v1838_v56  ;;  %v6273_v36 = vpop.f32.mrb[127].mxu1  ;;  %v2270_v37 = vmax.f32 %v1836_v6, 0.0  ;;  %v655_v5 = vpack.c.bf16 %v528_v1, %v527_v24 }
 0x1e6   : > { %v7453_v36 = vld [vmem:[%s10188_s5 + $0x30] sm:$0xff]   ;;  %6087 = vmatmul.mubr.msk.bf16.gmra.mrb[192].mxu0 %vm673_vm1, %v581_v31  ;;  %v2126_v1 = vmax.f32 %v1260_v4, 0.0 }
 0x1e7   : > { %v2271_v58 = vmax.f32 %v1839_v41, 0.0  ;;  %6379 = vmatmul.mubr.msk.bf16.gmra.mrb[232].mxu1 %vm673_vm1, %v654_v9  ;;  %6090 = vmatprep.mubr.msk.bf16.mxu0 %vm7475_vm0, %v10202_v32 }
 0x1e8   : > { %6382 = vmatprep.mubr.msk.bf16.mxu1 %vm7475_vm0, %v10202_v32  ;;  %6923 = vmatpush3.bf16.msra.mxu0 %v7453_v36 }
 0x1e9   : > { %v8361_v56 = vpack.c.bf16 %v2271_v58, %v2270_v37  ;;  %6924 = vmatprep.subr.bf16.mxu0 %v10202_v32  ;;  %v5984_v58 = vpop.f32.mrb[89].mxu0 }
 0x1ea   : > { %v1843_v6 = vpop.f32.mrb[128].mxu1 }
 0x1eb   : > { %10207 = vst [vmem:[#allocation15_spill] sm:$0xff] %v8361_v56  ;;  %v1844_v9 = vadd.f32 %v8162_v16, %v1843_v6  ;;  %v6276_v41 = vpop.f32.mrb[129].mxu1  ;;  %v1262_v6 = vpop.f32.mrb[90].mxu0 }
 0x1ec   : > { %v1846_v37 = vpop.f32.mrb[130].mxu1  ;;  %v582_v41 = vpack.c.bf16 %v382_v22, %v381_v12  ;;  %v1263_v28 = vadd.f32 %v8162_v16, %v1262_v6  ;;  %v5985_v36 = vpop.f32.mrb[91].mxu0 }
 0x1ed   : > { %v1847_v7 = vadd.f32 %v8162_v16, %v1846_v37  ;;  %v6277_v31 = vpop.f32.mrb[131].mxu1  ;;  %v2272_v24 = vmax.f32 %v1844_v9, 0.0  ;;  %v529_v37 = vld [vmem:[%s7543_s9 + $0x7b0] sm:$0xff]  ;;  %v1267_v6 = vpop.f32.mrb[92].mxu0  ;;  %v383_v36 = vld [vmem:[%s7543_s9 + $0x320] sm:$0xff] }
 0x1ee   : > { %v530_v31 = vld [vmem:[%s7543_s9 + $0x7b8] sm:$0xff]  ;;  %v2127_v58 = vmax.f32 %v1263_v28, 0.0  ;;  %6091 = vmatmul.mubr.msk.bf16.gmra.mrb[196].mxu0 %vm673_vm1, %v582_v41  ;;  %v1268_v28 = vadd.f32 %v8162_v16, %v1267_v6  ;;  %v5988_v41 = vpop.f32.mrb[93].mxu0 }
 0x1ef   : > { %v2273_v15 = vmax.f32 %v1847_v7, 0.0  ;;  %6383 = vmatmul.mubr.msk.bf16.gmra.mrb[236].mxu1 %vm673_vm1, %v655_v5  ;;  %6094 = vmatprep.mubr.msk.bf16.mxu0 %vm7475_vm0, %v10202_v32  ;;  %v656_v4 = vpack.c.bf16 %v530_v31, %v529_v37  ;;  %v1270_v56 = vpop.f32.mrb[94].mxu0 }
 0x1f0   : > { %6386 = vmatprep.mubr.msk.bf16.mxu1 %vm7475_vm0, %v10202_v32  ;;  %v8389_v12 = vpack.c.bf16 %v2127_v58, %v2126_v1  ;;  %v2128_v1 = vmax.f32 %v1268_v28, 0.0  ;;  %v1271_v37 = vadd.f32 %v8162_v16, %v1270_v56  ;;  %v5989_v31 = vpop.f32.mrb[95].mxu0  ;;  %v531_v58 = vld [vmem:[%s7543_s9 + $0x7c0] sm:$0xff] }
 0x1f1   : > { %v8383_v21 = vpack.c.bf16 %v2273_v15, %v2272_v24  ;;  %v1275_v28 = vpop.f32.mrb[96].mxu0 }
 0x1f2   : > { %v1851_v9 = vpop.f32.mrb[132].mxu1  ;;  %v2129_v6 = vmax.f32 %v1271_v37, 0.0  ;;  %v385_v37 = vld [vmem:[%s7543_s9 + $0x330] sm:$0xff] }
 0x1f3   : > { %10208 = vst [vmem:[#allocation16_spill] sm:$0xff] %v8383_v21  ;;  %v1852_v5 = vadd.f32 %v8162_v16, %v1851_v9  ;;  %v6280_v7 = vpop.f32.mrb[133].mxu1  ;;  %v384_v21 = vld [vmem:[%s7543_s9 + $0x328] sm:$0xff] }
 0x1f4   : > { %v1854_v22 = vpop.f32.mrb[134].mxu1  ;;  %v583_v47 = vpack.c.bf16 %v384_v21, %v383_v36  ;;  %v532_v7 = vld [vmem:[%s7543_s9 + $0x7c8] sm:$0xff]  ;;  %v1276_v36 = vadd.f32 %v8162_v16, %v1275_v28 }
 0x1f5   : > { %v1855_v24 = vadd.f32 %v8162_v16, %v1854_v22  ;;  %v6281_v15 = vpop.f32.mrb[135].mxu1  ;;  %v2274_v2 = vmax.f32 %v1852_v5, 0.0 }
 0x1f6   : > { %6095 = vmatmul.mubr.msk.bf16.gmra.mrb[200].mxu0 %vm673_vm1, %v583_v47  ;;  %v386_v47 = vld [vmem:[%s7543_s9 + $0x338] sm:$0xff] }
 0x1f7   : > { %v2275_v9 = vmax.f32 %v1855_v24, 0.0  ;;  %6387 = vmatmul.mubr.msk.bf16.gmra.mrb[240].mxu1 %vm673_vm1, %v656_v4  ;;  %6098 = vmatprep.mubr.msk.bf16.mxu0 %vm7475_vm0, %v10202_v32  ;;  %v657_v4 = vpack.c.bf16 %v532_v7, %v531_v58  ;;  %v8407_v24 = vpack.c.bf16 %v2129_v6, %v2128_v1 }
 0x1f8   : > { %6390 = vmatprep.mubr.msk.bf16.mxu1 %vm7475_vm0, %v10202_v32 }
 0x1f9   : > { %v8401_v22 = vpack.c.bf16 %v2275_v9, %v2274_v2  ;;  %v5992_v9 = vpop.f32.mrb[97].mxu0 }
 0x1fa   : > { %v1859_v21 = vpop.f32.mrb[136].mxu1  ;;  %v1278_v31 = vpop.f32.mrb[98].mxu0  ;;  %v387_v9 = vld [vmem:[%s7543_s9 + $0x340] sm:$0xff] }
 0x1fb   : > { %10209 = vst [vmem:[#allocation17_spill] sm:$0xff] %v8401_v22  ;;  %v1860_v5 = vadd.f32 %v8162_v16, %v1859_v21  ;;  %v6284_v56 = vpop.f32.mrb[137].mxu1  ;;  %v584_v22 = vpack.c.bf16 %v386_v47, %v385_v37  ;;  %v2130_v21 = vmax.f32 %v1276_v36, 0.0  ;;  %v1279_v1 = vadd.f32 %v8162_v16, %v1278_v31  ;;  %v5993_v58 = vpop.f32.mrb[99].mxu0  ;;  %v388_v37 = vld [vmem:[%s7543_s9 + $0x348] sm:$0xff] }
 0x1fc   : > { %v1862_v15 = vpop.f32.mrb[138].mxu1  ;;  %v585_v47 = vpack.c.bf16 %v388_v37, %v387_v9 }
 0x1fd   : > { %v1863_v41 = vadd.f32 %v8162_v16, %v1862_v15  ;;  %v6285_v2 = vpop.f32.mrb[139].mxu1  ;;  %v2276_v19 = vmax.f32 %v1860_v5, 0.0  ;;  %v2131_v6 = vmax.f32 %v1279_v1, 0.0 }
 0x1fe   : > { %6099 = vmatmul.mubr.msk.bf16.gmra.mrb[204].mxu0 %vm673_vm1, %v584_v22 }
 0x1ff   : > { %v2277_v40 = vmax.f32 %v1863_v41, 0.0  ;;  %6391 = vmatmul.mubr.msk.bf16.gmra.mrb[244].mxu1 %vm673_vm1, %v657_v4  ;;  %6102 = vmatprep.mubr.msk.bf16.mxu0 %vm7475_vm0, %v10202_v32  ;;  %v8423_v15 = vpack.c.bf16 %v2131_v6, %v2130_v21  ;;  %v1283_v41 = vpop.f32.mrb[100].mxu0 }
 0x200   : > { %6410 = vmatprep.mubr.msk.bf16.mxu1 %vm7475_vm0, %v10202_v32 }
 0x201   : > { %v8417_v7 = vpack.c.bf16 %v2277_v40, %v2276_v19  ;;  %v1284_v40 = vadd.f32 %v8162_v16, %v1283_v41  ;;  %v5996_v19 = vpop.f32.mrb[101].mxu0 }
 0x202   : > { %v1867_v56 = vpop.f32.mrb[140].mxu1  ;;  %v1286_v22 = vpop.f32.mrb[102].mxu0 }
 0x203   : > { %10210 = vst [vmem:[#allocation18_spill] sm:$0xff] %v8417_v7  ;;  %v1868_v5 = vadd.f32 %v8162_v16, %v1867_v56  ;;  %v6288_v4 = vpop.f32.mrb[141].mxu1  ;;  %v2132_v58 = vmax.f32 %v1284_v40, 0.0  ;;  %v1287_v21 = vadd.f32 %v8162_v16, %v1286_v22  ;;  %v5997_v6 = vpop.f32.mrb[103].mxu0  ;;  %v389_v22 = vld [vmem:[%s7543_s9 + $0x350] sm:$0xff] }
 0x204   : > { %v1870_v28 = vpop.f32.mrb[142].mxu1 }
 0x205   : > { %v1871_v2 = vadd.f32 %v8162_v16, %v1870_v28  ;;  %v6289_v36 = vpop.f32.mrb[143].mxu1  ;;  %v2278_v31 = vmax.f32 %v1868_v5, 0.0  ;;  %v2133_v4 = vmax.f32 %v1287_v21, 0.0 }
 0x206   : > { %6103 = vmatmul.mubr.msk.bf16.gmra.mrb[208].mxu0 %vm673_vm1, %v585_v47  ;;  %v1291_v36 = vpop.f32.mrb[104].mxu0 }
 0x207   : > { %v2279_v1 = vmax.f32 %v1871_v2, 0.0  ;;  %6411 = vmatmul.mubr.bf16.vlgmr.msra.gmra.mrb[248].mxu1 %v7973_v25  ;;  %6106 = vmatprep.mubr.msk.bf16.mxu0 %vm7475_vm0, %v10202_v32  ;;  %v8439_v41 = vpack.c.bf16 %v2133_v4, %v2132_v58  ;;  %v1292_v9 = vadd.f32 %v8162_v16, %v1291_v36  ;;  %v6000_v37 = vpop.f32.mrb[105].mxu0 }
 0x208   : > { %6414 = vmatprep.mubr.msk.bf16.mxu1 %vm7475_vm0, %v10202_v32  ;;  %v1294_v47 = vpop.f32.mrb[106].mxu0 }
 0x209   : > { %v8433_v56 = vpack.c.bf16 %v2279_v1, %v2278_v31  ;;  %v390_v31 = vld [vmem:[%s7543_s9 + $0x358] sm:$0xff]  ;;  %v1295_v58 = vadd.f32 %v8162_v16, %v1294_v47  ;;  %v6001_v4 = vpop.f32.mrb[107].mxu0 }
 0x20a   : > { %v1875_v28 = vpop.f32.mrb[144].mxu1  ;;  %v586_v1 = vpack.c.bf16 %v390_v31, %v389_v22 }
 0x20b   : > { %10211 = vst [vmem:[#allocation19_spill] sm:$0xff] %v8433_v56  ;;  %v1876_v25 = vadd.f32 %v8162_v16, %v1875_v28  ;;  %v6292_v5 = vpop.f32.mrb[145].mxu1  ;;  %v2134_v28 = vmax.f32 %v1292_v9, 0.0  ;;  %v1299_v9 = vpop.f32.mrb[108].mxu0 }
 0x20c   : > { %v1878_v2 = vpop.f32.mrb[146].mxu1  ;;  %v1300_v31 = vadd.f32 %v8162_v16, %v1299_v9  ;;  %v6004_v47 = vpop.f32.mrb[109].mxu0 }
 0x20d   : > { %v1879_v40 = vadd.f32 %v8162_v16, %v1878_v2  ;;  %v6293_v19 = vpop.f32.mrb[147].mxu1  ;;  %v2280_v21 = vmax.f32 %v1876_v25, 0.0  ;;  %v2135_v2 = vmax.f32 %v1295_v58, 0.0 }
 0x20e   : > { %6107 = vmatmul.mubr.msk.bf16.gmra.mrb[212].mxu0 %vm673_vm1, %v586_v1  ;;  %v1302_v1 = vpop.f32.mrb[110].mxu0 }
 0x20f   : > { %v2281_v6 = vmax.f32 %v1879_v40, 0.0  ;;  %6415 = vmatmul.mubr.bf16.gmra.mrb[252].mxu1 %v7994_v57  ;;  %6110 = vmatprep.mubr.msk.bf16.mxu0 %vm7475_vm0, %v10202_v32  ;;  %v8455_v40 = vpack.c.bf16 %v2135_v2, %v2134_v28  ;;  %v1303_v28 = vadd.f32 %v8162_v16, %v1302_v1  ;;  %v6005_v2 = vpop.f32.mrb[111].mxu0  ;;  %v393_v1 = vld [vmem:[%s7543_s9 + $0x370] sm:$0xff] }
 0x210   : > { %6418 = vmatprep.mubr.msk.bf16.mxu1 %vm7475_vm0, %v10202_v32 }
 0x211   : > { %v8449_v5 = vpack.c.bf16 %v2281_v6, %v2280_v21  ;;  %v391_v21 = vld [vmem:[%s7543_s9 + $0x360] sm:$0xff]  ;;  %v392_v6 = vld [vmem:[%s7543_s9 + $0x368] sm:$0xff] }
 0x212   : > { %v1883_v36 = vpop.f32.mrb[148].mxu1  ;;  %v587_v58 = vpack.c.bf16 %v392_v6, %v391_v21 }
 0x213   : > { %10212 = vst [vmem:[#allocation20_spill] sm:$0xff] %v8449_v5  ;;  %v1884_v57 = vadd.f32 %v8162_v16, %v1883_v36  ;;  %v6296_v25 = vpop.f32.mrb[149].mxu1  ;;  %v2136_v36 = vmax.f32 %v1300_v31, 0.0  ;;  %v1307_v31 = vpop.f32.mrb[112].mxu0 }
 0x214   : > { %v1886_v19 = vpop.f32.mrb[150].mxu1  ;;  %v6008_v6 = vpop.f32.mrb[113].mxu0 }
 0x215   : > { %v1887_v37 = vadd.f32 %v8162_v16, %v1886_v19  ;;  %v6297_v22 = vpop.f32.mrb[151].mxu1  ;;  %v2282_v4 = vmax.f32 %v1884_v57, 0.0  ;;  %v2137_v19 = vmax.f32 %v1303_v28, 0.0 }
 0x216   : > { %6111 = vmatmul.mubr.msk.bf16.gmra.mrb[216].mxu0 %vm673_vm1, %v587_v58  ;;  %v1310_v58 = vpop.f32.mrb[114].mxu0 }
 0x217   : > { %v2283_v5 = vmax.f32 %v1887_v37, 0.0  ;;  %6419 = vmatmul.mubr.bf16.gmra.mrb[0].mxu1 %v8012_v23  ;;  %6114 = vmatprep.mubr.msk.bf16.mxu0 %vm7475_vm0, %v10202_v32  ;;  %v8471_v37 = vpack.c.bf16 %v2137_v19, %v2136_v36  ;;  %v1311_v36 = vadd.f32 %v8162_v16, %v1310_v58  ;;  %v6009_v19 = vpop.f32.mrb[115].mxu0  ;;  %v395_v58 = vld [vmem:[%s7543_s9 + $0x380] sm:$0xff] }
 0x218   : > { %6422 = vmatprep.mubr.msk.bf16.mxu1 %vm7475_vm0, %v10202_v32 }
 0x219   : > { %v8465_v25 = vpack.c.bf16 %v2283_v5, %v2282_v4  ;;  %v1308_v5 = vadd.f32 %v8162_v16, %v1307_v31  ;;  %v394_v4 = vld [vmem:[%s7543_s9 + $0x378] sm:$0xff] }
 0x21a   : > { %v1891_v9 = vpop.f32.mrb[152].mxu1  ;;  %v588_v28 = vpack.c.bf16 %v394_v4, %v393_v1 }
 0x21b   : > { %10213 = vst [vmem:[#allocation21_spill] sm:$0xff] %v8465_v25  ;;  %v1892_v23 = vadd.f32 %v8162_v16, %v1891_v9  ;;  %v6300_v57 = vpop.f32.mrb[153].mxu1  ;;  %v2138_v9 = vmax.f32 %v1308_v5, 0.0  ;;  %v1315_v5 = vpop.f32.mrb[116].mxu0 }
 0x21c   : > { %v1894_v22 = vpop.f32.mrb[154].mxu1  ;;  %v6012_v4 = vpop.f32.mrb[117].mxu0 }
 0x21d   : > { %v1895_v47 = vadd.f32 %v8162_v16, %v1894_v22  ;;  %v6301_v21 = vpop.f32.mrb[155].mxu1  ;;  %v2284_v2 = vmax.f32 %v1892_v23, 0.0  ;;  %v2139_v22 = vmax.f32 %v1311_v36, 0.0 }
 0x21e   : > { %6115 = vmatmul.mubr.msk.bf16.gmra.mrb[220].mxu0 %vm673_vm1, %v588_v28  ;;  %v1318_v28 = vpop.f32.mrb[118].mxu0 }
 0x21f   : > { %v2285_v25 = vmax.f32 %v1895_v47, 0.0  ;;  %6423 = vmatmul.mubr.bf16.gmra.mrb[4].mxu1 %v8030_v54  ;;  %6118 = vmatprep.mubr.msk.bf16.mxu0 %vm7475_vm0, %v10202_v32  ;;  %v8487_v47 = vpack.c.bf16 %v2139_v22, %v2138_v9  ;;  %v8497_v9 = vld [vmem:[%s10185_s2] ss:$0 sm:$0xff] }
 0x220   : > { %6426 = vmatprep.mubr.msk.bf16.mxu1 %vm7475_vm0, %v10202_v32  ;;  %v1319_v22 = vadd.f32 %v8497_v9, %v1318_v28 }
 0x221   : > { %v8481_v57 = vpack.c.bf16 %v2285_v25, %v2284_v2  ;;  %v1316_v25 = vadd.f32 %v8162_v16, %v1315_v5  ;;  %v396_v2 = vld [vmem:[%s7543_s9 + $0x388] sm:$0xff] }
 0x222   : > { %v1899_v31 = vpop.f32.mrb[156].mxu1  ;;  %v589_v36 = vpack.c.bf16 %v396_v2, %v395_v58 }
 0x223   : > { %10214 = vst [vmem:[#allocation22_spill] sm:$0xff] %v8481_v57  ;;  %v1900_v54 = vadd.f32 %v8162_v16, %v1899_v31  ;;  %v6304_v23 = vpop.f32.mrb[157].mxu1  ;;  %v2140_v31 = vmax.f32 %v1316_v25, 0.0 }
 0x224   : > { %v1902_v21 = vpop.f32.mrb[158].mxu1  ;;  %v6013_v23 = vpop.f32.mrb[119].mxu0 }
 0x225   : > { %v1903_v6 = vadd.f32 %v8162_v16, %v1902_v21  ;;  %v6305_v1 = vpop.f32.mrb[159].mxu1  ;;  %v2286_v19 = vmax.f32 %v1900_v54, 0.0  ;;  %v7454_v54 = vld [vmem:[%s10188_s5 + $0x38] sm:$0xff]   ;;  %v1323_v25 = vpop.f32.mrb[120].mxu0 }
 0x226   : > { %6119 = vmatmul.mubr.msk.bf16.gmra.mrb[224].mxu0 %vm673_vm1, %v589_v36  ;;  %v1324_v2 = vadd.f32 %v8497_v9, %v1323_v25  ;;  %v6016_v28 = vpop.f32.mrb[121].mxu0  ;;  %v398_v36 = vld [vmem:[%s7543_s9 + $0x398] sm:$0xff] }
 0x227   : > { %v2287_v57 = vmax.f32 %v1903_v6, 0.0  ;;  %6427 = vmatmul.mubr.bf16.gmra.mrb[8].mxu1 %v8048_v26  ;;  %v2141_v26 = vmax.f32 %v1319_v22, 0.0  ;;  %6122 = vmatprep.mubr.msk.bf16.mxu0 %vm7475_vm0, %v10202_v32  ;;  %v1326_v22 = vpop.f32.mrb[122].mxu0 }
 0x228   : > { %6430 = vmatprep.mubr.msk.bf16.mxu1 %vm7475_vm0, %v10202_v32  ;;  %6925 = vmatpush3.bf16.msra.mxu0 %v7454_v54  ;;  %v6017_v54 = vpop.f32.mrb[123].mxu0 }
 0x229   : > { %v8502_v16 = vpack.c.bf16 %v2287_v57, %v2286_v19  ;;  %v8511_v1 = vpack.c.bf16 %v2141_v26, %v2140_v31  ;;  %v397_v19 = vld [vmem:[%s7543_s9 + $0x390] sm:$0xff]  ;;  %v1327_v31 = vadd.f32 %v8497_v9, %v1326_v22 }
 0x22a   : > { %v1907_v21 = vpop.f32.mrb[160].mxu1  ;;  %v590_v23 = vpack.c.bf16 %v398_v36, %v397_v19  ;;  %v399_v19 = vld [vmem:[%s7543_s9 + $0x3a0] sm:$0xff]  ;;  %v400_v36 = vld [vmem:[%s7543_s9 + $0x3a8] sm:$0xff] }
 0x22b   : > { %10215 = vst [vmem:[#allocation23_spill] sm:$0xff] %v8502_v16  ;;  %v1908_v5 = vadd.f32 %v8497_v9, %v1907_v21  ;;  %v6308_v6 = vpop.f32.mrb[161].mxu1  ;;  %v2142_v21 = vmax.f32 %v1324_v2, 0.0 }
 0x22c   : > { %v1910_v57 = vpop.f32.mrb[162].mxu1  ;;  %v2143_v6 = vmax.f32 %v1327_v31, 0.0 }
 0x22d   : > { %v1911_v4 = vadd.f32 %v8497_v9, %v1910_v57  ;;  %v6309_v58 = vpop.f32.mrb[163].mxu1  ;;  %v2288_v16 = vmax.f32 %v1908_v5, 0.0 }
 0x22e   : > { %6123 = vmatmul.mubr.msk.bf16.gmra.mrb[228].mxu0 %vm673_vm1, %v590_v23  ;;  %v8527_v25 = vpack.c.bf16 %v2143_v6, %v2142_v21  ;;  %v1331_v58 = vpop.f32.mrb[124].mxu0  ;;  %v591_v23 = vpack.c.bf16 %v400_v36, %v399_v19 }
 0x22f   : > { %v2289_v56 = vmax.f32 %v1911_v4, 0.0  ;;  %6431 = vmatmul.mubr.bf16.gmra.mrb[12].mxu1 %v8069_v61  ;;  %6126 = vmatprep.mubr.msk.bf16.mxu0 %vm7475_vm0, %v10202_v32 }
 0x230   : > { %6434 = vmatprep.mubr.msk.bf16.mxu1 %vm7475_vm0, %v10202_v32 }
 0x231   : > { %v8521_v26 = vpack.c.bf16 %v2289_v56, %v2288_v16  ;;  %v1332_v56 = vadd.f32 %v8497_v9, %v1331_v58  ;;  %v6020_v16 = vpop.f32.mrb[125].mxu0 }
 0x232   : > { %v1915_v57 = vpop.f32.mrb[164].mxu1  ;;  %v1334_v22 = vpop.f32.mrb[126].mxu0 }
 0x233   : > { %10216 = vst [vmem:[#allocation24_spill] sm:$0xff] %v8521_v26  ;;  %v1916_v61 = vadd.f32 %v8497_v9, %v1915_v57  ;;  %v6312_v5 = vpop.f32.mrb[165].mxu1  ;;  %v2144_v57 = vmax.f32 %v1332_v56, 0.0  ;;  %v1335_v21 = vadd.f32 %v8497_v9, %v1334_v22  ;;  %v6021_v6 = vpop.f32.mrb[127].mxu0 }
 0x234   : > { %v1918_v4 = vpop.f32.mrb[166].mxu1  ;;  %v1339_v56 = vpop.f32.mrb[128].mxu0 }
 0x235   : > { %v1919_v2 = vadd.f32 %v8497_v9, %v1918_v4  ;;  %v6313_v28 = vpop.f32.mrb[167].mxu1  ;;  %v2290_v31 = vmax.f32 %v1916_v61, 0.0  ;;  %v2145_v4 = vmax.f32 %v1335_v21, 0.0  ;;  %v1340_v36 = vadd.f32 %v8497_v9, %v1339_v56  ;;  %v6024_v22 = vpop.f32.mrb[129].mxu0 }
 0x236   : > { %6127 = vmatmul.mubr.msk.bf16.gmra.mrb[232].mxu0 %vm673_vm1, %v591_v23  ;;  %v1342_v23 = vpop.f32.mrb[130].mxu0 }
 0x237   : > { %v2291_v54 = vmax.f32 %v1919_v2, 0.0  ;;  %6435 = vmatmul.mubr.bf16.gmra.mrb[16].mxu1 %v8088_v35  ;;  %6130 = vmatprep.mubr.msk.bf16.mxu0 %vm7475_vm0, %v10202_v32  ;;  %v8543_v2 = vpack.c.bf16 %v2145_v4, %v2144_v57  ;;  %v1343_v57 = vadd.f32 %v8497_v9, %v1342_v23  ;;  %v6025_v4 = vpop.f32.mrb[131].mxu0  ;;  %v403_v23 = vld [vmem:[%s7543_s9 + $0x3c0] sm:$0xff] }
 0x238   : > { %6438 = vmatprep.mubr.msk.bf16.mxu1 %vm7475_vm0, %v10202_v32 }
 0x239   : > { %v8537_v5 = vpack.c.bf16 %v2291_v54, %v2290_v31  ;;  %v401_v31 = vld [vmem:[%s7543_s9 + $0x3b0] sm:$0xff]  ;;  %v402_v54 = vld [vmem:[%s7543_s9 + $0x3b8] sm:$0xff] }
 0x23a   : > { %v1923_v58 = vpop.f32.mrb[168].mxu1  ;;  %v592_v21 = vpack.c.bf16 %v402_v54, %v401_v31 }
 0x23b   : > { %10217 = vst [vmem:[#allocation25_spill] sm:$0xff] %v8537_v5  ;;  %v1924_v35 = vadd.f32 %v8497_v9, %v1923_v58  ;;  %v6316_v61 = vpop.f32.mrb[169].mxu1  ;;  %v2146_v58 = vmax.f32 %v1340_v36, 0.0  ;;  %v1347_v36 = vpop.f32.mrb[132].mxu0 }
 0x23c   : > { %v1926_v28 = vpop.f32.mrb[170].mxu1  ;;  %v6028_v54 = vpop.f32.mrb[133].mxu0 }
 0x23d   : > { %v1927_v16 = vadd.f32 %v8497_v9, %v1926_v28  ;;  %v6317_v19 = vpop.f32.mrb[171].mxu1  ;;  %v2292_v6 = vmax.f32 %v1924_v35, 0.0  ;;  %v2147_v28 = vmax.f32 %v1343_v57, 0.0 }
 0x23e   : > { %6131 = vmatmul.mubr.msk.bf16.gmra.mrb[236].mxu0 %vm673_vm1, %v592_v21  ;;  %v1350_v21 = vpop.f32.mrb[134].mxu0 }
 0x23f   : > { %v2293_v5 = vmax.f32 %v1927_v16, 0.0  ;;  %6439 = vmatmul.mubr.bf16.gmra.mrb[20].mxu1 %v8106_v8  ;;  %6134 = vmatprep.mubr.msk.bf16.mxu0 %vm7475_vm0, %v10202_v32  ;;  %v8559_v16 = vpack.c.bf16 %v2147_v28, %v2146_v58  ;;  %v1351_v58 = vadd.f32 %v8497_v9, %v1350_v21  ;;  %v6029_v28 = vpop.f32.mrb[135].mxu0  ;;  %v405_v21 = vld [vmem:[%s7543_s9 + $0x3d0] sm:$0xff] }
 0x240   : > { %6442 = vmatprep.mubr.msk.bf16.mxu1 %vm7475_vm0, %v10202_v32 }
 0x241   : > { %v8553_v61 = vpack.c.bf16 %v2293_v5, %v2292_v6  ;;  %v1348_v5 = vadd.f32 %v8497_v9, %v1347_v36  ;;  %v404_v6 = vld [vmem:[%s7543_s9 + $0x3c8] sm:$0xff] }
 0x242   : > { %v1931_v56 = vpop.f32.mrb[172].mxu1  ;;  %v593_v57 = vpack.c.bf16 %v404_v6, %v403_v23 }
 0x243   : > { %10218 = vst [vmem:[#allocation26_spill] sm:$0xff] %v8553_v61  ;;  %v1932_v8 = vadd.f32 %v8497_v9, %v1931_v56  ;;  %v6320_v35 = vpop.f32.mrb[173].mxu1  ;;  %v2148_v56 = vmax.f32 %v1348_v5, 0.0  ;;  %v1355_v5 = vpop.f32.mrb[136].mxu0 }
 0x244   : > { %v1934_v19 = vpop.f32.mrb[174].mxu1  ;;  %v6032_v6 = vpop.f32.mrb[137].mxu0 }
 0x245   : > { %v1935_v22 = vadd.f32 %v8497_v9, %v1934_v19  ;;  %v6321_v31 = vpop.f32.mrb[175].mxu1  ;;  %v2294_v4 = vmax.f32 %v1932_v8, 0.0  ;;  %v2149_v19 = vmax.f32 %v1351_v58, 0.0 }
 0x246   : > { %6135 = vmatmul.mubr.msk.bf16.gmra.mrb[240].mxu0 %vm673_vm1, %v593_v57  ;;  %v1358_v57 = vpop.f32.mrb[138].mxu0 }
 0x247   : > { %v2295_v61 = vmax.f32 %v1935_v22, 0.0  ;;  %6443 = vmatmul.mubr.bf16.gmra.mrb[24].mxu1 %v8124_v48  ;;  %6138 = vmatprep.mubr.msk.bf16.mxu0 %vm7475_vm0, %v10202_v32  ;;  %v8575_v22 = vpack.c.bf16 %v2149_v19, %v2148_v56  ;;  %v1359_v56 = vadd.f32 %v8497_v9, %v1358_v57  ;;  %v6033_v19 = vpop.f32.mrb[139].mxu0  ;;  %v407_v57 = vld [vmem:[%s7543_s9 + $0x3e0] sm:$0xff] }
 0x248   : > { %6446 = vmatprep.mubr.msk.bf16.mxu1 %vm7475_vm0, %v10202_v32 }
 0x249   : > { %v8569_v35 = vpack.c.bf16 %v2295_v61, %v2294_v4  ;;  %v1356_v61 = vadd.f32 %v8497_v9, %v1355_v5  ;;  %v406_v4 = vld [vmem:[%s7543_s9 + $0x3d8] sm:$0xff] }
 0x24a   : > { %v1939_v36 = vpop.f32.mrb[176].mxu1  ;;  %v594_v58 = vpack.c.bf16 %v406_v4, %v405_v21 }
 0x24b   : > { %10219 = vst [vmem:[#allocation27_spill] sm:$0xff] %v8569_v35  ;;  %v1940_v48 = vadd.f32 %v8497_v9, %v1939_v36  ;;  %v6324_v8 = vpop.f32.mrb[177].mxu1  ;;  %v2150_v36 = vmax.f32 %v1356_v61, 0.0  ;;  %v1363_v61 = vpop.f32.mrb[140].mxu0 }
 0x24c   : > { %v1942_v31 = vpop.f32.mrb[178].mxu1  ;;  %v6036_v4 = vpop.f32.mrb[141].mxu0 }
 0x24d   : > { %v1943_v54 = vadd.f32 %v8497_v9, %v1942_v31  ;;  %v6325_v23 = vpop.f32.mrb[179].mxu1  ;;  %v2296_v28 = vmax.f32 %v1940_v48, 0.0  ;;  %v2151_v31 = vmax.f32 %v1359_v56, 0.0 }
 0x24e   : > { %6139 = vmatmul.mubr.msk.bf16.gmra.mrb[244].mxu0 %vm673_vm1, %v594_v58  ;;  %v1366_v58 = vpop.f32.mrb[142].mxu0 }
 0x24f   : > { %v2297_v35 = vmax.f32 %v1943_v54, 0.0  ;;  %6447 = vmatmul.mubr.bf16.gmra.mrb[28].mxu1 %v8142_v30  ;;  %6142 = vmatprep.mubr.msk.bf16.mxu0 %vm7475_vm0, %v10202_v32  ;;  %v8591_v54 = vpack.c.bf16 %v2151_v31, %v2150_v36  ;;  %v1367_v36 = vadd.f32 %v8497_v9, %v1366_v58  ;;  %v6037_v31 = vpop.f32.mrb[143].mxu0 }
 0x250   : > { %6450 = vmatprep.mubr.msk.bf16.mxu1 %vm7475_vm0, %v10202_v32 }
 0x251   : > { %v8585_v8 = vpack.c.bf16 %v2297_v35, %v2296_v28  ;;  %v1364_v35 = vadd.f32 %v8497_v9, %v1363_v61  ;;  %v408_v28 = vld [vmem:[%s7543_s9 + $0x3e8] sm:$0xff] }
 0x252   : > { %v1947_v5 = vpop.f32.mrb[180].mxu1  ;;  %v595_v56 = vpack.c.bf16 %v408_v28, %v407_v57 }
 0x253   : > { %10220 = vst [vmem:[#allocation28_spill] sm:$0xff] %v8585_v8  ;;  %v1948_v30 = vadd.f32 %v8497_v9, %v1947_v5  ;;  %v6328_v48 = vpop.f32.mrb[181].mxu1  ;;  %v2152_v5 = vmax.f32 %v1364_v35, 0.0  ;;  %v1371_v35 = vpop.f32.mrb[144].mxu0 }
 0x254   : > { %v1950_v23 = vpop.f32.mrb[182].mxu1  ;;  %v6040_v28 = vpop.f32.mrb[145].mxu0 }
 0x255   : > { %v1951_v6 = vadd.f32 %v8497_v9, %v1950_v23  ;;  %v6329_v21 = vpop.f32.mrb[183].mxu1  ;;  %v2298_v19 = vmax.f32 %v1948_v30, 0.0  ;;  %v2153_v23 = vmax.f32 %v1367_v36, 0.0  ;;  %v1374_v58 = vpop.f32.mrb[146].mxu0 }
 0x256   : > { %6143 = vmatmul.mubr.msk.bf16.gmra.mrb[248].mxu0 %vm673_vm1, %v595_v56  ;;  %v1375_v31 = vadd.f32 %v8497_v9, %v1374_v58 }
 0x257   : > { %v2299_v8 = vmax.f32 %v1951_v6, 0.0  ;;  %6451 = vmatmul.mubr.bf16.gmra.mrb[32].mxu1 %v8165_v10  ;;  %6926 = vmatprep.mubr.msk.bf16.mxu0 %vm7475_vm0, %v10202_v32  ;;  %v8607_v10 = vpack.c.bf16 %v2153_v23, %v2152_v5 }
 0x258   : > { %6454 = vmatprep.mubr.msk.bf16.mxu1 %vm7475_vm0, %v10202_v32  ;;  %v2155_v23 = vmax.f32 %v1375_v31, 0.0 }
 0x259   : > { %v8601_v48 = vpack.c.bf16 %v2299_v8, %v2298_v19  ;;  %v1372_v8 = vadd.f32 %v8497_v9, %v1371_v35 }
 0x25a   : > { %v1955_v61 = vpop.f32.mrb[184].mxu1 }
 0x25b   : > { %10221 = vst [vmem:[#allocation29_spill] sm:$0xff] %v8601_v48  ;;  %v1956_v30 = vadd.f32 %v8497_v9, %v1955_v61  ;;  %v6332_v6 = vpop.f32.mrb[185].mxu1  ;;  %v2154_v36 = vmax.f32 %v1372_v8, 0.0  ;;  %v6041_v61 = vpop.f32.mrb[147].mxu0 }
 0x25c   : > { %v1958_v21 = vpop.f32.mrb[186].mxu1 }
 0x25d   : > { %v1959_v4 = vadd.f32 %v8497_v9, %v1958_v21  ;;  %v6333_v57 = vpop.f32.mrb[187].mxu1  ;;  %v2300_v19 = vmax.f32 %v1956_v30, 0.0 }
 0x25e   : > { %v8618_v57 = vpack.c.bf16 %v2155_v23, %v2154_v36 }
 0x25f   : > { %v2301_v56 = vmax.f32 %v1959_v4, 0.0  ;;  %6455 = vmatmul.mubr.bf16.gmra.mrb[36].mxu1 %v8183_v60  ;;  %v1379_v4 = vpop.f32.mrb[148].mxu0 }
 0x260   : > { %6458 = vmatprep.mubr.msk.bf16.mxu1 %vm7475_vm0, %v10202_v32  ;;  %v1380_v28 = vadd.f32 %v8497_v9, %v1379_v4  ;;  %v6044_v58 = vpop.f32.mrb[149].mxu0 }
 0x261   : > { %v8615_v5 = vpack.c.bf16 %v2301_v56, %v2300_v19  ;;  %v1382_v61 = vpop.f32.mrb[150].mxu0 }
 0x262   : > { %v1963_v6 = vpop.f32.mrb[188].mxu1  ;;  %v2156_v19 = vmax.f32 %v1380_v28, 0.0  ;;  %v1383_v56 = vadd.f32 %v8497_v9, %v1382_v61  ;;  %v6045_v31 = vpop.f32.mrb[151].mxu0 }
 0x263   : > { %10222 = vst [vmem:[#allocation30_spill] sm:$0xff] %v8615_v5  ;;  %v1964_v21 = vadd.f32 %v8497_v9, %v1963_v6  ;;  %v6336_v35 = vpop.f32.mrb[189].mxu1 }
 0x264   : > { %v1966_v30 = vpop.f32.mrb[190].mxu1  ;;  %v2157_v23 = vmax.f32 %v1383_v56, 0.0 }
 0x265   : > { %v1967_v60 = vadd.f32 %v8497_v9, %v1966_v30  ;;  %v6337_v8 = vpop.f32.mrb[191].mxu1  ;;  %v2302_v48 = vmax.f32 %v1964_v21, 0.0 }
 0x266   : > { %v8629_v4 = vpack.c.bf16 %v2157_v23, %v2156_v19 }
 0x267   : > { %v2303_v26 = vmax.f32 %v1967_v60, 0.0  ;;  %6459 = vmatmul.mubr.bf16.gmra.mrb[40].mxu1 %v8201_v52  ;;  %v1387_v60 = vpop.f32.mrb[152].mxu0 }
 0x268   : > { %6462 = vmatprep.mubr.msk.bf16.mxu1 %vm7475_vm0, %v10202_v32  ;;  %v1388_v28 = vadd.f32 %v8497_v9, %v1387_v60  ;;  %v6048_v58 = vpop.f32.mrb[153].mxu0 }
 0x269   : > { %v8626_v36 = vpack.c.bf16 %v2303_v26, %v2302_v48  ;;  %v1390_v61 = vpop.f32.mrb[154].mxu0 }
 0x26a   : > { %v1971_v6 = vpop.f32.mrb[192].mxu1  ;;  %v2158_v26 = vmax.f32 %v1388_v28, 0.0  ;;  %v1391_v48 = vadd.f32 %v8497_v9, %v1390_v61  ;;  %v6049_v56 = vpop.f32.mrb[155].mxu0 }
 0x26b   : > { %10223 = vst [vmem:[#allocation31_spill] sm:$0xff] %v8626_v36  ;;  %v1972_v35 = vadd.f32 %v8497_v9, %v1971_v6  ;;  %v6340_v30 = vpop.f32.mrb[193].mxu1 }
 0x26c   : > { %v1974_v21 = vpop.f32.mrb[194].mxu1  ;;  %v2159_v23 = vmax.f32 %v1391_v48, 0.0 }
 0x26d   : > { %v1975_v52 = vadd.f32 %v8497_v9, %v1974_v21  ;;  %v6341_v8 = vpop.f32.mrb[195].mxu1  ;;  %v2304_v31 = vmax.f32 %v1972_v35, 0.0 }
 0x26e   : > { %v8640_v60 = vpack.c.bf16 %v2159_v23, %v2158_v26 }
 0x26f   : > { %v2305_v5 = vmax.f32 %v1975_v52, 0.0  ;;  %6463 = vmatmul.mubr.bf16.gmra.mrb[44].mxu1 %v8222_v43  ;;  %v1395_v52 = vpop.f32.mrb[156].mxu0 }
 0x270   : > { %6466 = vmatprep.mubr.msk.bf16.mxu1 %vm7475_vm0, %v10202_v32  ;;  %v1396_v28 = vadd.f32 %v8497_v9, %v1395_v52  ;;  %v6052_v58 = vpop.f32.mrb[157].mxu0 }
 0x271   : > { %v8637_v19 = vpack.c.bf16 %v2305_v5, %v2304_v31  ;;  %v1398_v61 = vpop.f32.mrb[158].mxu0 }
 0x272   : > { %v1979_v6 = vpop.f32.mrb[196].mxu1  ;;  %v2160_v5 = vmax.f32 %v1396_v28, 0.0  ;;  %v1399_v31 = vadd.f32 %v8497_v9, %v1398_v61  ;;  %v6053_v48 = vpop.f32.mrb[159].mxu0 }
 0x273   : > { %10224 = vst [vmem:[#allocation32_spill] sm:$0xff] %v8637_v19  ;;  %v1980_v30 = vadd.f32 %v8497_v9, %v1979_v6  ;;  %v6344_v21 = vpop.f32.mrb[197].mxu1 }
 0x274   : > { %v1982_v35 = vpop.f32.mrb[198].mxu1  ;;  %v2161_v23 = vmax.f32 %v1399_v31, 0.0 }
 0x275   : > { %v1983_v43 = vadd.f32 %v8497_v9, %v1982_v35  ;;  %v6345_v8 = vpop.f32.mrb[199].mxu1  ;;  %v2306_v56 = vmax.f32 %v1980_v30, 0.0 }
 0x276   : > { %v8651_v52 = vpack.c.bf16 %v2161_v23, %v2160_v5 }
 0x277   : > { %v2307_v36 = vmax.f32 %v1983_v43, 0.0  ;;  %6467 = vmatmul.mubr.bf16.gmra.mrb[48].mxu1 %v8241_v42  ;;  %v1403_v43 = vpop.f32.mrb[160].mxu0 }
 0x278   : > { %6470 = vmatprep.mubr.msk.bf16.mxu1 %vm7475_vm0, %v10202_v32  ;;  %v1404_v28 = vadd.f32 %v8497_v9, %v1403_v43  ;;  %v6056_v58 = vpop.f32.mrb[161].mxu0 }
 0x279   : > { %v8648_v26 = vpack.c.bf16 %v2307_v36, %v2306_v56  ;;  %v1406_v61 = vpop.f32.mrb[162].mxu0 }
 0x27a   : > { %v1987_v6 = vpop.f32.mrb[200].mxu1  ;;  %v2162_v36 = vmax.f32 %v1404_v28, 0.0  ;;  %v1407_v56 = vadd.f32 %v8497_v9, %v1406_v61  ;;  %v6057_v31 = vpop.f32.mrb[163].mxu0 }
 0x27b   : > { %10225 = vst [vmem:[#allocation33_spill] sm:$0xff] %v8648_v26  ;;  %v1988_v21 = vadd.f32 %v8497_v9, %v1987_v6  ;;  %v6348_v35 = vpop.f32.mrb[201].mxu1 }
 0x27c   : > { %v1990_v30 = vpop.f32.mrb[202].mxu1  ;;  %v2163_v23 = vmax.f32 %v1407_v56, 0.0 }
 0x27d   : > { %v1991_v42 = vadd.f32 %v8497_v9, %v1990_v30  ;;  %v6349_v8 = vpop.f32.mrb[203].mxu1  ;;  %v2308_v48 = vmax.f32 %v1988_v21, 0.0 }
 0x27e   : > { %v8662_v43 = vpack.c.bf16 %v2163_v23, %v2162_v36 }
 0x27f   : > { %v2309_v19 = vmax.f32 %v1991_v42, 0.0  ;;  %6471 = vmatmul.mubr.bf16.gmra.mrb[52].mxu1 %v8259_v53  ;;  %v1411_v42 = vpop.f32.mrb[164].mxu0 }
 0x280   : > { %6474 = vmatprep.mubr.msk.bf16.mxu1 %vm7475_vm0, %v10202_v32  ;;  %v1412_v28 = vadd.f32 %v8497_v9, %v1411_v42  ;;  %v6060_v58 = vpop.f32.mrb[165].mxu0 }
 0x281   : > { %v8659_v5 = vpack.c.bf16 %v2309_v19, %v2308_v48  ;;  %v1414_v61 = vpop.f32.mrb[166].mxu0 }
 0x282   : > { %v1995_v6 = vpop.f32.mrb[204].mxu1  ;;  %v2164_v19 = vmax.f32 %v1412_v28, 0.0  ;;  %v1415_v48 = vadd.f32 %v8497_v9, %v1414_v61  ;;  %v6061_v56 = vpop.f32.mrb[167].mxu0 }
 0x283   : > { %10226 = vst [vmem:[#allocation34_spill] sm:$0xff] %v8659_v5  ;;  %v1996_v35 = vadd.f32 %v8497_v9, %v1995_v6  ;;  %v6352_v30 = vpop.f32.mrb[205].mxu1 }
 0x284   : > { %v1998_v21 = vpop.f32.mrb[206].mxu1  ;;  %v2165_v23 = vmax.f32 %v1415_v48, 0.0 }
 0x285   : > { %v1999_v53 = vadd.f32 %v8497_v9, %v1998_v21  ;;  %v6353_v8 = vpop.f32.mrb[207].mxu1  ;;  %v2310_v31 = vmax.f32 %v1996_v35, 0.0 }
 0x286   : > { %v8673_v42 = vpack.c.bf16 %v2165_v23, %v2164_v19 }
 0x287   : > { %v2311_v26 = vmax.f32 %v1999_v53, 0.0  ;;  %6475 = vmatmul.mubr.bf16.gmra.mrb[56].mxu1 %v8277_v62  ;;  %v1419_v53 = vpop.f32.mrb[168].mxu0 }
 0x288   : > { %6478 = vmatprep.mubr.msk.bf16.mxu1 %vm7475_vm0, %v10202_v32  ;;  %v1420_v28 = vadd.f32 %v8497_v9, %v1419_v53  ;;  %v6064_v58 = vpop.f32.mrb[169].mxu0 }
 0x289   : > { %v8670_v36 = vpack.c.bf16 %v2311_v26, %v2310_v31  ;;  %v1422_v61 = vpop.f32.mrb[170].mxu0 }
 0x28a   : > { %v2003_v6 = vpop.f32.mrb[208].mxu1  ;;  %v2166_v26 = vmax.f32 %v1420_v28, 0.0  ;;  %v1423_v31 = vadd.f32 %v8497_v9, %v1422_v61  ;;  %v6065_v48 = vpop.f32.mrb[171].mxu0 }
 0x28b   : > { %10227 = vst [vmem:[#allocation35_spill] sm:$0xff] %v8670_v36  ;;  %v2004_v30 = vadd.f32 %v8497_v9, %v2003_v6  ;;  %v6356_v21 = vpop.f32.mrb[209].mxu1 }
 0x28c   : > { %v2006_v35 = vpop.f32.mrb[210].mxu1  ;;  %v2167_v23 = vmax.f32 %v1423_v31, 0.0 }
 0x28d   : > { %v2007_v62 = vadd.f32 %v8497_v9, %v2006_v35  ;;  %v6357_v8 = vpop.f32.mrb[211].mxu1  ;;  %v2312_v56 = vmax.f32 %v2004_v30, 0.0 }
 0x28e   : > { %v8684_v53 = vpack.c.bf16 %v2167_v23, %v2166_v26 }
 0x28f   : > { %v2313_v5 = vmax.f32 %v2007_v62, 0.0  ;;  %6479 = vmatmul.mubr.bf16.gmra.mrb[60].mxu1 %v8295_v11  ;;  %v1427_v62 = vpop.f32.mrb[172].mxu0 }
 0x290   : > { %6482 = vmatprep.mubr.msk.bf16.mxu1 %vm7475_vm0, %v10202_v32  ;;  %v1428_v28 = vadd.f32 %v8497_v9, %v1427_v62  ;;  %v6068_v58 = vpop.f32.mrb[173].mxu0 }
 0x291   : > { %v8681_v19 = vpack.c.bf16 %v2313_v5, %v2312_v56  ;;  %v1430_v61 = vpop.f32.mrb[174].mxu0 }
 0x292   : > { %v2011_v6 = vpop.f32.mrb[212].mxu1  ;;  %v2168_v5 = vmax.f32 %v1428_v28, 0.0  ;;  %v1431_v56 = vadd.f32 %v8497_v9, %v1430_v61  ;;  %v6069_v31 = vpop.f32.mrb[175].mxu0 }
 0x293   : > { %10228 = vst [vmem:[#allocation36_spill] sm:$0xff] %v8681_v19  ;;  %v2012_v21 = vadd.f32 %v8497_v9, %v2011_v6  ;;  %v6360_v35 = vpop.f32.mrb[213].mxu1 }
 0x294   : > { %v2014_v30 = vpop.f32.mrb[214].mxu1  ;;  %v2169_v23 = vmax.f32 %v1431_v56, 0.0 }
 0x295   : > { %v2015_v11 = vadd.f32 %v8497_v9, %v2014_v30  ;;  %v6361_v8 = vpop.f32.mrb[215].mxu1  ;;  %v2314_v48 = vmax.f32 %v2012_v21, 0.0 }
 0x296   : > { %v8695_v62 = vpack.c.bf16 %v2169_v23, %v2168_v5 }
 0x297   : > { %v2315_v36 = vmax.f32 %v2015_v11, 0.0  ;;  %6483 = vmatmul.mubr.bf16.gmra.mrb[64].mxu1 %v8313_v39  ;;  %v1435_v11 = vpop.f32.mrb[176].mxu0 }
 0x298   : > { %6486 = vmatprep.mubr.msk.bf16.mxu1 %vm7475_vm0, %v10202_v32  ;;  %v1436_v28 = vadd.f32 %v8497_v9, %v1435_v11  ;;  %v6072_v58 = vpop.f32.mrb[177].mxu0 }
 0x299   : > { %v8692_v26 = vpack.c.bf16 %v2315_v36, %v2314_v48  ;;  %v1438_v61 = vpop.f32.mrb[178].mxu0 }
 0x29a   : > { %v2019_v6 = vpop.f32.mrb[216].mxu1  ;;  %v2170_v36 = vmax.f32 %v1436_v28, 0.0  ;;  %v1439_v48 = vadd.f32 %v8497_v9, %v1438_v61  ;;  %v6073_v56 = vpop.f32.mrb[179].mxu0 }
 0x29b   : > { %10229 = vst [vmem:[#allocation37_spill] sm:$0xff] %v8692_v26  ;;  %v2020_v35 = vadd.f32 %v8497_v9, %v2019_v6  ;;  %v6364_v30 = vpop.f32.mrb[217].mxu1 }
 0x29c   : > { %v2022_v21 = vpop.f32.mrb[218].mxu1  ;;  %v2171_v23 = vmax.f32 %v1439_v48, 0.0 }
 0x29d   : > { %v2023_v39 = vadd.f32 %v8497_v9, %v2022_v21  ;;  %v6365_v8 = vpop.f32.mrb[219].mxu1  ;;  %v2316_v31 = vmax.f32 %v2020_v35, 0.0 }
 0x29e   : > { %v8706_v11 = vpack.c.bf16 %v2171_v23, %v2170_v36 }
 0x29f   : > { %v2317_v19 = vmax.f32 %v2023_v39, 0.0  ;;  %6487 = vmatmul.mubr.bf16.gmra.mrb[68].mxu1 %v8331_v44 }
 0x2a0   : > { %6490 = vmatprep.mubr.msk.bf16.mxu1 %vm7475_vm0, %v10202_v32 }
 0x2a1   : > { %v8703_v5 = vpack.c.bf16 %v2317_v19, %v2316_v31  ;;  %v1443_v39 = vpop.f32.mrb[180].mxu0 }
 0x2a2   : > { %v2027_v6 = vpop.f32.mrb[220].mxu1  ;;  %v1444_v28 = vadd.f32 %v8497_v9, %v1443_v39  ;;  %v6076_v58 = vpop.f32.mrb[181].mxu0 }
 0x2a3   : > { %10230 = vst [vmem:[#allocation38_spill] sm:$0xff] %v8703_v5  ;;  %v2028_v30 = vadd.f32 %v8497_v9, %v2027_v6  ;;  %v6368_v21 = vpop.f32.mrb[221].mxu1  ;;  %v1446_v61 = vpop.f32.mrb[182].mxu0 }
 0x2a4   : > { %v2030_v35 = vpop.f32.mrb[222].mxu1  ;;  %v2172_v19 = vmax.f32 %v1444_v28, 0.0  ;;  %v1447_v31 = vadd.f32 %v8497_v9, %v1446_v61  ;;  %v6077_v48 = vpop.f32.mrb[183].mxu0 }
 0x2a5   : > { %v2031_v44 = vadd.f32 %v8497_v9, %v2030_v35  ;;  %v6369_v8 = vpop.f32.mrb[223].mxu1  ;;  %v2318_v56 = vmax.f32 %v2028_v30, 0.0 }
 0x2a6   : > { %v2173_v23 = vmax.f32 %v1447_v31, 0.0 }
 0x2a7   : > { %v2319_v26 = vmax.f32 %v2031_v44, 0.0  ;;  %6491 = vmatmul.mubr.bf16.gmra.mrb[72].mxu1 %v8349_v59 }
 0x2a8   : > { %6494 = vmatprep.mubr.msk.bf16.mxu1 %vm7475_vm0, %v10202_v32  ;;  %v8717_v39 = vpack.c.bf16 %v2173_v23, %v2172_v19 }
 0x2a9   : > { %v8714_v36 = vpack.c.bf16 %v2319_v26, %v2318_v56  ;;  %v1451_v44 = vpop.f32.mrb[184].mxu0 }
 0x2aa   : > { %v2035_v6 = vpop.f32.mrb[224].mxu1  ;;  %v1452_v28 = vadd.f32 %v8497_v9, %v1451_v44  ;;  %v6080_v58 = vpop.f32.mrb[185].mxu0 }
 0x2ab   : > { %10231 = vst [vmem:[#allocation39_spill] sm:$0xff] %v8714_v36  ;;  %v2036_v21 = vadd.f32 %v8497_v9, %v2035_v6  ;;  %v6372_v35 = vpop.f32.mrb[225].mxu1  ;;  %v1454_v61 = vpop.f32.mrb[186].mxu0 }
 0x2ac   : > { %v2038_v30 = vpop.f32.mrb[226].mxu1  ;;  %v2174_v26 = vmax.f32 %v1452_v28, 0.0  ;;  %v1455_v56 = vadd.f32 %v8497_v9, %v1454_v61  ;;  %v6081_v31 = vpop.f32.mrb[187].mxu0 }
 0x2ad   : > { %v2039_v59 = vadd.f32 %v8497_v9, %v2038_v30  ;;  %v6373_v8 = vpop.f32.mrb[227].mxu1  ;;  %v2320_v48 = vmax.f32 %v2036_v21, 0.0 }
 0x2ae   : > { %v2175_v23 = vmax.f32 %v1455_v56, 0.0 }
 0x2af   : > { %v2321_v5 = vmax.f32 %v2039_v59, 0.0  ;;  %6495 = vmatmul.mubr.bf16.gmra.mrb[76].mxu1 %v8370_v29 }
 0x2b0   : > { %6498 = vmatprep.mubr.msk.bf16.mxu1 %vm7475_vm0, %v10202_v32  ;;  %v8728_v44 = vpack.c.bf16 %v2175_v23, %v2174_v26 }
 0x2b1   : > { %v8725_v19 = vpack.c.bf16 %v2321_v5, %v2320_v48  ;;  %v1459_v59 = vpop.f32.mrb[188].mxu0 }
 0x2b2   : > { %v2043_v6 = vpop.f32.mrb[228].mxu1  ;;  %v1460_v28 = vadd.f32 %v8497_v9, %v1459_v59  ;;  %v6084_v58 = vpop.f32.mrb[189].mxu0 }
 0x2b3   : > { %10232 = vst [vmem:[#allocation40_spill] sm:$0xff] %v8725_v19  ;;  %v2044_v35 = vadd.f32 %v8497_v9, %v2043_v6  ;;  %v6376_v30 = vpop.f32.mrb[229].mxu1  ;;  %v1462_v61 = vpop.f32.mrb[190].mxu0 }
 0x2b4   : > { %v2046_v21 = vpop.f32.mrb[230].mxu1  ;;  %v2176_v5 = vmax.f32 %v1460_v28, 0.0  ;;  %v1463_v48 = vadd.f32 %v8497_v9, %v1462_v61  ;;  %v6085_v56 = vpop.f32.mrb[191].mxu0 }
 0x2b5   : > { %v2047_v29 = vadd.f32 %v8497_v9, %v2046_v21  ;;  %v6377_v8 = vpop.f32.mrb[231].mxu1  ;;  %v2322_v31 = vmax.f32 %v2044_v35, 0.0 }
 0x2b6   : > { %v2177_v23 = vmax.f32 %v1463_v48, 0.0 }
 0x2b7   : > { %v2323_v36 = vmax.f32 %v2047_v29, 0.0  ;;  %6499 = vmatmul.mubr.bf16.gmra.mrb[80].mxu1 %v8389_v12 }
 0x2b8   : > { %6502 = vmatprep.mubr.msk.bf16.mxu1 %vm7475_vm0, %v10202_v32  ;;  %v8739_v59 = vpack.c.bf16 %v2177_v23, %v2176_v5 }
 0x2b9   : > { %v8736_v26 = vpack.c.bf16 %v2323_v36, %v2322_v31  ;;  %v1467_v29 = vpop.f32.mrb[192].mxu0 }
 0x2ba   : > { %v2051_v6 = vpop.f32.mrb[232].mxu1  ;;  %v1468_v28 = vadd.f32 %v8497_v9, %v1467_v29  ;;  %v6088_v58 = vpop.f32.mrb[193].mxu0 }
 0x2bb   : > { %10233 = vst [vmem:[#allocation41_spill] sm:$0xff] %v8736_v26  ;;  %v2052_v30 = vadd.f32 %v8497_v9, %v2051_v6  ;;  %v6380_v21 = vpop.f32.mrb[233].mxu1  ;;  %v1470_v61 = vpop.f32.mrb[194].mxu0 }
 0x2bc   : > { %v2054_v35 = vpop.f32.mrb[234].mxu1  ;;  %v2178_v36 = vmax.f32 %v1468_v28, 0.0  ;;  %v1471_v31 = vadd.f32 %v8497_v9, %v1470_v61  ;;  %v6089_v48 = vpop.f32.mrb[195].mxu0 }
 0x2bd   : > { %v2055_v12 = vadd.f32 %v8497_v9, %v2054_v35  ;;  %v6381_v8 = vpop.f32.mrb[235].mxu1  ;;  %v2324_v56 = vmax.f32 %v2052_v30, 0.0 }
 0x2be   : > { %v2179_v23 = vmax.f32 %v1471_v31, 0.0 }
 0x2bf   : > { %v2325_v19 = vmax.f32 %v2055_v12, 0.0  ;;  %6503 = vmatmul.mubr.bf16.gmra.mrb[84].mxu1 %v8407_v24 }
 0x2c0   : > { %6506 = vmatprep.mubr.msk.bf16.mxu1 %vm7475_vm0, %v10202_v32  ;;  %v8750_v29 = vpack.c.bf16 %v2179_v23, %v2178_v36 }
 0x2c1   : > { %v8747_v5 = vpack.c.bf16 %v2325_v19, %v2324_v56  ;;  %v1475_v12 = vpop.f32.mrb[196].mxu0 }
 0x2c2   : > { %v2059_v6 = vpop.f32.mrb[236].mxu1  ;;  %v1476_v28 = vadd.f32 %v8497_v9, %v1475_v12  ;;  %v6092_v58 = vpop.f32.mrb[197].mxu0 }
 0x2c3   : > { %10234 = vst [vmem:[#allocation42_spill] sm:$0xff] %v8747_v5  ;;  %v2060_v21 = vadd.f32 %v8497_v9, %v2059_v6  ;;  %v6384_v35 = vpop.f32.mrb[237].mxu1  ;;  %v1478_v61 = vpop.f32.mrb[198].mxu0 }
 0x2c4   : > { %v2062_v30 = vpop.f32.mrb[238].mxu1  ;;  %v2180_v19 = vmax.f32 %v1476_v28, 0.0  ;;  %v1479_v56 = vadd.f32 %v8497_v9, %v1478_v61  ;;  %v6093_v31 = vpop.f32.mrb[199].mxu0 }
 0x2c5   : > { %v2063_v24 = vadd.f32 %v8497_v9, %v2062_v30  ;;  %v6385_v8 = vpop.f32.mrb[239].mxu1  ;;  %v2326_v48 = vmax.f32 %v2060_v21, 0.0 }
 0x2c6   : > { %v2181_v23 = vmax.f32 %v1479_v56, 0.0 }
 0x2c7   : > { %v2327_v26 = vmax.f32 %v2063_v24, 0.0  ;;  %6507 = vmatmul.mubr.bf16.gmra.mrb[88].mxu1 %v8423_v15 }
 0x2c8   : > { %6510 = vmatprep.mubr.msk.bf16.mxu1 %vm7475_vm0, %v10202_v32  ;;  %v8761_v12 = vpack.c.bf16 %v2181_v23, %v2180_v19 }
 0x2c9   : > { %v8758_v36 = vpack.c.bf16 %v2327_v26, %v2326_v48  ;;  %v1483_v24 = vpop.f32.mrb[200].mxu0 }
 0x2ca   : > { %v2067_v6 = vpop.f32.mrb[240].mxu1  ;;  %v1484_v28 = vadd.f32 %v8497_v9, %v1483_v24  ;;  %v6096_v58 = vpop.f32.mrb[201].mxu0 }
 0x2cb   : > { %10235 = vst [vmem:[#allocation43_spill] sm:$0xff] %v8758_v36  ;;  %v2068_v35 = vadd.f32 %v8497_v9, %v2067_v6  ;;  %v6388_v30 = vpop.f32.mrb[241].mxu1  ;;  %v1486_v61 = vpop.f32.mrb[202].mxu0 }
 0x2cc   : > { %v2070_v21 = vpop.f32.mrb[242].mxu1  ;;  %v2182_v26 = vmax.f32 %v1484_v28, 0.0  ;;  %v1487_v48 = vadd.f32 %v8497_v9, %v1486_v61  ;;  %v6097_v56 = vpop.f32.mrb[203].mxu0 }
 0x2cd   : > { %v2071_v15 = vadd.f32 %v8497_v9, %v2070_v21  ;;  %v6389_v8 = vpop.f32.mrb[243].mxu1  ;;  %v2328_v31 = vmax.f32 %v2068_v35, 0.0 }
 0x2ce   : > { %v2183_v23 = vmax.f32 %v1487_v48, 0.0 }
 0x2cf   : > { %v2329_v5 = vmax.f32 %v2071_v15, 0.0  ;;  %6511 = vmatmul.mubr.bf16.gmra.mrb[92].mxu1 %v8439_v41 }
 0x2d0   : > { %6514 = vmatprep.mubr.msk.bf16.mxu1 %vm7475_vm0, %v10202_v32  ;;  %v8772_v24 = vpack.c.bf16 %v2183_v23, %v2182_v26  ;;  %v8781_v26 = vld [vmem:[%s10187_s4] ss:$0 sm:$0xff] }
 0x2d1   : > { %v8769_v19 = vpack.c.bf16 %v2329_v5, %v2328_v31  ;;  %v1491_v15 = vpop.f32.mrb[204].mxu0 }
 0x2d2   : > { %v2075_v6 = vpop.f32.mrb[244].mxu1  ;;  %v1492_v28 = vadd.f32 %v8497_v9, %v1491_v15  ;;  %v6100_v58 = vpop.f32.mrb[205].mxu0 }
 0x2d3   : > { %10236 = vst [vmem:[#allocation44_spill] sm:$0xff] %v8769_v19  ;;  %v2076_v30 = vadd.f32 %v8497_v9, %v2075_v6  ;;  %v6392_v21 = vpop.f32.mrb[245].mxu1  ;;  %v1494_v61 = vpop.f32.mrb[206].mxu0 }
 0x2d4   : > { %v2078_v35 = vpop.f32.mrb[246].mxu1  ;;  %v2184_v5 = vmax.f32 %v1492_v28, 0.0  ;;  %v1495_v31 = vadd.f32 %v8497_v9, %v1494_v61  ;;  %v6101_v48 = vpop.f32.mrb[207].mxu0 }
 0x2d5   : > { %v2079_v41 = vadd.f32 %v8497_v9, %v2078_v35  ;;  %v6393_v8 = vpop.f32.mrb[247].mxu1  ;;  %v2330_v56 = vmax.f32 %v2076_v30, 0.0 }
 0x2d6   : > { %v2185_v6 = vmax.f32 %v1495_v31, 0.0 }
 0x2d7   : > { %v2331_v36 = vmax.f32 %v2079_v41, 0.0  ;;  %6515 = vmatmul.mubr.bf16.gmra.mrb[96].mxu1 %v8455_v40 }
 0x2d8   : > { %6518 = vmatprep.mubr.msk.bf16.mxu1 %vm7475_vm0, %v10202_v32  ;;  %v8788_v40 = vpack.c.bf16 %v2185_v6, %v2184_v5 }
 0x2d9   : > { %v8785_v23 = vpack.c.bf16 %v2331_v36, %v2330_v56  ;;  %v1499_v41 = vpop.f32.mrb[208].mxu0 }
 0x2da   : > { %v2562_v21 = vpop.f32.mrb[248].mxu1  ;;  %v1500_v58 = vadd.f32 %v8497_v9, %v1499_v41  ;;  %v6104_v61 = vpop.f32.mrb[209].mxu0 }
 0x2db   : > { %v2563_v30 = vadd.f32 %v8781_v26, %v2562_v21  ;;  %v6412_v35 = vpop.f32.mrb[249].mxu1  ;;  %v1502_v48 = vpop.f32.mrb[210].mxu0 }
 0x2dc   : > { %v2565_v15 = vpop.f32.mrb[250].mxu1  ;;  %v2186_v36 = vmax.f32 %v1500_v58, 0.0  ;;  %v1503_v56 = vadd.f32 %v8497_v9, %v1502_v48  ;;  %v6105_v31 = vpop.f32.mrb[211].mxu0 }
 0x2dd   : > { %v2566_v8 = vadd.f32 %v8781_v26, %v2565_v15  ;;  %v6413_v28 = vpop.f32.mrb[251].mxu1  ;;  %v3561_v19 = vmax.f32 %v2563_v30, 0.0 }
 0x2de   : > { %v2187_v6 = vmax.f32 %v1503_v56, 0.0 }
 0x2df   : > { %v3562_v7 = vmax.f32 %v2566_v8, 0.0  ;;  %6519 = vmatmul.mubr.bf16.gmra.mrb[100].mxu1 %v8471_v37 }
 0x2e0   : > { %6522 = vmatprep.mubr.msk.bf16.mxu1 %vm7475_vm0, %v10202_v32  ;;  %v8797_v41 = vpack.c.bf16 %v2187_v6, %v2186_v36  ;;  %v8807_v36 = vld [vmem:[%s10185_s2] ss:$0 sm:$0xff] }
 0x2e1   : > { %v3811_v5 = vpack.c.bf16 %v3562_v7, %v3561_v19  ;;  %v1507_v37 = vpop.f32.mrb[212].mxu0 }
 0x2e2   : > { %v2570_v21 = vpop.f32.mrb[252].mxu1  ;;  %v1508_v58 = vadd.f32 %v8497_v9, %v1507_v37  ;;  %v6108_v61 = vpop.f32.mrb[213].mxu0 }
 0x2e3   : > { %v2571_v35 = vadd.f32 %v8781_v26, %v2570_v21  ;;  %v6416_v15 = vpop.f32.mrb[253].mxu1  ;;  %6927 = vmatmul.mubr.bf16.vlgmr.msra.gmra.mrb[252].mxu0 %v3811_v5  ;;  %v1510_v7 = vpop.f32.mrb[214].mxu0 }
 0x2e4   : > { %v2573_v30 = vpop.f32.mrb[254].mxu1  ;;  %6930 = vmatprep.mubr.msk.bf16.mxu0 %vm7475_vm0, %v10202_v32  ;;  %v2188_v56 = vmax.f32 %v1508_v58, 0.0  ;;  %v1511_v31 = vadd.f32 %v8807_v36, %v1510_v7  ;;  %v6109_v5 = vpop.f32.mrb[215].mxu0 }
 0x2e5   : > { %v2574_v8 = vadd.f32 %v8781_v26, %v2573_v30  ;;  %v6417_v28 = vpop.f32.mrb[255].mxu1  ;;  %v3563_v19 = vmax.f32 %v2571_v35, 0.0 }
 0x2e6   : > { %v2189_v9 = vmax.f32 %v1511_v31, 0.0 }
 0x2e7   : > { %v3564_v48 = vmax.f32 %v2574_v8, 0.0  ;;  %6523 = vmatmul.mubr.bf16.gmra.mrb[104].mxu1 %v8487_v47 }
 0x2e8   : > { %6526 = vmatprep.mubr.msk.bf16.mxu1 %vm7475_vm0, %v10202_v32  ;;  %v8813_v47 = vpack.c.bf16 %v2189_v9, %v2188_v56 }
 0x2e9   : > { %v3812_v6 = vpack.c.bf16 %v3564_v48, %v3563_v19  ;;  %v1515_v37 = vpop.f32.mrb[216].mxu0 }
 0x2ea   : > { %v2578_v21 = vpop.f32.mrb[0].mxu1  ;;  %v1516_v58 = vadd.f32 %v8807_v36, %v1515_v37  ;;  %v6112_v61 = vpop.f32.mrb[217].mxu0 }
 0x2eb   : > { %v2579_v35 = vadd.f32 %v8781_v26, %v2578_v21  ;;  %v6420_v15 = vpop.f32.mrb[1].mxu1  ;;  %6931 = vmatmul.mubr.bf16.gmra.mrb[0].mxu0 %v3812_v6  ;;  %v1518_v7 = vpop.f32.mrb[218].mxu0 }
 0x2ec   : > { %v2581_v30 = vpop.f32.mrb[2].mxu1  ;;  %6934 = vmatprep.mubr.msk.bf16.mxu0 %vm7475_vm0, %v10202_v32  ;;  %v2190_v31 = vmax.f32 %v1516_v58, 0.0  ;;  %v1519_v56 = vadd.f32 %v8807_v36, %v1518_v7  ;;  %v6113_v5 = vpop.f32.mrb[219].mxu0 }
 0x2ed   : > { %v2582_v8 = vadd.f32 %v8781_v26, %v2581_v30  ;;  %v6421_v28 = vpop.f32.mrb[3].mxu1  ;;  %v3565_v19 = vmax.f32 %v2579_v35, 0.0 }
 0x2ee   : > { %v2191_v9 = vmax.f32 %v1519_v56, 0.0 }
 0x2ef   : > { %v3566_v48 = vmax.f32 %v2582_v8, 0.0  ;;  %6527 = vmatmul.mubr.bf16.gmra.mrb[108].mxu1 %v8511_v1 }
 0x2f0   : > { %6530 = vmatprep.mubr.msk.bf16.mxu1 %vm7475_vm0, %v10202_v32  ;;  %v8824_v37 = vpack.c.bf16 %v2191_v9, %v2190_v31 }
 0x2f1   : > { %v3813_v6 = vpack.c.bf16 %v3566_v48, %v3565_v19  ;;  %v1523_v1 = vpop.f32.mrb[220].mxu0 }
 0x2f2   : > { %v2586_v21 = vpop.f32.mrb[4].mxu1  ;;  %v1524_v58 = vadd.f32 %v8807_v36, %v1523_v1  ;;  %v6116_v61 = vpop.f32.mrb[221].mxu0 }
 0x2f3   : > { %v2587_v15 = vadd.f32 %v8781_v26, %v2586_v21  ;;  %v6424_v30 = vpop.f32.mrb[5].mxu1  ;;  %6935 = vmatmul.mubr.bf16.gmra.mrb[4].mxu0 %v3813_v6  ;;  %v1526_v7 = vpop.f32.mrb[222].mxu0 }
 0x2f4   : > { %v2589_v35 = vpop.f32.mrb[6].mxu1  ;;  %6938 = vmatprep.mubr.msk.bf16.mxu0 %vm7475_vm0, %v10202_v32  ;;  %v2192_v56 = vmax.f32 %v1524_v58, 0.0  ;;  %v1527_v31 = vadd.f32 %v8807_v36, %v1526_v7  ;;  %v6117_v5 = vpop.f32.mrb[223].mxu0 }
 0x2f5   : > { %v2590_v8 = vadd.f32 %v8781_v26, %v2589_v35  ;;  %v6425_v28 = vpop.f32.mrb[7].mxu1  ;;  %v3567_v19 = vmax.f32 %v2587_v15, 0.0 }
 0x2f6   : > { %v2193_v9 = vmax.f32 %v1527_v31, 0.0 }
 0x2f7   : > { %v3568_v48 = vmax.f32 %v2590_v8, 0.0  ;;  %6531 = vmatmul.mubr.bf16.gmra.mrb[112].mxu1 %v8527_v25 }
 0x2f8   : > { %6534 = vmatprep.mubr.msk.bf16.mxu1 %vm7475_vm0, %v10202_v32  ;;  %v8835_v1 = vpack.c.bf16 %v2193_v9, %v2192_v56 }
 0x2f9   : > { %v3814_v6 = vpack.c.bf16 %v3568_v48, %v3567_v19  ;;  %v1531_v25 = vpop.f32.mrb[224].mxu0 }
 0x2fa   : > { %v2594_v21 = vpop.f32.mrb[8].mxu1  ;;  %v1532_v58 = vadd.f32 %v8807_v36, %v1531_v25  ;;  %v6120_v61 = vpop.f32.mrb[225].mxu0 }
 0x2fb   : > { %v2595_v30 = vadd.f32 %v8781_v26, %v2594_v21  ;;  %v6428_v35 = vpop.f32.mrb[9].mxu1  ;;  %6939 = vmatmul.mubr.bf16.gmra.mrb[8].mxu0 %v3814_v6  ;;  %v1534_v7 = vpop.f32.mrb[226].mxu0 }
 0x2fc   : > { %v2597_v15 = vpop.f32.mrb[10].mxu1  ;;  %6942 = vmatprep.mubr.msk.bf16.mxu0 %vm7475_vm0, %v10202_v32  ;;  %v2194_v31 = vmax.f32 %v1532_v58, 0.0  ;;  %v1535_v56 = vadd.f32 %v8807_v36, %v1534_v7  ;;  %v6121_v5 = vpop.f32.mrb[227].mxu0 }
 0x2fd   : > { %v2598_v8 = vadd.f32 %v8781_v26, %v2597_v15  ;;  %v6429_v28 = vpop.f32.mrb[11].mxu1  ;;  %v3569_v19 = vmax.f32 %v2595_v30, 0.0 }
 0x2fe   : > { %v2195_v9 = vmax.f32 %v1535_v56, 0.0 }
 0x2ff   : > { %v3570_v48 = vmax.f32 %v2598_v8, 0.0  ;;  %6535 = vmatmul.mubr.bf16.gmra.mrb[116].mxu1 %v8543_v2 }
 0x300   : > { %6538 = vmatprep.mubr.msk.bf16.mxu1 %vm7475_vm0, %v10202_v32  ;;  %v8846_v25 = vpack.c.bf16 %v2195_v9, %v2194_v31 }
 0x301   : > { %v3815_v6 = vpack.c.bf16 %v3570_v48, %v3569_v19  ;;  %v1539_v2 = vpop.f32.mrb[228].mxu0 }
 0x302   : > { %v2602_v21 = vpop.f32.mrb[12].mxu1  ;;  %v1540_v58 = vadd.f32 %v8807_v36, %v1539_v2  ;;  %v6124_v61 = vpop.f32.mrb[229].mxu0 }
 0x303   : > { %v2603_v35 = vadd.f32 %v8781_v26, %v2602_v21  ;;  %v6432_v15 = vpop.f32.mrb[13].mxu1  ;;  %6943 = vmatmul.mubr.bf16.gmra.mrb[12].mxu0 %v3815_v6  ;;  %v1542_v7 = vpop.f32.mrb[230].mxu0 }
 0x304   : > { %v2605_v30 = vpop.f32.mrb[14].mxu1  ;;  %6946 = vmatprep.mubr.msk.bf16.mxu0 %vm7475_vm0, %v10202_v32  ;;  %v2196_v56 = vmax.f32 %v1540_v58, 0.0  ;;  %v1543_v31 = vadd.f32 %v8807_v36, %v1542_v7  ;;  %v6125_v5 = vpop.f32.mrb[231].mxu0 }
 0x305   : > { %v2606_v8 = vadd.f32 %v8781_v26, %v2605_v30  ;;  %v6433_v28 = vpop.f32.mrb[15].mxu1  ;;  %v3571_v19 = vmax.f32 %v2603_v35, 0.0 }
 0x306   : > { %v2197_v9 = vmax.f32 %v1543_v31, 0.0 }
 0x307   : > { %v3572_v48 = vmax.f32 %v2606_v8, 0.0  ;;  %6539 = vmatmul.mubr.bf16.gmra.mrb[120].mxu1 %v8559_v16 }
 0x308   : > { %6542 = vmatprep.mubr.msk.bf16.mxu1 %vm7475_vm0, %v10202_v32  ;;  %v8857_v2 = vpack.c.bf16 %v2197_v9, %v2196_v56 }
 0x309   : > { %v3816_v6 = vpack.c.bf16 %v3572_v48, %v3571_v19  ;;  %v1547_v16 = vpop.f32.mrb[232].mxu0 }
 0x30a   : > { %v2610_v21 = vpop.f32.mrb[16].mxu1  ;;  %v1548_v58 = vadd.f32 %v8807_v36, %v1547_v16  ;;  %v6128_v61 = vpop.f32.mrb[233].mxu0 }
 0x30b   : > { %v2611_v15 = vadd.f32 %v8781_v26, %v2610_v21  ;;  %v6436_v30 = vpop.f32.mrb[17].mxu1  ;;  %6947 = vmatmul.mubr.bf16.gmra.mrb[16].mxu0 %v3816_v6  ;;  %v1550_v7 = vpop.f32.mrb[234].mxu0 }
 0x30c   : > { %v2613_v35 = vpop.f32.mrb[18].mxu1  ;;  %6950 = vmatprep.mubr.msk.bf16.mxu0 %vm7475_vm0, %v10202_v32  ;;  %v2198_v31 = vmax.f32 %v1548_v58, 0.0  ;;  %v1551_v56 = vadd.f32 %v8807_v36, %v1550_v7  ;;  %v6129_v5 = vpop.f32.mrb[235].mxu0 }
 0x30d   : > { %v2614_v8 = vadd.f32 %v8781_v26, %v2613_v35  ;;  %v6437_v28 = vpop.f32.mrb[19].mxu1  ;;  %v3573_v19 = vmax.f32 %v2611_v15, 0.0 }
 0x30e   : > { %v2199_v9 = vmax.f32 %v1551_v56, 0.0 }
 0x30f   : > { %v3574_v48 = vmax.f32 %v2614_v8, 0.0  ;;  %6543 = vmatmul.mubr.bf16.gmra.mrb[124].mxu1 %v8575_v22 }
 0x310   : > { %6546 = vmatprep.mubr.msk.bf16.mxu1 %vm7475_vm0, %v10202_v32  ;;  %v8868_v16 = vpack.c.bf16 %v2199_v9, %v2198_v31 }
 0x311   : > { %v3817_v6 = vpack.c.bf16 %v3574_v48, %v3573_v19  ;;  %v1555_v22 = vpop.f32.mrb[236].mxu0 }
 0x312   : > { %v2618_v21 = vpop.f32.mrb[20].mxu1  ;;  %v1556_v58 = vadd.f32 %v8807_v36, %v1555_v22  ;;  %v6132_v61 = vpop.f32.mrb[237].mxu0 }
 0x313   : > { %v2619_v30 = vadd.f32 %v8781_v26, %v2618_v21  ;;  %v6440_v35 = vpop.f32.mrb[21].mxu1  ;;  %6951 = vmatmul.mubr.bf16.gmra.mrb[20].mxu0 %v3817_v6  ;;  %v1558_v7 = vpop.f32.mrb[238].mxu0 }
 0x314   : > { %v2621_v15 = vpop.f32.mrb[22].mxu1  ;;  %6954 = vmatprep.mubr.msk.bf16.mxu0 %vm7475_vm0, %v10202_v32  ;;  %v2200_v56 = vmax.f32 %v1556_v58, 0.0  ;;  %v1559_v31 = vadd.f32 %v8807_v36, %v1558_v7  ;;  %v6133_v5 = vpop.f32.mrb[239].mxu0 }
 0x315   : > { %v2622_v8 = vadd.f32 %v8781_v26, %v2621_v15  ;;  %v6441_v28 = vpop.f32.mrb[23].mxu1  ;;  %v3575_v19 = vmax.f32 %v2619_v30, 0.0 }
 0x316   : > { %v2201_v9 = vmax.f32 %v1559_v31, 0.0 }
 0x317   : > { %v3576_v48 = vmax.f32 %v2622_v8, 0.0  ;;  %6547 = vmatmul.mubr.bf16.gmra.mrb[128].mxu1 %v8591_v54 }
 0x318   : > { %6550 = vmatprep.mubr.msk.bf16.mxu1 %vm7475_vm0, %v10202_v32  ;;  %v8879_v22 = vpack.c.bf16 %v2201_v9, %v2200_v56 }
 0x319   : > { %v3818_v6 = vpack.c.bf16 %v3576_v48, %v3575_v19  ;;  %v1563_v54 = vpop.f32.mrb[240].mxu0 }
 0x31a   : > { %v2626_v21 = vpop.f32.mrb[24].mxu1  ;;  %v1564_v58 = vadd.f32 %v8807_v36, %v1563_v54  ;;  %v6136_v61 = vpop.f32.mrb[241].mxu0 }
 0x31b   : > { %v2627_v35 = vadd.f32 %v8781_v26, %v2626_v21  ;;  %v6444_v15 = vpop.f32.mrb[25].mxu1  ;;  %6955 = vmatmul.mubr.bf16.gmra.mrb[24].mxu0 %v3818_v6  ;;  %v1566_v7 = vpop.f32.mrb[242].mxu0 }
 0x31c   : > { %v2629_v30 = vpop.f32.mrb[26].mxu1  ;;  %6958 = vmatprep.mubr.msk.bf16.mxu0 %vm7475_vm0, %v10202_v32  ;;  %v2202_v31 = vmax.f32 %v1564_v58, 0.0  ;;  %v1567_v56 = vadd.f32 %v8807_v36, %v1566_v7  ;;  %v6137_v5 = vpop.f32.mrb[243].mxu0 }
 0x31d   : > { %v2630_v8 = vadd.f32 %v8781_v26, %v2629_v30  ;;  %v6445_v28 = vpop.f32.mrb[27].mxu1  ;;  %v3577_v19 = vmax.f32 %v2627_v35, 0.0 }
 0x31e   : > { %v2203_v9 = vmax.f32 %v1567_v56, 0.0 }
 0x31f   : > { %v3578_v48 = vmax.f32 %v2630_v8, 0.0  ;;  %6551 = vmatmul.mubr.bf16.gmra.mrb[132].mxu1 %v8607_v10 }
 0x320   : > { %6554 = vmatprep.mubr.msk.bf16.mxu1 %vm7475_vm0, %v10202_v32  ;;  %v8890_v54 = vpack.c.bf16 %v2203_v9, %v2202_v31 }
 0x321   : > { %v3819_v6 = vpack.c.bf16 %v3578_v48, %v3577_v19  ;;  %v1571_v10 = vpop.f32.mrb[244].mxu0 }
 0x322   : > { %v2634_v21 = vpop.f32.mrb[28].mxu1  ;;  %v1572_v58 = vadd.f32 %v8807_v36, %v1571_v10  ;;  %v6140_v61 = vpop.f32.mrb[245].mxu0 }
 0x323   : > { %v2635_v15 = vadd.f32 %v8781_v26, %v2634_v21  ;;  %v6448_v30 = vpop.f32.mrb[29].mxu1  ;;  %6959 = vmatmul.mubr.bf16.gmra.mrb[28].mxu0 %v3819_v6  ;;  %v1574_v7 = vpop.f32.mrb[246].mxu0 }
 0x324   : > { %v2637_v35 = vpop.f32.mrb[30].mxu1  ;;  %6962 = vmatprep.mubr.msk.bf16.mxu0 %vm7475_vm0, %v10202_v32  ;;  %v2204_v56 = vmax.f32 %v1572_v58, 0.0  ;;  %v1575_v31 = vadd.f32 %v8807_v36, %v1574_v7  ;;  %v6141_v5 = vpop.f32.mrb[247].mxu0 }
 0x325   : > { %v2638_v8 = vadd.f32 %v8781_v26, %v2637_v35  ;;  %v6449_v28 = vpop.f32.mrb[31].mxu1  ;;  %v3579_v19 = vmax.f32 %v2635_v15, 0.0 }
 0x326   : > { %v2205_v9 = vmax.f32 %v1575_v31, 0.0 }
 0x327   : > { %v3580_v48 = vmax.f32 %v2638_v8, 0.0  ;;  %6555 = vmatmul.mubr.bf16.gmra.mrb[136].mxu1 %v8618_v57 }
 0x328   : > { %6558 = vmatprep.mubr.msk.bf16.mxu1 %vm7475_vm0, %v10202_v32  ;;  %v8901_v10 = vpack.c.bf16 %v2205_v9, %v2204_v56 }
 0x329   : > { %v3820_v6 = vpack.c.bf16 %v3580_v48, %v3579_v19  ;;  %v1579_v57 = vpop.f32.mrb[248].mxu0 }
 0x32a   : > { %v2642_v21 = vpop.f32.mrb[32].mxu1  ;;  %v1580_v58 = vadd.f32 %v8807_v36, %v1579_v57  ;;  %v6144_v61 = vpop.f32.mrb[249].mxu0 }
 0x32b   : > { %v2643_v30 = vadd.f32 %v8781_v26, %v2642_v21  ;;  %v6452_v35 = vpop.f32.mrb[33].mxu1  ;;  %6963 = vmatmul.mubr.bf16.gmra.mrb[32].mxu0 %v3820_v6  ;;  %v1582_v7 = vpop.f32.mrb[250].mxu0 }
 0x32c   : > { %v2645_v15 = vpop.f32.mrb[34].mxu1  ;;  %6966 = vmatprep.mubr.msk.bf16.mxu0 %vm7475_vm0, %v10202_v32  ;;  %v2206_v31 = vmax.f32 %v1580_v58, 0.0  ;;  %v1583_v56 = vadd.f32 %v8807_v36, %v1582_v7  ;;  %v6145_v5 = vpop.f32.mrb[251].mxu0 }
 0x32d   : > { %v2646_v8 = vadd.f32 %v8781_v26, %v2645_v15  ;;  %v6453_v28 = vpop.f32.mrb[35].mxu1  ;;  %v3581_v19 = vmax.f32 %v2643_v30, 0.0 }
 0x32e   : > { %v2207_v9 = vmax.f32 %v1583_v56, 0.0 }
 0x32f   : > { %v3582_v48 = vmax.f32 %v2646_v8, 0.0  ;;  %6559 = vmatmul.mubr.bf16.gmra.mrb[140].mxu1 %v8629_v4 }
 0x330   : > { %6562 = vmatprep.mubr.msk.bf16.mxu1 %vm7475_vm0, %v10202_v32  ;;  %v8912_v57 = vpack.c.bf16 %v2207_v9, %v2206_v31 }
 0x331   : > { %v3821_v6 = vpack.c.bf16 %v3582_v48, %v3581_v19 }
 0x332   : > { %v2650_v21 = vpop.f32.mrb[36].mxu1 }
 0x333   : > { %v2651_v35 = vadd.f32 %v8781_v26, %v2650_v21  ;;  %v6456_v15 = vpop.f32.mrb[37].mxu1  ;;  %6967 = vmatmul.mubr.bf16.gmra.mrb[36].mxu0 %v3821_v6 }
 0x334   : > { %v2653_v30 = vpop.f32.mrb[38].mxu1  ;;  %6970 = vmatprep.mubr.msk.bf16.mxu0 %vm7475_vm0, %v10202_v32 }
 0x335   : > { %v2654_v4 = vadd.f32 %v8781_v26, %v2653_v30  ;;  %v6457_v36 = vpop.f32.mrb[39].mxu1  ;;  %v3583_v8 = vmax.f32 %v2651_v35, 0.0 }
 0x337   : > { %v3584_v28 = vmax.f32 %v2654_v4, 0.0  ;;  %6563 = vmatmul.mubr.bf16.gmra.mrb[144].mxu1 %v8640_v60 }
 0x338   : > { %6566 = vmatprep.mubr.msk.bf16.mxu1 %vm7475_vm0, %v10202_v32 }
 0x339   : > { %v3822_v58 = vpack.c.bf16 %v3584_v28, %v3583_v8 }
 0x33a   : > { %v2658_v61 = vpop.f32.mrb[40].mxu1 }
 0x33b   : > { %v2659_v7 = vadd.f32 %v8781_v26, %v2658_v61  ;;  %v6460_v19 = vpop.f32.mrb[41].mxu1  ;;  %6971 = vmatmul.mubr.bf16.gmra.mrb[40].mxu0 %v3822_v58 }
 0x33c   : > { %v2661_v48 = vpop.f32.mrb[42].mxu1  ;;  %6974 = vmatprep.mubr.msk.bf16.mxu0 %vm7475_vm0, %v10202_v32 }
 0x33d   : > { %v2662_v31 = vadd.f32 %v8781_v26, %v2661_v48  ;;  %v6461_v56 = vpop.f32.mrb[43].mxu1  ;;  %v3585_v5 = vmax.f32 %v2659_v7, 0.0 }
 0x33f   : > { %v3586_v6 = vmax.f32 %v2662_v31, 0.0  ;;  %6567 = vmatmul.mubr.bf16.gmra.mrb[148].mxu1 %v8651_v52 }
 0x340   : > { %6570 = vmatprep.mubr.msk.bf16.mxu1 %vm7475_vm0, %v10202_v32 }
 0x341   : > { %v3823_v60 = vpack.c.bf16 %v3586_v6, %v3585_v5 }
 0x342   : > { %v2666_v9 = vpop.f32.mrb[44].mxu1 }
 0x343   : > { %v2667_v21 = vadd.f32 %v8781_v26, %v2666_v9  ;;  %v6464_v35 = vpop.f32.mrb[45].mxu1  ;;  %6975 = vmatmul.mubr.bf16.gmra.mrb[44].mxu0 %v3823_v60 }
 0x344   : > { %v2669_v15 = vpop.f32.mrb[46].mxu1  ;;  %6978 = vmatprep.mubr.msk.bf16.mxu0 %vm7475_vm0, %v10202_v32 }
 0x345   : > { %v2670_v30 = vadd.f32 %v8781_v26, %v2669_v15  ;;  %v6465_v4 = vpop.f32.mrb[47].mxu1  ;;  %v3587_v36 = vmax.f32 %v2667_v21, 0.0 }
 0x347   : > { %v3588_v8 = vmax.f32 %v2670_v30, 0.0  ;;  %6571 = vmatmul.mubr.bf16.gmra.mrb[152].mxu1 %v8662_v43 }
 0x348   : > { %6574 = vmatprep.mubr.msk.bf16.mxu1 %vm7475_vm0, %v10202_v32 }
 0x349   : > { %v3824_v52 = vpack.c.bf16 %v3588_v8, %v3587_v36 }
 0x34a   : > { %v2674_v28 = vpop.f32.mrb[48].mxu1 }
 0x34b   : > { %v2675_v58 = vadd.f32 %v8781_v26, %v2674_v28  ;;  %v6468_v61 = vpop.f32.mrb[49].mxu1  ;;  %6979 = vmatmul.mubr.bf16.gmra.mrb[48].mxu0 %v3824_v52 }
 0x34c   : > { %v2677_v7 = vpop.f32.mrb[50].mxu1  ;;  %6982 = vmatprep.mubr.msk.bf16.mxu0 %vm7475_vm0, %v10202_v32 }
 0x34d   : > { %v2678_v19 = vadd.f32 %v8781_v26, %v2677_v7  ;;  %v6469_v48 = vpop.f32.mrb[51].mxu1  ;;  %v3589_v31 = vmax.f32 %v2675_v58, 0.0 }
 0x34f   : > { %v3590_v56 = vmax.f32 %v2678_v19, 0.0  ;;  %6575 = vmatmul.mubr.bf16.gmra.mrb[156].mxu1 %v8673_v42 }
 0x350   : > { %6578 = vmatprep.mubr.msk.bf16.mxu1 %vm7475_vm0, %v10202_v32 }
 0x351   : > { %v3825_v43 = vpack.c.bf16 %v3590_v56, %v3589_v31 }
 0x352   : > { %v2682_v5 = vpop.f32.mrb[52].mxu1 }
 0x353   : > { %v2683_v6 = vadd.f32 %v8781_v26, %v2682_v5  ;;  %v6472_v60 = vpop.f32.mrb[53].mxu1  ;;  %6983 = vmatmul.mubr.bf16.gmra.mrb[52].mxu0 %v3825_v43 }
 0x354   : > { %v2685_v9 = vpop.f32.mrb[54].mxu1  ;;  %6986 = vmatprep.mubr.msk.bf16.mxu0 %vm7475_vm0, %v10202_v32 }
 0x355   : > { %v2686_v21 = vadd.f32 %v8781_v26, %v2685_v9  ;;  %v6473_v35 = vpop.f32.mrb[55].mxu1  ;;  %v3591_v15 = vmax.f32 %v2683_v6, 0.0 }
 0x357   : > { %v3592_v30 = vmax.f32 %v2686_v21, 0.0  ;;  %6579 = vmatmul.mubr.bf16.gmra.mrb[160].mxu1 %v8684_v53 }
 0x358   : > { %6582 = vmatprep.mubr.msk.bf16.mxu1 %vm7475_vm0, %v10202_v32 }
 0x359   : > { %v3826_v42 = vpack.c.bf16 %v3592_v30, %v3591_v15 }
 0x35a   : > { %v2690_v4 = vpop.f32.mrb[56].mxu1 }
 0x35b   : > { %v2691_v36 = vadd.f32 %v8781_v26, %v2690_v4  ;;  %v6476_v8 = vpop.f32.mrb[57].mxu1  ;;  %6987 = vmatmul.mubr.bf16.gmra.mrb[56].mxu0 %v3826_v42 }
 0x35c   : > { %v2693_v52 = vpop.f32.mrb[58].mxu1  ;;  %6990 = vmatprep.mubr.msk.bf16.mxu0 %vm7475_vm0, %v10202_v32 }
 0x35d   : > { %v2694_v28 = vadd.f32 %v8781_v26, %v2693_v52  ;;  %v6477_v58 = vpop.f32.mrb[59].mxu1  ;;  %v3593_v61 = vmax.f32 %v2691_v36, 0.0 }
 0x35f   : > { %v3594_v7 = vmax.f32 %v2694_v28, 0.0  ;;  %6583 = vmatmul.mubr.bf16.gmra.mrb[164].mxu1 %v8695_v62 }
 0x360   : > { %6586 = vmatprep.mubr.msk.bf16.mxu1 %vm7475_vm0, %v10202_v32 }
 0x361   : > { %v3827_v53 = vpack.c.bf16 %v3594_v7, %v3593_v61 }
 0x362   : > { %v2698_v19 = vpop.f32.mrb[60].mxu1 }
 0x363   : > { %v2699_v48 = vadd.f32 %v8781_v26, %v2698_v19  ;;  %v6480_v31 = vpop.f32.mrb[61].mxu1  ;;  %6991 = vmatmul.mubr.bf16.gmra.mrb[60].mxu0 %v3827_v53 }
 0x364   : > { %v2701_v56 = vpop.f32.mrb[62].mxu1  ;;  %6994 = vmatprep.mubr.msk.bf16.mxu0 %vm7475_vm0, %v10202_v32 }
 0x365   : > { %v2702_v43 = vadd.f32 %v8781_v26, %v2701_v56  ;;  %v6481_v5 = vpop.f32.mrb[63].mxu1  ;;  %v3595_v6 = vmax.f32 %v2699_v48, 0.0 }
 0x367   : > { %v3596_v60 = vmax.f32 %v2702_v43, 0.0  ;;  %6587 = vmatmul.mubr.bf16.gmra.mrb[168].mxu1 %v8706_v11 }
 0x368   : > { %6590 = vmatprep.mubr.msk.bf16.mxu1 %vm7475_vm0, %v10202_v32 }
 0x369   : > { %v3828_v62 = vpack.c.bf16 %v3596_v60, %v3595_v6 }
 0x36a   : > { %v2706_v9 = vpop.f32.mrb[64].mxu1 }
 0x36b   : > { %v2707_v21 = vadd.f32 %v8781_v26, %v2706_v9  ;;  %v6484_v35 = vpop.f32.mrb[65].mxu1  ;;  %6995 = vmatmul.mubr.bf16.gmra.mrb[64].mxu0 %v3828_v62 }
 0x36c   : > { %v2709_v15 = vpop.f32.mrb[66].mxu1  ;;  %6998 = vmatprep.mubr.msk.bf16.mxu0 %vm7475_vm0, %v10202_v32 }
 0x36d   : > { %v2710_v30 = vadd.f32 %v8781_v26, %v2709_v15  ;;  %v6485_v42 = vpop.f32.mrb[67].mxu1  ;;  %v3597_v4 = vmax.f32 %v2707_v21, 0.0 }
 0x36f   : > { %v3598_v36 = vmax.f32 %v2710_v30, 0.0  ;;  %6591 = vmatmul.mubr.bf16.gmra.mrb[172].mxu1 %v8717_v39 }
 0x370   : > { %6594 = vmatprep.mubr.msk.bf16.mxu1 %vm7475_vm0, %v10202_v32 }
 0x371   : > { %v3829_v11 = vpack.c.bf16 %v3598_v36, %v3597_v4 }
 0x372   : > { %v2714_v8 = vpop.f32.mrb[68].mxu1 }
 0x373   : > { %v2715_v52 = vadd.f32 %v8781_v26, %v2714_v8  ;;  %v6488_v28 = vpop.f32.mrb[69].mxu1  ;;  %6999 = vmatmul.mubr.bf16.gmra.mrb[68].mxu0 %v3829_v11 }
 0x374   : > { %v2717_v58 = vpop.f32.mrb[70].mxu1  ;;  %7002 = vmatprep.mubr.msk.bf16.mxu0 %vm7475_vm0, %v10202_v32 }
 0x375   : > { %v2718_v61 = vadd.f32 %v8781_v26, %v2717_v58  ;;  %v6489_v7 = vpop.f32.mrb[71].mxu1  ;;  %v3599_v53 = vmax.f32 %v2715_v52, 0.0 }
 0x377   : > { %v3600_v19 = vmax.f32 %v2718_v61, 0.0  ;;  %6595 = vmatmul.mubr.bf16.gmra.mrb[176].mxu1 %v8728_v44 }
 0x378   : > { %6598 = vmatprep.mubr.msk.bf16.mxu1 %vm7475_vm0, %v10202_v32 }
 0x379   : > { %v3830_v39 = vpack.c.bf16 %v3600_v19, %v3599_v53 }
 0x37a   : > { %v2722_v48 = vpop.f32.mrb[72].mxu1 }
 0x37b   : > { %v2723_v31 = vadd.f32 %v8781_v26, %v2722_v48  ;;  %v6492_v56 = vpop.f32.mrb[73].mxu1  ;;  %7003 = vmatmul.mubr.bf16.gmra.mrb[72].mxu0 %v3830_v39 }
 0x37c   : > { %v2725_v43 = vpop.f32.mrb[74].mxu1  ;;  %7006 = vmatprep.mubr.msk.bf16.mxu0 %vm7475_vm0, %v10202_v32 }
 0x37d   : > { %v2726_v5 = vadd.f32 %v8781_v26, %v2725_v43  ;;  %v6493_v6 = vpop.f32.mrb[75].mxu1  ;;  %v3601_v60 = vmax.f32 %v2723_v31, 0.0 }
 0x37f   : > { %v3602_v62 = vmax.f32 %v2726_v5, 0.0  ;;  %6599 = vmatmul.mubr.bf16.gmra.mrb[180].mxu1 %v8739_v59 }
 0x380   : > { %6602 = vmatprep.mubr.msk.bf16.mxu1 %vm7475_vm0, %v10202_v32 }
 0x381   : > { %v3831_v44 = vpack.c.bf16 %v3602_v62, %v3601_v60 }
 0x382   : > { %v2730_v9 = vpop.f32.mrb[76].mxu1 }
 0x383   : > { %v2731_v21 = vadd.f32 %v8781_v26, %v2730_v9  ;;  %v6496_v35 = vpop.f32.mrb[77].mxu1  ;;  %7007 = vmatmul.mubr.bf16.gmra.mrb[76].mxu0 %v3831_v44 }
 0x384   : > { %v2733_v15 = vpop.f32.mrb[78].mxu1  ;;  %7010 = vmatprep.mubr.msk.bf16.mxu0 %vm7475_vm0, %v10202_v32 }
 0x385   : > { %v2734_v30 = vadd.f32 %v8781_v26, %v2733_v15  ;;  %v6497_v42 = vpop.f32.mrb[79].mxu1  ;;  %v3603_v4 = vmax.f32 %v2731_v21, 0.0 }
 0x387   : > { %v3604_v36 = vmax.f32 %v2734_v30, 0.0  ;;  %6603 = vmatmul.mubr.bf16.gmra.mrb[184].mxu1 %v8750_v29 }
 0x388   : > { %6606 = vmatprep.mubr.msk.bf16.mxu1 %vm7475_vm0, %v10202_v32 }
 0x389   : > { %v3832_v59 = vpack.c.bf16 %v3604_v36, %v3603_v4 }
 0x38a   : > { %v2738_v11 = vpop.f32.mrb[80].mxu1 }
 0x38b   : > { %v2739_v8 = vadd.f32 %v8781_v26, %v2738_v11  ;;  %v6500_v52 = vpop.f32.mrb[81].mxu1  ;;  %7011 = vmatmul.mubr.bf16.gmra.mrb[80].mxu0 %v3832_v59 }
 0x38c   : > { %v2741_v28 = vpop.f32.mrb[82].mxu1  ;;  %7014 = vmatprep.mubr.msk.bf16.mxu0 %vm7475_vm0, %v10202_v32 }
 0x38d   : > { %v2742_v58 = vadd.f32 %v8781_v26, %v2741_v28  ;;  %v6501_v61 = vpop.f32.mrb[83].mxu1  ;;  %v3605_v7 = vmax.f32 %v2739_v8, 0.0 }
 0x38f   : > { %v3606_v53 = vmax.f32 %v2742_v58, 0.0  ;;  %6607 = vmatmul.mubr.bf16.gmra.mrb[188].mxu1 %v8761_v12 }
 0x390   : > { %6610 = vmatprep.mubr.msk.bf16.mxu1 %vm7475_vm0, %v10202_v32 }
 0x391   : > { %v3833_v29 = vpack.c.bf16 %v3606_v53, %v3605_v7 }
 0x392   : > { %v2746_v19 = vpop.f32.mrb[84].mxu1 }
 0x393   : > { %v2747_v39 = vadd.f32 %v8781_v26, %v2746_v19  ;;  %v6504_v48 = vpop.f32.mrb[85].mxu1  ;;  %7015 = vmatmul.mubr.bf16.gmra.mrb[84].mxu0 %v3833_v29 }
 0x394   : > { %v2749_v31 = vpop.f32.mrb[86].mxu1  ;;  %7018 = vmatprep.mubr.msk.bf16.mxu0 %vm7475_vm0, %v10202_v32 }
 0x395   : > { %v2750_v56 = vadd.f32 %v8781_v26, %v2749_v31  ;;  %v6505_v43 = vpop.f32.mrb[87].mxu1  ;;  %v3607_v5 = vmax.f32 %v2747_v39, 0.0 }
 0x397   : > { %v3608_v6 = vmax.f32 %v2750_v56, 0.0  ;;  %6611 = vmatmul.mubr.bf16.gmra.mrb[192].mxu1 %v8772_v24 }
 0x398   : > { %6614 = vmatprep.mubr.msk.bf16.mxu1 %vm7475_vm0, %v10202_v32 }
 0x399   : > { %v3834_v12 = vpack.c.bf16 %v3608_v6, %v3607_v5  ;;  %v9029_v6 = vld [vmem:[%s10189_s6] ss:$0 sm:$0xff] }
 0x39a   : > { %v2754_v60 = vpop.f32.mrb[88].mxu1 }
 0x39b   : > { %v2755_v62 = vadd.f32 %v8781_v26, %v2754_v60  ;;  %v6508_v44 = vpop.f32.mrb[89].mxu1  ;;  %7019 = vmatmul.mubr.bf16.gmra.mrb[88].mxu0 %v3834_v12 }
 0x39c   : > { %v2757_v9 = vpop.f32.mrb[90].mxu1  ;;  %7022 = vmatprep.mubr.msk.bf16.mxu0 %vm7475_vm0, %v10202_v32 }
 0x39d   : > { %v2758_v21 = vadd.f32 %v8781_v26, %v2757_v9  ;;  %v6509_v35 = vpop.f32.mrb[91].mxu1  ;;  %v3609_v15 = vmax.f32 %v2755_v62, 0.0 }
 0x39f   : > { %v3610_v30 = vmax.f32 %v2758_v21, 0.0  ;;  %6615 = vmatmul.mubr.bf16.gmra.mrb[196].mxu1 %v8788_v40 }
 0x3a0   : > { %6618 = vmatprep.mubr.msk.bf16.mxu1 %vm7475_vm0, %v10202_v32 }
 0x3a1   : > { %v3835_v24 = vpack.c.bf16 %v3610_v30, %v3609_v15 }
 0x3a2   : > { %v2762_v42 = vpop.f32.mrb[92].mxu1 }
 0x3a3   : > { %v2763_v4 = vadd.f32 %v8781_v26, %v2762_v42  ;;  %v6512_v36 = vpop.f32.mrb[93].mxu1  ;;  %7023 = vmatmul.mubr.bf16.gmra.mrb[92].mxu0 %v3835_v24 }
 0x3a4   : > { %v2765_v59 = vpop.f32.mrb[94].mxu1  ;;  %7026 = vmatprep.mubr.msk.bf16.mxu0 %vm7475_vm0, %v10202_v32 }
 0x3a5   : > { %v2766_v11 = vadd.f32 %v8781_v26, %v2765_v59  ;;  %v6513_v8 = vpop.f32.mrb[95].mxu1  ;;  %v3611_v52 = vmax.f32 %v2763_v4, 0.0 }
 0x3a7   : > { %v3612_v28 = vmax.f32 %v2766_v11, 0.0  ;;  %6619 = vmatmul.mubr.bf16.gmra.mrb[200].mxu1 %v8797_v41 }
 0x3a8   : > { %6622 = vmatprep.mubr.msk.bf16.mxu1 %vm7475_vm0, %v10202_v32 }
 0x3a9   : > { %v3836_v40 = vpack.c.bf16 %v3612_v28, %v3611_v52 }
 0x3aa   : > { %v2770_v58 = vpop.f32.mrb[96].mxu1 }
 0x3ab   : > { %v2771_v61 = vadd.f32 %v8781_v26, %v2770_v58  ;;  %v6516_v7 = vpop.f32.mrb[97].mxu1  ;;  %7027 = vmatmul.mubr.bf16.gmra.mrb[96].mxu0 %v3836_v40 }
 0x3ac   : > { %v2773_v53 = vpop.f32.mrb[98].mxu1  ;;  %7030 = vmatprep.mubr.msk.bf16.mxu0 %vm7475_vm0, %v10202_v32 }
 0x3ad   : > { %v2774_v29 = vadd.f32 %v8781_v26, %v2773_v53  ;;  %v6517_v19 = vpop.f32.mrb[99].mxu1  ;;  %v3613_v39 = vmax.f32 %v2771_v61, 0.0 }
 0x3af   : > { %v3614_v48 = vmax.f32 %v2774_v29, 0.0  ;;  %6623 = vmatmul.mubr.bf16.gmra.mrb[204].mxu1 %v8813_v47 }
 0x3b0   : > { %6626 = vmatprep.mubr.msk.bf16.mxu1 %vm7475_vm0, %v10202_v32 }
 0x3b1   : > { %v3837_v41 = vpack.c.bf16 %v3614_v48, %v3613_v39 }
 0x3b2   : > { %v2778_v31 = vpop.f32.mrb[100].mxu1 }
 0x3b3   : > { %v2779_v56 = vadd.f32 %v8781_v26, %v2778_v31  ;;  %v6520_v43 = vpop.f32.mrb[101].mxu1  ;;  %7031 = vmatmul.mubr.bf16.gmra.mrb[100].mxu0 %v3837_v41 }
 0x3b4   : > { %v2781_v5 = vpop.f32.mrb[102].mxu1  ;;  %7034 = vmatprep.mubr.msk.bf16.mxu0 %vm7475_vm0, %v10202_v32 }
 0x3b5   : > { %v2782_v47 = vadd.f32 %v8781_v26, %v2781_v5  ;;  %v6521_v12 = vpop.f32.mrb[103].mxu1  ;;  %v3615_v62 = vmax.f32 %v2779_v56, 0.0 }
 0x3b6   : > { %v4041_v60 = vpop.f32.mrb[252].mxu0 }
 0x3b7   : > { %v3616_v44 = vmax.f32 %v2782_v47, 0.0  ;;  %v4042_v9 = vadd.f32 %v9029_v6, %v4041_v60  ;;  %6627 = vmatmul.mubr.bf16.gmra.mrb[208].mxu1 %v8824_v37  ;;  %v6928_v21 = vpop.f32.mrb[253].mxu0 }
 0x3b8   : > { %v4044_v35 = vpop.f32.mrb[254].mxu0  ;;  %6630 = vmatprep.mubr.msk.bf16.mxu1 %vm7475_vm0, %v10202_v32 }
 0x3b9   : > { %v3838_v15 = vpack.c.bf16 %v3616_v44, %v3615_v62  ;;  %5040 = vst [vmem:[%s9039_s17] sm:$0xff] %v4042_v9  ;;  %v4045_v30 = vadd.f32 %v9029_v6, %v4044_v35  ;;  %v6929_v24 = vpop.f32.mrb[255].mxu0 }
 0x3ba   : > { %v2786_v42 = vpop.f32.mrb[104].mxu1 }
 0x3bb   : > { %5041 = vst [vmem:[%s9039_s17 + $0x8] sm:$0xff] %v4045_v30  ;;  %v2787_v4 = vadd.f32 %v8781_v26, %v2786_v42  ;;  %v6524_v36 = vpop.f32.mrb[105].mxu1  ;;  %7035 = vmatmul.mubr.bf16.gmra.mrb[104].mxu0 %v3838_v15 }
 0x3bc   : > { %v2789_v59 = vpop.f32.mrb[106].mxu1  ;;  %7038 = vmatprep.mubr.msk.bf16.mxu0 %vm7475_vm0, %v10202_v32 }
 0x3bd   : > { %v2790_v37 = vadd.f32 %v8781_v26, %v2789_v59  ;;  %v6525_v11 = vpop.f32.mrb[107].mxu1  ;;  %v3617_v52 = vmax.f32 %v2787_v4, 0.0 }
 0x3be   : > { %v4049_v8 = vpop.f32.mrb[0].mxu0 }
 0x3bf   : > { %v3618_v28 = vmax.f32 %v2790_v37, 0.0  ;;  %v4050_v40 = vadd.f32 %v9029_v6, %v4049_v8  ;;  %6631 = vmatmul.mubr.bf16.gmra.mrb[212].mxu1 %v8835_v1  ;;  %v6932_v58 = vpop.f32.mrb[1].mxu0 }
 0x3c0   : > { %v4052_v61 = vpop.f32.mrb[2].mxu0  ;;  %6634 = vmatprep.mubr.msk.bf16.mxu1 %vm7475_vm0, %v10202_v32 }
 0x3c1   : > { %v3839_v7 = vpack.c.bf16 %v3618_v28, %v3617_v52  ;;  %5042 = vst [vmem:[%s9039_s17 + $0x10] sm:$0xff] %v4050_v40  ;;  %v4053_v53 = vadd.f32 %v9029_v6, %v4052_v61  ;;  %v6933_v29 = vpop.f32.mrb[3].mxu0 }
 0x3c2   : > { %v2794_v19 = vpop.f32.mrb[108].mxu1 }
 0x3c3   : > { %5043 = vst [vmem:[%s9039_s17 + $0x18] sm:$0xff] %v4053_v53  ;;  %v2795_v39 = vadd.f32 %v8781_v26, %v2794_v19  ;;  %v6528_v48 = vpop.f32.mrb[109].mxu1  ;;  %7039 = vmatmul.mubr.bf16.gmra.mrb[108].mxu0 %v3839_v7 }
 0x3c4   : > { %v2797_v41 = vpop.f32.mrb[110].mxu1  ;;  %7042 = vmatprep.mubr.msk.bf16.mxu0 %vm7475_vm0, %v10202_v32 }
 0x3c5   : > { %v2798_v1 = vadd.f32 %v8781_v26, %v2797_v41  ;;  %v6529_v31 = vpop.f32.mrb[111].mxu1  ;;  %v3619_v43 = vmax.f32 %v2795_v39, 0.0  ;;  %v9073_v26 = vld [vmem:[%s10187_s4] ss:$0 sm:$0xff] }
 0x3c6   : > { %v4057_v56 = vpop.f32.mrb[4].mxu0 }
 0x3c7   : > { %v3620_v5 = vmax.f32 %v2798_v1, 0.0  ;;  %v4058_v47 = vadd.f32 %v9029_v6, %v4057_v56  ;;  %6635 = vmatmul.mubr.bf16.gmra.mrb[216].mxu1 %v8846_v25  ;;  %v6936_v12 = vpop.f32.mrb[5].mxu0 }
 0x3c8   : > { %v4060_v60 = vpop.f32.mrb[6].mxu0  ;;  %6638 = vmatprep.mubr.msk.bf16.mxu1 %vm7475_vm0, %v10202_v32 }
 0x3c9   : > { %v3840_v62 = vpack.c.bf16 %v3620_v5, %v3619_v43  ;;  %5044 = vst [vmem:[%s9039_s17 + $0x20] sm:$0xff] %v4058_v47  ;;  %v4061_v44 = vadd.f32 %v9029_v6, %v4060_v60  ;;  %v6937_v9 = vpop.f32.mrb[7].mxu0 }
 0x3ca   : > { %v2802_v21 = vpop.f32.mrb[112].mxu1 }
 0x3cb   : > { %5045 = vst [vmem:[%s9039_s17 + $0x28] sm:$0xff] %v4061_v44  ;;  %v2803_v35 = vadd.f32 %v9073_v26, %v2802_v21  ;;  %v6532_v25 = vpop.f32.mrb[113].mxu1  ;;  %7043 = vmatmul.mubr.bf16.gmra.mrb[112].mxu0 %v3840_v62 }
 0x3cc   : > { %v2805_v15 = vpop.f32.mrb[114].mxu1  ;;  %7046 = vmatprep.mubr.msk.bf16.mxu0 %vm7475_vm0, %v10202_v32 }
 0x3cd   : > { %v2806_v30 = vadd.f32 %v9073_v26, %v2805_v15  ;;  %v6533_v24 = vpop.f32.mrb[115].mxu1  ;;  %v3621_v4 = vmax.f32 %v2803_v35, 0.0 }
 0x3ce   : > { %v4065_v42 = vpop.f32.mrb[8].mxu0 }
 0x3cf   : > { %v3622_v36 = vmax.f32 %v2806_v30, 0.0  ;;  %v4066_v59 = vadd.f32 %v9029_v6, %v4065_v42  ;;  %6639 = vmatmul.mubr.bf16.gmra.mrb[220].mxu1 %v8857_v2  ;;  %v6940_v37 = vpop.f32.mrb[9].mxu0 }
 0x3d0   : > { %v4068_v11 = vpop.f32.mrb[10].mxu0  ;;  %6642 = vmatprep.mubr.msk.bf16.mxu1 %vm7475_vm0, %v10202_v32 }
 0x3d1   : > { %v3841_v8 = vpack.c.bf16 %v3622_v36, %v3621_v4  ;;  %5046 = vst [vmem:[%s9039_s17 + $0x30] sm:$0xff] %v4066_v59  ;;  %v4069_v52 = vadd.f32 %v9029_v6, %v4068_v11  ;;  %v6941_v28 = vpop.f32.mrb[11].mxu0 }
 0x3d2   : > { %v2810_v40 = vpop.f32.mrb[116].mxu1 }
 0x3d3   : > { %5047 = vst [vmem:[%s9039_s17 + $0x38] sm:$0xff] %v4069_v52  ;;  %v2811_v58 = vadd.f32 %v9073_v26, %v2810_v40  ;;  %v6536_v61 = vpop.f32.mrb[117].mxu1  ;;  %7047 = vmatmul.mubr.bf16.gmra.mrb[116].mxu0 %v3841_v8 }
 0x3d4   : > { %v2813_v7 = vpop.f32.mrb[118].mxu1  ;;  %7050 = vmatprep.mubr.msk.bf16.mxu0 %vm7475_vm0, %v10202_v32 }
 0x3d5   : > { %v2814_v2 = vadd.f32 %v9073_v26, %v2813_v7  ;;  %v6537_v53 = vpop.f32.mrb[119].mxu1  ;;  %v3623_v19 = vmax.f32 %v2811_v58, 0.0 }
 0x3d6   : > { %v4073_v29 = vpop.f32.mrb[12].mxu0 }
 0x3d7   : > { %v3624_v39 = vmax.f32 %v2814_v2, 0.0  ;;  %v4074_v48 = vadd.f32 %v9029_v6, %v4073_v29  ;;  %6643 = vmatmul.mubr.bf16.gmra.mrb[224].mxu1 %v8868_v16  ;;  %v6944_v41 = vpop.f32.mrb[13].mxu0 }
 0x3d8   : > { %v4076_v1 = vpop.f32.mrb[14].mxu0  ;;  %6646 = vmatprep.mubr.msk.bf16.mxu1 %vm7475_vm0, %v10202_v32 }
 0x3d9   : > { %v3842_v31 = vpack.c.bf16 %v3624_v39, %v3623_v19  ;;  %5048 = vst [vmem:[%s9039_s17 + $0x40] sm:$0xff] %v4074_v48  ;;  %v4077_v56 = vadd.f32 %v9029_v6, %v4076_v1  ;;  %v6945_v43 = vpop.f32.mrb[15].mxu0 }
 0x3da   : > { %v2818_v5 = vpop.f32.mrb[120].mxu1 }
 0x3db   : > { %5049 = vst [vmem:[%s9039_s17 + $0x48] sm:$0xff] %v4077_v56  ;;  %v2819_v47 = vadd.f32 %v9073_v26, %v2818_v5  ;;  %v6540_v12 = vpop.f32.mrb[121].mxu1  ;;  %7051 = vmatmul.mubr.bf16.gmra.mrb[120].mxu0 %v3842_v31 }
 0x3dc   : > { %v2821_v60 = vpop.f32.mrb[122].mxu1  ;;  %7054 = vmatprep.mubr.msk.bf16.mxu0 %vm7475_vm0, %v10202_v32 }
 0x3dd   : > { %v2822_v16 = vadd.f32 %v9073_v26, %v2821_v60  ;;  %v6541_v62 = vpop.f32.mrb[123].mxu1  ;;  %v3625_v9 = vmax.f32 %v2819_v47, 0.0 }
 0x3de   : > { %v4081_v44 = vpop.f32.mrb[16].mxu0 }
 0x3df   : > { %v3626_v21 = vmax.f32 %v2822_v16, 0.0  ;;  %v4082_v35 = vadd.f32 %v9029_v6, %v4081_v44  ;;  %6647 = vmatmul.mubr.bf16.gmra.mrb[228].mxu1 %v8879_v22  ;;  %v6948_v25 = vpop.f32.mrb[17].mxu0 }
 0x3e0   : > { %v4084_v15 = vpop.f32.mrb[18].mxu0  ;;  %6650 = vmatprep.mubr.msk.bf16.mxu1 %vm7475_vm0, %v10202_v32 }
 0x3e1   : > { %v3843_v30 = vpack.c.bf16 %v3626_v21, %v3625_v9  ;;  %5050 = vst [vmem:[%s9039_s17 + $0x50] sm:$0xff] %v4082_v35  ;;  %v4085_v24 = vadd.f32 %v9029_v6, %v4084_v15  ;;  %v6949_v42 = vpop.f32.mrb[19].mxu0 }
 0x3e2   : > { %v2826_v4 = vpop.f32.mrb[124].mxu1 }
 0x3e3   : > { %5051 = vst [vmem:[%s9039_s17 + $0x58] sm:$0xff] %v4085_v24  ;;  %v2827_v36 = vadd.f32 %v9073_v26, %v2826_v4  ;;  %v6544_v59 = vpop.f32.mrb[125].mxu1  ;;  %7055 = vmatmul.mubr.bf16.gmra.mrb[124].mxu0 %v3843_v30 }
 0x3e4   : > { %v2829_v37 = vpop.f32.mrb[126].mxu1  ;;  %7058 = vmatprep.mubr.msk.bf16.mxu0 %vm7475_vm0, %v10202_v32 }
 0x3e5   : > { %v2830_v22 = vadd.f32 %v9073_v26, %v2829_v37  ;;  %v6545_v11 = vpop.f32.mrb[127].mxu1  ;;  %v3627_v52 = vmax.f32 %v2827_v36, 0.0 }
 0x3e6   : > { %v4089_v8 = vpop.f32.mrb[20].mxu0 }
 0x3e7   : > { %v3628_v28 = vmax.f32 %v2830_v22, 0.0  ;;  %v4090_v40 = vadd.f32 %v9029_v6, %v4089_v8  ;;  %6651 = vmatmul.mubr.bf16.gmra.mrb[232].mxu1 %v8890_v54  ;;  %v6952_v58 = vpop.f32.mrb[21].mxu0 }
 0x3e8   : > { %v4092_v61 = vpop.f32.mrb[22].mxu0  ;;  %6654 = vmatprep.mubr.msk.bf16.mxu1 %vm7475_vm0, %v10202_v32 }
 0x3e9   : > { %v3844_v7 = vpack.c.bf16 %v3628_v28, %v3627_v52  ;;  %5052 = vst [vmem:[%s9039_s17 + $0x60] sm:$0xff] %v4090_v40  ;;  %v4093_v2 = vadd.f32 %v9029_v6, %v4092_v61  ;;  %v6953_v53 = vpop.f32.mrb[23].mxu0 }
 0x3ea   : > { %v2834_v29 = vpop.f32.mrb[128].mxu1 }
 0x3eb   : > { %5053 = vst [vmem:[%s9039_s17 + $0x68] sm:$0xff] %v4093_v2  ;;  %v2835_v19 = vadd.f32 %v9073_v26, %v2834_v29  ;;  %v6548_v39 = vpop.f32.mrb[129].mxu1  ;;  %7059 = vmatmul.mubr.bf16.gmra.mrb[128].mxu0 %v3844_v7 }
 0x3ec   : > { %v2837_v48 = vpop.f32.mrb[130].mxu1  ;;  %7062 = vmatprep.mubr.msk.bf16.mxu0 %vm7475_vm0, %v10202_v32 }
 0x3ed   : > { %v2838_v54 = vadd.f32 %v9073_v26, %v2837_v48  ;;  %v6549_v41 = vpop.f32.mrb[131].mxu1  ;;  %v3629_v31 = vmax.f32 %v2835_v19, 0.0 }
 0x3ee   : > { %v4097_v1 = vpop.f32.mrb[24].mxu0 }
 0x3ef   : > { %v3630_v56 = vmax.f32 %v2838_v54, 0.0  ;;  %v4098_v43 = vadd.f32 %v9029_v6, %v4097_v1  ;;  %6655 = vmatmul.mubr.bf16.gmra.mrb[236].mxu1 %v8901_v10  ;;  %v6956_v5 = vpop.f32.mrb[25].mxu0 }
 0x3f0   : > { %v4100_v47 = vpop.f32.mrb[26].mxu0  ;;  %6658 = vmatprep.mubr.msk.bf16.mxu1 %vm7475_vm0, %v10202_v32 }
 0x3f1   : > { %v3845_v12 = vpack.c.bf16 %v3630_v56, %v3629_v31  ;;  %5054 = vst [vmem:[%s9039_s17 + $0x70] sm:$0xff] %v4098_v43  ;;  %v4101_v60 = vadd.f32 %v9029_v6, %v4100_v47  ;;  %v6957_v16 = vpop.f32.mrb[27].mxu0 }
 0x3f2   : > { %v2842_v62 = vpop.f32.mrb[132].mxu1 }
 0x3f3   : > { %5055 = vst [vmem:[%s9039_s17 + $0x78] sm:$0xff] %v4101_v60  ;;  %v2843_v44 = vadd.f32 %v9073_v26, %v2842_v62  ;;  %v6552_v9 = vpop.f32.mrb[133].mxu1  ;;  %7063 = vmatmul.mubr.bf16.gmra.mrb[132].mxu0 %v3845_v12 }
 0x3f4   : > { %v2845_v21 = vpop.f32.mrb[134].mxu1  ;;  %7066 = vmatprep.mubr.msk.bf16.mxu0 %vm7475_vm0, %v10202_v32 }
 0x3f5   : > { %v2846_v10 = vadd.f32 %v9073_v26, %v2845_v21  ;;  %v6553_v35 = vpop.f32.mrb[135].mxu1  ;;  %v3631_v15 = vmax.f32 %v2843_v44, 0.0 }
 0x3f6   : > { %v4105_v25 = vpop.f32.mrb[28].mxu0 }
 0x3f7   : > { %v3632_v30 = vmax.f32 %v2846_v10, 0.0  ;;  %v4106_v24 = vadd.f32 %v9029_v6, %v4105_v25  ;;  %6659 = vmatmul.mubr.bf16.gmra.mrb[240].mxu1 %v8912_v57  ;;  %v6960_v42 = vpop.f32.mrb[29].mxu0 }
 0x3f8   : > { %v4108_v4 = vpop.f32.mrb[30].mxu0  ;;  %6662 = vmatprep.mubr.msk.bf16.mxu1 %vm7475_vm0, %v10202_v32 }
 0x3f9   : > { %v3846_v36 = vpack.c.bf16 %v3632_v30, %v3631_v15  ;;  %5056 = vst [vmem:[%s9039_s17 + $0x80] sm:$0xff] %v4106_v24  ;;  %v4109_v59 = vadd.f32 %v9029_v6, %v4108_v4  ;;  %v6961_v37 = vpop.f32.mrb[31].mxu0 }
 0x3fa   : > { %v2850_v22 = vpop.f32.mrb[136].mxu1 }
 0x3fb   : > { %5057 = vst [vmem:[%s9039_s17 + $0x88] sm:$0xff] %v4109_v59  ;;  %v2851_v11 = vadd.f32 %v9073_v26, %v2850_v22  ;;  %v6556_v8 = vpop.f32.mrb[137].mxu1  ;;  %7067 = vmatmul.mubr.bf16.gmra.mrb[136].mxu0 %v3846_v36 }
 0x3fc   : > { %v2853_v52 = vpop.f32.mrb[138].mxu1  ;;  %7070 = vmatprep.mubr.msk.bf16.mxu0 %vm7475_vm0, %v10202_v32 }
 0x3fd   : > { %v2854_v57 = vadd.f32 %v9073_v26, %v2853_v52  ;;  %v6557_v28 = vpop.f32.mrb[139].mxu1  ;;  %v3633_v58 = vmax.f32 %v2851_v11, 0.0 }
 0x3fe   : > { %v4113_v40 = vpop.f32.mrb[32].mxu0 }
 0x3ff   : > { %v3634_v61 = vmax.f32 %v2854_v57, 0.0  ;;  %v4114_v7 = vadd.f32 %v9029_v6, %v4113_v40  ;;  %6663 = vmatmul.mubr.bf16.gmra.mrb[244].mxu1 %v7818_v34  ;;  %v6964_v2 = vpop.f32.mrb[33].mxu0 }
 0x400   : > { %v4116_v53 = vpop.f32.mrb[34].mxu0  ;;  %6666 = vmatprep.mubr.msk.bf16.mxu1 %vm7475_vm0, %v10202_v32 }
 0x401   : > { %v3847_v29 = vpack.c.bf16 %v3634_v61, %v3633_v58  ;;  %5058 = vst [vmem:[%s9039_s17 + $0x90] sm:$0xff] %v4114_v7  ;;  %v4117_v19 = vadd.f32 %v9029_v6, %v4116_v53  ;;  %v6965_v39 = vpop.f32.mrb[35].mxu0 }
 0x402   : > { %v2858_v48 = vpop.f32.mrb[140].mxu1 }
 0x403   : > { %5059 = vst [vmem:[%s9039_s17 + $0x98] sm:$0xff] %v4117_v19  ;;  %v2859_v54 = vadd.f32 %v9073_v26, %v2858_v48  ;;  %v6560_v41 = vpop.f32.mrb[141].mxu1  ;;  %7071 = vmatmul.mubr.bf16.gmra.mrb[140].mxu0 %v3847_v29 }
 0x404   : > { %v2861_v1 = vpop.f32.mrb[142].mxu1  ;;  %7074 = vmatprep.mubr.msk.bf16.mxu0 %vm7475_vm0, %v10202_v32 }
 0x405   : > { %v2862_v34 = vadd.f32 %v9073_v26, %v2861_v1  ;;  %v6561_v31 = vpop.f32.mrb[143].mxu1  ;;  %v3635_v43 = vmax.f32 %v2859_v54, 0.0 }
 0x406   : > { %v4121_v56 = vpop.f32.mrb[36].mxu0 }
 0x407   : > { %v3636_v5 = vmax.f32 %v2862_v34, 0.0  ;;  %v4122_v47 = vadd.f32 %v9029_v6, %v4121_v56  ;;  %6667 = vmatmul.mubr.bf16.gmra.mrb[248].mxu1 %v7832_v49  ;;  %v6968_v12 = vpop.f32.mrb[37].mxu0 }
 0x408   : > { %v4124_v60 = vpop.f32.mrb[38].mxu0  ;;  %6670 = vmatprep.mubr.msk.bf16.mxu1 %vm7475_vm0, %v10202_v32 }
 0x409   : > { %v3848_v16 = vpack.c.bf16 %v3636_v5, %v3635_v43  ;;  %5060 = vst [vmem:[%s9039_s17 + $0xa0] sm:$0xff] %v4122_v47  ;;  %v4125_v62 = vadd.f32 %v9029_v6, %v4124_v60  ;;  %v6969_v44 = vpop.f32.mrb[39].mxu0 }
 0x40a   : > { %v2866_v9 = vpop.f32.mrb[144].mxu1 }
 0x40b   : > { %5061 = vst [vmem:[%s9039_s17 + $0xa8] sm:$0xff] %v4125_v62  ;;  %v2867_v21 = vadd.f32 %v9073_v26, %v2866_v9  ;;  %v6564_v10 = vpop.f32.mrb[145].mxu1  ;;  %7075 = vmatmul.mubr.bf16.gmra.mrb[144].mxu0 %v3848_v16 }
 0x40c   : > { %v2869_v35 = vpop.f32.mrb[146].mxu1  ;;  %7078 = vmatprep.mubr.msk.bf16.mxu0 %vm7475_vm0, %v10202_v32 }
 0x40d   : > { %v2870_v49 = vadd.f32 %v9073_v26, %v2869_v35  ;;  %v6565_v25 = vpop.f32.mrb[147].mxu1  ;;  %v3637_v30 = vmax.f32 %v2867_v21, 0.0 }
 0x40e   : > { %v4129_v15 = vpop.f32.mrb[40].mxu0 }
 0x40f   : > { %v3638_v24 = vmax.f32 %v2870_v49, 0.0  ;;  %v4130_v42 = vadd.f32 %v9029_v6, %v4129_v15  ;;  %6671 = vmatmul.mubr.bf16.gmra.mrb[252].mxu1 %v7846_v0  ;;  %v6972_v4 = vpop.f32.mrb[41].mxu0 }
 0x410   : > { %v4132_v36 = vpop.f32.mrb[42].mxu0  ;;  %6674 = vmatprep.mubr.msk.bf16.mxu1 %vm7475_vm0, %v10202_v32 }
 0x411   : > { %v3849_v59 = vpack.c.bf16 %v3638_v24, %v3637_v30  ;;  %5062 = vst [vmem:[%s9039_s17 + $0xb0] sm:$0xff] %v4130_v42  ;;  %v4133_v37 = vadd.f32 %v9029_v6, %v4132_v36  ;;  %v6973_v22 = vpop.f32.mrb[43].mxu0 }
 0x412   : > { %v2874_v11 = vpop.f32.mrb[148].mxu1 }
 0x413   : > { %5063 = vst [vmem:[%s9039_s17 + $0xb8] sm:$0xff] %v4133_v37  ;;  %v2875_v8 = vadd.f32 %v9073_v26, %v2874_v11  ;;  %v6568_v52 = vpop.f32.mrb[149].mxu1  ;;  %7079 = vmatmul.mubr.bf16.gmra.mrb[148].mxu0 %v3849_v59 }
 0x414   : > { %v2877_v57 = vpop.f32.mrb[150].mxu1  ;;  %7082 = vmatprep.mubr.msk.bf16.mxu0 %vm7475_vm0, %v10202_v32 }
 0x415   : > { %v2878_v0 = vadd.f32 %v9073_v26, %v2877_v57  ;;  %v6569_v28 = vpop.f32.mrb[151].mxu1  ;;  %v3639_v58 = vmax.f32 %v2875_v8, 0.0 }
 0x416   : > { %v4137_v40 = vpop.f32.mrb[44].mxu0 }
 0x417   : > { %v3640_v61 = vmax.f32 %v2878_v0, 0.0  ;;  %v4138_v7 = vadd.f32 %v9029_v6, %v4137_v40  ;;  %6675 = vmatmul.mubr.bf16.gmra.mrb[0].mxu1 %v7860_v17  ;;  %v6976_v2 = vpop.f32.mrb[45].mxu0 }
 0x418   : > { %v4140_v53 = vpop.f32.mrb[46].mxu0  ;;  %6678 = vmatprep.mubr.msk.bf16.mxu1 %vm7475_vm0, %v10202_v32 }
 0x419   : > { %v3850_v29 = vpack.c.bf16 %v3640_v61, %v3639_v58  ;;  %5064 = vst [vmem:[%s9039_s17 + $0xc0] sm:$0xff] %v4138_v7  ;;  %v4141_v19 = vadd.f32 %v9029_v6, %v4140_v53  ;;  %v6977_v39 = vpop.f32.mrb[47].mxu0 }
 0x41a   : > { %v2882_v48 = vpop.f32.mrb[152].mxu1 }
 0x41b   : > { %5065 = vst [vmem:[%s9039_s17 + $0xc8] sm:$0xff] %v4141_v19  ;;  %v2883_v54 = vadd.f32 %v9073_v26, %v2882_v48  ;;  %v6572_v41 = vpop.f32.mrb[153].mxu1  ;;  %7083 = vmatmul.mubr.bf16.gmra.mrb[152].mxu0 %v3850_v29 }
 0x41c   : > { %v2885_v1 = vpop.f32.mrb[154].mxu1  ;;  %7086 = vmatprep.mubr.msk.bf16.mxu0 %vm7475_vm0, %v10202_v32 }
 0x41d   : > { %v2886_v17 = vadd.f32 %v9073_v26, %v2885_v1  ;;  %v6573_v34 = vpop.f32.mrb[155].mxu1  ;;  %v3641_v56 = vmax.f32 %v2883_v54, 0.0 }
 0x41e   : > { %v4145_v31 = vpop.f32.mrb[48].mxu0 }
 0x41f   : > { %v3642_v43 = vmax.f32 %v2886_v17, 0.0  ;;  %v4146_v5 = vadd.f32 %v9029_v6, %v4145_v31  ;;  %6679 = vmatmul.mubr.bf16.gmra.mrb[4].mxu1 %v7876_v33  ;;  %v6980_v47 = vpop.f32.mrb[49].mxu0 }
 0x420   : > { %v4148_v12 = vpop.f32.mrb[50].mxu0  ;;  %6682 = vmatprep.mubr.msk.bf16.mxu1 %vm7475_vm0, %v10202_v32 }
 0x421   : > { %v3851_v60 = vpack.c.bf16 %v3642_v43, %v3641_v56  ;;  %5066 = vst [vmem:[%s9039_s17 + $0xd0] sm:$0xff] %v4146_v5  ;;  %v4149_v16 = vadd.f32 %v9029_v6, %v4148_v12  ;;  %v6981_v62 = vpop.f32.mrb[51].mxu0 }
 0x422   : > { %v2890_v44 = vpop.f32.mrb[156].mxu1 }
 0x423   : > { %5067 = vst [vmem:[%s9039_s17 + $0xd8] sm:$0xff] %v4149_v16  ;;  %v2891_v9 = vadd.f32 %v9073_v26, %v2890_v44  ;;  %v6576_v21 = vpop.f32.mrb[157].mxu1  ;;  %7087 = vmatmul.mubr.bf16.gmra.mrb[156].mxu0 %v3851_v60 }
 0x424   : > { %v2893_v10 = vpop.f32.mrb[158].mxu1  ;;  %7090 = vmatprep.mubr.msk.bf16.mxu0 %vm7475_vm0, %v10202_v32 }
 0x425   : > { %v2894_v33 = vadd.f32 %v9073_v26, %v2893_v10  ;;  %v6577_v35 = vpop.f32.mrb[159].mxu1  ;;  %v3643_v25 = vmax.f32 %v2891_v9, 0.0 }
 0x426   : > { %v4153_v49 = vpop.f32.mrb[52].mxu0 }
 0x427   : > { %v3644_v15 = vmax.f32 %v2894_v33, 0.0  ;;  %v4154_v30 = vadd.f32 %v9029_v6, %v4153_v49  ;;  %6683 = vmatmul.mubr.bf16.gmra.mrb[8].mxu1 %v7891_v50  ;;  %v6984_v24 = vpop.f32.mrb[53].mxu0 }
 0x428   : > { %v4156_v42 = vpop.f32.mrb[54].mxu0  ;;  %6686 = vmatprep.mubr.msk.bf16.mxu1 %vm7475_vm0, %v10202_v32 }
 0x429   : > { %v3852_v4 = vpack.c.bf16 %v3644_v15, %v3643_v25  ;;  %5068 = vst [vmem:[%s9039_s17 + $0xe0] sm:$0xff] %v4154_v30  ;;  %v4157_v36 = vadd.f32 %v9029_v6, %v4156_v42  ;;  %v6985_v59 = vpop.f32.mrb[55].mxu0 }
 0x42a   : > { %v2898_v37 = vpop.f32.mrb[160].mxu1 }
 0x42b   : > { %5069 = vst [vmem:[%s9039_s17 + $0xe8] sm:$0xff] %v4157_v36  ;;  %v2899_v22 = vadd.f32 %v9073_v26, %v2898_v37  ;;  %v6580_v11 = vpop.f32.mrb[161].mxu1  ;;  %7091 = vmatmul.mubr.bf16.gmra.mrb[160].mxu0 %v3852_v4 }
 0x42c   : > { %v2901_v8 = vpop.f32.mrb[162].mxu1  ;;  %7094 = vmatprep.mubr.msk.bf16.mxu0 %vm7475_vm0, %v10202_v32 }
 0x42d   : > { %v2902_v50 = vadd.f32 %v9073_v26, %v2901_v8  ;;  %v6581_v52 = vpop.f32.mrb[163].mxu1  ;;  %v3645_v0 = vmax.f32 %v2899_v22, 0.0 }
 0x42e   : > { %v4161_v57 = vpop.f32.mrb[56].mxu0 }
 0x42f   : > { %v3646_v28 = vmax.f32 %v2902_v50, 0.0  ;;  %v4162_v40 = vadd.f32 %v9029_v6, %v4161_v57  ;;  %6687 = vmatmul.mubr.bf16.gmra.mrb[12].mxu1 %v7905_v3  ;;  %v6988_v58 = vpop.f32.mrb[57].mxu0 }
 0x430   : > { %v4164_v61 = vpop.f32.mrb[58].mxu0  ;;  %6690 = vmatprep.mubr.msk.bf16.mxu1 %vm7475_vm0, %v10202_v32 }
 0x431   : > { %v3853_v7 = vpack.c.bf16 %v3646_v28, %v3645_v0  ;;  %5070 = vst [vmem:[%s9039_s17 + $0xf0] sm:$0xff] %v4162_v40  ;;  %v4165_v2 = vadd.f32 %v9029_v6, %v4164_v61  ;;  %v6989_v53 = vpop.f32.mrb[59].mxu0 }
 0x432   : > { %v2906_v29 = vpop.f32.mrb[164].mxu1 }
 0x433   : > { %5071 = vst [vmem:[%s9039_s17 + $0xf8] sm:$0xff] %v4165_v2  ;;  %v2907_v19 = vadd.f32 %v9073_v26, %v2906_v29  ;;  %v6584_v39 = vpop.f32.mrb[165].mxu1  ;;  %7095 = vmatmul.mubr.bf16.gmra.mrb[164].mxu0 %v3853_v7 }
 0x434   : > { %v2909_v48 = vpop.f32.mrb[166].mxu1  ;;  %7098 = vmatprep.mubr.msk.bf16.mxu0 %vm7475_vm0, %v10202_v32 }
 0x435   : > { %v2910_v3 = vadd.f32 %v9073_v26, %v2909_v48  ;;  %v6585_v54 = vpop.f32.mrb[167].mxu1  ;;  %v3647_v1 = vmax.f32 %v2907_v19, 0.0 }
 0x436   : > { %v4169_v41 = vpop.f32.mrb[60].mxu0 }
 0x437   : > { %v3648_v17 = vmax.f32 %v2910_v3, 0.0  ;;  %v4170_v34 = vadd.f32 %v9029_v6, %v4169_v41  ;;  %6691 = vmatmul.mubr.bf16.gmra.mrb[16].mxu1 %v7919_v20  ;;  %v6992_v31 = vpop.f32.mrb[61].mxu0 }
 0x438   : > { %v4172_v56 = vpop.f32.mrb[62].mxu0  ;;  %6694 = vmatprep.mubr.msk.bf16.mxu1 %vm7475_vm0, %v10202_v32 }
 0x439   : > { %v3854_v43 = vpack.c.bf16 %v3648_v17, %v3647_v1  ;;  %5072 = vst [vmem:[%s9039_s17 + $0x100] sm:$0xff] %v4170_v34  ;;  %v4173_v5 = vadd.f32 %v9029_v6, %v4172_v56  ;;  %v6993_v47 = vpop.f32.mrb[63].mxu0 }
 0x43a   : > { %v2914_v12 = vpop.f32.mrb[168].mxu1 }
 0x43b   : > { %5073 = vst [vmem:[%s9039_s17 + $0x108] sm:$0xff] %v4173_v5  ;;  %v2915_v60 = vadd.f32 %v9073_v26, %v2914_v12  ;;  %v6588_v16 = vpop.f32.mrb[169].mxu1  ;;  %7099 = vmatmul.mubr.bf16.gmra.mrb[168].mxu0 %v3854_v43 }
 0x43c   : > { %v2917_v62 = vpop.f32.mrb[170].mxu1  ;;  %7102 = vmatprep.mubr.msk.bf16.mxu0 %vm7475_vm0, %v10202_v32 }
 0x43d   : > { %v2918_v20 = vadd.f32 %v9073_v26, %v2917_v62  ;;  %v6589_v44 = vpop.f32.mrb[171].mxu1  ;;  %v3649_v21 = vmax.f32 %v2915_v60, 0.0 }
 0x43e   : > { %v4177_v9 = vpop.f32.mrb[64].mxu0 }
 0x43f   : > { %v3650_v10 = vmax.f32 %v2918_v20, 0.0  ;;  %v4178_v33 = vadd.f32 %v9029_v6, %v4177_v9  ;;  %6695 = vmatmul.mubr.bf16.gmra.mrb[20].mxu1 %v7937_v38  ;;  %v6996_v35 = vpop.f32.mrb[65].mxu0 }
 0x440   : > { %v4180_v49 = vpop.f32.mrb[66].mxu0  ;;  %6698 = vmatprep.mubr.msk.bf16.mxu1 %vm7475_vm0, %v10202_v32 }
 0x441   : > { %v3855_v25 = vpack.c.bf16 %v3650_v10, %v3649_v21  ;;  %5074 = vst [vmem:[%s9039_s17 + $0x110] sm:$0xff] %v4178_v33  ;;  %v4181_v15 = vadd.f32 %v9029_v6, %v4180_v49  ;;  %v6997_v30 = vpop.f32.mrb[67].mxu0 }
 0x442   : > { %v2922_v24 = vpop.f32.mrb[172].mxu1 }
 0x443   : > { %5075 = vst [vmem:[%s9039_s17 + $0x118] sm:$0xff] %v4181_v15  ;;  %v2923_v42 = vadd.f32 %v9073_v26, %v2922_v24  ;;  %v6592_v4 = vpop.f32.mrb[173].mxu1  ;;  %7103 = vmatmul.mubr.bf16.gmra.mrb[172].mxu0 %v3855_v25 }
 0x444   : > { %v2925_v36 = vpop.f32.mrb[174].mxu1  ;;  %7106 = vmatprep.mubr.msk.bf16.mxu0 %vm7475_vm0, %v10202_v32 }
 0x445   : > { %v2926_v38 = vadd.f32 %v9073_v26, %v2925_v36  ;;  %v6593_v59 = vpop.f32.mrb[175].mxu1  ;;  %v3651_v22 = vmax.f32 %v2923_v42, 0.0 }
 0x446   : > { %v4185_v37 = vpop.f32.mrb[68].mxu0 }
 0x447   : > { %v3652_v11 = vmax.f32 %v2926_v38, 0.0  ;;  %v4186_v8 = vadd.f32 %v9029_v6, %v4185_v37  ;;  %6699 = vmatmul.mubr.bf16.gmra.mrb[24].mxu1 %v7951_v55  ;;  %v7000_v50 = vpop.f32.mrb[69].mxu0 }
 0x448   : > { %v4188_v52 = vpop.f32.mrb[70].mxu0  ;;  %6702 = vmatprep.mubr.msk.bf16.mxu1 %vm7475_vm0, %v10202_v32 }
 0x449   : > { %v3856_v57 = vpack.c.bf16 %v3652_v11, %v3651_v22  ;;  %5076 = vst [vmem:[%s9039_s17 + $0x120] sm:$0xff] %v4186_v8  ;;  %v4189_v0 = vadd.f32 %v9029_v6, %v4188_v52  ;;  %v7001_v28 = vpop.f32.mrb[71].mxu0 }
 0x44a   : > { %v2930_v40 = vpop.f32.mrb[176].mxu1 }
 0x44b   : > { %5077 = vst [vmem:[%s9039_s17 + $0x128] sm:$0xff] %v4189_v0  ;;  %v2931_v58 = vadd.f32 %v9073_v26, %v2930_v40  ;;  %v6596_v61 = vpop.f32.mrb[177].mxu1  ;;  %7107 = vmatmul.mubr.bf16.gmra.mrb[176].mxu0 %v3856_v57 }
 0x44c   : > { %v2933_v7 = vpop.f32.mrb[178].mxu1  ;;  %7110 = vmatprep.mubr.msk.bf16.mxu0 %vm7475_vm0, %v10202_v32 }
 0x44d   : > { %v2934_v55 = vadd.f32 %v9073_v26, %v2933_v7  ;;  %v6597_v2 = vpop.f32.mrb[179].mxu1  ;;  %v3653_v29 = vmax.f32 %v2931_v58, 0.0 }
 0x44e   : > { %v4193_v53 = vpop.f32.mrb[72].mxu0 }
 0x44f   : > { %v3654_v19 = vmax.f32 %v2934_v55, 0.0  ;;  %v4194_v39 = vadd.f32 %v9029_v6, %v4193_v53  ;;  %6703 = vmatmul.mubr.bf16.gmra.mrb[28].mxu1 %v7967_v18  ;;  %v7004_v48 = vpop.f32.mrb[73].mxu0 }
 0x450   : > { %v4196_v3 = vpop.f32.mrb[74].mxu0  ;;  %6706 = vmatprep.mubr.msk.bf16.mxu1 %vm7475_vm0, %v10202_v32 }
 0x451   : > { %v3857_v54 = vpack.c.bf16 %v3654_v19, %v3653_v29  ;;  %5078 = vst [vmem:[%s9039_s17 + $0x130] sm:$0xff] %v4194_v39  ;;  %v4197_v41 = vadd.f32 %v9029_v6, %v4196_v3  ;;  %v7005_v1 = vpop.f32.mrb[75].mxu0 }
 0x452   : > { %v2938_v17 = vpop.f32.mrb[180].mxu1 }
 0x453   : > { %5079 = vst [vmem:[%s9039_s17 + $0x138] sm:$0xff] %v4197_v41  ;;  %v2939_v34 = vadd.f32 %v9073_v26, %v2938_v17  ;;  %v6600_v31 = vpop.f32.mrb[181].mxu1  ;;  %7111 = vmatmul.mubr.bf16.gmra.mrb[180].mxu0 %v3857_v54 }
 0x454   : > { %v2941_v56 = vpop.f32.mrb[182].mxu1  ;;  %7114 = vmatprep.mubr.msk.bf16.mxu0 %vm7475_vm0, %v10202_v32 }
 0x455   : > { %v2942_v18 = vadd.f32 %v9073_v26, %v2941_v56  ;;  %v6601_v43 = vpop.f32.mrb[183].mxu1  ;;  %v3655_v47 = vmax.f32 %v2939_v34, 0.0 }
 0x456   : > { %v4201_v5 = vpop.f32.mrb[76].mxu0 }
 0x457   : > { %v3656_v12 = vmax.f32 %v2942_v18, 0.0  ;;  %v4202_v60 = vadd.f32 %v9029_v6, %v4201_v5  ;;  %6707 = vmatmul.mubr.bf16.gmra.mrb[32].mxu1 %v7985_v46  ;;  %v7008_v16 = vpop.f32.mrb[77].mxu0 }
 0x458   : > { %v4204_v62 = vpop.f32.mrb[78].mxu0  ;;  %6710 = vmatprep.mubr.msk.bf16.mxu1 %vm7475_vm0, %v10202_v32 }
 0x459   : > { %v3858_v20 = vpack.c.bf16 %v3656_v12, %v3655_v47  ;;  %5080 = vst [vmem:[%s9039_s17 + $0x140] sm:$0xff] %v4202_v60  ;;  %v4205_v44 = vadd.f32 %v9029_v6, %v4204_v62  ;;  %v7009_v9 = vpop.f32.mrb[79].mxu0 }
 0x45a   : > { %v2946_v21 = vpop.f32.mrb[184].mxu1 }
 0x45b   : > { %5081 = vst [vmem:[%s9039_s17 + $0x148] sm:$0xff] %v4205_v44  ;;  %v2947_v10 = vadd.f32 %v9073_v26, %v2946_v21  ;;  %v6604_v33 = vpop.f32.mrb[185].mxu1  ;;  %7115 = vmatmul.mubr.bf16.gmra.mrb[184].mxu0 %v3858_v20 }
 0x45c   : > { %v2949_v35 = vpop.f32.mrb[186].mxu1  ;;  %7118 = vmatprep.mubr.msk.bf16.mxu0 %vm7475_vm0, %v10202_v32 }
 0x45d   : > { %v2950_v46 = vadd.f32 %v9073_v26, %v2949_v35  ;;  %v6605_v49 = vpop.f32.mrb[187].mxu1  ;;  %v3657_v15 = vmax.f32 %v2947_v10, 0.0 }
 0x45e   : > { %v4209_v25 = vpop.f32.mrb[80].mxu0 }
 0x45f   : > { %v3658_v30 = vmax.f32 %v2950_v46, 0.0  ;;  %v4210_v24 = vadd.f32 %v9029_v6, %v4209_v25  ;;  %6711 = vmatmul.mubr.bf16.gmra.mrb[36].mxu1 %v8006_v13  ;;  %v7012_v42 = vpop.f32.mrb[81].mxu0 }
 0x460   : > { %v4212_v4 = vpop.f32.mrb[82].mxu0  ;;  %6714 = vmatprep.mubr.msk.bf16.mxu1 %vm7475_vm0, %v10202_v32 }
 0x461   : > { %v3859_v36 = vpack.c.bf16 %v3658_v30, %v3657_v15  ;;  %5082 = vst [vmem:[%s9039_s17 + $0x150] sm:$0xff] %v4210_v24  ;;  %v4213_v38 = vadd.f32 %v9029_v6, %v4212_v4  ;;  %v7013_v59 = vpop.f32.mrb[83].mxu0 }
 0x462   : > { %v2954_v37 = vpop.f32.mrb[188].mxu1 }
 0x463   : > { %5083 = vst [vmem:[%s9039_s17 + $0x158] sm:$0xff] %v4213_v38  ;;  %v2955_v22 = vadd.f32 %v9073_v26, %v2954_v37  ;;  %v6608_v11 = vpop.f32.mrb[189].mxu1  ;;  %7119 = vmatmul.mubr.bf16.gmra.mrb[188].mxu0 %v3859_v36 }
 0x464   : > { %v2957_v8 = vpop.f32.mrb[190].mxu1  ;;  %7122 = vmatprep.mubr.msk.bf16.mxu0 %vm7475_vm0, %v10202_v32 }
 0x465   : > { %v2958_v13 = vadd.f32 %v9073_v26, %v2957_v8  ;;  %v6609_v50 = vpop.f32.mrb[191].mxu1  ;;  %v3659_v57 = vmax.f32 %v2955_v22, 0.0 }
 0x466   : > { %v4217_v52 = vpop.f32.mrb[84].mxu0 }
 0x467   : > { %v3660_v0 = vmax.f32 %v2958_v13, 0.0  ;;  %v4218_v28 = vadd.f32 %v9029_v6, %v4217_v52  ;;  %6715 = vmatmul.mubr.bf16.gmra.mrb[40].mxu1 %v8024_v45  ;;  %v7016_v40 = vpop.f32.mrb[85].mxu0 }
 0x468   : > { %v4220_v58 = vpop.f32.mrb[86].mxu0  ;;  %6718 = vmatprep.mubr.msk.bf16.mxu1 %vm7475_vm0, %v10202_v32 }
 0x469   : > { %v3860_v61 = vpack.c.bf16 %v3660_v0, %v3659_v57  ;;  %5084 = vst [vmem:[%s9039_s17 + $0x160] sm:$0xff] %v4218_v28  ;;  %v4221_v7 = vadd.f32 %v9029_v6, %v4220_v58  ;;  %v7017_v55 = vpop.f32.mrb[87].mxu0 }
 0x46a   : > { %v2962_v2 = vpop.f32.mrb[192].mxu1 }
 0x46b   : > { %5085 = vst [vmem:[%s9039_s17 + $0x168] sm:$0xff] %v4221_v7  ;;  %v2963_v53 = vadd.f32 %v9073_v26, %v2962_v2  ;;  %v6612_v29 = vpop.f32.mrb[193].mxu1  ;;  %7123 = vmatmul.mubr.bf16.gmra.mrb[192].mxu0 %v3860_v61 }
 0x46c   : > { %v2965_v19 = vpop.f32.mrb[194].mxu1  ;;  %7126 = vmatprep.mubr.msk.bf16.mxu0 %vm7475_vm0, %v10202_v32 }
 0x46d   : > { %v2966_v45 = vadd.f32 %v9073_v26, %v2965_v19  ;;  %v6613_v39 = vpop.f32.mrb[195].mxu1  ;;  %v3661_v3 = vmax.f32 %v2963_v53, 0.0 }
 0x46e   : > { %v4225_v48 = vpop.f32.mrb[88].mxu0 }
 0x46f   : > { %v3662_v54 = vmax.f32 %v2966_v45, 0.0  ;;  %v4226_v41 = vadd.f32 %v9029_v6, %v4225_v48  ;;  %6719 = vmatmul.mubr.bf16.gmra.mrb[44].mxu1 %v8042_v14  ;;  %v7020_v1 = vpop.f32.mrb[89].mxu0 }
 0x470   : > { %v4228_v17 = vpop.f32.mrb[90].mxu0  ;;  %6722 = vmatprep.mubr.msk.bf16.mxu1 %vm7475_vm0, %v10202_v32  ;;  %v10237_v1 = vld [vmem:[#allocation2_spill] sm:$0xff] }
 0x471   : > { %v3861_v34 = vpack.c.bf16 %v3662_v54, %v3661_v3  ;;  %5086 = vst [vmem:[%s9039_s17 + $0x170] sm:$0xff] %v4226_v41  ;;  %v4229_v31 = vadd.f32 %v9029_v6, %v4228_v17  ;;  %v7021_v56 = vpop.f32.mrb[91].mxu0  ;;  %v9313_v6 = vld [vmem:[%s10189_s6] ss:$0 sm:$0xff] }
 0x472   : > { %v2970_v18 = vpop.f32.mrb[196].mxu1 }
 0x473   : > { %5087 = vst [vmem:[%s9039_s17 + $0x178] sm:$0xff] %v4229_v31  ;;  %v2971_v43 = vadd.f32 %v9073_v26, %v2970_v18  ;;  %v6616_v5 = vpop.f32.mrb[197].mxu1  ;;  %7127 = vmatmul.mubr.bf16.gmra.mrb[196].mxu0 %v3861_v34 }
 0x474   : > { %v2973_v47 = vpop.f32.mrb[198].mxu1  ;;  %7130 = vmatprep.mubr.msk.bf16.mxu0 %vm7475_vm0, %v10202_v32 }
 0x475   : > { %v2974_v14 = vadd.f32 %v9073_v26, %v2973_v47  ;;  %v6617_v12 = vpop.f32.mrb[199].mxu1  ;;  %v3663_v16 = vmax.f32 %v2971_v43, 0.0 }
 0x476   : > { %v4233_v60 = vpop.f32.mrb[92].mxu0 }
 0x477   : > { %v3664_v62 = vmax.f32 %v2974_v14, 0.0  ;;  %v4234_v20 = vadd.f32 %v9313_v6, %v4233_v60  ;;  %6723 = vmatmul.mubr.bf16.gmra.mrb[48].mxu1 %v8060_v51  ;;  %v7024_v44 = vpop.f32.mrb[93].mxu0 }
 0x478   : > { %v4236_v9 = vpop.f32.mrb[94].mxu0  ;;  %6726 = vmatprep.mubr.msk.bf16.mxu1 %vm7475_vm0, %v10202_v32 }
 0x479   : > { %v3862_v21 = vpack.c.bf16 %v3664_v62, %v3663_v16  ;;  %5088 = vst [vmem:[%s9039_s17 + $0x180] sm:$0xff] %v4234_v20  ;;  %v4237_v10 = vadd.f32 %v9313_v6, %v4236_v9  ;;  %v7025_v33 = vpop.f32.mrb[95].mxu0  ;;  %v10238_v9 = vld [vmem:[#allocation3_spill] sm:$0xff] }
 0x47a   : > { %v2978_v35 = vpop.f32.mrb[200].mxu1 }
 0x47b   : > { %5089 = vst [vmem:[%s9039_s17 + $0x188] sm:$0xff] %v4237_v10  ;;  %v2979_v46 = vadd.f32 %v9073_v26, %v2978_v35  ;;  %v6620_v49 = vpop.f32.mrb[201].mxu1  ;;  %7131 = vmatmul.mubr.bf16.gmra.mrb[200].mxu0 %v3862_v21 }
 0x47c   : > { %v2981_v25 = vpop.f32.mrb[202].mxu1  ;;  %7134 = vmatprep.mubr.msk.bf16.mxu0 %vm7475_vm0, %v10202_v32 }
 0x47d   : > { %v2982_v51 = vadd.f32 %v9073_v26, %v2981_v25  ;;  %v6621_v15 = vpop.f32.mrb[203].mxu1  ;;  %v3665_v24 = vmax.f32 %v2979_v46, 0.0 }
 0x47e   : > { %v4241_v30 = vpop.f32.mrb[96].mxu0 }
 0x47f   : > { %v3666_v42 = vmax.f32 %v2982_v51, 0.0  ;;  %v4242_v4 = vadd.f32 %v9313_v6, %v4241_v30  ;;  %6727 = vmatmul.mubr.bf16.gmra.mrb[52].mxu1 %v8082_v27  ;;  %v7028_v36 = vpop.f32.mrb[97].mxu0 }
 0x480   : > { %v4244_v38 = vpop.f32.mrb[98].mxu0  ;;  %6730 = vmatprep.mubr.msk.bf16.mxu1 %vm7475_vm0, %v10202_v32 }
 0x481   : > { %v3863_v59 = vpack.c.bf16 %v3666_v42, %v3665_v24  ;;  %5090 = vst [vmem:[%s9039_s17 + $0x190] sm:$0xff] %v4242_v4  ;;  %v4245_v37 = vadd.f32 %v9313_v6, %v4244_v38  ;;  %v7029_v22 = vpop.f32.mrb[99].mxu0 }
 0x482   : > { %v2986_v11 = vpop.f32.mrb[204].mxu1 }
 0x483   : > { %5091 = vst [vmem:[%s9039_s17 + $0x198] sm:$0xff] %v4245_v37  ;;  %v2987_v8 = vadd.f32 %v9073_v26, %v2986_v11  ;;  %v6624_v13 = vpop.f32.mrb[205].mxu1  ;;  %7135 = vmatmul.mubr.bf16.gmra.mrb[204].mxu0 %v3863_v59  ;;  %v10239_v59 = vld [vmem:[#allocation4_spill] sm:$0xff] }
 0x484   : > { %v2989_v50 = vpop.f32.mrb[206].mxu1  ;;  %7138 = vmatprep.mubr.msk.bf16.mxu0 %vm7475_vm0, %v10202_v32 }
 0x485   : > { %v2990_v27 = vadd.f32 %v9073_v26, %v2989_v50  ;;  %v6625_v52 = vpop.f32.mrb[207].mxu1  ;;  %v3667_v0 = vmax.f32 %v2987_v8, 0.0 }
 0x486   : > { %v4249_v57 = vpop.f32.mrb[100].mxu0 }
 0x487   : > { %v3668_v28 = vmax.f32 %v2990_v27, 0.0  ;;  %v4250_v40 = vadd.f32 %v9313_v6, %v4249_v57  ;;  %6731 = vmatmul.mubr.bf16.gmra.mrb[56].mxu1 %v8100_v63  ;;  %v7032_v58 = vpop.f32.mrb[101].mxu0 }
 0x488   : > { %v4252_v61 = vpop.f32.mrb[102].mxu0  ;;  %6734 = vmatprep.mubr.msk.bf16.mxu1 %vm7475_vm0, %v10202_v32 }
 0x489   : > { %v3864_v7 = vpack.c.bf16 %v3668_v28, %v3667_v0  ;;  %5092 = vst [vmem:[%s9039_s17 + $0x1a0] sm:$0xff] %v4250_v40  ;;  %v4253_v55 = vadd.f32 %v9313_v6, %v4252_v61  ;;  %v7033_v2 = vpop.f32.mrb[103].mxu0 }
 0x48a   : > { %v2994_v53 = vpop.f32.mrb[208].mxu1 }
 0x48b   : > { %5093 = vst [vmem:[%s9039_s17 + $0x1a8] sm:$0xff] %v4253_v55  ;;  %v2995_v29 = vadd.f32 %v9073_v26, %v2994_v53  ;;  %v6628_v19 = vpop.f32.mrb[209].mxu1  ;;  %7139 = vmatmul.mubr.bf16.gmra.mrb[208].mxu0 %v3864_v7  ;;  %v10240_v55 = vld [vmem:[#allocation5_spill] sm:$0xff] }
 0x48c   : > { %v2997_v45 = vpop.f32.mrb[210].mxu1  ;;  %7142 = vmatprep.mubr.msk.bf16.mxu0 %vm7475_vm0, %v10202_v32 }
 0x48d   : > { %v2998_v63 = vadd.f32 %v9073_v26, %v2997_v45  ;;  %v6629_v39 = vpop.f32.mrb[211].mxu1  ;;  %v3669_v3 = vmax.f32 %v2995_v29, 0.0  ;;  %v9358_v26 = vld [vmem:[%s10187_s4] ss:$0 sm:$0xff] }
 0x48e   : > { %v4257_v48 = vpop.f32.mrb[104].mxu0 }
 0x48f   : > { %v3670_v54 = vmax.f32 %v2998_v63, 0.0  ;;  %v4258_v41 = vadd.f32 %v9313_v6, %v4257_v48  ;;  %6735 = vmatmul.mubr.bf16.gmra.mrb[60].mxu1 %v10237_v1  ;;  %v7036_v17 = vpop.f32.mrb[105].mxu0 }
 0x490   : > { %v4260_v34 = vpop.f32.mrb[106].mxu0  ;;  %6738 = vmatprep.mubr.msk.bf16.mxu1 %vm7475_vm0, %v10202_v32 }
 0x491   : > { %v3865_v31 = vpack.c.bf16 %v3670_v54, %v3669_v3  ;;  %5094 = vst [vmem:[%s9039_s17 + $0x1b0] sm:$0xff] %v4258_v41  ;;  %v4261_v56 = vadd.f32 %v9313_v6, %v4260_v34  ;;  %v7037_v18 = vpop.f32.mrb[107].mxu0 }
 0x492   : > { %v3002_v43 = vpop.f32.mrb[212].mxu1 }
 0x493   : > { %5095 = vst [vmem:[%s9039_s17 + $0x1b8] sm:$0xff] %v4261_v56  ;;  %v3003_v5 = vadd.f32 %v9358_v26, %v3002_v43  ;;  %v6632_v47 = vpop.f32.mrb[213].mxu1  ;;  %7143 = vmatmul.mubr.bf16.gmra.mrb[212].mxu0 %v3865_v31  ;;  %v10241_v56 = vld [vmem:[#allocation6_spill] sm:$0xff] }
 0x494   : > { %v3005_v14 = vpop.f32.mrb[214].mxu1  ;;  %7146 = vmatprep.mubr.msk.bf16.mxu0 %vm7475_vm0, %v10202_v32 }
 0x495   : > { %v3006_v12 = vadd.f32 %v9358_v26, %v3005_v14  ;;  %v6633_v60 = vpop.f32.mrb[215].mxu1  ;;  %v3671_v62 = vmax.f32 %v3003_v5, 0.0 }
 0x496   : > { %v4265_v16 = vpop.f32.mrb[108].mxu0 }
 0x497   : > { %v3672_v20 = vmax.f32 %v3006_v12, 0.0  ;;  %v4266_v44 = vadd.f32 %v9313_v6, %v4265_v16  ;;  %6739 = vmatmul.mubr.bf16.gmra.mrb[64].mxu1 %v10238_v9  ;;  %v7040_v21 = vpop.f32.mrb[109].mxu0 }
 0x498   : > { %v4268_v10 = vpop.f32.mrb[110].mxu0  ;;  %6742 = vmatprep.mubr.msk.bf16.mxu1 %vm7475_vm0, %v10202_v32 }
 0x499   : > { %v3866_v33 = vpack.c.bf16 %v3672_v20, %v3671_v62  ;;  %5096 = vst [vmem:[%s9039_s17 + $0x1c0] sm:$0xff] %v4266_v44  ;;  %v4269_v35 = vadd.f32 %v9313_v6, %v4268_v10  ;;  %v7041_v46 = vpop.f32.mrb[111].mxu0 }
 0x49a   : > { %v3010_v49 = vpop.f32.mrb[216].mxu1 }
 0x49b   : > { %5097 = vst [vmem:[%s9039_s17 + $0x1c8] sm:$0xff] %v4269_v35  ;;  %v3011_v25 = vadd.f32 %v9358_v26, %v3010_v49  ;;  %v6636_v51 = vpop.f32.mrb[217].mxu1  ;;  %7147 = vmatmul.mubr.bf16.gmra.mrb[216].mxu0 %v3866_v33  ;;  %v10242_v35 = vld [vmem:[#allocation7_spill] sm:$0xff] }
 0x49c   : > { %v3013_v15 = vpop.f32.mrb[218].mxu1  ;;  %7150 = vmatprep.mubr.msk.bf16.mxu0 %vm7475_vm0, %v10202_v32 }
 0x49d   : > { %v3014_v30 = vadd.f32 %v9358_v26, %v3013_v15  ;;  %v6637_v24 = vpop.f32.mrb[219].mxu1  ;;  %v3673_v4 = vmax.f32 %v3011_v25, 0.0 }
 0x49e   : > { %v4273_v42 = vpop.f32.mrb[112].mxu0 }
 0x49f   : > { %v3674_v36 = vmax.f32 %v3014_v30, 0.0  ;;  %v4274_v38 = vadd.f32 %v9313_v6, %v4273_v42  ;;  %6743 = vmatmul.mubr.bf16.gmra.mrb[68].mxu1 %v10239_v59  ;;  %v7044_v37 = vpop.f32.mrb[113].mxu0 }
 0x4a0   : > { %v4276_v22 = vpop.f32.mrb[114].mxu0  ;;  %6746 = vmatprep.mubr.msk.bf16.mxu1 %vm7475_vm0, %v10202_v32 }
 0x4a1   : > { %v3867_v11 = vpack.c.bf16 %v3674_v36, %v3673_v4  ;;  %5098 = vst [vmem:[%s9039_s17 + $0x1d0] sm:$0xff] %v4274_v38  ;;  %v4277_v8 = vadd.f32 %v9313_v6, %v4276_v22  ;;  %v7045_v13 = vpop.f32.mrb[115].mxu0 }
 0x4a2   : > { %v3018_v50 = vpop.f32.mrb[220].mxu1 }
 0x4a3   : > { %5099 = vst [vmem:[%s9039_s17 + $0x1d8] sm:$0xff] %v4277_v8  ;;  %v3019_v27 = vadd.f32 %v9358_v26, %v3018_v50  ;;  %v6640_v52 = vpop.f32.mrb[221].mxu1  ;;  %7151 = vmatmul.mubr.bf16.gmra.mrb[220].mxu0 %v3867_v11  ;;  %v10243_v8 = vld [vmem:[#allocation8_spill] sm:$0xff] }
 0x4a4   : > { %v3021_v57 = vpop.f32.mrb[222].mxu1  ;;  %7154 = vmatprep.mubr.msk.bf16.mxu0 %vm7475_vm0, %v10202_v32 }
 0x4a5   : > { %v3022_v0 = vadd.f32 %v9358_v26, %v3021_v57  ;;  %v6641_v28 = vpop.f32.mrb[223].mxu1  ;;  %v3675_v58 = vmax.f32 %v3019_v27, 0.0 }
 0x4a6   : > { %v4281_v40 = vpop.f32.mrb[116].mxu0 }
 0x4a7   : > { %v3676_v61 = vmax.f32 %v3022_v0, 0.0  ;;  %v4282_v7 = vadd.f32 %v9313_v6, %v4281_v40  ;;  %6747 = vmatmul.mubr.bf16.gmra.mrb[72].mxu1 %v10240_v55  ;;  %v7048_v2 = vpop.f32.mrb[117].mxu0 }
 0x4a8   : > { %v4284_v53 = vpop.f32.mrb[118].mxu0  ;;  %6750 = vmatprep.mubr.msk.bf16.mxu1 %vm7475_vm0, %v10202_v32 }
 0x4a9   : > { %v3868_v29 = vpack.c.bf16 %v3676_v61, %v3675_v58  ;;  %5100 = vst [vmem:[%s9039_s17 + $0x1e0] sm:$0xff] %v4282_v7  ;;  %v4285_v19 = vadd.f32 %v9313_v6, %v4284_v53  ;;  %v7049_v45 = vpop.f32.mrb[119].mxu0 }
 0x4aa   : > { %v3026_v63 = vpop.f32.mrb[224].mxu1 }
 0x4ab   : > { %5101 = vst [vmem:[%s9039_s17 + $0x1e8] sm:$0xff] %v4285_v19  ;;  %v3027_v39 = vadd.f32 %v9358_v26, %v3026_v63  ;;  %v6644_v48 = vpop.f32.mrb[225].mxu1  ;;  %7155 = vmatmul.mubr.bf16.gmra.mrb[224].mxu0 %v3868_v29  ;;  %v10244_v19 = vld [vmem:[#allocation9_spill] sm:$0xff] }
 0x4ac   : > { %v3029_v3 = vpop.f32.mrb[226].mxu1  ;;  %7158 = vmatprep.mubr.msk.bf16.mxu0 %vm7475_vm0, %v10202_v32 }
 0x4ad   : > { %v3030_v54 = vadd.f32 %v9358_v26, %v3029_v3  ;;  %v6645_v41 = vpop.f32.mrb[227].mxu1  ;;  %v3677_v17 = vmax.f32 %v3027_v39, 0.0 }
 0x4ae   : > { %v4289_v1 = vpop.f32.mrb[120].mxu0 }
 0x4af   : > { %v3678_v34 = vmax.f32 %v3030_v54, 0.0  ;;  %v4290_v31 = vadd.f32 %v9313_v6, %v4289_v1  ;;  %6751 = vmatmul.mubr.bf16.gmra.mrb[76].mxu1 %v10241_v56  ;;  %v7052_v18 = vpop.f32.mrb[121].mxu0 }
 0x4b0   : > { %v4292_v43 = vpop.f32.mrb[122].mxu0  ;;  %6754 = vmatprep.mubr.msk.bf16.mxu1 %vm7475_vm0, %v10202_v32 }
 0x4b1   : > { %v3869_v5 = vpack.c.bf16 %v3678_v34, %v3677_v17  ;;  %5102 = vst [vmem:[%s9039_s17 + $0x1f0] sm:$0xff] %v4290_v31  ;;  %v4293_v47 = vadd.f32 %v9313_v6, %v4292_v43  ;;  %v7053_v14 = vpop.f32.mrb[123].mxu0 }
 0x4b2   : > { %v3034_v12 = vpop.f32.mrb[228].mxu1 }
 0x4b3   : > { %5103 = vst [vmem:[%s9039_s17 + $0x1f8] sm:$0xff] %v4293_v47  ;;  %v3035_v60 = vadd.f32 %v9358_v26, %v3034_v12  ;;  %v6648_v16 = vpop.f32.mrb[229].mxu1  ;;  %7159 = vmatmul.mubr.bf16.gmra.mrb[228].mxu0 %v3869_v5  ;;  %v10245_v47 = vld [vmem:[#allocation10_spill] sm:$0xff] }
 0x4b4   : > { %v3037_v62 = vpop.f32.mrb[230].mxu1  ;;  %7162 = vmatprep.mubr.msk.bf16.mxu0 %vm7475_vm0, %v10202_v32 }
 0x4b5   : > { %v3038_v20 = vadd.f32 %v9358_v26, %v3037_v62  ;;  %v6649_v44 = vpop.f32.mrb[231].mxu1  ;;  %v3679_v21 = vmax.f32 %v3035_v60, 0.0 }
 0x4b6   : > { %v4297_v9 = vpop.f32.mrb[124].mxu0 }
 0x4b7   : > { %v3680_v10 = vmax.f32 %v3038_v20, 0.0  ;;  %v4298_v33 = vadd.f32 %v9313_v6, %v4297_v9  ;;  %6755 = vmatmul.mubr.bf16.gmra.mrb[80].mxu1 %v10242_v35  ;;  %v7056_v46 = vpop.f32.mrb[125].mxu0 }
 0x4b8   : > { %v4300_v49 = vpop.f32.mrb[126].mxu0  ;;  %6758 = vmatprep.mubr.msk.bf16.mxu1 %vm7475_vm0, %v10202_v32 }
 0x4b9   : > { %v3870_v25 = vpack.c.bf16 %v3680_v10, %v3679_v21  ;;  %5104 = vst [vmem:[%s9039_s17 + $0x200] sm:$0xff] %v4298_v33  ;;  %v4301_v51 = vadd.f32 %v9313_v6, %v4300_v49  ;;  %v7057_v15 = vpop.f32.mrb[127].mxu0 }
 0x4ba   : > { %v3042_v30 = vpop.f32.mrb[232].mxu1 }
 0x4bb   : > { %5105 = vst [vmem:[%s9039_s17 + $0x208] sm:$0xff] %v4301_v51  ;;  %v3043_v24 = vadd.f32 %v9358_v26, %v3042_v30  ;;  %v6652_v42 = vpop.f32.mrb[233].mxu1  ;;  %7163 = vmatmul.mubr.bf16.gmra.mrb[232].mxu0 %v3870_v25  ;;  %v10246_v51 = vld [vmem:[#allocation11_spill] sm:$0xff] }
 0x4bc   : > { %v3045_v4 = vpop.f32.mrb[234].mxu1  ;;  %7166 = vmatprep.mubr.msk.bf16.mxu0 %vm7475_vm0, %v10202_v32 }
 0x4bd   : > { %v3046_v36 = vadd.f32 %v9358_v26, %v3045_v4  ;;  %v6653_v38 = vpop.f32.mrb[235].mxu1  ;;  %v3681_v37 = vmax.f32 %v3043_v24, 0.0 }
 0x4be   : > { %v4305_v59 = vpop.f32.mrb[128].mxu0 }
 0x4bf   : > { %v3682_v22 = vmax.f32 %v3046_v36, 0.0  ;;  %v4306_v11 = vadd.f32 %v9313_v6, %v4305_v59  ;;  %6759 = vmatmul.mubr.bf16.gmra.mrb[84].mxu1 %v10243_v8  ;;  %v7060_v13 = vpop.f32.mrb[129].mxu0 }
 0x4c0   : > { %v4308_v50 = vpop.f32.mrb[130].mxu0  ;;  %6762 = vmatprep.mubr.msk.bf16.mxu1 %vm7475_vm0, %v10202_v32 }
 0x4c1   : > { %v3871_v27 = vpack.c.bf16 %v3682_v22, %v3681_v37  ;;  %5106 = vst [vmem:[%s9039_s17 + $0x210] sm:$0xff] %v4306_v11  ;;  %v4309_v52 = vadd.f32 %v9313_v6, %v4308_v50  ;;  %v7061_v57 = vpop.f32.mrb[131].mxu0 }
 0x4c2   : > { %v3050_v0 = vpop.f32.mrb[236].mxu1 }
 0x4c3   : > { %5107 = vst [vmem:[%s9039_s17 + $0x218] sm:$0xff] %v4309_v52  ;;  %v3051_v28 = vadd.f32 %v9358_v26, %v3050_v0  ;;  %v6656_v40 = vpop.f32.mrb[237].mxu1  ;;  %7167 = vmatmul.mubr.bf16.gmra.mrb[236].mxu0 %v3871_v27  ;;  %v10247_v52 = vld [vmem:[#allocation12_spill] sm:$0xff] }
 0x4c4   : > { %v3053_v58 = vpop.f32.mrb[238].mxu1  ;;  %7170 = vmatprep.mubr.msk.bf16.mxu0 %vm7475_vm0, %v10202_v32 }
 0x4c5   : > { %v3054_v61 = vadd.f32 %v9358_v26, %v3053_v58  ;;  %v6657_v7 = vpop.f32.mrb[239].mxu1  ;;  %v3683_v2 = vmax.f32 %v3051_v28, 0.0 }
 0x4c6   : > { %v4313_v55 = vpop.f32.mrb[132].mxu0 }
 0x4c7   : > { %v3684_v53 = vmax.f32 %v3054_v61, 0.0  ;;  %v4314_v29 = vadd.f32 %v9313_v6, %v4313_v55  ;;  %6763 = vmatmul.mubr.bf16.gmra.mrb[88].mxu1 %v10244_v19  ;;  %v7064_v45 = vpop.f32.mrb[133].mxu0 }
 0x4c8   : > { %v4316_v63 = vpop.f32.mrb[134].mxu0  ;;  %6766 = vmatprep.mubr.msk.bf16.mxu1 %vm7475_vm0, %v10202_v32 }
 0x4c9   : > { %v3872_v39 = vpack.c.bf16 %v3684_v53, %v3683_v2  ;;  %5108 = vst [vmem:[%s9039_s17 + $0x220] sm:$0xff] %v4314_v29  ;;  %v4317_v48 = vadd.f32 %v9313_v6, %v4316_v63  ;;  %v7065_v3 = vpop.f32.mrb[135].mxu0 }
 0x4ca   : > { %v3058_v54 = vpop.f32.mrb[240].mxu1 }
 0x4cb   : > { %5109 = vst [vmem:[%s9039_s17 + $0x228] sm:$0xff] %v4317_v48  ;;  %v3059_v41 = vadd.f32 %v9358_v26, %v3058_v54  ;;  %v6660_v1 = vpop.f32.mrb[241].mxu1  ;;  %7171 = vmatmul.mubr.bf16.gmra.mrb[240].mxu0 %v3872_v39  ;;  %v10248_v48 = vld [vmem:[#allocation13_spill] sm:$0xff] }
 0x4cc   : > { %v3061_v17 = vpop.f32.mrb[242].mxu1  ;;  %7174 = vmatprep.mubr.msk.bf16.mxu0 %vm7475_vm0, %v10202_v32 }
 0x4cd   : > { %v3062_v34 = vadd.f32 %v9358_v26, %v3061_v17  ;;  %v6661_v31 = vpop.f32.mrb[243].mxu1  ;;  %v3685_v18 = vmax.f32 %v3059_v41, 0.0 }
 0x4ce   : > { %v4321_v56 = vpop.f32.mrb[136].mxu0 }
 0x4cf   : > { %v3686_v43 = vmax.f32 %v3062_v34, 0.0  ;;  %v4322_v5 = vadd.f32 %v9313_v6, %v4321_v56  ;;  %6767 = vmatmul.mubr.bf16.gmra.mrb[92].mxu1 %v10245_v47  ;;  %v7068_v14 = vpop.f32.mrb[137].mxu0 }
 0x4d0   : > { %v4324_v12 = vpop.f32.mrb[138].mxu0  ;;  %6770 = vmatprep.mubr.msk.bf16.mxu1 %vm7475_vm0, %v10202_v32 }
 0x4d1   : > { %v3873_v60 = vpack.c.bf16 %v3686_v43, %v3685_v18  ;;  %5110 = vst [vmem:[%s9039_s17 + $0x230] sm:$0xff] %v4322_v5  ;;  %v4325_v16 = vadd.f32 %v9313_v6, %v4324_v12  ;;  %v7069_v62 = vpop.f32.mrb[139].mxu0 }
 0x4d2   : > { %v3066_v20 = vpop.f32.mrb[244].mxu1 }
 0x4d3   : > { %5111 = vst [vmem:[%s9039_s17 + $0x238] sm:$0xff] %v4325_v16  ;;  %v3067_v44 = vadd.f32 %v9358_v26, %v3066_v20  ;;  %v6664_v9 = vpop.f32.mrb[245].mxu1  ;;  %7175 = vmatmul.mubr.bf16.gmra.mrb[244].mxu0 %v3873_v60  ;;  %v10249_v16 = vld [vmem:[#allocation14_spill] sm:$0xff] }
 0x4d4   : > { %v3069_v21 = vpop.f32.mrb[246].mxu1  ;;  %7178 = vmatprep.mubr.msk.bf16.mxu0 %vm7475_vm0, %v10202_v32 }
 0x4d5   : > { %v3070_v10 = vadd.f32 %v9358_v26, %v3069_v21  ;;  %v6665_v33 = vpop.f32.mrb[247].mxu1  ;;  %v3687_v46 = vmax.f32 %v3067_v44, 0.0 }
 0x4d6   : > { %v4329_v35 = vpop.f32.mrb[140].mxu0 }
 0x4d7   : > { %v3688_v49 = vmax.f32 %v3070_v10, 0.0  ;;  %v4330_v25 = vadd.f32 %v9313_v6, %v4329_v35  ;;  %6771 = vmatmul.mubr.bf16.gmra.mrb[96].mxu1 %v10246_v51  ;;  %v7072_v15 = vpop.f32.mrb[141].mxu0 }
 0x4d8   : > { %v4332_v30 = vpop.f32.mrb[142].mxu0  ;;  %6774 = vmatprep.mubr.msk.bf16.mxu1 %vm7475_vm0, %v10202_v32 }
 0x4d9   : > { %v3874_v24 = vpack.c.bf16 %v3688_v49, %v3687_v46  ;;  %5112 = vst [vmem:[%s9039_s17 + $0x240] sm:$0xff] %v4330_v25  ;;  %v4333_v42 = vadd.f32 %v9313_v6, %v4332_v30  ;;  %v7073_v4 = vpop.f32.mrb[143].mxu0 }
 0x4da   : > { %v3074_v36 = vpop.f32.mrb[248].mxu1 }
 0x4db   : > { %5113 = vst [vmem:[%s9039_s17 + $0x248] sm:$0xff] %v4333_v42  ;;  %v3075_v38 = vadd.f32 %v9358_v26, %v3074_v36  ;;  %v6668_v59 = vpop.f32.mrb[249].mxu1  ;;  %7179 = vmatmul.mubr.bf16.gmra.mrb[248].mxu0 %v3874_v24  ;;  %v10250_v42 = vld [vmem:[#allocation15_spill] sm:$0xff] }
 0x4dc   : > { %v3077_v37 = vpop.f32.mrb[250].mxu1  ;;  %7182 = vmatprep.mubr.msk.bf16.mxu0 %vm7475_vm0, %v10202_v32 }
 0x4dd   : > { %v3078_v22 = vadd.f32 %v9358_v26, %v3077_v37  ;;  %v6669_v11 = vpop.f32.mrb[251].mxu1  ;;  %v3689_v13 = vmax.f32 %v3075_v38, 0.0 }
 0x4de   : > { %v4337_v8 = vpop.f32.mrb[144].mxu0 }
 0x4df   : > { %v3690_v50 = vmax.f32 %v3078_v22, 0.0  ;;  %v4338_v27 = vadd.f32 %v9313_v6, %v4337_v8  ;;  %6775 = vmatmul.mubr.bf16.gmra.mrb[100].mxu1 %v10247_v52  ;;  %v7076_v57 = vpop.f32.mrb[145].mxu0 }
 0x4e0   : > { %v4340_v0 = vpop.f32.mrb[146].mxu0  ;;  %6778 = vmatprep.mubr.msk.bf16.mxu1 %vm7475_vm0, %v10202_v32 }
 0x4e1   : > { %v3875_v28 = vpack.c.bf16 %v3690_v50, %v3689_v13  ;;  %5114 = vst [vmem:[%s9039_s17 + $0x250] sm:$0xff] %v4338_v27  ;;  %v4341_v40 = vadd.f32 %v9313_v6, %v4340_v0  ;;  %v7077_v58 = vpop.f32.mrb[147].mxu0 }
 0x4e2   : > { %v3082_v61 = vpop.f32.mrb[252].mxu1 }
 0x4e3   : > { %5115 = vst [vmem:[%s9039_s17 + $0x258] sm:$0xff] %v4341_v40  ;;  %v3083_v7 = vadd.f32 %v9358_v26, %v3082_v61  ;;  %v6672_v55 = vpop.f32.mrb[253].mxu1  ;;  %7183 = vmatmul.mubr.bf16.gmra.mrb[252].mxu0 %v3875_v28  ;;  %v10251_v40 = vld [vmem:[#allocation16_spill] sm:$0xff] }
 0x4e4   : > { %v3085_v2 = vpop.f32.mrb[254].mxu1  ;;  %7186 = vmatprep.mubr.msk.bf16.mxu0 %vm7475_vm0, %v10202_v32 }
 0x4e5   : > { %v3086_v53 = vadd.f32 %v9358_v26, %v3085_v2  ;;  %v6673_v29 = vpop.f32.mrb[255].mxu1  ;;  %v3691_v45 = vmax.f32 %v3083_v7, 0.0 }
 0x4e6   : > { %v4345_v19 = vpop.f32.mrb[148].mxu0 }
 0x4e7   : > { %v3692_v63 = vmax.f32 %v3086_v53, 0.0  ;;  %v4346_v39 = vadd.f32 %v9313_v6, %v4345_v19  ;;  %6779 = vmatmul.mubr.bf16.gmra.mrb[104].mxu1 %v10248_v48  ;;  %v7080_v3 = vpop.f32.mrb[149].mxu0 }
 0x4e8   : > { %v4348_v54 = vpop.f32.mrb[150].mxu0  ;;  %6782 = vmatprep.mubr.msk.bf16.mxu1 %vm7475_vm0, %v10202_v32 }
 0x4e9   : > { %v3876_v41 = vpack.c.bf16 %v3692_v63, %v3691_v45  ;;  %5116 = vst [vmem:[%s9039_s17 + $0x260] sm:$0xff] %v4346_v39  ;;  %v4349_v1 = vadd.f32 %v9313_v6, %v4348_v54  ;;  %v7081_v17 = vpop.f32.mrb[151].mxu0 }
 0x4ea   : > { %v3090_v34 = vpop.f32.mrb[0].mxu1 }
 0x4eb   : > { %5117 = vst [vmem:[%s9039_s17 + $0x268] sm:$0xff] %v4349_v1  ;;  %v3091_v31 = vadd.f32 %v9358_v26, %v3090_v34  ;;  %v6676_v56 = vpop.f32.mrb[1].mxu1  ;;  %7187 = vmatmul.mubr.bf16.gmra.mrb[0].mxu0 %v3876_v41  ;;  %v10252_v1 = vld [vmem:[#allocation17_spill] sm:$0xff] }
 0x4ec   : > { %v3093_v18 = vpop.f32.mrb[2].mxu1  ;;  %7190 = vmatprep.mubr.msk.bf16.mxu0 %vm7475_vm0, %v10202_v32 }
 0x4ed   : > { %v3094_v43 = vadd.f32 %v9358_v26, %v3093_v18  ;;  %v6677_v5 = vpop.f32.mrb[3].mxu1  ;;  %v3693_v14 = vmax.f32 %v3091_v31, 0.0 }
 0x4ee   : > { %v4353_v47 = vpop.f32.mrb[152].mxu0 }
 0x4ef   : > { %v3694_v12 = vmax.f32 %v3094_v43, 0.0  ;;  %v4354_v60 = vadd.f32 %v9313_v6, %v4353_v47  ;;  %6783 = vmatmul.mubr.bf16.gmra.mrb[108].mxu1 %v10249_v16  ;;  %v7084_v62 = vpop.f32.mrb[153].mxu0 }
 0x4f0   : > { %v4356_v20 = vpop.f32.mrb[154].mxu0  ;;  %6786 = vmatprep.mubr.msk.bf16.mxu1 %vm7475_vm0, %v10202_v32 }
 0x4f1   : > { %v3877_v44 = vpack.c.bf16 %v3694_v12, %v3693_v14  ;;  %5118 = vst [vmem:[%s9039_s17 + $0x270] sm:$0xff] %v4354_v60  ;;  %v4357_v9 = vadd.f32 %v9313_v6, %v4356_v20  ;;  %v7085_v21 = vpop.f32.mrb[155].mxu0 }
 0x4f2   : > { %v3098_v10 = vpop.f32.mrb[4].mxu1 }
 0x4f3   : > { %5119 = vst [vmem:[%s9039_s17 + $0x278] sm:$0xff] %v4357_v9  ;;  %v3099_v33 = vadd.f32 %v9358_v26, %v3098_v10  ;;  %v6680_v35 = vpop.f32.mrb[5].mxu1  ;;  %7191 = vmatmul.mubr.bf16.gmra.mrb[4].mxu0 %v3877_v44  ;;  %v10253_v9 = vld [vmem:[#allocation18_spill] sm:$0xff] }
 0x4f4   : > { %v3101_v46 = vpop.f32.mrb[6].mxu1  ;;  %7194 = vmatprep.mubr.msk.bf16.mxu0 %vm7475_vm0, %v10202_v32 }
 0x4f5   : > { %v3102_v49 = vadd.f32 %v9358_v26, %v3101_v46  ;;  %v6681_v25 = vpop.f32.mrb[7].mxu1  ;;  %v3695_v15 = vmax.f32 %v3099_v33, 0.0 }
 0x4f6   : > { %v4361_v51 = vpop.f32.mrb[156].mxu0 }
 0x4f7   : > { %v3696_v30 = vmax.f32 %v3102_v49, 0.0  ;;  %v4362_v24 = vadd.f32 %v9313_v6, %v4361_v51  ;;  %6787 = vmatmul.mubr.bf16.gmra.mrb[112].mxu1 %v10250_v42  ;;  %v7088_v4 = vpop.f32.mrb[157].mxu0 }
 0x4f8   : > { %v4364_v36 = vpop.f32.mrb[158].mxu0  ;;  %6790 = vmatprep.mubr.msk.bf16.mxu1 %vm7475_vm0, %v10202_v32 }
 0x4f9   : > { %v3878_v38 = vpack.c.bf16 %v3696_v30, %v3695_v15  ;;  %5120 = vst [vmem:[%s9039_s17 + $0x280] sm:$0xff] %v4362_v24  ;;  %v4365_v59 = vadd.f32 %v9313_v6, %v4364_v36  ;;  %v7089_v37 = vpop.f32.mrb[159].mxu0 }
 0x4fa   : > { %v3106_v22 = vpop.f32.mrb[8].mxu1 }
 0x4fb   : > { %5121 = vst [vmem:[%s9039_s17 + $0x288] sm:$0xff] %v4365_v59  ;;  %v3107_v11 = vadd.f32 %v9358_v26, %v3106_v22  ;;  %v6684_v8 = vpop.f32.mrb[9].mxu1  ;;  %7195 = vmatmul.mubr.bf16.gmra.mrb[8].mxu0 %v3878_v38  ;;  %v10254_v59 = vld [vmem:[#allocation19_spill] sm:$0xff] }
 0x4fc   : > { %v3109_v13 = vpop.f32.mrb[10].mxu1  ;;  %7198 = vmatprep.mubr.msk.bf16.mxu0 %vm7475_vm0, %v10202_v32 }
 0x4fd   : > { %v3110_v50 = vadd.f32 %v9358_v26, %v3109_v13  ;;  %v6685_v27 = vpop.f32.mrb[11].mxu1  ;;  %v3697_v57 = vmax.f32 %v3107_v11, 0.0 }
 0x4fe   : > { %v4369_v52 = vpop.f32.mrb[160].mxu0 }
 0x4ff   : > { %v3698_v0 = vmax.f32 %v3110_v50, 0.0  ;;  %v4370_v28 = vadd.f32 %v9313_v6, %v4369_v52  ;;  %6791 = vmatmul.mubr.bf16.gmra.mrb[116].mxu1 %v10251_v40  ;;  %v7092_v58 = vpop.f32.mrb[161].mxu0 }
 0x500   : > { %v4372_v61 = vpop.f32.mrb[162].mxu0  ;;  %6794 = vmatprep.mubr.msk.bf16.mxu1 %vm7475_vm0, %v10202_v32 }
 0x501   : > { %v3879_v7 = vpack.c.bf16 %v3698_v0, %v3697_v57  ;;  %5122 = vst [vmem:[%s9039_s17 + $0x290] sm:$0xff] %v4370_v28  ;;  %v4373_v55 = vadd.f32 %v9313_v6, %v4372_v61  ;;  %v7093_v2 = vpop.f32.mrb[163].mxu0 }
 0x502   : > { %v3114_v53 = vpop.f32.mrb[12].mxu1 }
 0x503   : > { %5123 = vst [vmem:[%s9039_s17 + $0x298] sm:$0xff] %v4373_v55  ;;  %v3115_v29 = vadd.f32 %v9358_v26, %v3114_v53  ;;  %v6688_v19 = vpop.f32.mrb[13].mxu1  ;;  %7199 = vmatmul.mubr.bf16.gmra.mrb[12].mxu0 %v3879_v7  ;;  %v10255_v55 = vld [vmem:[#allocation20_spill] sm:$0xff] }
 0x504   : > { %v3117_v45 = vpop.f32.mrb[14].mxu1  ;;  %7202 = vmatprep.mubr.msk.bf16.mxu0 %vm7475_vm0, %v10202_v32 }
 0x505   : > { %v3118_v63 = vadd.f32 %v9358_v26, %v3117_v45  ;;  %v6689_v39 = vpop.f32.mrb[15].mxu1  ;;  %v3699_v3 = vmax.f32 %v3115_v29, 0.0 }
 0x506   : > { %v4377_v48 = vpop.f32.mrb[164].mxu0 }
 0x507   : > { %v3700_v54 = vmax.f32 %v3118_v63, 0.0  ;;  %v4378_v41 = vadd.f32 %v9313_v6, %v4377_v48  ;;  %6795 = vmatmul.mubr.bf16.gmra.mrb[120].mxu1 %v10252_v1  ;;  %v7096_v17 = vpop.f32.mrb[165].mxu0 }
 0x508   : > { %v4380_v34 = vpop.f32.mrb[166].mxu0  ;;  %6798 = vmatprep.mubr.msk.bf16.mxu1 %vm7475_vm0, %v10202_v32 }
 0x509   : > { %v3880_v31 = vpack.c.bf16 %v3700_v54, %v3699_v3  ;;  %5124 = vst [vmem:[%s9039_s17 + $0x2a0] sm:$0xff] %v4378_v41  ;;  %v4381_v56 = vadd.f32 %v9313_v6, %v4380_v34  ;;  %v7097_v18 = vpop.f32.mrb[167].mxu0 }
 0x50a   : > { %v3122_v43 = vpop.f32.mrb[16].mxu1 }
 0x50b   : > { %5125 = vst [vmem:[%s9039_s17 + $0x2a8] sm:$0xff] %v4381_v56  ;;  %v3123_v5 = vadd.f32 %v9358_v26, %v3122_v43  ;;  %v6692_v47 = vpop.f32.mrb[17].mxu1  ;;  %7203 = vmatmul.mubr.bf16.gmra.mrb[16].mxu0 %v3880_v31  ;;  %v10256_v56 = vld [vmem:[#allocation21_spill] sm:$0xff] }
 0x50c   : > { %v3125_v14 = vpop.f32.mrb[18].mxu1  ;;  %7206 = vmatprep.mubr.msk.bf16.mxu0 %vm7475_vm0, %v10202_v32 }
 0x50d   : > { %v3126_v12 = vadd.f32 %v9358_v26, %v3125_v14  ;;  %v6693_v60 = vpop.f32.mrb[19].mxu1  ;;  %v3701_v62 = vmax.f32 %v3123_v5, 0.0 }
 0x50e   : > { %v4385_v16 = vpop.f32.mrb[168].mxu0 }
 0x50f   : > { %v3702_v20 = vmax.f32 %v3126_v12, 0.0  ;;  %v4386_v44 = vadd.f32 %v9313_v6, %v4385_v16  ;;  %6799 = vmatmul.mubr.bf16.gmra.mrb[124].mxu1 %v10253_v9  ;;  %v7100_v21 = vpop.f32.mrb[169].mxu0 }
 0x510   : > { %v4388_v10 = vpop.f32.mrb[170].mxu0  ;;  %6802 = vmatprep.mubr.msk.bf16.mxu1 %vm7475_vm0, %v10202_v32 }
 0x511   : > { %v3881_v33 = vpack.c.bf16 %v3702_v20, %v3701_v62  ;;  %5126 = vst [vmem:[%s9039_s17 + $0x2b0] sm:$0xff] %v4386_v44  ;;  %v4389_v35 = vadd.f32 %v9313_v6, %v4388_v10  ;;  %v7101_v46 = vpop.f32.mrb[171].mxu0 }
 0x512   : > { %v3130_v49 = vpop.f32.mrb[20].mxu1 }
 0x513   : > { %5127 = vst [vmem:[%s9039_s17 + $0x2b8] sm:$0xff] %v4389_v35  ;;  %v3131_v25 = vadd.f32 %v9358_v26, %v3130_v49  ;;  %v6696_v51 = vpop.f32.mrb[21].mxu1  ;;  %7207 = vmatmul.mubr.bf16.gmra.mrb[20].mxu0 %v3881_v33  ;;  %v10257_v35 = vld [vmem:[#allocation22_spill] sm:$0xff] }
 0x514   : > { %v3133_v15 = vpop.f32.mrb[22].mxu1  ;;  %7210 = vmatprep.mubr.msk.bf16.mxu0 %vm7475_vm0, %v10202_v32 }
 0x515   : > { %v3134_v30 = vadd.f32 %v9358_v26, %v3133_v15  ;;  %v6697_v24 = vpop.f32.mrb[23].mxu1  ;;  %v3703_v4 = vmax.f32 %v3131_v25, 0.0 }
 0x516   : > { %v4393_v42 = vpop.f32.mrb[172].mxu0 }
 0x517   : > { %v3704_v36 = vmax.f32 %v3134_v30, 0.0  ;;  %v4394_v38 = vadd.f32 %v9313_v6, %v4393_v42  ;;  %6803 = vmatmul.mubr.bf16.gmra.mrb[128].mxu1 %v10254_v59  ;;  %v7104_v37 = vpop.f32.mrb[173].mxu0 }
 0x518   : > { %v4396_v22 = vpop.f32.mrb[174].mxu0  ;;  %6806 = vmatprep.mubr.msk.bf16.mxu1 %vm7475_vm0, %v10202_v32 }
 0x519   : > { %v3882_v11 = vpack.c.bf16 %v3704_v36, %v3703_v4  ;;  %5128 = vst [vmem:[%s9039_s17 + $0x2c0] sm:$0xff] %v4394_v38  ;;  %v4397_v8 = vadd.f32 %v9313_v6, %v4396_v22  ;;  %v7105_v13 = vpop.f32.mrb[175].mxu0 }
 0x51a   : > { %v3138_v50 = vpop.f32.mrb[24].mxu1 }
 0x51b   : > { %5129 = vst [vmem:[%s9039_s17 + $0x2c8] sm:$0xff] %v4397_v8  ;;  %v3139_v27 = vadd.f32 %v9358_v26, %v3138_v50  ;;  %v6700_v52 = vpop.f32.mrb[25].mxu1  ;;  %7211 = vmatmul.mubr.bf16.gmra.mrb[24].mxu0 %v3882_v11  ;;  %v10258_v8 = vld [vmem:[#allocation23_spill] sm:$0xff] }
 0x51c   : > { %v3141_v57 = vpop.f32.mrb[26].mxu1  ;;  %7214 = vmatprep.mubr.msk.bf16.mxu0 %vm7475_vm0, %v10202_v32 }
 0x51d   : > { %v3142_v0 = vadd.f32 %v9358_v26, %v3141_v57  ;;  %v6701_v28 = vpop.f32.mrb[27].mxu1  ;;  %v3705_v58 = vmax.f32 %v3139_v27, 0.0 }
 0x51e   : > { %v4401_v40 = vpop.f32.mrb[176].mxu0 }
 0x51f   : > { %v3706_v61 = vmax.f32 %v3142_v0, 0.0  ;;  %v4402_v7 = vadd.f32 %v9313_v6, %v4401_v40  ;;  %6807 = vmatmul.mubr.bf16.gmra.mrb[132].mxu1 %v10255_v55  ;;  %v7108_v2 = vpop.f32.mrb[177].mxu0 }
 0x520   : > { %v4404_v53 = vpop.f32.mrb[178].mxu0  ;;  %6810 = vmatprep.mubr.msk.bf16.mxu1 %vm7475_vm0, %v10202_v32 }
 0x521   : > { %v3883_v29 = vpack.c.bf16 %v3706_v61, %v3705_v58  ;;  %5130 = vst [vmem:[%s9039_s17 + $0x2d0] sm:$0xff] %v4402_v7  ;;  %v4405_v19 = vadd.f32 %v9313_v6, %v4404_v53  ;;  %v7109_v45 = vpop.f32.mrb[179].mxu0 }
 0x522   : > { %v3146_v63 = vpop.f32.mrb[28].mxu1 }
 0x523   : > { %5131 = vst [vmem:[%s9039_s17 + $0x2d8] sm:$0xff] %v4405_v19  ;;  %v3147_v39 = vadd.f32 %v9358_v26, %v3146_v63  ;;  %v6704_v48 = vpop.f32.mrb[29].mxu1  ;;  %7215 = vmatmul.mubr.bf16.gmra.mrb[28].mxu0 %v3883_v29  ;;  %v10259_v19 = vld [vmem:[#allocation24_spill] sm:$0xff] }
 0x524   : > { %v3149_v3 = vpop.f32.mrb[30].mxu1  ;;  %7218 = vmatprep.mubr.msk.bf16.mxu0 %vm7475_vm0, %v10202_v32 }
 0x525   : > { %v3150_v54 = vadd.f32 %v9358_v26, %v3149_v3  ;;  %v6705_v41 = vpop.f32.mrb[31].mxu1  ;;  %v3707_v17 = vmax.f32 %v3147_v39, 0.0 }
 0x526   : > { %v4409_v1 = vpop.f32.mrb[180].mxu0 }
 0x527   : > { %v3708_v34 = vmax.f32 %v3150_v54, 0.0  ;;  %v4410_v31 = vadd.f32 %v9313_v6, %v4409_v1  ;;  %6811 = vmatmul.mubr.bf16.gmra.mrb[136].mxu1 %v10256_v56  ;;  %v7112_v18 = vpop.f32.mrb[181].mxu0 }
 0x528   : > { %v4412_v43 = vpop.f32.mrb[182].mxu0  ;;  %6814 = vmatprep.mubr.msk.bf16.mxu1 %vm7475_vm0, %v10202_v32 }
 0x529   : > { %v3884_v5 = vpack.c.bf16 %v3708_v34, %v3707_v17  ;;  %5132 = vst [vmem:[%s9039_s17 + $0x2e0] sm:$0xff] %v4410_v31  ;;  %v4413_v47 = vadd.f32 %v9313_v6, %v4412_v43  ;;  %v7113_v14 = vpop.f32.mrb[183].mxu0 }
 0x52a   : > { %v3154_v12 = vpop.f32.mrb[32].mxu1 }
 0x52b   : > { %5133 = vst [vmem:[%s9039_s17 + $0x2e8] sm:$0xff] %v4413_v47  ;;  %v3155_v60 = vadd.f32 %v9358_v26, %v3154_v12  ;;  %v6708_v16 = vpop.f32.mrb[33].mxu1  ;;  %7219 = vmatmul.mubr.bf16.gmra.mrb[32].mxu0 %v3884_v5  ;;  %v10260_v47 = vld [vmem:[#allocation25_spill] sm:$0xff] }
 0x52c   : > { %v3157_v62 = vpop.f32.mrb[34].mxu1  ;;  %7222 = vmatprep.mubr.msk.bf16.mxu0 %vm7475_vm0, %v10202_v32 }
 0x52d   : > { %v3158_v20 = vadd.f32 %v9358_v26, %v3157_v62  ;;  %v6709_v44 = vpop.f32.mrb[35].mxu1  ;;  %v3709_v21 = vmax.f32 %v3155_v60, 0.0 }
 0x52e   : > { %v4417_v9 = vpop.f32.mrb[184].mxu0 }
 0x52f   : > { %v3710_v10 = vmax.f32 %v3158_v20, 0.0  ;;  %v4418_v33 = vadd.f32 %v9313_v6, %v4417_v9  ;;  %6815 = vmatmul.mubr.bf16.gmra.mrb[140].mxu1 %v10257_v35  ;;  %v7116_v46 = vpop.f32.mrb[185].mxu0 }
 0x530   : > { %v4420_v49 = vpop.f32.mrb[186].mxu0  ;;  %6818 = vmatprep.mubr.msk.bf16.mxu1 %vm7475_vm0, %v10202_v32 }
 0x531   : > { %v3885_v25 = vpack.c.bf16 %v3710_v10, %v3709_v21  ;;  %5134 = vst [vmem:[%s9039_s17 + $0x2f0] sm:$0xff] %v4418_v33  ;;  %v4421_v51 = vadd.f32 %v9313_v6, %v4420_v49  ;;  %v7117_v15 = vpop.f32.mrb[187].mxu0 }
 0x532   : > { %v3162_v30 = vpop.f32.mrb[36].mxu1 }
 0x533   : > { %5135 = vst [vmem:[%s9039_s17 + $0x2f8] sm:$0xff] %v4421_v51  ;;  %v3163_v24 = vadd.f32 %v9358_v26, %v3162_v30  ;;  %v6712_v42 = vpop.f32.mrb[37].mxu1  ;;  %7223 = vmatmul.mubr.bf16.gmra.mrb[36].mxu0 %v3885_v25  ;;  %v10261_v51 = vld [vmem:[#allocation26_spill] sm:$0xff] }
 0x534   : > { %v3165_v4 = vpop.f32.mrb[38].mxu1  ;;  %7226 = vmatprep.mubr.msk.bf16.mxu0 %vm7475_vm0, %v10202_v32 }
 0x535   : > { %v3166_v36 = vadd.f32 %v9358_v26, %v3165_v4  ;;  %v6713_v38 = vpop.f32.mrb[39].mxu1  ;;  %v3711_v37 = vmax.f32 %v3163_v24, 0.0 }
 0x536   : > { %v4425_v59 = vpop.f32.mrb[188].mxu0 }
 0x537   : > { %v3712_v22 = vmax.f32 %v3166_v36, 0.0  ;;  %v4426_v11 = vadd.f32 %v9313_v6, %v4425_v59  ;;  %6819 = vmatmul.mubr.bf16.gmra.mrb[144].mxu1 %v10258_v8  ;;  %v7120_v13 = vpop.f32.mrb[189].mxu0 }
 0x538   : > { %v4428_v50 = vpop.f32.mrb[190].mxu0  ;;  %6822 = vmatprep.mubr.msk.bf16.mxu1 %vm7475_vm0, %v10202_v32 }
 0x539   : > { %v3886_v27 = vpack.c.bf16 %v3712_v22, %v3711_v37  ;;  %5136 = vst [vmem:[%s9039_s17 + $0x300] sm:$0xff] %v4426_v11  ;;  %v4429_v52 = vadd.f32 %v9313_v6, %v4428_v50  ;;  %v7121_v57 = vpop.f32.mrb[191].mxu0  ;;  %v9598_v6 = vld [vmem:[%s10189_s6] ss:$0 sm:$0xff] }
 0x53a   : > { %v3170_v0 = vpop.f32.mrb[40].mxu1 }
 0x53b   : > { %5137 = vst [vmem:[%s9039_s17 + $0x308] sm:$0xff] %v4429_v52  ;;  %v3171_v28 = vadd.f32 %v9358_v26, %v3170_v0  ;;  %v6716_v40 = vpop.f32.mrb[41].mxu1  ;;  %7227 = vmatmul.mubr.bf16.gmra.mrb[40].mxu0 %v3886_v27  ;;  %v10262_v52 = vld [vmem:[#allocation27_spill] sm:$0xff] }
 0x53c   : > { %v3173_v58 = vpop.f32.mrb[42].mxu1  ;;  %7230 = vmatprep.mubr.msk.bf16.mxu0 %vm7475_vm0, %v10202_v32 }
 0x53d   : > { %v3174_v61 = vadd.f32 %v9358_v26, %v3173_v58  ;;  %v6717_v7 = vpop.f32.mrb[43].mxu1  ;;  %v3713_v2 = vmax.f32 %v3171_v28, 0.0 }
 0x53e   : > { %v4433_v55 = vpop.f32.mrb[192].mxu0 }
 0x53f   : > { %v3714_v53 = vmax.f32 %v3174_v61, 0.0  ;;  %v4434_v29 = vadd.f32 %v9598_v6, %v4433_v55  ;;  %6823 = vmatmul.mubr.bf16.gmra.mrb[148].mxu1 %v10259_v19  ;;  %v7124_v45 = vpop.f32.mrb[193].mxu0 }
 0x540   : > { %v4436_v63 = vpop.f32.mrb[194].mxu0  ;;  %6826 = vmatprep.mubr.msk.bf16.mxu1 %vm7475_vm0, %v10202_v32 }
 0x541   : > { %v3887_v39 = vpack.c.bf16 %v3714_v53, %v3713_v2  ;;  %5138 = vst [vmem:[%s9039_s17 + $0x310] sm:$0xff] %v4434_v29  ;;  %v4437_v48 = vadd.f32 %v9598_v6, %v4436_v63  ;;  %v7125_v3 = vpop.f32.mrb[195].mxu0 }
 0x542   : > { %v3178_v54 = vpop.f32.mrb[44].mxu1 }
 0x543   : > { %5139 = vst [vmem:[%s9039_s17 + $0x318] sm:$0xff] %v4437_v48  ;;  %v3179_v41 = vadd.f32 %v9358_v26, %v3178_v54  ;;  %v6720_v1 = vpop.f32.mrb[45].mxu1  ;;  %7231 = vmatmul.mubr.bf16.gmra.mrb[44].mxu0 %v3887_v39  ;;  %v10263_v48 = vld [vmem:[#allocation28_spill] sm:$0xff] }
 0x544   : > { %v3181_v17 = vpop.f32.mrb[46].mxu1  ;;  %7234 = vmatprep.mubr.msk.bf16.mxu0 %vm7475_vm0, %v10202_v32 }
 0x545   : > { %v3182_v34 = vadd.f32 %v9358_v26, %v3181_v17  ;;  %v6721_v31 = vpop.f32.mrb[47].mxu1  ;;  %v3715_v18 = vmax.f32 %v3179_v41, 0.0 }
 0x546   : > { %v4441_v56 = vpop.f32.mrb[196].mxu0 }
 0x547   : > { %v3716_v43 = vmax.f32 %v3182_v34, 0.0  ;;  %v4442_v5 = vadd.f32 %v9598_v6, %v4441_v56  ;;  %6827 = vmatmul.mubr.bf16.gmra.mrb[152].mxu1 %v10260_v47  ;;  %v7128_v14 = vpop.f32.mrb[197].mxu0 }
 0x548   : > { %v4444_v12 = vpop.f32.mrb[198].mxu0  ;;  %6830 = vmatprep.mubr.msk.bf16.mxu1 %vm7475_vm0, %v10202_v32 }
 0x549   : > { %v3888_v60 = vpack.c.bf16 %v3716_v43, %v3715_v18  ;;  %5140 = vst [vmem:[%s9039_s17 + $0x320] sm:$0xff] %v4442_v5  ;;  %v4445_v16 = vadd.f32 %v9598_v6, %v4444_v12  ;;  %v7129_v62 = vpop.f32.mrb[199].mxu0 }
 0x54a   : > { %v3186_v20 = vpop.f32.mrb[48].mxu1 }
 0x54b   : > { %5141 = vst [vmem:[%s9039_s17 + $0x328] sm:$0xff] %v4445_v16  ;;  %v3187_v44 = vadd.f32 %v9358_v26, %v3186_v20  ;;  %v6724_v9 = vpop.f32.mrb[49].mxu1  ;;  %7235 = vmatmul.mubr.bf16.gmra.mrb[48].mxu0 %v3888_v60  ;;  %v10264_v16 = vld [vmem:[#allocation29_spill] sm:$0xff] }
 0x54c   : > { %v3189_v21 = vpop.f32.mrb[50].mxu1  ;;  %7238 = vmatprep.mubr.msk.bf16.mxu0 %vm7475_vm0, %v10202_v32 }
 0x54d   : > { %v3190_v10 = vadd.f32 %v9358_v26, %v3189_v21  ;;  %v6725_v33 = vpop.f32.mrb[51].mxu1  ;;  %v3717_v46 = vmax.f32 %v3187_v44, 0.0 }
 0x54e   : > { %v4449_v35 = vpop.f32.mrb[200].mxu0 }
 0x54f   : > { %v3718_v49 = vmax.f32 %v3190_v10, 0.0  ;;  %v4450_v25 = vadd.f32 %v9598_v6, %v4449_v35  ;;  %6831 = vmatmul.mubr.bf16.gmra.mrb[156].mxu1 %v10261_v51  ;;  %v7132_v15 = vpop.f32.mrb[201].mxu0 }
 0x550   : > { %v4452_v30 = vpop.f32.mrb[202].mxu0  ;;  %6834 = vmatprep.mubr.msk.bf16.mxu1 %vm7475_vm0, %v10202_v32 }
 0x551   : > { %v3889_v24 = vpack.c.bf16 %v3718_v49, %v3717_v46  ;;  %5142 = vst [vmem:[%s9039_s17 + $0x330] sm:$0xff] %v4450_v25  ;;  %v4453_v42 = vadd.f32 %v9598_v6, %v4452_v30  ;;  %v7133_v4 = vpop.f32.mrb[203].mxu0 }
 0x552   : > { %v3194_v36 = vpop.f32.mrb[52].mxu1 }
 0x553   : > { %5143 = vst [vmem:[%s9039_s17 + $0x338] sm:$0xff] %v4453_v42  ;;  %v3195_v38 = vadd.f32 %v9358_v26, %v3194_v36  ;;  %v6728_v59 = vpop.f32.mrb[53].mxu1  ;;  %7239 = vmatmul.mubr.bf16.gmra.mrb[52].mxu0 %v3889_v24  ;;  %v10265_v42 = vld [vmem:[#allocation30_spill] sm:$0xff] }
 0x554   : > { %v3197_v37 = vpop.f32.mrb[54].mxu1  ;;  %7242 = vmatprep.mubr.msk.bf16.mxu0 %vm7475_vm0, %v10202_v32 }
 0x555   : > { %v3198_v22 = vadd.f32 %v9358_v26, %v3197_v37  ;;  %v6729_v11 = vpop.f32.mrb[55].mxu1  ;;  %v3719_v13 = vmax.f32 %v3195_v38, 0.0  ;;  %v9643_v26 = vld [vmem:[%s10187_s4] ss:$0 sm:$0xff] }
 0x556   : > { %v4457_v8 = vpop.f32.mrb[204].mxu0 }
 0x557   : > { %v3720_v50 = vmax.f32 %v3198_v22, 0.0  ;;  %v4458_v27 = vadd.f32 %v9598_v6, %v4457_v8  ;;  %6835 = vmatmul.mubr.bf16.gmra.mrb[160].mxu1 %v10262_v52  ;;  %v7136_v57 = vpop.f32.mrb[205].mxu0 }
 0x558   : > { %v4460_v0 = vpop.f32.mrb[206].mxu0  ;;  %6838 = vmatprep.mubr.msk.bf16.mxu1 %vm7475_vm0, %v10202_v32 }
 0x559   : > { %v3890_v28 = vpack.c.bf16 %v3720_v50, %v3719_v13  ;;  %5144 = vst [vmem:[%s9039_s17 + $0x340] sm:$0xff] %v4458_v27  ;;  %v4461_v40 = vadd.f32 %v9598_v6, %v4460_v0  ;;  %v7137_v58 = vpop.f32.mrb[207].mxu0 }
 0x55a   : > { %v3202_v61 = vpop.f32.mrb[56].mxu1 }
 0x55b   : > { %5145 = vst [vmem:[%s9039_s17 + $0x348] sm:$0xff] %v4461_v40  ;;  %v3203_v7 = vadd.f32 %v9643_v26, %v3202_v61  ;;  %v6732_v55 = vpop.f32.mrb[57].mxu1  ;;  %7243 = vmatmul.mubr.bf16.gmra.mrb[56].mxu0 %v3890_v28  ;;  %v10266_v40 = vld [vmem:[#allocation31_spill] sm:$0xff] }
 0x55c   : > { %v3205_v2 = vpop.f32.mrb[58].mxu1  ;;  %7246 = vmatprep.mubr.msk.bf16.mxu0 %vm7475_vm0, %v10202_v32 }
 0x55d   : > { %v3206_v53 = vadd.f32 %v9643_v26, %v3205_v2  ;;  %v6733_v29 = vpop.f32.mrb[59].mxu1  ;;  %v3721_v45 = vmax.f32 %v3203_v7, 0.0 }
 0x55e   : > { %v4465_v19 = vpop.f32.mrb[208].mxu0 }
 0x55f   : > { %v3722_v63 = vmax.f32 %v3206_v53, 0.0  ;;  %v4466_v39 = vadd.f32 %v9598_v6, %v4465_v19  ;;  %6839 = vmatmul.mubr.bf16.gmra.mrb[164].mxu1 %v10263_v48  ;;  %v7140_v3 = vpop.f32.mrb[209].mxu0 }
 0x560   : > { %v4468_v54 = vpop.f32.mrb[210].mxu0  ;;  %6842 = vmatprep.mubr.msk.bf16.mxu1 %vm7475_vm0, %v10202_v32 }
 0x561   : > { %v3891_v41 = vpack.c.bf16 %v3722_v63, %v3721_v45  ;;  %5146 = vst [vmem:[%s9039_s17 + $0x350] sm:$0xff] %v4466_v39  ;;  %v4469_v1 = vadd.f32 %v9598_v6, %v4468_v54  ;;  %v7141_v17 = vpop.f32.mrb[211].mxu0 }
 0x562   : > { %v3210_v34 = vpop.f32.mrb[60].mxu1 }
 0x563   : > { %5147 = vst [vmem:[%s9039_s17 + $0x358] sm:$0xff] %v4469_v1  ;;  %v3211_v31 = vadd.f32 %v9643_v26, %v3210_v34  ;;  %v6736_v56 = vpop.f32.mrb[61].mxu1  ;;  %7247 = vmatmul.mubr.bf16.gmra.mrb[60].mxu0 %v3891_v41  ;;  %v10267_v1 = vld [vmem:[#allocation32_spill] sm:$0xff] }
 0x564   : > { %v3213_v18 = vpop.f32.mrb[62].mxu1  ;;  %7250 = vmatprep.mubr.msk.bf16.mxu0 %vm7475_vm0, %v10202_v32 }
 0x565   : > { %v3214_v43 = vadd.f32 %v9643_v26, %v3213_v18  ;;  %v6737_v5 = vpop.f32.mrb[63].mxu1  ;;  %v3723_v14 = vmax.f32 %v3211_v31, 0.0 }
 0x566   : > { %v4473_v47 = vpop.f32.mrb[212].mxu0 }
 0x567   : > { %v3724_v12 = vmax.f32 %v3214_v43, 0.0  ;;  %v4474_v60 = vadd.f32 %v9598_v6, %v4473_v47  ;;  %6843 = vmatmul.mubr.bf16.gmra.mrb[168].mxu1 %v10264_v16  ;;  %v7144_v62 = vpop.f32.mrb[213].mxu0 }
 0x568   : > { %v4476_v20 = vpop.f32.mrb[214].mxu0  ;;  %6846 = vmatprep.mubr.msk.bf16.mxu1 %vm7475_vm0, %v10202_v32 }
 0x569   : > { %v3892_v44 = vpack.c.bf16 %v3724_v12, %v3723_v14  ;;  %5148 = vst [vmem:[%s9039_s17 + $0x360] sm:$0xff] %v4474_v60  ;;  %v4477_v9 = vadd.f32 %v9598_v6, %v4476_v20  ;;  %v7145_v21 = vpop.f32.mrb[215].mxu0 }
 0x56a   : > { %v3218_v10 = vpop.f32.mrb[64].mxu1 }
 0x56b   : > { %5149 = vst [vmem:[%s9039_s17 + $0x368] sm:$0xff] %v4477_v9  ;;  %v3219_v33 = vadd.f32 %v9643_v26, %v3218_v10  ;;  %v6740_v35 = vpop.f32.mrb[65].mxu1  ;;  %7251 = vmatmul.mubr.bf16.gmra.mrb[64].mxu0 %v3892_v44  ;;  %v10268_v9 = vld [vmem:[#allocation33_spill] sm:$0xff] }
 0x56c   : > { %v3221_v46 = vpop.f32.mrb[66].mxu1  ;;  %7254 = vmatprep.mubr.msk.bf16.mxu0 %vm7475_vm0, %v10202_v32 }
 0x56d   : > { %v3222_v49 = vadd.f32 %v9643_v26, %v3221_v46  ;;  %v6741_v25 = vpop.f32.mrb[67].mxu1  ;;  %v3725_v15 = vmax.f32 %v3219_v33, 0.0 }
 0x56e   : > { %v4481_v51 = vpop.f32.mrb[216].mxu0 }
 0x56f   : > { %v3726_v30 = vmax.f32 %v3222_v49, 0.0  ;;  %v4482_v24 = vadd.f32 %v9598_v6, %v4481_v51  ;;  %6847 = vmatmul.mubr.bf16.gmra.mrb[172].mxu1 %v10265_v42  ;;  %v7148_v4 = vpop.f32.mrb[217].mxu0 }
 0x570   : > { %v4484_v36 = vpop.f32.mrb[218].mxu0  ;;  %6850 = vmatprep.mubr.msk.bf16.mxu1 %vm7475_vm0, %v10202_v32 }
 0x571   : > { %v3893_v38 = vpack.c.bf16 %v3726_v30, %v3725_v15  ;;  %5150 = vst [vmem:[%s9039_s17 + $0x370] sm:$0xff] %v4482_v24  ;;  %v4485_v59 = vadd.f32 %v9598_v6, %v4484_v36  ;;  %v7149_v37 = vpop.f32.mrb[219].mxu0 }
 0x572   : > { %v3226_v22 = vpop.f32.mrb[68].mxu1 }
 0x573   : > { %5151 = vst [vmem:[%s9039_s17 + $0x378] sm:$0xff] %v4485_v59  ;;  %v3227_v11 = vadd.f32 %v9643_v26, %v3226_v22  ;;  %v6744_v8 = vpop.f32.mrb[69].mxu1  ;;  %7255 = vmatmul.mubr.bf16.gmra.mrb[68].mxu0 %v3893_v38  ;;  %v10269_v59 = vld [vmem:[#allocation34_spill] sm:$0xff] }
 0x574   : > { %v3229_v13 = vpop.f32.mrb[70].mxu1  ;;  %7258 = vmatprep.mubr.msk.bf16.mxu0 %vm7475_vm0, %v10202_v32 }
 0x575   : > { %v3230_v50 = vadd.f32 %v9643_v26, %v3229_v13  ;;  %v6745_v27 = vpop.f32.mrb[71].mxu1  ;;  %v3727_v57 = vmax.f32 %v3227_v11, 0.0 }
 0x576   : > { %v4489_v52 = vpop.f32.mrb[220].mxu0 }
 0x577   : > { %v3728_v0 = vmax.f32 %v3230_v50, 0.0  ;;  %v4490_v28 = vadd.f32 %v9598_v6, %v4489_v52  ;;  %6851 = vmatmul.mubr.bf16.gmra.mrb[176].mxu1 %v10266_v40  ;;  %v7152_v58 = vpop.f32.mrb[221].mxu0 }
 0x578   : > { %v4492_v61 = vpop.f32.mrb[222].mxu0  ;;  %6854 = vmatprep.mubr.msk.bf16.mxu1 %vm7475_vm0, %v10202_v32 }
 0x579   : > { %v3894_v7 = vpack.c.bf16 %v3728_v0, %v3727_v57  ;;  %5152 = vst [vmem:[%s9039_s17 + $0x380] sm:$0xff] %v4490_v28  ;;  %v4493_v55 = vadd.f32 %v9598_v6, %v4492_v61  ;;  %v7153_v2 = vpop.f32.mrb[223].mxu0 }
 0x57a   : > { %v3234_v53 = vpop.f32.mrb[72].mxu1 }
 0x57b   : > { %5153 = vst [vmem:[%s9039_s17 + $0x388] sm:$0xff] %v4493_v55  ;;  %v3235_v29 = vadd.f32 %v9643_v26, %v3234_v53  ;;  %v6748_v19 = vpop.f32.mrb[73].mxu1  ;;  %7259 = vmatmul.mubr.bf16.gmra.mrb[72].mxu0 %v3894_v7  ;;  %v10270_v55 = vld [vmem:[#allocation35_spill] sm:$0xff] }
 0x57c   : > { %v3237_v45 = vpop.f32.mrb[74].mxu1  ;;  %7262 = vmatprep.mubr.msk.bf16.mxu0 %vm7475_vm0, %v10202_v32 }
 0x57d   : > { %v3238_v63 = vadd.f32 %v9643_v26, %v3237_v45  ;;  %v6749_v39 = vpop.f32.mrb[75].mxu1  ;;  %v3729_v3 = vmax.f32 %v3235_v29, 0.0 }
 0x57e   : > { %v4497_v48 = vpop.f32.mrb[224].mxu0 }
 0x57f   : > { %v3730_v54 = vmax.f32 %v3238_v63, 0.0  ;;  %v4498_v41 = vadd.f32 %v9598_v6, %v4497_v48  ;;  %6855 = vmatmul.mubr.bf16.gmra.mrb[180].mxu1 %v10267_v1  ;;  %v7156_v17 = vpop.f32.mrb[225].mxu0 }
 0x580   : > { %v4500_v34 = vpop.f32.mrb[226].mxu0  ;;  %6858 = vmatprep.mubr.msk.bf16.mxu1 %vm7475_vm0, %v10202_v32 }
 0x581   : > { %v3895_v31 = vpack.c.bf16 %v3730_v54, %v3729_v3  ;;  %5154 = vst [vmem:[%s9039_s17 + $0x390] sm:$0xff] %v4498_v41  ;;  %v4501_v56 = vadd.f32 %v9598_v6, %v4500_v34  ;;  %v7157_v18 = vpop.f32.mrb[227].mxu0 }
 0x582   : > { %v3242_v43 = vpop.f32.mrb[76].mxu1 }
 0x583   : > { %5155 = vst [vmem:[%s9039_s17 + $0x398] sm:$0xff] %v4501_v56  ;;  %v3243_v5 = vadd.f32 %v9643_v26, %v3242_v43  ;;  %v6752_v47 = vpop.f32.mrb[77].mxu1  ;;  %7263 = vmatmul.mubr.bf16.gmra.mrb[76].mxu0 %v3895_v31  ;;  %v10271_v56 = vld [vmem:[#allocation36_spill] sm:$0xff] }
 0x584   : > { %v3245_v14 = vpop.f32.mrb[78].mxu1  ;;  %7266 = vmatprep.mubr.msk.bf16.mxu0 %vm7475_vm0, %v10202_v32 }
 0x585   : > { %v3246_v12 = vadd.f32 %v9643_v26, %v3245_v14  ;;  %v6753_v60 = vpop.f32.mrb[79].mxu1  ;;  %v3731_v62 = vmax.f32 %v3243_v5, 0.0 }
 0x586   : > { %v4505_v16 = vpop.f32.mrb[228].mxu0 }
 0x587   : > { %v3732_v20 = vmax.f32 %v3246_v12, 0.0  ;;  %v4506_v44 = vadd.f32 %v9598_v6, %v4505_v16  ;;  %6859 = vmatmul.mubr.bf16.gmra.mrb[184].mxu1 %v10268_v9  ;;  %v7160_v21 = vpop.f32.mrb[229].mxu0 }
 0x588   : > { %v4508_v10 = vpop.f32.mrb[230].mxu0  ;;  %6862 = vmatprep.mubr.msk.bf16.mxu1 %vm7475_vm0, %v10202_v32 }
 0x589   : > { %v3896_v33 = vpack.c.bf16 %v3732_v20, %v3731_v62  ;;  %5156 = vst [vmem:[%s9039_s17 + $0x3a0] sm:$0xff] %v4506_v44  ;;  %v4509_v35 = vadd.f32 %v9598_v6, %v4508_v10  ;;  %v7161_v46 = vpop.f32.mrb[231].mxu0 }
 0x58a   : > { %v3250_v49 = vpop.f32.mrb[80].mxu1 }
 0x58b   : > { %5157 = vst [vmem:[%s9039_s17 + $0x3a8] sm:$0xff] %v4509_v35  ;;  %v3251_v25 = vadd.f32 %v9643_v26, %v3250_v49  ;;  %v6756_v51 = vpop.f32.mrb[81].mxu1  ;;  %7267 = vmatmul.mubr.bf16.gmra.mrb[80].mxu0 %v3896_v33  ;;  %v10272_v35 = vld [vmem:[#allocation37_spill] sm:$0xff] }
 0x58c   : > { %v3253_v15 = vpop.f32.mrb[82].mxu1  ;;  %7270 = vmatprep.mubr.msk.bf16.mxu0 %vm7475_vm0, %v10202_v32 }
 0x58d   : > { %v3254_v30 = vadd.f32 %v9643_v26, %v3253_v15  ;;  %v6757_v24 = vpop.f32.mrb[83].mxu1  ;;  %v3733_v4 = vmax.f32 %v3251_v25, 0.0 }
 0x58e   : > { %v4513_v42 = vpop.f32.mrb[232].mxu0 }
 0x58f   : > { %v3734_v36 = vmax.f32 %v3254_v30, 0.0  ;;  %v4514_v38 = vadd.f32 %v9598_v6, %v4513_v42  ;;  %6863 = vmatmul.mubr.bf16.gmra.mrb[188].mxu1 %v10269_v59  ;;  %v7164_v37 = vpop.f32.mrb[233].mxu0 }
 0x590   : > { %v4516_v22 = vpop.f32.mrb[234].mxu0  ;;  %6866 = vmatprep.mubr.msk.bf16.mxu1 %vm7475_vm0, %v10202_v32 }
 0x591   : > { %v3897_v11 = vpack.c.bf16 %v3734_v36, %v3733_v4  ;;  %5158 = vst [vmem:[%s9039_s17 + $0x3b0] sm:$0xff] %v4514_v38  ;;  %v4517_v8 = vadd.f32 %v9598_v6, %v4516_v22  ;;  %v7165_v13 = vpop.f32.mrb[235].mxu0 }
 0x592   : > { %v3258_v50 = vpop.f32.mrb[84].mxu1 }
 0x593   : > { %5159 = vst [vmem:[%s9039_s17 + $0x3b8] sm:$0xff] %v4517_v8  ;;  %v3259_v27 = vadd.f32 %v9643_v26, %v3258_v50  ;;  %v6760_v52 = vpop.f32.mrb[85].mxu1  ;;  %7271 = vmatmul.mubr.bf16.gmra.mrb[84].mxu0 %v3897_v11  ;;  %v10273_v8 = vld [vmem:[#allocation38_spill] sm:$0xff] }
 0x594   : > { %v3261_v57 = vpop.f32.mrb[86].mxu1  ;;  %7274 = vmatprep.mubr.msk.bf16.mxu0 %vm7475_vm0, %v10202_v32 }
 0x595   : > { %v3262_v0 = vadd.f32 %v9643_v26, %v3261_v57  ;;  %v6761_v28 = vpop.f32.mrb[87].mxu1  ;;  %v3735_v58 = vmax.f32 %v3259_v27, 0.0 }
 0x596   : > { %v4521_v40 = vpop.f32.mrb[236].mxu0 }
 0x597   : > { %v3736_v61 = vmax.f32 %v3262_v0, 0.0  ;;  %v4522_v7 = vadd.f32 %v9598_v6, %v4521_v40  ;;  %6867 = vmatmul.mubr.bf16.gmra.mrb[192].mxu1 %v10270_v55  ;;  %v7168_v2 = vpop.f32.mrb[237].mxu0 }
 0x598   : > { %v4524_v53 = vpop.f32.mrb[238].mxu0  ;;  %6870 = vmatprep.mubr.msk.bf16.mxu1 %vm7475_vm0, %v10202_v32 }
 0x599   : > { %v3898_v29 = vpack.c.bf16 %v3736_v61, %v3735_v58  ;;  %5160 = vst [vmem:[%s9039_s17 + $0x3c0] sm:$0xff] %v4522_v7  ;;  %v4525_v19 = vadd.f32 %v9598_v6, %v4524_v53  ;;  %v7169_v45 = vpop.f32.mrb[239].mxu0 }
 0x59a   : > { %v3266_v63 = vpop.f32.mrb[88].mxu1 }
 0x59b   : > { %5161 = vst [vmem:[%s9039_s17 + $0x3c8] sm:$0xff] %v4525_v19  ;;  %v3267_v39 = vadd.f32 %v9643_v26, %v3266_v63  ;;  %v6764_v48 = vpop.f32.mrb[89].mxu1  ;;  %7275 = vmatmul.mubr.bf16.gmra.mrb[88].mxu0 %v3898_v29  ;;  %v10274_v19 = vld [vmem:[#allocation39_spill] sm:$0xff] }
 0x59c   : > { %v3269_v3 = vpop.f32.mrb[90].mxu1  ;;  %7278 = vmatprep.mubr.msk.bf16.mxu0 %vm7475_vm0, %v10202_v32 }
 0x59d   : > { %v3270_v54 = vadd.f32 %v9643_v26, %v3269_v3  ;;  %v6765_v41 = vpop.f32.mrb[91].mxu1  ;;  %v3737_v17 = vmax.f32 %v3267_v39, 0.0 }
 0x59e   : > { %v4529_v1 = vpop.f32.mrb[240].mxu0 }
 0x59f   : > { %v3738_v34 = vmax.f32 %v3270_v54, 0.0  ;;  %v4530_v31 = vadd.f32 %v9598_v6, %v4529_v1  ;;  %6871 = vmatmul.mubr.bf16.gmra.mrb[196].mxu1 %v10271_v56  ;;  %v7172_v18 = vpop.f32.mrb[241].mxu0 }
 0x5a0   : > { %v4532_v43 = vpop.f32.mrb[242].mxu0  ;;  %6874 = vmatprep.mubr.msk.bf16.mxu1 %vm7475_vm0, %v10202_v32 }
 0x5a1   : > { %v3899_v5 = vpack.c.bf16 %v3738_v34, %v3737_v17  ;;  %5162 = vst [vmem:[%s9039_s17 + $0x3d0] sm:$0xff] %v4530_v31  ;;  %v4533_v47 = vadd.f32 %v9598_v6, %v4532_v43  ;;  %v7173_v14 = vpop.f32.mrb[243].mxu0 }
 0x5a2   : > { %v3274_v12 = vpop.f32.mrb[92].mxu1 }
 0x5a3   : > { %5163 = vst [vmem:[%s9039_s17 + $0x3d8] sm:$0xff] %v4533_v47  ;;  %v3275_v60 = vadd.f32 %v9643_v26, %v3274_v12  ;;  %v6768_v16 = vpop.f32.mrb[93].mxu1  ;;  %7279 = vmatmul.mubr.bf16.gmra.mrb[92].mxu0 %v3899_v5  ;;  %v10275_v47 = vld [vmem:[#allocation40_spill] sm:$0xff] }
 0x5a4   : > { %v3277_v62 = vpop.f32.mrb[94].mxu1  ;;  %7282 = vmatprep.mubr.msk.bf16.mxu0 %vm7475_vm0, %v10202_v32 }
 0x5a5   : > { %v3278_v20 = vadd.f32 %v9643_v26, %v3277_v62  ;;  %v6769_v44 = vpop.f32.mrb[95].mxu1  ;;  %v3739_v21 = vmax.f32 %v3275_v60, 0.0 }
 0x5a6   : > { %v4537_v9 = vpop.f32.mrb[244].mxu0 }
 0x5a7   : > { %v3740_v10 = vmax.f32 %v3278_v20, 0.0  ;;  %v4538_v33 = vadd.f32 %v9598_v6, %v4537_v9  ;;  %6875 = vmatmul.mubr.bf16.gmra.mrb[200].mxu1 %v10272_v35  ;;  %v7176_v46 = vpop.f32.mrb[245].mxu0 }
 0x5a8   : > { %v4540_v49 = vpop.f32.mrb[246].mxu0  ;;  %6878 = vmatprep.mubr.msk.bf16.mxu1 %vm7475_vm0, %v10202_v32 }
 0x5a9   : > { %v3900_v25 = vpack.c.bf16 %v3740_v10, %v3739_v21  ;;  %5164 = vst [vmem:[%s9039_s17 + $0x3e0] sm:$0xff] %v4538_v33  ;;  %v4541_v51 = vadd.f32 %v9598_v6, %v4540_v49  ;;  %v7177_v15 = vpop.f32.mrb[247].mxu0 }
 0x5aa   : > { %v3282_v30 = vpop.f32.mrb[96].mxu1 }
 0x5ab   : > { %5165 = vst [vmem:[%s9039_s17 + $0x3e8] sm:$0xff] %v4541_v51  ;;  %v3283_v24 = vadd.f32 %v9643_v26, %v3282_v30  ;;  %v6772_v42 = vpop.f32.mrb[97].mxu1  ;;  %7283 = vmatmul.mubr.bf16.gmra.mrb[96].mxu0 %v3900_v25  ;;  %v10276_v51 = vld [vmem:[#allocation41_spill] sm:$0xff] }
 0x5ac   : > { %v3285_v4 = vpop.f32.mrb[98].mxu1  ;;  %7286 = vmatprep.mubr.msk.bf16.mxu0 %vm7475_vm0, %v10202_v32 }
 0x5ad   : > { %v3286_v36 = vadd.f32 %v9643_v26, %v3285_v4  ;;  %v6773_v38 = vpop.f32.mrb[99].mxu1  ;;  %v3741_v37 = vmax.f32 %v3283_v24, 0.0 }
 0x5ae   : > { %v4545_v59 = vpop.f32.mrb[248].mxu0 }
 0x5af   : > { %v3742_v22 = vmax.f32 %v3286_v36, 0.0  ;;  %v4546_v11 = vadd.f32 %v9598_v6, %v4545_v59  ;;  %6879 = vmatmul.mubr.bf16.gmra.mrb[204].mxu1 %v10273_v8  ;;  %v7180_v13 = vpop.f32.mrb[249].mxu0 }
 0x5b0   : > { %v4548_v50 = vpop.f32.mrb[250].mxu0  ;;  %6882 = vmatprep.mubr.msk.bf16.mxu1 %vm7475_vm0, %v10202_v32 }
 0x5b1   : > { %v3901_v27 = vpack.c.bf16 %v3742_v22, %v3741_v37  ;;  %5166 = vst [vmem:[%s9039_s17 + $0x3f0] sm:$0xff] %v4546_v11  ;;  %v4549_v52 = vadd.f32 %v9598_v6, %v4548_v50  ;;  %v7181_v57 = vpop.f32.mrb[251].mxu0 }
 0x5b2   : > { %v3290_v0 = vpop.f32.mrb[100].mxu1 }
 0x5b3   : > { %5167 = vst [vmem:[%s9039_s17 + $0x3f8] sm:$0xff] %v4549_v52  ;;  %v3291_v28 = vadd.f32 %v9643_v26, %v3290_v0  ;;  %v6776_v40 = vpop.f32.mrb[101].mxu1  ;;  %7287 = vmatmul.mubr.bf16.gmra.mrb[100].mxu0 %v3901_v27  ;;  %v10277_v52 = vld [vmem:[#allocation42_spill] sm:$0xff] }
 0x5b4   : > { %v3293_v58 = vpop.f32.mrb[102].mxu1  ;;  %7290 = vmatprep.mubr.msk.bf16.mxu0 %vm7475_vm0, %v10202_v32 }
 0x5b5   : > { %v3294_v61 = vadd.f32 %v9643_v26, %v3293_v58  ;;  %v6777_v7 = vpop.f32.mrb[103].mxu1  ;;  %v3743_v2 = vmax.f32 %v3291_v28, 0.0 }
 0x5b6   : > { %v4553_v55 = vpop.f32.mrb[252].mxu0 }
 0x5b7   : > { %v3744_v53 = vmax.f32 %v3294_v61, 0.0  ;;  %v4554_v29 = vadd.f32 %v9598_v6, %v4553_v55  ;;  %6883 = vmatmul.mubr.bf16.gmra.mrb[208].mxu1 %v10274_v19  ;;  %v7184_v45 = vpop.f32.mrb[253].mxu0 }
 0x5b8   : > { %v4556_v63 = vpop.f32.mrb[254].mxu0  ;;  %6886 = vmatprep.mubr.msk.bf16.mxu1 %vm7475_vm0, %v10202_v32 }
 0x5b9   : > { %v3902_v39 = vpack.c.bf16 %v3744_v53, %v3743_v2  ;;  %5168 = vst [vmem:[%s9039_s17 + $0x400] sm:$0xff] %v4554_v29  ;;  %v4557_v48 = vadd.f32 %v9598_v6, %v4556_v63  ;;  %v7185_v3 = vpop.f32.mrb[255].mxu0 }
 0x5ba   : > { %v3298_v54 = vpop.f32.mrb[104].mxu1 }
 0x5bb   : > { %5169 = vst [vmem:[%s9039_s17 + $0x408] sm:$0xff] %v4557_v48  ;;  %v3299_v41 = vadd.f32 %v9643_v26, %v3298_v54  ;;  %v6780_v1 = vpop.f32.mrb[105].mxu1  ;;  %7291 = vmatmul.mubr.bf16.gmra.mrb[104].mxu0 %v3902_v39  ;;  %v10278_v48 = vld [vmem:[#allocation43_spill] sm:$0xff] }
 0x5bc   : > { %v3301_v17 = vpop.f32.mrb[106].mxu1  ;;  %7294 = vmatprep.mubr.msk.bf16.mxu0 %vm7475_vm0, %v10202_v32 }
 0x5bd   : > { %v3302_v34 = vadd.f32 %v9643_v26, %v3301_v17  ;;  %v6781_v31 = vpop.f32.mrb[107].mxu1  ;;  %v3745_v18 = vmax.f32 %v3299_v41, 0.0 }
 0x5be   : > { %v4561_v56 = vpop.f32.mrb[0].mxu0 }
 0x5bf   : > { %v3746_v43 = vmax.f32 %v3302_v34, 0.0  ;;  %v4562_v5 = vadd.f32 %v9598_v6, %v4561_v56  ;;  %6887 = vmatmul.mubr.bf16.gmra.mrb[212].mxu1 %v10275_v47  ;;  %v7188_v14 = vpop.f32.mrb[1].mxu0 }
 0x5c0   : > { %v4564_v12 = vpop.f32.mrb[2].mxu0  ;;  %6890 = vmatprep.mubr.msk.bf16.mxu1 %vm7475_vm0, %v10202_v32 }
 0x5c1   : > { %v3903_v60 = vpack.c.bf16 %v3746_v43, %v3745_v18  ;;  %5170 = vst [vmem:[%s9039_s17 + $0x410] sm:$0xff] %v4562_v5  ;;  %v4565_v16 = vadd.f32 %v9598_v6, %v4564_v12  ;;  %v7189_v62 = vpop.f32.mrb[3].mxu0 }
 0x5c2   : > { %v3306_v20 = vpop.f32.mrb[108].mxu1 }
 0x5c3   : > { %5171 = vst [vmem:[%s9039_s17 + $0x418] sm:$0xff] %v4565_v16  ;;  %v3307_v44 = vadd.f32 %v9643_v26, %v3306_v20  ;;  %v6784_v9 = vpop.f32.mrb[109].mxu1  ;;  %7295 = vmatmul.mubr.bf16.gmra.mrb[108].mxu0 %v3903_v60  ;;  %v10279_v16 = vld [vmem:[#allocation44_spill] sm:$0xff] }
 0x5c4   : > { %v3309_v21 = vpop.f32.mrb[110].mxu1  ;;  %7298 = vmatprep.mubr.msk.bf16.mxu0 %vm7475_vm0, %v10202_v32 }
 0x5c5   : > { %v3310_v10 = vadd.f32 %v9643_v26, %v3309_v21  ;;  %v6785_v33 = vpop.f32.mrb[111].mxu1  ;;  %v3747_v46 = vmax.f32 %v3307_v44, 0.0 }
 0x5c6   : > { %v4569_v35 = vpop.f32.mrb[4].mxu0 }
 0x5c7   : > { %v3748_v49 = vmax.f32 %v3310_v10, 0.0  ;;  %v4570_v25 = vadd.f32 %v9598_v6, %v4569_v35  ;;  %6891 = vmatmul.mubr.bf16.gmra.mrb[216].mxu1 %v10276_v51  ;;  %v7192_v15 = vpop.f32.mrb[5].mxu0 }
 0x5c8   : > { %v4572_v30 = vpop.f32.mrb[6].mxu0  ;;  %6894 = vmatprep.mubr.msk.bf16.mxu1 %vm7475_vm0, %v10202_v32 }
 0x5c9   : > { %v3904_v24 = vpack.c.bf16 %v3748_v49, %v3747_v46  ;;  %5172 = vst [vmem:[%s9039_s17 + $0x420] sm:$0xff] %v4570_v25  ;;  %v4573_v42 = vadd.f32 %v9598_v6, %v4572_v30  ;;  %v7193_v4 = vpop.f32.mrb[7].mxu0 }
 0x5ca   : > { %v3314_v36 = vpop.f32.mrb[112].mxu1 }
 0x5cb   : > { %5173 = vst [vmem:[%s9039_s17 + $0x428] sm:$0xff] %v4573_v42  ;;  %v3315_v38 = vadd.f32 %v9643_v26, %v3314_v36  ;;  %v6788_v59 = vpop.f32.mrb[113].mxu1  ;;  %7299 = vmatmul.mubr.bf16.gmra.mrb[112].mxu0 %v3904_v24 }
 0x5cc   : > { %v3317_v37 = vpop.f32.mrb[114].mxu1  ;;  %7302 = vmatprep.mubr.msk.bf16.mxu0 %vm7475_vm0, %v10202_v32 }
 0x5cd   : > { %v3318_v22 = vadd.f32 %v9643_v26, %v3317_v37  ;;  %v6789_v11 = vpop.f32.mrb[115].mxu1  ;;  %v3749_v13 = vmax.f32 %v3315_v38, 0.0 }
 0x5ce   : > { %v4577_v8 = vpop.f32.mrb[8].mxu0 }
 0x5cf   : > { %v3750_v50 = vmax.f32 %v3318_v22, 0.0  ;;  %v4578_v27 = vadd.f32 %v9598_v6, %v4577_v8  ;;  %6895 = vmatmul.mubr.bf16.gmra.mrb[220].mxu1 %v10277_v52  ;;  %v7196_v57 = vpop.f32.mrb[9].mxu0 }
 0x5d0   : > { %v4580_v0 = vpop.f32.mrb[10].mxu0  ;;  %6898 = vmatprep.mubr.msk.bf16.mxu1 %vm7475_vm0, %v10202_v32 }
 0x5d1   : > { %v3905_v28 = vpack.c.bf16 %v3750_v50, %v3749_v13  ;;  %5174 = vst [vmem:[%s9039_s17 + $0x430] sm:$0xff] %v4578_v27  ;;  %v4581_v40 = vadd.f32 %v9598_v6, %v4580_v0  ;;  %v7197_v58 = vpop.f32.mrb[11].mxu0 }
 0x5d2   : > { %v3322_v61 = vpop.f32.mrb[116].mxu1 }
 0x5d3   : > { %5175 = vst [vmem:[%s9039_s17 + $0x438] sm:$0xff] %v4581_v40  ;;  %v3323_v7 = vadd.f32 %v9643_v26, %v3322_v61  ;;  %v6792_v55 = vpop.f32.mrb[117].mxu1  ;;  %7303 = vmatmul.mubr.bf16.gmra.mrb[116].mxu0 %v3905_v28 }
 0x5d4   : > { %v3325_v2 = vpop.f32.mrb[118].mxu1  ;;  %7306 = vmatprep.mubr.msk.bf16.mxu0 %vm7475_vm0, %v10202_v32 }
 0x5d5   : > { %v3326_v53 = vadd.f32 %v9643_v26, %v3325_v2  ;;  %v6793_v29 = vpop.f32.mrb[119].mxu1  ;;  %v3751_v45 = vmax.f32 %v3323_v7, 0.0 }
 0x5d6   : > { %v4585_v19 = vpop.f32.mrb[12].mxu0 }
 0x5d7   : > { %v3752_v63 = vmax.f32 %v3326_v53, 0.0  ;;  %v4586_v39 = vadd.f32 %v9598_v6, %v4585_v19  ;;  %6899 = vmatmul.mubr.bf16.gmra.mrb[224].mxu1 %v10278_v48  ;;  %v7200_v3 = vpop.f32.mrb[13].mxu0 }
 0x5d8   : > { %v4588_v54 = vpop.f32.mrb[14].mxu0  ;;  %6902 = vmatprep.mubr.msk.bf16.mxu1 %vm7475_vm0, %v10202_v32 }
 0x5d9   : > { %v3906_v41 = vpack.c.bf16 %v3752_v63, %v3751_v45  ;;  %5176 = vst [vmem:[%s9039_s17 + $0x440] sm:$0xff] %v4586_v39  ;;  %v4589_v1 = vadd.f32 %v9598_v6, %v4588_v54  ;;  %v7201_v17 = vpop.f32.mrb[15].mxu0 }
 0x5da   : > { %v3330_v34 = vpop.f32.mrb[120].mxu1 }
 0x5db   : > { %5177 = vst [vmem:[%s9039_s17 + $0x448] sm:$0xff] %v4589_v1  ;;  %v3331_v31 = vadd.f32 %v9643_v26, %v3330_v34  ;;  %v6796_v56 = vpop.f32.mrb[121].mxu1  ;;  %7307 = vmatmul.mubr.bf16.gmra.mrb[120].mxu0 %v3906_v41 }
 0x5dc   : > { %v3333_v18 = vpop.f32.mrb[122].mxu1  ;;  %7310 = vmatprep.mubr.msk.bf16.mxu0 %vm7475_vm0, %v10202_v32 }
 0x5dd   : > { %v3334_v43 = vadd.f32 %v9643_v26, %v3333_v18  ;;  %v6797_v5 = vpop.f32.mrb[123].mxu1  ;;  %v3753_v14 = vmax.f32 %v3331_v31, 0.0 }
 0x5de   : > { %v4593_v47 = vpop.f32.mrb[16].mxu0 }
 0x5df   : > { %v3754_v12 = vmax.f32 %v3334_v43, 0.0  ;;  %v4594_v60 = vadd.f32 %v9598_v6, %v4593_v47  ;;  %6903 = vmatmul.mubr.bf16.gmra.mrb[228].mxu1 %v10279_v16  ;;  %v7204_v62 = vpop.f32.mrb[17].mxu0 }
 0x5e0   : > { %v4596_v20 = vpop.f32.mrb[18].mxu0  ;;  %6906 = vmatprep.mubr.msk.bf16.mxu1 %vm7475_vm0, %v10202_v32 }
 0x5e1   : > { %v3907_v44 = vpack.c.bf16 %v3754_v12, %v3753_v14  ;;  %5178 = vst [vmem:[%s9039_s17 + $0x450] sm:$0xff] %v4594_v60  ;;  %v4597_v9 = vadd.f32 %v9598_v6, %v4596_v20  ;;  %v7205_v21 = vpop.f32.mrb[19].mxu0 }
 0x5e2   : > { %v3338_v10 = vpop.f32.mrb[124].mxu1 }
 0x5e3   : > { %5179 = vst [vmem:[%s9039_s17 + $0x458] sm:$0xff] %v4597_v9  ;;  %v3339_v33 = vadd.f32 %v9643_v26, %v3338_v10  ;;  %v6800_v35 = vpop.f32.mrb[125].mxu1  ;;  %7311 = vmatmul.mubr.bf16.gmra.mrb[124].mxu0 %v3907_v44 }
 0x5e4   : > { %v3341_v46 = vpop.f32.mrb[126].mxu1  ;;  %7314 = vmatprep.mubr.msk.bf16.mxu0 %vm7475_vm0, %v10202_v32 }
 0x5e5   : > { %v3342_v49 = vadd.f32 %v9643_v26, %v3341_v46  ;;  %v6801_v25 = vpop.f32.mrb[127].mxu1  ;;  %v3755_v15 = vmax.f32 %v3339_v33, 0.0 }
 0x5e6   : > { %v4601_v51 = vpop.f32.mrb[20].mxu0 }
 0x5e7   : > { %v3756_v30 = vmax.f32 %v3342_v49, 0.0  ;;  %v4602_v24 = vadd.f32 %v9598_v6, %v4601_v51  ;;  %6907 = vmatmul.mubr.bf16.gmra.mrb[232].mxu1 %v8785_v23  ;;  %v7208_v42 = vpop.f32.mrb[21].mxu0 }
 0x5e8   : > { %v4604_v4 = vpop.f32.mrb[22].mxu0 }
 0x5e9   : > { %v3908_v36 = vpack.c.bf16 %v3756_v30, %v3755_v15  ;;  %5180 = vst [vmem:[%s9039_s17 + $0x460] sm:$0xff] %v4602_v24  ;;  %v4605_v38 = vadd.f32 %v9598_v6, %v4604_v4  ;;  %v7209_v59 = vpop.f32.mrb[23].mxu0 }
 0x5ea   : > { %v3346_v37 = vpop.f32.mrb[128].mxu1 }
 0x5eb   : > { %5181 = vst [vmem:[%s9039_s17 + $0x468] sm:$0xff] %v4605_v38  ;;  %v3347_v22 = vadd.f32 %v9643_v26, %v3346_v37  ;;  %v6804_v11 = vpop.f32.mrb[129].mxu1  ;;  %7315 = vmatmul.mubr.bf16.gmra.mrb[128].mxu0 %v3908_v36 }
 0x5ec   : > { %v3349_v8 = vpop.f32.mrb[130].mxu1  ;;  %7318 = vmatprep.mubr.msk.bf16.mxu0 %vm7475_vm0, %v10202_v32 }
 0x5ed   : > { %v3350_v23 = vadd.f32 %v9643_v26, %v3349_v8  ;;  %v6805_v13 = vpop.f32.mrb[131].mxu1  ;;  %v3757_v27 = vmax.f32 %v3347_v22, 0.0 }
 0x5ee   : > { %v4609_v50 = vpop.f32.mrb[24].mxu0 }
 0x5ef   : > { %v3758_v52 = vmax.f32 %v3350_v23, 0.0  ;;  %v4610_v57 = vadd.f32 %v9598_v6, %v4609_v50  ;;  %v7212_v0 = vpop.f32.mrb[25].mxu0 }
 0x5f0   : > { %v4612_v28 = vpop.f32.mrb[26].mxu0 }
 0x5f1   : > { %v3909_v40 = vpack.c.bf16 %v3758_v52, %v3757_v27  ;;  %5182 = vst [vmem:[%s9039_s17 + $0x470] sm:$0xff] %v4610_v57  ;;  %v4613_v58 = vadd.f32 %v9598_v6, %v4612_v28  ;;  %v7213_v61 = vpop.f32.mrb[27].mxu0 }
 0x5f2   : > { %v3354_v7 = vpop.f32.mrb[132].mxu1 }
 0x5f3   : > { %5183 = vst [vmem:[%s9039_s17 + $0x478] sm:$0xff] %v4613_v58  ;;  %v3355_v55 = vadd.f32 %v9643_v26, %v3354_v7  ;;  %v6808_v2 = vpop.f32.mrb[133].mxu1  ;;  %7319 = vmatmul.mubr.bf16.gmra.mrb[132].mxu0 %v3909_v40 }
 0x5f4   : > { %v3357_v53 = vpop.f32.mrb[134].mxu1  ;;  %7322 = vmatprep.mubr.msk.bf16.mxu0 %vm7475_vm0, %v10202_v32 }
 0x5f5   : > { %v3358_v29 = vadd.f32 %v9643_v26, %v3357_v53  ;;  %v6809_v19 = vpop.f32.mrb[135].mxu1  ;;  %v3759_v63 = vmax.f32 %v3355_v55, 0.0 }
 0x5f6   : > { %v4617_v45 = vpop.f32.mrb[28].mxu0 }
 0x5f7   : > { %v3760_v39 = vmax.f32 %v3358_v29, 0.0  ;;  %v4618_v48 = vadd.f32 %v9598_v6, %v4617_v45  ;;  %v7216_v3 = vpop.f32.mrb[29].mxu0 }
 0x5f8   : > { %v4620_v54 = vpop.f32.mrb[30].mxu0 }
 0x5f9   : > { %v3910_v41 = vpack.c.bf16 %v3760_v39, %v3759_v63  ;;  %5184 = vst [vmem:[%s9039_s17 + $0x480] sm:$0xff] %v4618_v48  ;;  %v4621_v1 = vadd.f32 %v9598_v6, %v4620_v54  ;;  %v7217_v17 = vpop.f32.mrb[31].mxu0 }
 0x5fa   : > { %v3362_v34 = vpop.f32.mrb[136].mxu1 }
 0x5fb   : > { %5185 = vst [vmem:[%s9039_s17 + $0x488] sm:$0xff] %v4621_v1  ;;  %v3363_v31 = vadd.f32 %v9643_v26, %v3362_v34  ;;  %v6812_v56 = vpop.f32.mrb[137].mxu1  ;;  %7323 = vmatmul.mubr.bf16.gmra.mrb[136].mxu0 %v3910_v41 }
 0x5fc   : > { %v3365_v18 = vpop.f32.mrb[138].mxu1  ;;  %7326 = vmatprep.mubr.msk.bf16.mxu0 %vm7475_vm0, %v10202_v32 }
 0x5fd   : > { %v3366_v43 = vadd.f32 %v9643_v26, %v3365_v18  ;;  %v6813_v5 = vpop.f32.mrb[139].mxu1  ;;  %v3761_v14 = vmax.f32 %v3363_v31, 0.0 }
 0x5fe   : > { %v4625_v47 = vpop.f32.mrb[32].mxu0 }
 0x5ff   : > { %v3762_v12 = vmax.f32 %v3366_v43, 0.0  ;;  %v4626_v60 = vadd.f32 %v9598_v6, %v4625_v47  ;;  %v7220_v16 = vpop.f32.mrb[33].mxu0 }
 0x600   : > { %v4628_v62 = vpop.f32.mrb[34].mxu0 }
 0x601   : > { %v3911_v20 = vpack.c.bf16 %v3762_v12, %v3761_v14  ;;  %5186 = vst [vmem:[%s9039_s17 + $0x490] sm:$0xff] %v4626_v60  ;;  %v4629_v44 = vadd.f32 %v9598_v6, %v4628_v62  ;;  %v7221_v9 = vpop.f32.mrb[35].mxu0  ;;  %v9872_v6 = vld [vmem:[%s10189_s6] ss:$0 sm:$0xff] }
 0x602   : > { %v3370_v21 = vpop.f32.mrb[140].mxu1 }
 0x603   : > { %5187 = vst [vmem:[%s9039_s17 + $0x498] sm:$0xff] %v4629_v44  ;;  %v3371_v10 = vadd.f32 %v9643_v26, %v3370_v21  ;;  %v6816_v33 = vpop.f32.mrb[141].mxu1  ;;  %7327 = vmatmul.mubr.bf16.gmra.mrb[140].mxu0 %v3911_v20 }
 0x604   : > { %v3373_v35 = vpop.f32.mrb[142].mxu1  ;;  %7330 = vmatprep.mubr.msk.bf16.mxu0 %vm7475_vm0, %v10202_v32 }
 0x605   : > { %v3374_v46 = vadd.f32 %v9643_v26, %v3373_v35  ;;  %v6817_v49 = vpop.f32.mrb[143].mxu1  ;;  %v3763_v51 = vmax.f32 %v3371_v10, 0.0  ;;  %v9908_v35 = vld [vmem:[%s10187_s4] ss:$0 sm:$0xff] }
 0x606   : > { %v4633_v25 = vpop.f32.mrb[36].mxu0 }
 0x607   : > { %v3764_v15 = vmax.f32 %v3374_v46, 0.0  ;;  %v4634_v30 = vadd.f32 %v9872_v6, %v4633_v25  ;;  %v7224_v24 = vpop.f32.mrb[37].mxu0 }
 0x608   : > { %v4636_v42 = vpop.f32.mrb[38].mxu0 }
 0x609   : > { %v3912_v4 = vpack.c.bf16 %v3764_v15, %v3763_v51  ;;  %5188 = vst [vmem:[%s9039_s17 + $0x4a0] sm:$0xff] %v4634_v30  ;;  %v4637_v36 = vadd.f32 %v9872_v6, %v4636_v42  ;;  %v7225_v38 = vpop.f32.mrb[39].mxu0 }
 0x60a   : > { %v3378_v59 = vpop.f32.mrb[144].mxu1 }
 0x60b   : > { %5189 = vst [vmem:[%s9039_s17 + $0x4a8] sm:$0xff] %v4637_v36  ;;  %v3379_v37 = vadd.f32 %v9643_v26, %v3378_v59  ;;  %v6820_v22 = vpop.f32.mrb[145].mxu1  ;;  %7331 = vmatmul.mubr.bf16.gmra.mrb[144].mxu0 %v3912_v4 }
 0x60c   : > { %v3381_v11 = vpop.f32.mrb[146].mxu1  ;;  %7334 = vmatprep.mubr.msk.bf16.mxu0 %vm7475_vm0, %v10202_v32 }
 0x60d   : > { %v3382_v8 = vadd.f32 %v9643_v26, %v3381_v11  ;;  %v6821_v23 = vpop.f32.mrb[147].mxu1  ;;  %v3765_v50 = vmax.f32 %v3379_v37, 0.0 }
 0x60e   : > { %v4641_v13 = vpop.f32.mrb[40].mxu0 }
 0x60f   : > { %v3766_v27 = vmax.f32 %v3382_v8, 0.0  ;;  %v4642_v52 = vadd.f32 %v9872_v6, %v4641_v13  ;;  %v7228_v57 = vpop.f32.mrb[41].mxu0 }
 0x610   : > { %v4644_v0 = vpop.f32.mrb[42].mxu0 }
 0x611   : > { %v3913_v28 = vpack.c.bf16 %v3766_v27, %v3765_v50  ;;  %5190 = vst [vmem:[%s9039_s17 + $0x4b0] sm:$0xff] %v4642_v52  ;;  %v4645_v40 = vadd.f32 %v9872_v6, %v4644_v0  ;;  %v7229_v58 = vpop.f32.mrb[43].mxu0 }
 0x612   : > { %v3386_v61 = vpop.f32.mrb[148].mxu1 }
 0x613   : > { %5191 = vst [vmem:[%s9039_s17 + $0x4b8] sm:$0xff] %v4645_v40  ;;  %v3387_v7 = vadd.f32 %v9643_v26, %v3386_v61  ;;  %v6824_v55 = vpop.f32.mrb[149].mxu1  ;;  %7335 = vmatmul.mubr.bf16.gmra.mrb[148].mxu0 %v3913_v28 }
 0x614   : > { %v3389_v2 = vpop.f32.mrb[150].mxu1  ;;  %7338 = vmatprep.mubr.msk.bf16.mxu0 %vm7475_vm0, %v10202_v32 }
 0x615   : > { %v3390_v53 = vadd.f32 %v9643_v26, %v3389_v2  ;;  %v6825_v29 = vpop.f32.mrb[151].mxu1  ;;  %v3767_v45 = vmax.f32 %v3387_v7, 0.0 }
 0x616   : > { %v4649_v19 = vpop.f32.mrb[44].mxu0 }
 0x617   : > { %v3768_v63 = vmax.f32 %v3390_v53, 0.0  ;;  %v4650_v39 = vadd.f32 %v9872_v6, %v4649_v19  ;;  %v7232_v48 = vpop.f32.mrb[45].mxu0 }
 0x618   : > { %v4652_v3 = vpop.f32.mrb[46].mxu0 }
 0x619   : > { %v3914_v54 = vpack.c.bf16 %v3768_v63, %v3767_v45  ;;  %5192 = vst [vmem:[%s9039_s17 + $0x4c0] sm:$0xff] %v4650_v39  ;;  %v4653_v41 = vadd.f32 %v9872_v6, %v4652_v3  ;;  %v7233_v1 = vpop.f32.mrb[47].mxu0 }
 0x61a   : > { %v3394_v17 = vpop.f32.mrb[152].mxu1 }
 0x61b   : > { %5193 = vst [vmem:[%s9039_s17 + $0x4c8] sm:$0xff] %v4653_v41  ;;  %v3395_v34 = vadd.f32 %v9643_v26, %v3394_v17  ;;  %v6828_v31 = vpop.f32.mrb[153].mxu1  ;;  %7339 = vmatmul.mubr.bf16.gmra.mrb[152].mxu0 %v3914_v54 }
 0x61c   : > { %v3397_v56 = vpop.f32.mrb[154].mxu1  ;;  %7342 = vmatprep.mubr.msk.bf16.mxu0 %vm7475_vm0, %v10202_v32 }
 0x61d   : > { %v3398_v18 = vadd.f32 %v9643_v26, %v3397_v56  ;;  %v6829_v43 = vpop.f32.mrb[155].mxu1  ;;  %v3769_v47 = vmax.f32 %v3395_v34, 0.0 }
 0x61e   : > { %v4657_v5 = vpop.f32.mrb[48].mxu0 }
 0x61f   : > { %v3770_v14 = vmax.f32 %v3398_v18, 0.0  ;;  %v4658_v12 = vadd.f32 %v9872_v6, %v4657_v5  ;;  %v7236_v60 = vpop.f32.mrb[49].mxu0 }
 0x620   : > { %v4660_v16 = vpop.f32.mrb[50].mxu0 }
 0x621   : > { %v3915_v62 = vpack.c.bf16 %v3770_v14, %v3769_v47  ;;  %5194 = vst [vmem:[%s9039_s17 + $0x4d0] sm:$0xff] %v4658_v12  ;;  %v4661_v20 = vadd.f32 %v9872_v6, %v4660_v16  ;;  %v7237_v44 = vpop.f32.mrb[51].mxu0 }
 0x622   : > { %v3402_v9 = vpop.f32.mrb[156].mxu1 }
 0x623   : > { %5195 = vst [vmem:[%s9039_s17 + $0x4d8] sm:$0xff] %v4661_v20  ;;  %v3403_v21 = vadd.f32 %v9643_v26, %v3402_v9  ;;  %v6832_v10 = vpop.f32.mrb[157].mxu1  ;;  %7343 = vmatmul.mubr.bf16.gmra.mrb[156].mxu0 %v3915_v62 }
 0x624   : > { %v3405_v33 = vpop.f32.mrb[158].mxu1  ;;  %7346 = vmatprep.mubr.msk.bf16.mxu0 %vm7475_vm0, %v10202_v32 }
 0x625   : > { %v3406_v46 = vadd.f32 %v9908_v35, %v3405_v33  ;;  %v6833_v49 = vpop.f32.mrb[159].mxu1  ;;  %v3771_v51 = vmax.f32 %v3403_v21, 0.0 }
 0x626   : > { %v4665_v25 = vpop.f32.mrb[52].mxu0 }
 0x627   : > { %v3772_v15 = vmax.f32 %v3406_v46, 0.0  ;;  %v4666_v26 = vadd.f32 %v9872_v6, %v4665_v25  ;;  %v7240_v30 = vpop.f32.mrb[53].mxu0 }
 0x628   : > { %v4668_v24 = vpop.f32.mrb[54].mxu0 }
 0x629   : > { %v3916_v42 = vpack.c.bf16 %v3772_v15, %v3771_v51  ;;  %5196 = vst [vmem:[%s9039_s17 + $0x4e0] sm:$0xff] %v4666_v26  ;;  %v4669_v4 = vadd.f32 %v9872_v6, %v4668_v24  ;;  %v7241_v36 = vpop.f32.mrb[55].mxu0 }
 0x62a   : > { %v3410_v38 = vpop.f32.mrb[160].mxu1 }
 0x62b   : > { %5197 = vst [vmem:[%s9039_s17 + $0x4e8] sm:$0xff] %v4669_v4  ;;  %v3411_v59 = vadd.f32 %v9908_v35, %v3410_v38  ;;  %v6836_v37 = vpop.f32.mrb[161].mxu1  ;;  %7347 = vmatmul.mubr.bf16.gmra.mrb[160].mxu0 %v3916_v42 }
 0x62c   : > { %v3413_v22 = vpop.f32.mrb[162].mxu1  ;;  %7350 = vmatprep.mubr.msk.bf16.mxu0 %vm7475_vm0, %v10202_v32 }
 0x62d   : > { %v3414_v11 = vadd.f32 %v9908_v35, %v3413_v22  ;;  %v6837_v8 = vpop.f32.mrb[163].mxu1  ;;  %v3773_v13 = vmax.f32 %v3411_v59, 0.0 }
 0x62e   : > { %v4673_v23 = vpop.f32.mrb[56].mxu0 }
 0x62f   : > { %v3774_v50 = vmax.f32 %v3414_v11, 0.0  ;;  %v4674_v27 = vadd.f32 %v9872_v6, %v4673_v23  ;;  %v7244_v52 = vpop.f32.mrb[57].mxu0 }
 0x630   : > { %v4676_v57 = vpop.f32.mrb[58].mxu0 }
 0x631   : > { %v3917_v0 = vpack.c.bf16 %v3774_v50, %v3773_v13  ;;  %5198 = vst [vmem:[%s9039_s17 + $0x4f0] sm:$0xff] %v4674_v27  ;;  %v4677_v28 = vadd.f32 %v9872_v6, %v4676_v57  ;;  %v7245_v40 = vpop.f32.mrb[59].mxu0 }
 0x632   : > { %v3418_v58 = vpop.f32.mrb[164].mxu1 }
 0x633   : > { %5199 = vst [vmem:[%s9039_s17 + $0x4f8] sm:$0xff] %v4677_v28  ;;  %v3419_v61 = vadd.f32 %v9908_v35, %v3418_v58  ;;  %v6840_v7 = vpop.f32.mrb[165].mxu1  ;;  %7351 = vmatmul.mubr.bf16.gmra.mrb[164].mxu0 %v3917_v0 }
 0x634   : > { %v3421_v55 = vpop.f32.mrb[166].mxu1  ;;  %7354 = vmatprep.mubr.msk.bf16.mxu0 %vm7475_vm0, %v10202_v32 }
 0x635   : > { %v3422_v2 = vadd.f32 %v9908_v35, %v3421_v55  ;;  %v6841_v53 = vpop.f32.mrb[167].mxu1  ;;  %v3775_v19 = vmax.f32 %v3419_v61, 0.0 }
 0x636   : > { %v4681_v29 = vpop.f32.mrb[60].mxu0 }
 0x637   : > { %v3776_v45 = vmax.f32 %v3422_v2, 0.0  ;;  %v4682_v63 = vadd.f32 %v9872_v6, %v4681_v29  ;;  %v7248_v39 = vpop.f32.mrb[61].mxu0 }
 0x638   : > { %v4684_v48 = vpop.f32.mrb[62].mxu0 }
 0x639   : > { %v3918_v3 = vpack.c.bf16 %v3776_v45, %v3775_v19  ;;  %5200 = vst [vmem:[%s9039_s17 + $0x500] sm:$0xff] %v4682_v63  ;;  %v4685_v54 = vadd.f32 %v9872_v6, %v4684_v48  ;;  %v7249_v41 = vpop.f32.mrb[63].mxu0 }
 0x63a   : > { %v3426_v1 = vpop.f32.mrb[168].mxu1 }
 0x63b   : > { %5201 = vst [vmem:[%s9039_s17 + $0x508] sm:$0xff] %v4685_v54  ;;  %v3427_v17 = vadd.f32 %v9908_v35, %v3426_v1  ;;  %v6844_v34 = vpop.f32.mrb[169].mxu1  ;;  %7355 = vmatmul.mubr.bf16.gmra.mrb[168].mxu0 %v3918_v3 }
 0x63c   : > { %v3429_v31 = vpop.f32.mrb[170].mxu1  ;;  %7358 = vmatprep.mubr.msk.bf16.mxu0 %vm7475_vm0, %v10202_v32 }
 0x63d   : > { %v3430_v56 = vadd.f32 %v9908_v35, %v3429_v31  ;;  %v6845_v18 = vpop.f32.mrb[171].mxu1  ;;  %v3777_v5 = vmax.f32 %v3427_v17, 0.0 }
 0x63e   : > { %v4689_v43 = vpop.f32.mrb[64].mxu0 }
 0x63f   : > { %v3778_v47 = vmax.f32 %v3430_v56, 0.0  ;;  %v4690_v14 = vadd.f32 %v9872_v6, %v4689_v43  ;;  %v7252_v12 = vpop.f32.mrb[65].mxu0 }
 0x640   : > { %v4692_v60 = vpop.f32.mrb[66].mxu0 }
 0x641   : > { %v3919_v16 = vpack.c.bf16 %v3778_v47, %v3777_v5  ;;  %5202 = vst [vmem:[%s9039_s17 + $0x510] sm:$0xff] %v4690_v14  ;;  %v4693_v62 = vadd.f32 %v9872_v6, %v4692_v60  ;;  %v7253_v20 = vpop.f32.mrb[67].mxu0 }
 0x642   : > { %v3434_v44 = vpop.f32.mrb[172].mxu1 }
 0x643   : > { %5203 = vst [vmem:[%s9039_s17 + $0x518] sm:$0xff] %v4693_v62  ;;  %v3435_v9 = vadd.f32 %v9908_v35, %v3434_v44  ;;  %v6848_v21 = vpop.f32.mrb[173].mxu1  ;;  %7359 = vmatmul.mubr.bf16.gmra.mrb[172].mxu0 %v3919_v16 }
 0x644   : > { %v3437_v10 = vpop.f32.mrb[174].mxu1  ;;  %7362 = vmatprep.mubr.msk.bf16.mxu0 %vm7475_vm0, %v10202_v32 }
 0x645   : > { %v3438_v33 = vadd.f32 %v9908_v35, %v3437_v10  ;;  %v6849_v46 = vpop.f32.mrb[175].mxu1  ;;  %v3779_v25 = vmax.f32 %v3435_v9, 0.0 }
 0x646   : > { %v4697_v49 = vpop.f32.mrb[68].mxu0 }
 0x647   : > { %v3780_v51 = vmax.f32 %v3438_v33, 0.0  ;;  %v4698_v15 = vadd.f32 %v9872_v6, %v4697_v49  ;;  %v7256_v26 = vpop.f32.mrb[69].mxu0 }
 0x648   : > { %v4700_v30 = vpop.f32.mrb[70].mxu0 }
 0x649   : > { %v3920_v24 = vpack.c.bf16 %v3780_v51, %v3779_v25  ;;  %5204 = vst [vmem:[%s9039_s17 + $0x520] sm:$0xff] %v4698_v15  ;;  %v4701_v42 = vadd.f32 %v9872_v6, %v4700_v30  ;;  %v7257_v4 = vpop.f32.mrb[71].mxu0 }
 0x64a   : > { %v3442_v36 = vpop.f32.mrb[176].mxu1 }
 0x64b   : > { %5205 = vst [vmem:[%s9039_s17 + $0x528] sm:$0xff] %v4701_v42  ;;  %v3443_v38 = vadd.f32 %v9908_v35, %v3442_v36  ;;  %v6852_v59 = vpop.f32.mrb[177].mxu1  ;;  %7363 = vmatmul.mubr.bf16.gmra.mrb[176].mxu0 %v3920_v24 }
 0x64c   : > { %v3445_v37 = vpop.f32.mrb[178].mxu1  ;;  %7366 = vmatprep.mubr.msk.bf16.mxu0 %vm7475_vm0, %v10202_v32 }
 0x64d   : > { %v3446_v22 = vadd.f32 %v9908_v35, %v3445_v37  ;;  %v6853_v11 = vpop.f32.mrb[179].mxu1  ;;  %v3781_v23 = vmax.f32 %v3443_v38, 0.0 }
 0x64e   : > { %v4705_v8 = vpop.f32.mrb[72].mxu0 }
 0x64f   : > { %v3782_v13 = vmax.f32 %v3446_v22, 0.0  ;;  %v4706_v50 = vadd.f32 %v9872_v6, %v4705_v8  ;;  %v7260_v27 = vpop.f32.mrb[73].mxu0 }
 0x650   : > { %v4708_v52 = vpop.f32.mrb[74].mxu0 }
 0x651   : > { %v3921_v57 = vpack.c.bf16 %v3782_v13, %v3781_v23  ;;  %5206 = vst [vmem:[%s9039_s17 + $0x530] sm:$0xff] %v4706_v50  ;;  %v4709_v0 = vadd.f32 %v9872_v6, %v4708_v52  ;;  %v7261_v28 = vpop.f32.mrb[75].mxu0 }
 0x652   : > { %v3450_v40 = vpop.f32.mrb[180].mxu1 }
 0x653   : > { %5207 = vst [vmem:[%s9039_s17 + $0x538] sm:$0xff] %v4709_v0  ;;  %v3451_v58 = vadd.f32 %v9908_v35, %v3450_v40  ;;  %v6856_v61 = vpop.f32.mrb[181].mxu1  ;;  %7367 = vmatmul.mubr.bf16.gmra.mrb[180].mxu0 %v3921_v57 }
 0x654   : > { %v3453_v7 = vpop.f32.mrb[182].mxu1  ;;  %7370 = vmatprep.mubr.msk.bf16.mxu0 %vm7475_vm0, %v10202_v32 }
 0x655   : > { %v3454_v55 = vadd.f32 %v9908_v35, %v3453_v7  ;;  %v6857_v2 = vpop.f32.mrb[183].mxu1  ;;  %v3783_v29 = vmax.f32 %v3451_v58, 0.0 }
 0x656   : > { %v4713_v53 = vpop.f32.mrb[76].mxu0 }
 0x657   : > { %v3784_v19 = vmax.f32 %v3454_v55, 0.0  ;;  %v4714_v45 = vadd.f32 %v9872_v6, %v4713_v53  ;;  %v7264_v63 = vpop.f32.mrb[77].mxu0 }
 0x658   : > { %v4716_v39 = vpop.f32.mrb[78].mxu0 }
 0x659   : > { %v3922_v48 = vpack.c.bf16 %v3784_v19, %v3783_v29  ;;  %5208 = vst [vmem:[%s9039_s17 + $0x540] sm:$0xff] %v4714_v45  ;;  %v4717_v3 = vadd.f32 %v9872_v6, %v4716_v39  ;;  %v7265_v54 = vpop.f32.mrb[79].mxu0 }
 0x65a   : > { %v3458_v41 = vpop.f32.mrb[184].mxu1 }
 0x65b   : > { %5209 = vst [vmem:[%s9039_s17 + $0x548] sm:$0xff] %v4717_v3  ;;  %v3459_v1 = vadd.f32 %v9908_v35, %v3458_v41  ;;  %v6860_v17 = vpop.f32.mrb[185].mxu1  ;;  %7371 = vmatmul.mubr.bf16.gmra.mrb[184].mxu0 %v3922_v48 }
 0x65c   : > { %v3461_v34 = vpop.f32.mrb[186].mxu1  ;;  %7374 = vmatprep.mubr.msk.bf16.mxu0 %vm7475_vm0, %v10202_v32 }
 0x65d   : > { %v3462_v31 = vadd.f32 %v9908_v35, %v3461_v34  ;;  %v6861_v56 = vpop.f32.mrb[187].mxu1  ;;  %v3785_v43 = vmax.f32 %v3459_v1, 0.0 }
 0x65e   : > { %v4721_v18 = vpop.f32.mrb[80].mxu0 }
 0x65f   : > { %v3786_v5 = vmax.f32 %v3462_v31, 0.0  ;;  %v4722_v47 = vadd.f32 %v9872_v6, %v4721_v18  ;;  %v7268_v14 = vpop.f32.mrb[81].mxu0 }
 0x660   : > { %v4724_v12 = vpop.f32.mrb[82].mxu0 }
 0x661   : > { %v3923_v60 = vpack.c.bf16 %v3786_v5, %v3785_v43  ;;  %5210 = vst [vmem:[%s9039_s17 + $0x550] sm:$0xff] %v4722_v47  ;;  %v4725_v16 = vadd.f32 %v9872_v6, %v4724_v12  ;;  %v7269_v62 = vpop.f32.mrb[83].mxu0 }
 0x662   : > { %v3466_v20 = vpop.f32.mrb[188].mxu1 }
 0x663   : > { %5211 = vst [vmem:[%s9039_s17 + $0x558] sm:$0xff] %v4725_v16  ;;  %v3467_v44 = vadd.f32 %v9908_v35, %v3466_v20  ;;  %v6864_v9 = vpop.f32.mrb[189].mxu1  ;;  %7375 = vmatmul.mubr.bf16.gmra.mrb[188].mxu0 %v3923_v60 }
 0x664   : > { %v3469_v21 = vpop.f32.mrb[190].mxu1  ;;  %7378 = vmatprep.mubr.msk.bf16.mxu0 %vm7475_vm0, %v10202_v32 }
 0x665   : > { %v3470_v10 = vadd.f32 %v9908_v35, %v3469_v21  ;;  %v6865_v33 = vpop.f32.mrb[191].mxu1  ;;  %v3787_v49 = vmax.f32 %v3467_v44, 0.0 }
 0x666   : > { %v4729_v46 = vpop.f32.mrb[84].mxu0 }
 0x667   : > { %v3788_v25 = vmax.f32 %v3470_v10, 0.0  ;;  %v4730_v51 = vadd.f32 %v9872_v6, %v4729_v46  ;;  %v7272_v15 = vpop.f32.mrb[85].mxu0 }
 0x668   : > { %v4732_v26 = vpop.f32.mrb[86].mxu0 }
 0x669   : > { %v3924_v30 = vpack.c.bf16 %v3788_v25, %v3787_v49  ;;  %5212 = vst [vmem:[%s9039_s17 + $0x560] sm:$0xff] %v4730_v51  ;;  %v4733_v24 = vadd.f32 %v9872_v6, %v4732_v26  ;;  %v7273_v42 = vpop.f32.mrb[87].mxu0 }
 0x66a   : > { %v3474_v4 = vpop.f32.mrb[192].mxu1 }
 0x66b   : > { %5213 = vst [vmem:[%s9039_s17 + $0x568] sm:$0xff] %v4733_v24  ;;  %v3475_v36 = vadd.f32 %v9908_v35, %v3474_v4  ;;  %v6868_v38 = vpop.f32.mrb[193].mxu1  ;;  %7379 = vmatmul.mubr.bf16.gmra.mrb[192].mxu0 %v3924_v30 }
 0x66c   : > { %v3477_v59 = vpop.f32.mrb[194].mxu1  ;;  %7382 = vmatprep.mubr.msk.bf16.mxu0 %vm7475_vm0, %v10202_v32 }
 0x66d   : > { %v3478_v37 = vadd.f32 %v9908_v35, %v3477_v59  ;;  %v6869_v22 = vpop.f32.mrb[195].mxu1  ;;  %v3789_v8 = vmax.f32 %v3475_v36, 0.0 }
 0x66e   : > { %v4737_v11 = vpop.f32.mrb[88].mxu0 }
 0x66f   : > { %v3790_v23 = vmax.f32 %v3478_v37, 0.0  ;;  %v4738_v13 = vadd.f32 %v9872_v6, %v4737_v11  ;;  %v7276_v50 = vpop.f32.mrb[89].mxu0 }
 0x670   : > { %v4740_v27 = vpop.f32.mrb[90].mxu0 }
 0x671   : > { %v3925_v52 = vpack.c.bf16 %v3790_v23, %v3789_v8  ;;  %5214 = vst [vmem:[%s9039_s17 + $0x570] sm:$0xff] %v4738_v13  ;;  %v4741_v57 = vadd.f32 %v9872_v6, %v4740_v27  ;;  %v7277_v0 = vpop.f32.mrb[91].mxu0 }
 0x672   : > { %v3482_v28 = vpop.f32.mrb[196].mxu1 }
 0x673   : > { %5215 = vst [vmem:[%s9039_s17 + $0x578] sm:$0xff] %v4741_v57  ;;  %v3483_v40 = vadd.f32 %v9908_v35, %v3482_v28  ;;  %v6872_v58 = vpop.f32.mrb[197].mxu1  ;;  %7383 = vmatmul.mubr.bf16.gmra.mrb[196].mxu0 %v3925_v52 }
 0x674   : > { %v3485_v61 = vpop.f32.mrb[198].mxu1  ;;  %7386 = vmatprep.mubr.msk.bf16.mxu0 %vm7475_vm0, %v10202_v32 }
 0x675   : > { %v3486_v7 = vadd.f32 %v9908_v35, %v3485_v61  ;;  %v6873_v55 = vpop.f32.mrb[199].mxu1  ;;  %v3791_v53 = vmax.f32 %v3483_v40, 0.0 }
 0x676   : > { %v4745_v2 = vpop.f32.mrb[92].mxu0 }
 0x677   : > { %v3792_v29 = vmax.f32 %v3486_v7, 0.0  ;;  %v4746_v19 = vadd.f32 %v9872_v6, %v4745_v2  ;;  %v7280_v45 = vpop.f32.mrb[93].mxu0 }
 0x678   : > { %v4748_v63 = vpop.f32.mrb[94].mxu0 }
 0x679   : > { %v3926_v39 = vpack.c.bf16 %v3792_v29, %v3791_v53  ;;  %5216 = vst [vmem:[%s9039_s17 + $0x580] sm:$0xff] %v4746_v19  ;;  %v4749_v48 = vadd.f32 %v9872_v6, %v4748_v63  ;;  %v7281_v3 = vpop.f32.mrb[95].mxu0 }
 0x67a   : > { %v3490_v54 = vpop.f32.mrb[200].mxu1 }
 0x67b   : > { %5217 = vst [vmem:[%s9039_s17 + $0x588] sm:$0xff] %v4749_v48  ;;  %v3491_v41 = vadd.f32 %v9908_v35, %v3490_v54  ;;  %v6876_v1 = vpop.f32.mrb[201].mxu1  ;;  %7387 = vmatmul.mubr.bf16.gmra.mrb[200].mxu0 %v3926_v39 }
 0x67c   : > { %v3493_v17 = vpop.f32.mrb[202].mxu1  ;;  %7390 = vmatprep.mubr.msk.bf16.mxu0 %vm7475_vm0, %v10202_v32 }
 0x67d   : > { %v3494_v34 = vadd.f32 %v9908_v35, %v3493_v17  ;;  %v6877_v31 = vpop.f32.mrb[203].mxu1  ;;  %v3793_v18 = vmax.f32 %v3491_v41, 0.0 }
 0x67e   : > { %v4753_v56 = vpop.f32.mrb[96].mxu0 }
 0x67f   : > { %v3794_v43 = vmax.f32 %v3494_v34, 0.0  ;;  %v4754_v5 = vadd.f32 %v9872_v6, %v4753_v56  ;;  %v7284_v47 = vpop.f32.mrb[97].mxu0 }
 0x680   : > { %v4756_v14 = vpop.f32.mrb[98].mxu0 }
 0x681   : > { %v3927_v12 = vpack.c.bf16 %v3794_v43, %v3793_v18  ;;  %5218 = vst [vmem:[%s9039_s17 + $0x590] sm:$0xff] %v4754_v5  ;;  %v4757_v60 = vadd.f32 %v9872_v6, %v4756_v14  ;;  %v7285_v16 = vpop.f32.mrb[99].mxu0 }
 0x682   : > { %v3498_v62 = vpop.f32.mrb[204].mxu1 }
 0x683   : > { %5219 = vst [vmem:[%s9039_s17 + $0x598] sm:$0xff] %v4757_v60  ;;  %v3499_v20 = vadd.f32 %v9908_v35, %v3498_v62  ;;  %v6880_v44 = vpop.f32.mrb[205].mxu1  ;;  %7391 = vmatmul.mubr.bf16.gmra.mrb[204].mxu0 %v3927_v12 }
 0x684   : > { %v3501_v9 = vpop.f32.mrb[206].mxu1  ;;  %7394 = vmatprep.mubr.msk.bf16.mxu0 %vm7475_vm0, %v10202_v32 }
 0x685   : > { %v3502_v21 = vadd.f32 %v9908_v35, %v3501_v9  ;;  %v6881_v10 = vpop.f32.mrb[207].mxu1  ;;  %v3795_v46 = vmax.f32 %v3499_v20, 0.0 }
 0x686   : > { %v4761_v33 = vpop.f32.mrb[100].mxu0 }
 0x687   : > { %v3796_v49 = vmax.f32 %v3502_v21, 0.0  ;;  %v4762_v25 = vadd.f32 %v9872_v6, %v4761_v33  ;;  %v7288_v51 = vpop.f32.mrb[101].mxu0 }
 0x688   : > { %v4764_v15 = vpop.f32.mrb[102].mxu0 }
 0x689   : > { %v3928_v26 = vpack.c.bf16 %v3796_v49, %v3795_v46  ;;  %5220 = vst [vmem:[%s9039_s17 + $0x5a0] sm:$0xff] %v4762_v25  ;;  %v4765_v30 = vadd.f32 %v9872_v6, %v4764_v15  ;;  %v7289_v24 = vpop.f32.mrb[103].mxu0 }
 0x68a   : > { %v3506_v42 = vpop.f32.mrb[208].mxu1 }
 0x68b   : > { %5221 = vst [vmem:[%s9039_s17 + $0x5a8] sm:$0xff] %v4765_v30  ;;  %v3507_v4 = vadd.f32 %v9908_v35, %v3506_v42  ;;  %v6884_v36 = vpop.f32.mrb[209].mxu1  ;;  %7395 = vmatmul.mubr.bf16.gmra.mrb[208].mxu0 %v3928_v26 }
 0x68c   : > { %v3509_v38 = vpop.f32.mrb[210].mxu1  ;;  %7398 = vmatprep.mubr.msk.bf16.mxu0 %vm7475_vm0, %v10202_v32 }
 0x68d   : > { %v3510_v59 = vadd.f32 %v9908_v35, %v3509_v38  ;;  %v6885_v37 = vpop.f32.mrb[211].mxu1  ;;  %v3797_v11 = vmax.f32 %v3507_v4, 0.0 }
 0x68e   : > { %v4769_v22 = vpop.f32.mrb[104].mxu0 }
 0x68f   : > { %v3798_v8 = vmax.f32 %v3510_v59, 0.0  ;;  %v4770_v23 = vadd.f32 %v9872_v6, %v4769_v22  ;;  %v7292_v13 = vpop.f32.mrb[105].mxu0 }
 0x690   : > { %v4772_v50 = vpop.f32.mrb[106].mxu0 }
 0x691   : > { %v3929_v27 = vpack.c.bf16 %v3798_v8, %v3797_v11  ;;  %5222 = vst [vmem:[%s9039_s17 + $0x5b0] sm:$0xff] %v4770_v23  ;;  %v4773_v52 = vadd.f32 %v9872_v6, %v4772_v50  ;;  %v7293_v57 = vpop.f32.mrb[107].mxu0 }
 0x692   : > { %v3514_v0 = vpop.f32.mrb[212].mxu1 }
 0x693   : > { %5223 = vst [vmem:[%s9039_s17 + $0x5b8] sm:$0xff] %v4773_v52  ;;  %v3515_v28 = vadd.f32 %v9908_v35, %v3514_v0  ;;  %v6888_v40 = vpop.f32.mrb[213].mxu1  ;;  %7399 = vmatmul.mubr.bf16.gmra.mrb[212].mxu0 %v3929_v27 }
 0x694   : > { %v3517_v58 = vpop.f32.mrb[214].mxu1  ;;  %7402 = vmatprep.mubr.msk.bf16.mxu0 %vm7475_vm0, %v10202_v32 }
 0x695   : > { %v3518_v61 = vadd.f32 %v9908_v35, %v3517_v58  ;;  %v6889_v7 = vpop.f32.mrb[215].mxu1  ;;  %v3799_v2 = vmax.f32 %v3515_v28, 0.0 }
 0x696   : > { %v4777_v55 = vpop.f32.mrb[108].mxu0 }
 0x697   : > { %v3800_v53 = vmax.f32 %v3518_v61, 0.0  ;;  %v4778_v29 = vadd.f32 %v9872_v6, %v4777_v55  ;;  %v7296_v19 = vpop.f32.mrb[109].mxu0 }
 0x698   : > { %v4780_v45 = vpop.f32.mrb[110].mxu0 }
 0x699   : > { %v3930_v63 = vpack.c.bf16 %v3800_v53, %v3799_v2  ;;  %5224 = vst [vmem:[%s9039_s17 + $0x5c0] sm:$0xff] %v4778_v29  ;;  %v4781_v39 = vadd.f32 %v9872_v6, %v4780_v45  ;;  %v7297_v48 = vpop.f32.mrb[111].mxu0 }
 0x69a   : > { %v3522_v3 = vpop.f32.mrb[216].mxu1 }
 0x69b   : > { %5225 = vst [vmem:[%s9039_s17 + $0x5c8] sm:$0xff] %v4781_v39  ;;  %v3523_v54 = vadd.f32 %v9908_v35, %v3522_v3  ;;  %v6892_v41 = vpop.f32.mrb[217].mxu1  ;;  %7403 = vmatmul.mubr.bf16.gmra.mrb[216].mxu0 %v3930_v63 }
 0x69c   : > { %v3525_v1 = vpop.f32.mrb[218].mxu1  ;;  %7406 = vmatprep.mubr.msk.bf16.mxu0 %vm7475_vm0, %v10202_v32 }
 0x69d   : > { %v3526_v17 = vadd.f32 %v9908_v35, %v3525_v1  ;;  %v6893_v34 = vpop.f32.mrb[219].mxu1  ;;  %v3801_v56 = vmax.f32 %v3523_v54, 0.0 }
 0x69e   : > { %v4785_v31 = vpop.f32.mrb[112].mxu0 }
 0x69f   : > { %v3802_v18 = vmax.f32 %v3526_v17, 0.0  ;;  %v4786_v43 = vadd.f32 %v9872_v6, %v4785_v31  ;;  %v7300_v5 = vpop.f32.mrb[113].mxu0 }
 0x6a0   : > { %v4788_v47 = vpop.f32.mrb[114].mxu0 }
 0x6a1   : > { %v3931_v14 = vpack.c.bf16 %v3802_v18, %v3801_v56  ;;  %5226 = vst [vmem:[%s9039_s17 + $0x5d0] sm:$0xff] %v4786_v43  ;;  %v4789_v12 = vadd.f32 %v9872_v6, %v4788_v47  ;;  %v7301_v60 = vpop.f32.mrb[115].mxu0 }
 0x6a2   : > { %v3530_v16 = vpop.f32.mrb[220].mxu1 }
 0x6a3   : > { %5227 = vst [vmem:[%s9039_s17 + $0x5d8] sm:$0xff] %v4789_v12  ;;  %v3531_v62 = vadd.f32 %v9908_v35, %v3530_v16  ;;  %v6896_v20 = vpop.f32.mrb[221].mxu1  ;;  %7407 = vmatmul.mubr.bf16.gmra.mrb[220].mxu0 %v3931_v14 }
 0x6a4   : > { %v3533_v44 = vpop.f32.mrb[222].mxu1  ;;  %7410 = vmatprep.mubr.msk.bf16.mxu0 %vm7475_vm0, %v10202_v32 }
 0x6a5   : > { %v3534_v9 = vadd.f32 %v9908_v35, %v3533_v44  ;;  %v6897_v21 = vpop.f32.mrb[223].mxu1  ;;  %v3803_v33 = vmax.f32 %v3531_v62, 0.0 }
 0x6a6   : > { %v4793_v10 = vpop.f32.mrb[116].mxu0 }
 0x6a7   : > { %v3804_v46 = vmax.f32 %v3534_v9, 0.0  ;;  %v4794_v49 = vadd.f32 %v9872_v6, %v4793_v10  ;;  %v7304_v25 = vpop.f32.mrb[117].mxu0 }
 0x6a8   : > { %v4796_v51 = vpop.f32.mrb[118].mxu0 }
 0x6a9   : > { %v3932_v15 = vpack.c.bf16 %v3804_v46, %v3803_v33  ;;  %5228 = vst [vmem:[%s9039_s17 + $0x5e0] sm:$0xff] %v4794_v49  ;;  %v4797_v26 = vadd.f32 %v9872_v6, %v4796_v51  ;;  %v7305_v30 = vpop.f32.mrb[119].mxu0 }
 0x6aa   : > { %v3538_v24 = vpop.f32.mrb[224].mxu1 }
 0x6ab   : > { %5229 = vst [vmem:[%s9039_s17 + $0x5e8] sm:$0xff] %v4797_v26  ;;  %v3539_v42 = vadd.f32 %v9908_v35, %v3538_v24  ;;  %v6900_v4 = vpop.f32.mrb[225].mxu1  ;;  %7411 = vmatmul.mubr.bf16.gmra.mrb[224].mxu0 %v3932_v15 }
 0x6ac   : > { %v3541_v36 = vpop.f32.mrb[226].mxu1  ;;  %7414 = vmatprep.mubr.msk.bf16.mxu0 %vm7475_vm0, %v10202_v32 }
 0x6ad   : > { %v3542_v38 = vadd.f32 %v9908_v35, %v3541_v36  ;;  %v6901_v59 = vpop.f32.mrb[227].mxu1  ;;  %v3805_v22 = vmax.f32 %v3539_v42, 0.0 }
 0x6ae   : > { %v4801_v37 = vpop.f32.mrb[120].mxu0 }
 0x6af   : > { %v3806_v11 = vmax.f32 %v3542_v38, 0.0  ;;  %v4802_v8 = vadd.f32 %v9872_v6, %v4801_v37  ;;  %v7308_v23 = vpop.f32.mrb[121].mxu0 }
 0x6b0   : > { %v4804_v13 = vpop.f32.mrb[122].mxu0 }
 0x6b1   : > { %v3933_v50 = vpack.c.bf16 %v3806_v11, %v3805_v22  ;;  %5230 = vst [vmem:[%s9039_s17 + $0x5f0] sm:$0xff] %v4802_v8  ;;  %v4805_v27 = vadd.f32 %v9872_v6, %v4804_v13  ;;  %v7309_v52 = vpop.f32.mrb[123].mxu0 }
 0x6b2   : > { %v3546_v57 = vpop.f32.mrb[228].mxu1 }
 0x6b3   : > { %5231 = vst [vmem:[%s9039_s17 + $0x5f8] sm:$0xff] %v4805_v27  ;;  %v3547_v0 = vadd.f32 %v9908_v35, %v3546_v57  ;;  %v6904_v28 = vpop.f32.mrb[229].mxu1  ;;  %7415 = vmatmul.mubr.bf16.gmra.mrb[228].mxu0 %v3933_v50 }
 0x6b4   : > { %v3549_v40 = vpop.f32.mrb[230].mxu1  ;;  %7418 = vmatprep.mubr.msk.bf16.mxu0 %vm7475_vm0, %v10202_v32 }
 0x6b5   : > { %v3550_v58 = vadd.f32 %v9908_v35, %v3549_v40  ;;  %v6905_v61 = vpop.f32.mrb[231].mxu1  ;;  %v3807_v55 = vmax.f32 %v3547_v0, 0.0 }
 0x6b6   : > { %v4809_v7 = vpop.f32.mrb[124].mxu0 }
 0x6b7   : > { %v3808_v2 = vmax.f32 %v3550_v58, 0.0  ;;  %v4810_v53 = vadd.f32 %v9872_v6, %v4809_v7  ;;  %v7312_v29 = vpop.f32.mrb[125].mxu0 }
 0x6b8   : > { %v4812_v19 = vpop.f32.mrb[126].mxu0 }
 0x6b9   : > { %v3934_v45 = vpack.c.bf16 %v3808_v2, %v3807_v55  ;;  %5232 = vst [vmem:[%s9039_s17 + $0x600] sm:$0xff] %v4810_v53  ;;  %v4813_v63 = vadd.f32 %v9872_v6, %v4812_v19  ;;  %v7313_v39 = vpop.f32.mrb[127].mxu0 }
 0x6ba   : > { %v3554_v48 = vpop.f32.mrb[232].mxu1 }
 0x6bb   : > { %5233 = vst [vmem:[%s9039_s17 + $0x608] sm:$0xff] %v4813_v63  ;;  %v3555_v3 = vadd.f32 %v9908_v35, %v3554_v48  ;;  %v6908_v54 = vpop.f32.mrb[233].mxu1  ;;  %7419 = vmatmul.mubr.bf16.gmra.mrb[232].mxu0 %v3934_v45 }
 0x6bc   : > { %v3557_v41 = vpop.f32.mrb[234].mxu1  ;;  %7422 = vmatprep.mubr.msk.bf16.mxu0 %vm7475_vm0, %v10202_v32 }
 0x6bd   : > { %v3558_v1 = vadd.f32 %v9908_v35, %v3557_v41  ;;  %v6909_v17 = vpop.f32.mrb[235].mxu1  ;;  %v3809_v31 = vmax.f32 %v3555_v3, 0.0 }
 0x6be   : > { %v4817_v34 = vpop.f32.mrb[128].mxu0 }
 0x6bf   : > { %v3810_v56 = vmax.f32 %v3558_v1, 0.0  ;;  %v4818_v18 = vadd.f32 %v9872_v6, %v4817_v34  ;;  %v7316_v43 = vpop.f32.mrb[129].mxu0  ;;  %v10104_v1 = vld [vmem:[%s10189_s6] ss:$0 sm:$0xff] }
 0x6c0   : > { %v4820_v5 = vpop.f32.mrb[130].mxu0 }
 0x6c1   : > { %v3935_v47 = vpack.c.bf16 %v3810_v56, %v3809_v31  ;;  %5234 = vst [vmem:[%s9039_s17 + $0x610] sm:$0xff] %v4818_v18  ;;  %v4821_v14 = vadd.f32 %v9872_v6, %v4820_v5  ;;  %v7317_v12 = vpop.f32.mrb[131].mxu0 }
 0x6c3   : > { %5235 = vst [vmem:[%s9039_s17 + $0x618] sm:$0xff] %v4821_v14  ;;  %7423 = vmatmul.mubr.bf16.gmra.mrb[236].mxu0 %v3935_v47 }
 0x6c6   : > { %v4825_v32 = vpop.f32.mrb[132].mxu0 }
 0x6c7   : > { %v4826_v35 = vadd.f32 %v9872_v6, %v4825_v32  ;;  %v7320_v60 = vpop.f32.mrb[133].mxu0 }
 0x6c8   : > { %v4828_v16 = vpop.f32.mrb[134].mxu0 }
 0x6c9   : > { %5236 = vst [vmem:[%s9039_s17 + $0x620] sm:$0xff] %v4826_v35  ;;  %v4829_v62 = vadd.f32 %v9872_v6, %v4828_v16  ;;  %v7321_v20 = vpop.f32.mrb[135].mxu0 }
 0x6cb   : > { %5237 = vst [vmem:[%s9039_s17 + $0x628] sm:$0xff] %v4829_v62 }
 0x6ce   : > { %v4833_v44 = vpop.f32.mrb[136].mxu0 }
 0x6cf   : > { %v4834_v9 = vadd.f32 %v9872_v6, %v4833_v44  ;;  %v7324_v21 = vpop.f32.mrb[137].mxu0 }
 0x6d0   : > { %v4836_v10 = vpop.f32.mrb[138].mxu0 }
 0x6d1   : > { %5238 = vst [vmem:[%s9039_s17 + $0x630] sm:$0xff] %v4834_v9  ;;  %v4837_v33 = vadd.f32 %v9872_v6, %v4836_v10  ;;  %v7325_v46 = vpop.f32.mrb[139].mxu0 }
 0x6d3   : > { %5239 = vst [vmem:[%s9039_s17 + $0x638] sm:$0xff] %v4837_v33 }
 0x6d6   : > { %v4841_v49 = vpop.f32.mrb[140].mxu0 }
 0x6d7   : > { %v4842_v25 = vadd.f32 %v9872_v6, %v4841_v49  ;;  %v7328_v51 = vpop.f32.mrb[141].mxu0 }
 0x6d8   : > { %v4844_v15 = vpop.f32.mrb[142].mxu0 }
 0x6d9   : > { %5240 = vst [vmem:[%s9039_s17 + $0x640] sm:$0xff] %v4842_v25  ;;  %v4845_v26 = vadd.f32 %v9872_v6, %v4844_v15  ;;  %v7329_v30 = vpop.f32.mrb[143].mxu0 }
 0x6db   : > { %5241 = vst [vmem:[%s9039_s17 + $0x648] sm:$0xff] %v4845_v26 }
 0x6de   : > { %v4849_v24 = vpop.f32.mrb[144].mxu0 }
 0x6df   : > { %v4850_v42 = vadd.f32 %v9872_v6, %v4849_v24  ;;  %v7332_v4 = vpop.f32.mrb[145].mxu0 }
 0x6e0   : > { %v4852_v36 = vpop.f32.mrb[146].mxu0 }
 0x6e1   : > { %5242 = vst [vmem:[%s9039_s17 + $0x650] sm:$0xff] %v4850_v42  ;;  %v4853_v38 = vadd.f32 %v9872_v6, %v4852_v36  ;;  %v7333_v59 = vpop.f32.mrb[147].mxu0 }
 0x6e3   : > { %5243 = vst [vmem:[%s9039_s17 + $0x658] sm:$0xff] %v4853_v38 }
 0x6e6   : > { %v4857_v37 = vpop.f32.mrb[148].mxu0 }
 0x6e7   : > { %v4858_v22 = vadd.f32 %v9872_v6, %v4857_v37  ;;  %v7336_v11 = vpop.f32.mrb[149].mxu0 }
 0x6e8   : > { %v4860_v8 = vpop.f32.mrb[150].mxu0 }
 0x6e9   : > { %5244 = vst [vmem:[%s9039_s17 + $0x660] sm:$0xff] %v4858_v22  ;;  %v4861_v23 = vadd.f32 %v9872_v6, %v4860_v8  ;;  %v7337_v13 = vpop.f32.mrb[151].mxu0 }
 0x6eb   : > { %5245 = vst [vmem:[%s9039_s17 + $0x668] sm:$0xff] %v4861_v23 }
 0x6ee   : > { %v4865_v50 = vpop.f32.mrb[152].mxu0 }
 0x6ef   : > { %v4866_v27 = vadd.f32 %v9872_v6, %v4865_v50  ;;  %v7340_v52 = vpop.f32.mrb[153].mxu0 }
 0x6f0   : > { %v4868_v57 = vpop.f32.mrb[154].mxu0 }
 0x6f1   : > { %5246 = vst [vmem:[%s9039_s17 + $0x670] sm:$0xff] %v4866_v27  ;;  %v4869_v0 = vadd.f32 %v9872_v6, %v4868_v57  ;;  %v7341_v28 = vpop.f32.mrb[155].mxu0 }
 0x6f3   : > { %5247 = vst [vmem:[%s9039_s17 + $0x678] sm:$0xff] %v4869_v0 }
 0x6f6   : > { %v4873_v40 = vpop.f32.mrb[156].mxu0 }
 0x6f7   : > { %v4874_v58 = vadd.f32 %v9872_v6, %v4873_v40  ;;  %v7344_v61 = vpop.f32.mrb[157].mxu0 }
 0x6f8   : > { %v4876_v7 = vpop.f32.mrb[158].mxu0 }
 0x6f9   : > { %5248 = vst [vmem:[%s9039_s17 + $0x680] sm:$0xff] %v4874_v58  ;;  %v4877_v55 = vadd.f32 %v9872_v6, %v4876_v7  ;;  %v7345_v2 = vpop.f32.mrb[159].mxu0 }
 0x6fb   : > { %5249 = vst [vmem:[%s9039_s17 + $0x688] sm:$0xff] %v4877_v55 }
 0x6fe   : > { %v4881_v53 = vpop.f32.mrb[160].mxu0 }
 0x6ff   : > { %v4882_v29 = vadd.f32 %v9872_v6, %v4881_v53  ;;  %v7348_v19 = vpop.f32.mrb[161].mxu0 }
 0x700   : > { %v4884_v45 = vpop.f32.mrb[162].mxu0 }
 0x701   : > { %5250 = vst [vmem:[%s9039_s17 + $0x690] sm:$0xff] %v4882_v29  ;;  %v4885_v63 = vadd.f32 %v9872_v6, %v4884_v45  ;;  %v7349_v39 = vpop.f32.mrb[163].mxu0 }
 0x703   : > { %5251 = vst [vmem:[%s9039_s17 + $0x698] sm:$0xff] %v4885_v63 }
 0x706   : > { %v4889_v48 = vpop.f32.mrb[164].mxu0 }
 0x707   : > { %v4890_v3 = vadd.f32 %v9872_v6, %v4889_v48  ;;  %v7352_v54 = vpop.f32.mrb[165].mxu0 }
 0x708   : > { %v4892_v41 = vpop.f32.mrb[166].mxu0 }
 0x709   : > { %5252 = vst [vmem:[%s9039_s17 + $0x6a0] sm:$0xff] %v4890_v3  ;;  %v4893_v17 = vadd.f32 %v10104_v1, %v4892_v41  ;;  %v7353_v34 = vpop.f32.mrb[167].mxu0 }
 0x70b   : > { %5253 = vst [vmem:[%s9039_s17 + $0x6a8] sm:$0xff] %v4893_v17 }
 0x70e   : > { %v4897_v31 = vpop.f32.mrb[168].mxu0 }
 0x70f   : > { %v4898_v56 = vadd.f32 %v10104_v1, %v4897_v31  ;;  %v7356_v18 = vpop.f32.mrb[169].mxu0 }
 0x710   : > { %v4900_v43 = vpop.f32.mrb[170].mxu0 }
 0x711   : > { %5254 = vst [vmem:[%s9039_s17 + $0x6b0] sm:$0xff] %v4898_v56  ;;  %v4901_v6 = vadd.f32 %v10104_v1, %v4900_v43  ;;  %v7357_v5 = vpop.f32.mrb[171].mxu0 }
 0x713   : > { %5255 = vst [vmem:[%s9039_s17 + $0x6b8] sm:$0xff] %v4901_v6 }
 0x716   : > { %v4905_v47 = vpop.f32.mrb[172].mxu0 }
 0x717   : > { %v4906_v14 = vadd.f32 %v10104_v1, %v4905_v47  ;;  %v7360_v12 = vpop.f32.mrb[173].mxu0 }
 0x718   : > { %v4908_v32 = vpop.f32.mrb[174].mxu0 }
 0x719   : > { %5256 = vst [vmem:[%s9039_s17 + $0x6c0] sm:$0xff] %v4906_v14  ;;  %v4909_v35 = vadd.f32 %v10104_v1, %v4908_v32  ;;  %v7361_v60 = vpop.f32.mrb[175].mxu0 }
 0x71b   : > { %5257 = vst [vmem:[%s9039_s17 + $0x6c8] sm:$0xff] %v4909_v35 }
 0x71e   : > { %v4913_v16 = vpop.f32.mrb[176].mxu0 }
 0x71f   : > { %v4914_v62 = vadd.f32 %v10104_v1, %v4913_v16  ;;  %v7364_v20 = vpop.f32.mrb[177].mxu0 }
 0x720   : > { %v4916_v44 = vpop.f32.mrb[178].mxu0 }
 0x721   : > { %5258 = vst [vmem:[%s9039_s17 + $0x6d0] sm:$0xff] %v4914_v62  ;;  %v4917_v9 = vadd.f32 %v10104_v1, %v4916_v44  ;;  %v7365_v21 = vpop.f32.mrb[179].mxu0 }
 0x723   : > { %5259 = vst [vmem:[%s9039_s17 + $0x6d8] sm:$0xff] %v4917_v9 }
 0x726   : > { %v4921_v10 = vpop.f32.mrb[180].mxu0 }
 0x727   : > { %v4922_v33 = vadd.f32 %v10104_v1, %v4921_v10  ;;  %v7368_v46 = vpop.f32.mrb[181].mxu0 }
 0x728   : > { %v4924_v49 = vpop.f32.mrb[182].mxu0 }
 0x729   : > { %5260 = vst [vmem:[%s9039_s17 + $0x6e0] sm:$0xff] %v4922_v33  ;;  %v4925_v25 = vadd.f32 %v10104_v1, %v4924_v49  ;;  %v7369_v51 = vpop.f32.mrb[183].mxu0 }
 0x72b   : > { %5261 = vst [vmem:[%s9039_s17 + $0x6e8] sm:$0xff] %v4925_v25 }
 0x72e   : > { %v4929_v15 = vpop.f32.mrb[184].mxu0 }
 0x72f   : > { %v4930_v26 = vadd.f32 %v10104_v1, %v4929_v15  ;;  %v7372_v30 = vpop.f32.mrb[185].mxu0 }
 0x730   : > { %v4932_v24 = vpop.f32.mrb[186].mxu0 }
 0x731   : > { %5262 = vst [vmem:[%s9039_s17 + $0x6f0] sm:$0xff] %v4930_v26  ;;  %v4933_v42 = vadd.f32 %v10104_v1, %v4932_v24  ;;  %v7373_v4 = vpop.f32.mrb[187].mxu0 }
 0x733   : > { %5263 = vst [vmem:[%s9039_s17 + $0x6f8] sm:$0xff] %v4933_v42 }
 0x736   : > { %v4937_v36 = vpop.f32.mrb[188].mxu0 }
 0x737   : > { %v4938_v38 = vadd.f32 %v10104_v1, %v4937_v36  ;;  %v7376_v59 = vpop.f32.mrb[189].mxu0 }
 0x738   : > { %v4940_v37 = vpop.f32.mrb[190].mxu0 }
 0x739   : > { %5264 = vst [vmem:[%s9039_s17 + $0x700] sm:$0xff] %v4938_v38  ;;  %v4941_v22 = vadd.f32 %v10104_v1, %v4940_v37  ;;  %v7377_v11 = vpop.f32.mrb[191].mxu0 }
 0x73b   : > { %5265 = vst [vmem:[%s9039_s17 + $0x708] sm:$0xff] %v4941_v22 }
 0x73e   : > { %v4945_v8 = vpop.f32.mrb[192].mxu0 }
 0x73f   : > { %v4946_v23 = vadd.f32 %v10104_v1, %v4945_v8  ;;  %v7380_v13 = vpop.f32.mrb[193].mxu0 }
 0x740   : > { %v4948_v50 = vpop.f32.mrb[194].mxu0 }
 0x741   : > { %5266 = vst [vmem:[%s9039_s17 + $0x710] sm:$0xff] %v4946_v23  ;;  %v4949_v27 = vadd.f32 %v10104_v1, %v4948_v50  ;;  %v7381_v52 = vpop.f32.mrb[195].mxu0 }
 0x743   : > { %5267 = vst [vmem:[%s9039_s17 + $0x718] sm:$0xff] %v4949_v27 }
 0x746   : > { %v4953_v57 = vpop.f32.mrb[196].mxu0 }
 0x747   : > { %v4954_v0 = vadd.f32 %v10104_v1, %v4953_v57  ;;  %v7384_v28 = vpop.f32.mrb[197].mxu0 }
 0x748   : > { %v4956_v40 = vpop.f32.mrb[198].mxu0 }
 0x749   : > { %5268 = vst [vmem:[%s9039_s17 + $0x720] sm:$0xff] %v4954_v0  ;;  %v4957_v58 = vadd.f32 %v10104_v1, %v4956_v40  ;;  %v7385_v61 = vpop.f32.mrb[199].mxu0 }
 0x74b   : > { %5269 = vst [vmem:[%s9039_s17 + $0x728] sm:$0xff] %v4957_v58 }
 0x74e   : > { %v4961_v7 = vpop.f32.mrb[200].mxu0 }
 0x74f   : > { %v4962_v55 = vadd.f32 %v10104_v1, %v4961_v7  ;;  %v7388_v2 = vpop.f32.mrb[201].mxu0 }
 0x750   : > { %v4964_v53 = vpop.f32.mrb[202].mxu0 }
 0x751   : > { %5270 = vst [vmem:[%s9039_s17 + $0x730] sm:$0xff] %v4962_v55  ;;  %v4965_v29 = vadd.f32 %v10104_v1, %v4964_v53  ;;  %v7389_v19 = vpop.f32.mrb[203].mxu0 }
 0x753   : > { %5271 = vst [vmem:[%s9039_s17 + $0x738] sm:$0xff] %v4965_v29 }
 0x756   : > { %v4969_v45 = vpop.f32.mrb[204].mxu0 }
 0x757   : > { %v4970_v63 = vadd.f32 %v10104_v1, %v4969_v45  ;;  %v7392_v39 = vpop.f32.mrb[205].mxu0 }
 0x758   : > { %v4972_v48 = vpop.f32.mrb[206].mxu0 }
 0x759   : > { %5272 = vst [vmem:[%s9039_s17 + $0x740] sm:$0xff] %v4970_v63  ;;  %v4973_v3 = vadd.f32 %v10104_v1, %v4972_v48  ;;  %v7393_v54 = vpop.f32.mrb[207].mxu0 }
 0x75b   : > { %5273 = vst [vmem:[%s9039_s17 + $0x748] sm:$0xff] %v4973_v3 }
 0x75e   : > { %v4977_v41 = vpop.f32.mrb[208].mxu0 }
 0x75f   : > { %v4978_v17 = vadd.f32 %v10104_v1, %v4977_v41  ;;  %v7396_v34 = vpop.f32.mrb[209].mxu0 }
 0x760   : > { %v4980_v31 = vpop.f32.mrb[210].mxu0 }
 0x761   : > { %5274 = vst [vmem:[%s9039_s17 + $0x750] sm:$0xff] %v4978_v17  ;;  %v4981_v56 = vadd.f32 %v10104_v1, %v4980_v31  ;;  %v7397_v18 = vpop.f32.mrb[211].mxu0 }
 0x763   : > { %5275 = vst [vmem:[%s9039_s17 + $0x758] sm:$0xff] %v4981_v56 }
 0x766   : > { %v4985_v43 = vpop.f32.mrb[212].mxu0 }
 0x767   : > { %v4986_v6 = vadd.f32 %v10104_v1, %v4985_v43  ;;  %v7400_v5 = vpop.f32.mrb[213].mxu0 }
 0x768   : > { %v4988_v47 = vpop.f32.mrb[214].mxu0 }
 0x769   : > { %5276 = vst [vmem:[%s9039_s17 + $0x760] sm:$0xff] %v4986_v6  ;;  %v4989_v14 = vadd.f32 %v10104_v1, %v4988_v47  ;;  %v7401_v12 = vpop.f32.mrb[215].mxu0 }
 0x76b   : > { %5277 = vst [vmem:[%s9039_s17 + $0x768] sm:$0xff] %v4989_v14 }
 0x76e   : > { %v4993_v32 = vpop.f32.mrb[216].mxu0 }
 0x76f   : > { %v4994_v35 = vadd.f32 %v10104_v1, %v4993_v32  ;;  %v7404_v60 = vpop.f32.mrb[217].mxu0 }
 0x770   : > { %v4996_v16 = vpop.f32.mrb[218].mxu0 }
 0x771   : > { %5278 = vst [vmem:[%s9039_s17 + $0x770] sm:$0xff] %v4994_v35  ;;  %v4997_v62 = vadd.f32 %v10104_v1, %v4996_v16  ;;  %v7405_v20 = vpop.f32.mrb[219].mxu0 }
 0x773   : > { %5279 = vst [vmem:[%s9039_s17 + $0x778] sm:$0xff] %v4997_v62 }
 0x776   : > { %v5001_v44 = vpop.f32.mrb[220].mxu0 }
 0x777   : > { %v5002_v9 = vadd.f32 %v10104_v1, %v5001_v44  ;;  %v7408_v21 = vpop.f32.mrb[221].mxu0 }
 0x778   : > { %v5004_v10 = vpop.f32.mrb[222].mxu0 }
 0x779   : > { %5280 = vst [vmem:[%s9039_s17 + $0x780] sm:$0xff] %v5002_v9  ;;  %v5005_v33 = vadd.f32 %v10104_v1, %v5004_v10  ;;  %v7409_v46 = vpop.f32.mrb[223].mxu0 }
 0x77b   : > { %5281 = vst [vmem:[%s9039_s17 + $0x788] sm:$0xff] %v5005_v33 }
 0x77e   : > { %v5009_v49 = vpop.f32.mrb[224].mxu0 }
 0x77f   : > { %v5010_v25 = vadd.f32 %v10104_v1, %v5009_v49  ;;  %v7412_v51 = vpop.f32.mrb[225].mxu0 }
 0x780   : > { %v5012_v15 = vpop.f32.mrb[226].mxu0 }
 0x781   : > { %5282 = vst [vmem:[%s9039_s17 + $0x790] sm:$0xff] %v5010_v25  ;;  %v5013_v26 = vadd.f32 %v10104_v1, %v5012_v15  ;;  %v7413_v30 = vpop.f32.mrb[227].mxu0 }
 0x783   : > { %5283 = vst [vmem:[%s9039_s17 + $0x798] sm:$0xff] %v5013_v26 }
 0x786   : > { %v5017_v24 = vpop.f32.mrb[228].mxu0 }
 0x787   : > { %v5018_v42 = vadd.f32 %v10104_v1, %v5017_v24  ;;  %v7416_v4 = vpop.f32.mrb[229].mxu0 }
 0x788   : > { %v5020_v36 = vpop.f32.mrb[230].mxu0 }
 0x789   : > { %5284 = vst [vmem:[%s9039_s17 + $0x7a0] sm:$0xff] %v5018_v42  ;;  %v5021_v38 = vadd.f32 %v10104_v1, %v5020_v36  ;;  %v7417_v59 = vpop.f32.mrb[231].mxu0 }
 0x78b   : > { %5285 = vst [vmem:[%s9039_s17 + $0x7a8] sm:$0xff] %v5021_v38 }
 0x78e   : > { %v5025_v37 = vpop.f32.mrb[232].mxu0 }
 0x78f   : > { %v5026_v22 = vadd.f32 %v10104_v1, %v5025_v37  ;;  %v7420_v11 = vpop.f32.mrb[233].mxu0 }
 0x790   : > { %v5028_v8 = vpop.f32.mrb[234].mxu0 }
 0x791   : > { %5286 = vst [vmem:[%s9039_s17 + $0x7b0] sm:$0xff] %v5026_v22  ;;  %v5029_v23 = vadd.f32 %v10104_v1, %v5028_v8  ;;  %v7421_v13 = vpop.f32.mrb[235].mxu0 }
 0x793   : > { %5287 = vst [vmem:[%s9039_s17 + $0x7b8] sm:$0xff] %v5029_v23 }
 0x796   : > { %v5033_v50 = vpop.f32.mrb[236].mxu0 }
 0x797   : > { %v5034_v27 = vadd.f32 %v10104_v1, %v5033_v50  ;;  %v7424_v52 = vpop.f32.mrb[237].mxu0 }
 0x798   : > { %v5036_v57 = vpop.f32.mrb[238].mxu0 }
 0x799   : > { %5288 = vst [vmem:[%s9039_s17 + $0x7c0] sm:$0xff] %v5034_v27  ;;  %v5037_v0 = vadd.f32 %v10104_v1, %v5036_v57  ;;  %v7425_v28 = vpop.f32.mrb[239].mxu0 }
 0x79b   : > { %5289 = vst [vmem:[%s9039_s17 + $0x7c8] sm:$0xff] %v5037_v0 }
 0x79c PF: > { %s17_s24 = sadd.s32 1, %s7472_s24  }
 0x79d   : > { %p14_p4 = scmp.ge.s32.totalorder %s17_s24, 4  }
 0x79f   :  { %16 = sbr.rel (!%p14_p4) target bundleno = 1 (0x1), region = 78 }

</bundles_post_ra>
